<compile_context>
chip_gen: v7x
topology: tpu7x:2x2x1
jax: 0.10.0
libtpu: 0.0.40
codegen_flags: <defaults>
</compile_context>

<pallas_src>
import numpy as np
import jax
import jax.numpy as jnp
from jax.experimental import pallas as pl
from jax.experimental.pallas import tpu as pltpu


# ----------------------------------------------------------------------------
# One-time parameter / gather-matrix preparation (hoisted out of the forward).
# Gather matrices encode the (batch, H, W) geometry, so prep is per-shape.
# ----------------------------------------------------------------------------
def _conv_s2_gathers(n, hi, wi):
    """0/1 gather matrices for Conv2d(k=3, stride=2, padding=1).

    G[t] has shape (n*ho*wo, n*hi*wi); output-row r_out has a single 1 at the
    input pixel read by kernel tap t = ky*3+kx (all-zero row when that tap
    falls in the zero padding).  Activations are rows r=(b*H+h)*W+w, C lanes.
    """
    ho, wo = hi // 2, wi // 2
    g = np.zeros((9, n * ho * wo, n * hi * wi), np.float32)
    for b in range(n):
        for oy in range(ho):
            for ox in range(wo):
                ro = (b * ho + oy) * wo + ox
                for ky in range(3):
                    for kx in range(3):
                        iy, ix = 2 * oy + ky - 1, 2 * ox + kx - 1
                        if 0 <= iy < hi and 0 <= ix < wi:
                            g[ky * 3 + kx, ro, (b * hi + iy) * wi + ix] = 1.0
    return jnp.asarray(g)


def _convt_s2_gathers(n, hi, wi):
    """0/1 gather matrices for ConvTranspose2d(k=3, s=2, p=1, output_padding=1).

    PyTorch semantics: output (oy, ox) += x[iy, ix] @ W[ky, kx] whenever
    oy = 2*iy - 1 + ky and ox = 2*ix - 1 + kx are inside the (2hi, 2wi) output.
    """
    ho, wo = 2 * hi, 2 * wi
    g = np.zeros((9, n * ho * wo, n * hi * wi), np.float32)
    for b in range(n):
        for iy in range(hi):
            for ix in range(wi):
                ri = (b * hi + iy) * wi + ix
                for ky in range(3):
                    for kx in range(3):
                        oy, ox = 2 * iy - 1 + ky, 2 * ix - 1 + kx
                        if 0 <= oy < ho and 0 <= ox < wo:
                            g[ky * 3 + kx, (b * ho + oy) * wo + ox, ri] = 1.0
    return jnp.asarray(g)


_ARG_ORDER = ("w1", "b1", "g2", "w2", "b2", "g3", "w3", "b3",
              "sl", "wl", "bl", "pd", "wd", "bd",
              "gt1", "wt1", "bt1", "gt2", "wt2", "bt2",
              "gt3", "wt3", "bt3", "w4", "b4")


def prep_params(p, n, h, w):
    """One-time repack of PyTorch-layout params into kernel-ready matrices
    (tap-split conv weights, HWC-ordered linear weights) plus the 0/1 gather
    matrices encoding the spatial wiring for this (n, h, w)."""
    assert h % 8 == 0 and w % 8 == 0
    h1, w1 = h // 2, w // 2
    h2, w2 = h // 4, w // 4
    h3, w3 = h // 8, w // 8
    hw3 = h3 * w3

    def conv_taps(wo):     # Conv2d (Cout, Cin, 3, 3)      -> (9, Cin, Cout)
        return jnp.transpose(wo, (2, 3, 1, 0)).reshape(9, wo.shape[1], wo.shape[0])

    def convt_taps(wt):    # ConvTranspose2d (Cin, Cout, 3, 3) -> (9, Cin, Cout)
        return jnp.transpose(wt, (2, 3, 0, 1)).reshape(9, wt.shape[0], wt.shape[1])

    cin = p["ec1_w"].shape[1]
    c3 = p["ec3_w"].shape[0]

    # gather / scatter matrices for the two bottleneck linears (PyTorch flatten
    # order is CHW; our activation rows are (b, h, w) with C on lanes).
    sl = np.zeros((hw3, n, n * hw3), np.float32)
    pd = np.zeros((hw3, n * hw3, n), np.float32)
    for b in range(n):
        for s in range(hw3):
            sl[s, b, b * hw3 + s] = 1.0
            pd[s, b * hw3 + s, b] = 1.0

    kp = {
        # encoder conv1 uses wrapper-side im2col: flat (9*Cin, 32) weight
        "w1": jnp.transpose(p["ec1_w"], (2, 3, 1, 0)).reshape(9 * cin, -1),
        "b1": p["ec1_b"].reshape(1, -1),
        "g2": _conv_s2_gathers(n, h1, w1), "w2": conv_taps(p["ec2_w"]),
        "b2": p["ec2_b"].reshape(1, -1),
        "g3": _conv_s2_gathers(n, h2, w2), "w3": conv_taps(p["ec3_w"]),
        "b3": p["ec3_b"].reshape(1, -1),
        # encoder linear: Wl[s][c, j] = el_w[c*hw3 + s, j]
        "sl": jnp.asarray(sl),
        "wl": jnp.stack([p["el_w"][s::hw3, :] for s in range(hw3)], axis=0),
        "bl": p["el_b"].reshape(1, -1),
        # decoder linear: Wd[s][j, c] = dl_w[j, c*hw3 + s]
        "pd": jnp.asarray(pd),
        "wd": jnp.stack([p["dl_w"][:, s::hw3] for s in range(hw3)], axis=0),
        "bd": jnp.stack([p["dl_b"][s::hw3] for s in range(hw3)],
                        axis=0).reshape(hw3, 1, c3),
        "gt1": _convt_s2_gathers(n, h3, w3), "wt1": convt_taps(p["dc1_w"]),
        "bt1": p["dc1_b"].reshape(1, -1),
        "gt2": _convt_s2_gathers(n, h2, w2), "wt2": convt_taps(p["dc2_w"]),
        "bt2": p["dc2_b"].reshape(1, -1),
        "gt3": _convt_s2_gathers(n, h1, w1), "wt3": convt_taps(p["dc3_w"]),
        "bt3": p["dc3_b"].reshape(1, -1),
        "w4": p["dc4_w"][:, :, 0, 0],
        "b4": p["dc4_b"].reshape(1, -1),
    }
    return {k: v.astype(jnp.float32) for k, v in kp.items()}


# ----------------------------------------------------------------------------
# The fused whole-model kernel: one pallas_call, everything VMEM-resident.
# ----------------------------------------------------------------------------
def _autoencoder_kernel(cols1, w1, b1, g2, w2, b2, g3, w3, b3,
                        sl, wl, bl, pd, wd, bd,
                        gt1, wt1, bt1, gt2, wt2, bt2, gt3, wt3, bt3,
                        w4, b4, out_ref):
    f32 = jnp.float32

    def mm(a, b):
        return jnp.dot(a, b, preferred_element_type=f32)

    def conv_block(x, g, wt, bias, gather_first):
        # relu( sum_t  G_t @ x @ W_t  + b ): 9 taps, spatial gather as 0/1 matmul
        ro, co = g.shape[1], wt.shape[2]
        acc = jnp.zeros((ro, co), f32)
        for t in range(9):
            if gather_first:          # encoder: shrink rows before channel mix
                acc = acc + mm(mm(g[t], x), wt[t])
            else:                     # decoder: mix channels before row scatter
                acc = acc + mm(g[t], mm(x, wt[t]))
        return jnp.maximum(acc + bias[...], 0.0)

    # ---------------- encoder ----------------
    a = jnp.maximum(mm(cols1[...], w1[...]) + b1[...], 0.0)   # conv1 (im2col outside)
    a = conv_block(a, g2, w2, b2, gather_first=True)          # conv2  32 -> 64
    a = conv_block(a, g3, w3, b3, gather_first=True)          # conv3  64 -> 128

    # encoder linear: z = relu( sum_s (S_s @ a) @ Wl_s + b )
    nb, hidden = sl.shape[1], wl.shape[2]
    z = jnp.zeros((nb, hidden), f32)
    for s in range(sl.shape[0]):
        z = z + mm(mm(sl[s], a), wl[s])
    z = jnp.maximum(z + bl[...], 0.0)

    # ---------------- decoder ----------------
    r3, c3 = pd.shape[1], wd.shape[2]
    d = jnp.zeros((r3, c3), f32)
    for s in range(pd.shape[0]):
        d = d + mm(pd[s], mm(z, wd[s]) + bd[s])               # scatter rows back
    d = jnp.maximum(d, 0.0)

    d = conv_block(d, gt1, wt1, bt1, gather_first=False)      # convT 128 -> 64
    d = conv_block(d, gt2, wt2, bt2, gather_first=False)      # convT  64 -> 32
    d = conv_block(d, gt3, wt3, bt3, gather_first=False)      # convT  32 -> C

    y = mm(d, w4[...]) + b4[...]                               # 1x1 convT
    out_ref[...] = 1.0 / (1.0 + jnp.exp(-y))                   # exact sigmoid


def autoencoder_forward(x_nchw, kp):
    """x: (N, C, H, W) float32; kp: prep_params(...) output.  Returns NCHW."""
    n, c, h, w = x_nchw.shape
    x = jnp.transpose(x_nchw, (0, 2, 3, 1))                    # NCHW -> NHWC once
    # im2col for the first conv only (fuses with the transpose in XLA).
    xp = jnp.pad(x, ((0, 0), (1, 1), (1, 1), (0, 0)))
    ho, wo = h // 2, w // 2
    taps = [xp[:, ky:ky + 2 * ho - 1:2, kx:kx + 2 * wo - 1:2, :]
            for ky in range(3) for kx in range(3)]
    cols1 = jnp.concatenate(taps, axis=-1).reshape(n * ho * wo, 9 * c)

    args = tuple(kp[k] for k in _ARG_ORDER)
    out_rows = n * h * w

    # advisory cost estimate (dominant terms: tap gathers + tap matmuls)
    flops = 2 * cols1.shape[0] * cols1.shape[1] * kp["w1"].shape[1]
    for gk, wk in (("g2", "w2"), ("g3", "w3"),
                   ("gt1", "wt1"), ("gt2", "wt2"), ("gt3", "wt3")):
        _, ro, ri = kp[gk].shape
        _, ci, co = kp[wk].shape
        flops += 2 * 9 * (ro * ri * min(ci, co) + ro * ci * co)
    flops += 4 * kp["wl"].size + 4 * kp["wd"].size + 2 * out_rows * c * c
    bytes_accessed = (cols1.size + sum(a.size for a in args) + out_rows * c) * 4

    out = pl.pallas_call(
        _autoencoder_kernel,
        out_shape=jax.ShapeDtypeStruct((out_rows, c), jnp.float32),
        in_specs=[pl.BlockSpec(memory_space=pltpu.MemorySpace.VMEM)] * (1 + len(args)),
        out_specs=pl.BlockSpec(memory_space=pltpu.MemorySpace.VMEM),
        compiler_params=pltpu.CompilerParams(vmem_limit_bytes=32 * 1024 * 1024),
        cost_estimate=pl.CostEstimate(flops=int(flops),
                                      transcendentals=int(out_rows * c),
                                      bytes_accessed=int(bytes_accessed)),
    )(cols1, *args)

    return jnp.transpose(out.reshape(n, h, w, c), (0, 3, 1, 2))


# ----------------------------------------------------------------------------
# Pure-XLA reference of the exact PyTorch module semantics (for validation)
# ----------------------------------------------------------------------------
def reference_forward(x, p):
    def conv(h_, wo, b, stride):
        y = jax.lax.conv_general_dilated(
            h_, wo, window_strides=(stride, stride),
            padding=((1, 1), (1, 1)),
            dimension_numbers=("NCHW", "OIHW", "NCHW"))
        return y + b.reshape(1, -1, 1, 1)

    def convt(h_, wt, b):   # k=3, stride=2, padding=1, output_padding=1
        wo = jnp.transpose(wt, (1, 0, 2, 3))[:, :, ::-1, ::-1]
        y = jax.lax.conv_general_dilated(
            h_, wo, window_strides=(1, 1), padding=((1, 2), (1, 2)),
            lhs_dilation=(2, 2), dimension_numbers=("NCHW", "OIHW", "NCHW"))
        return y + b.reshape(1, -1, 1, 1)

    n = x.shape[0]
    h = jax.nn.relu(conv(x, p["ec1_w"], p["ec1_b"], 2))
    h = jax.nn.relu(conv(h, p["ec2_w"], p["ec2_b"], 2))
    h = jax.nn.relu(conv(h, p["ec3_w"], p["ec3_b"], 2))
    shape3 = h.shape
    z = jax.nn.relu(h.reshape(n, -1) @ p["el_w"] + p["el_b"])
    d = jax.nn.relu(z @ p["dl_w"] + p["dl_b"]).reshape(shape3)
    d = jax.nn.relu(convt(d, p["dc1_w"], p["dc1_b"]))
    d = jax.nn.relu(convt(d, p["dc2_w"], p["dc2_b"]))
    d = jax.nn.relu(convt(d, p["dc3_w"], p["dc3_b"]))
    d = (jnp.einsum("nchw,cd->ndhw", d, p["dc4_w"][:, :, 0, 0])
         + p["dc4_b"].reshape(1, -1, 1, 1))
    return jax.nn.sigmoid(d)


def init_params(key, c_in, h, w, hidden_dim):
    assert h % 8 == 0 and w % 8 == 0
    linear_dim = 128 * (h // 8) * (w // 8)
    ks = jax.random.split(key, 18)

    def nrm(k, shape, scale=0.05):
        return (scale * jax.random.normal(k, shape)).astype(jnp.float32)

    return {
        # encoder convs (Cout, Cin, 3, 3) -- PyTorch Conv2d layout
        "ec1_w": nrm(ks[0], (32, c_in, 3, 3)), "ec1_b": nrm(ks[9], (32,), 0.02),
        "ec2_w": nrm(ks[1], (64, 32, 3, 3)),   "ec2_b": nrm(ks[10], (64,), 0.02),
        "ec3_w": nrm(ks[2], (128, 64, 3, 3)),  "ec3_b": nrm(ks[11], (128,), 0.02),
        # linears stored as (in, out), input/output index in PyTorch CHW flatten order
        "el_w": nrm(ks[3], (linear_dim, hidden_dim)),
        "el_b": nrm(ks[12], (hidden_dim,), 0.02),
        "dl_w": nrm(ks[4], (hidden_dim, linear_dim)),
        "dl_b": nrm(ks[13], (linear_dim,), 0.02),
        # decoder transposed convs (Cin, Cout, 3, 3) -- PyTorch ConvTranspose2d layout
        "dc1_w": nrm(ks[5], (128, 64, 3, 3)),  "dc1_b": nrm(ks[14], (64,), 0.02),
        "dc2_w": nrm(ks[6], (64, 32, 3, 3)),   "dc2_b": nrm(ks[15], (32,), 0.02),
        "dc3_w": nrm(ks[7], (32, c_in, 3, 3)), "dc3_b": nrm(ks[16], (c_in,), 0.02),
        "dc4_w": nrm(ks[8], (c_in, c_in, 1, 1)), "dc4_b": nrm(ks[17], (c_in,), 0.02),
    }


if __name__ == "__main__":
    key = jax.random.PRNGKey(0)
    k_x, k_p = jax.random.split(key)

    batch, c_in, h, w = 2, 4, 16, 16
    hidden_dim = 32

    x = jax.random.uniform(k_x, (batch, c_in, h, w), dtype=jnp.float32)
    params = init_params(k_p, c_in, h, w, hidden_dim)

    # one-time repack of weights + gather matrices; never re-traced per forward
    kparams = prep_params(params, batch, h, w)

    fwd = jax.jit(autoencoder_forward)
    out = jax.block_until_ready(fwd(x, kparams))

    assert out.shape == (batch, c_in, h, w), out.shape
    assert out.dtype == jnp.float32
    assert bool(jnp.all((out >= 0.0) & (out <= 1.0)))

    # numerical check against a pure-XLA reference of the PyTorch module
    ref = jax.block_until_ready(jax.jit(reference_forward)(x, params))
    err = float(jnp.max(jnp.abs(out - ref)))
    assert err < 2e-2, f"max|pallas - reference| = {err}"

    print("KERNEL_OK")
</pallas_src>

<mosaic_0001>
module attributes {stable_mosaic.version = 11 : i64} {
  func.func @_autoencoder_kernel(%arg0: memref<128x36xf32, #tpu.memory_space<vmem>>, %arg1: memref<36x32xf32, #tpu.memory_space<vmem>>, %arg2: memref<1x32xf32, #tpu.memory_space<vmem>>, %arg3: memref<9x32x128xf32, #tpu.memory_space<vmem>>, %arg4: memref<9x32x64xf32, #tpu.memory_space<vmem>>, %arg5: memref<1x64xf32, #tpu.memory_space<vmem>>, %arg6: memref<9x8x32xf32, #tpu.memory_space<vmem>>, %arg7: memref<9x64x128xf32, #tpu.memory_space<vmem>>, %arg8: memref<1x128xf32, #tpu.memory_space<vmem>>, %arg9: memref<4x2x8xf32, #tpu.memory_space<vmem>>, %arg10: memref<4x128x32xf32, #tpu.memory_space<vmem>>, %arg11: memref<1x32xf32, #tpu.memory_space<vmem>>, %arg12: memref<4x8x2xf32, #tpu.memory_space<vmem>>, %arg13: memref<4x32x128xf32, #tpu.memory_space<vmem>>, %arg14: memref<4x1x128xf32, #tpu.memory_space<vmem>>, %arg15: memref<9x32x8xf32, #tpu.memory_space<vmem>>, %arg16: memref<9x128x64xf32, #tpu.memory_space<vmem>>, %arg17: memref<1x64xf32, #tpu.memory_space<vmem>>, %arg18: memref<9x128x32xf32, #tpu.memory_space<vmem>>, %arg19: memref<9x64x32xf32, #tpu.memory_space<vmem>>, %arg20: memref<1x32xf32, #tpu.memory_space<vmem>>, %arg21: memref<9x512x128xf32, #tpu.memory_space<vmem>>, %arg22: memref<9x32x4xf32, #tpu.memory_space<vmem>>, %arg23: memref<1x4xf32, #tpu.memory_space<vmem>>, %arg24: memref<4x4xf32, #tpu.memory_space<vmem>>, %arg25: memref<1x4xf32, #tpu.memory_space<vmem>>, %arg26: memref<512x4xf32, #tpu.memory_space<vmem>>) attributes {dimension_semantics = [], scalar_prefetch = 0 : i64, scratch_operands = 0 : i64, tpu.core_type = #tpu.core_type<tc>} {
    %c0 = arith.constant 0 : index
    %c0_0 = arith.constant 0 : index
    %0 = vector.load %arg0[%c0, %c0_0] : memref<128x36xf32, #tpu.memory_space<vmem>>, vector<128x36xf32>
    %c0_1 = arith.constant 0 : index
    %c0_2 = arith.constant 0 : index
    %1 = vector.load %arg1[%c0_1, %c0_2] : memref<36x32xf32, #tpu.memory_space<vmem>>, vector<36x32xf32>
    %cst = arith.constant dense<0.000000e+00> : vector<128x32xf32>
    %2 = tpu.matmul %0, %1, %cst {dimension_numbers = #tpu.dot_dimension_numbers<[1], [0], [0], [1], [0, 0, 1, 1], [], []>} : vector<128x36xf32>, vector<36x32xf32>, vector<128x32xf32> -> vector<128x32xf32>
    %c0_3 = arith.constant 0 : index
    %c0_4 = arith.constant 0 : index
    %3 = vector.load %arg2[%c0_3, %c0_4] : memref<1x32xf32, #tpu.memory_space<vmem>>, vector<1x32xf32>
    %4 = vector.broadcast %3 : vector<1x32xf32> to vector<128x32xf32>
    %5 = arith.addf %2, %4 : vector<128x32xf32>
    %cst_5 = arith.constant 0.000000e+00 : f32
    %6 = vector.broadcast %cst_5 : f32 to vector<128x32xf32>
    %7 = arith.maximumf %5, %6 : vector<128x32xf32>
    %cst_6 = arith.constant 0.000000e+00 : f32
    %8 = vector.broadcast %cst_6 : f32 to vector<32x64xf32>
    %c0_7 = arith.constant 0 : index
    %c0_8 = arith.constant 0 : index
    %c0_9 = arith.constant 0 : index
    %9 = vector.load %arg3[%c0_7, %c0_8, %c0_9] : memref<9x32x128xf32, #tpu.memory_space<vmem>>, vector<1x32x128xf32>
    %10 = vector.shape_cast %9 : vector<1x32x128xf32> to vector<32x128xf32>
    %cst_10 = arith.constant dense<0.000000e+00> : vector<32x32xf32>
    %11 = tpu.matmul %10, %7, %cst_10 {dimension_numbers = #tpu.dot_dimension_numbers<[1], [0], [0], [1], [0, 0, 1, 1], [], []>} : vector<32x128xf32>, vector<128x32xf32>, vector<32x32xf32> -> vector<32x32xf32>
    %c0_11 = arith.constant 0 : index
    %c0_12 = arith.constant 0 : index
    %c0_13 = arith.constant 0 : index
    %12 = vector.load %arg4[%c0_11, %c0_12, %c0_13] : memref<9x32x64xf32, #tpu.memory_space<vmem>>, vector<1x32x64xf32>
    %13 = vector.shape_cast %12 : vector<1x32x64xf32> to vector<32x64xf32>
    %cst_14 = arith.constant dense<0.000000e+00> : vector<32x64xf32>
    %14 = tpu.matmul %11, %13, %cst_14 {dimension_numbers = #tpu.dot_dimension_numbers<[1], [0], [0], [1], [0, 0, 1, 1], [], []>} : vector<32x32xf32>, vector<32x64xf32>, vector<32x64xf32> -> vector<32x64xf32>
    %15 = arith.addf %8, %14 : vector<32x64xf32>
    %c1 = arith.constant 1 : index
    %c0_15 = arith.constant 0 : index
    %c0_16 = arith.constant 0 : index
    %16 = vector.load %arg3[%c1, %c0_15, %c0_16] : memref<9x32x128xf32, #tpu.memory_space<vmem>>, vector<1x32x128xf32>
    %17 = vector.shape_cast %16 : vector<1x32x128xf32> to vector<32x128xf32>
    %cst_17 = arith.constant dense<0.000000e+00> : vector<32x32xf32>
    %18 = tpu.matmul %17, %7, %cst_17 {dimension_numbers = #tpu.dot_dimension_numbers<[1], [0], [0], [1], [0, 0, 1, 1], [], []>} : vector<32x128xf32>, vector<128x32xf32>, vector<32x32xf32> -> vector<32x32xf32>
    %c1_18 = arith.constant 1 : index
    %c0_19 = arith.constant 0 : index
    %c0_20 = arith.constant 0 : index
    %19 = vector.load %arg4[%c1_18, %c0_19, %c0_20] : memref<9x32x64xf32, #tpu.memory_space<vmem>>, vector<1x32x64xf32>
    %20 = vector.shape_cast %19 : vector<1x32x64xf32> to vector<32x64xf32>
    %cst_21 = arith.constant dense<0.000000e+00> : vector<32x64xf32>
    %21 = tpu.matmul %18, %20, %cst_21 {dimension_numbers = #tpu.dot_dimension_numbers<[1], [0], [0], [1], [0, 0, 1, 1], [], []>} : vector<32x32xf32>, vector<32x64xf32>, vector<32x64xf32> -> vector<32x64xf32>
    %22 = arith.addf %15, %21 : vector<32x64xf32>
    %c2 = arith.constant 2 : index
    %c0_22 = arith.constant 0 : index
    %c0_23 = arith.constant 0 : index
    %23 = vector.load %arg3[%c2, %c0_22, %c0_23] : memref<9x32x128xf32, #tpu.memory_space<vmem>>, vector<1x32x128xf32>
    %24 = vector.shape_cast %23 : vector<1x32x128xf32> to vector<32x128xf32>
    %cst_24 = arith.constant dense<0.000000e+00> : vector<32x32xf32>
    %25 = tpu.matmul %24, %7, %cst_24 {dimension_numbers = #tpu.dot_dimension_numbers<[1], [0], [0], [1], [0, 0, 1, 1], [], []>} : vector<32x128xf32>, vector<128x32xf32>, vector<32x32xf32> -> vector<32x32xf32>
    %c2_25 = arith.constant 2 : index
    %c0_26 = arith.constant 0 : index
    %c0_27 = arith.constant 0 : index
    %26 = vector.load %arg4[%c2_25, %c0_26, %c0_27] : memref<9x32x64xf32, #tpu.memory_space<vmem>>, vector<1x32x64xf32>
    %27 = vector.shape_cast %26 : vector<1x32x64xf32> to vector<32x64xf32>
    %cst_28 = arith.constant dense<0.000000e+00> : vector<32x64xf32>
    %28 = tpu.matmul %25, %27, %cst_28 {dimension_numbers = #tpu.dot_dimension_numbers<[1], [0], [0], [1], [0, 0, 1, 1], [], []>} : vector<32x32xf32>, vector<32x64xf32>, vector<32x64xf32> -> vector<32x64xf32>
    %29 = arith.addf %22, %28 : vector<32x64xf32>
    %c3 = arith.constant 3 : index
    %c0_29 = arith.constant 0 : index
    %c0_30 = arith.constant 0 : index
    %30 = vector.load %arg3[%c3, %c0_29, %c0_30] : memref<9x32x128xf32, #tpu.memory_space<vmem>>, vector<1x32x128xf32>
    %31 = vector.shape_cast %30 : vector<1x32x128xf32> to vector<32x128xf32>
    %cst_31 = arith.constant dense<0.000000e+00> : vector<32x32xf32>
    %32 = tpu.matmul %31, %7, %cst_31 {dimension_numbers = #tpu.dot_dimension_numbers<[1], [0], [0], [1], [0, 0, 1, 1], [], []>} : vector<32x128xf32>, vector<128x32xf32>, vector<32x32xf32> -> vector<32x32xf32>
    %c3_32 = arith.constant 3 : index
    %c0_33 = arith.constant 0 : index
    %c0_34 = arith.constant 0 : index
    %33 = vector.load %arg4[%c3_32, %c0_33, %c0_34] : memref<9x32x64xf32, #tpu.memory_space<vmem>>, vector<1x32x64xf32>
    %34 = vector.shape_cast %33 : vector<1x32x64xf32> to vector<32x64xf32>
    %cst_35 = arith.constant dense<0.000000e+00> : vector<32x64xf32>
    %35 = tpu.matmul %32, %34, %cst_35 {dimension_numbers = #tpu.dot_dimension_numbers<[1], [0], [0], [1], [0, 0, 1, 1], [], []>} : vector<32x32xf32>, vector<32x64xf32>, vector<32x64xf32> -> vector<32x64xf32>
    %36 = arith.addf %29, %35 : vector<32x64xf32>
    %c4 = arith.constant 4 : index
    %c0_36 = arith.constant 0 : index
    %c0_37 = arith.constant 0 : index
    %37 = vector.load %arg3[%c4, %c0_36, %c0_37] : memref<9x32x128xf32, #tpu.memory_space<vmem>>, vector<1x32x128xf32>
    %38 = vector.shape_cast %37 : vector<1x32x128xf32> to vector<32x128xf32>
    %cst_38 = arith.constant dense<0.000000e+00> : vector<32x32xf32>
    %39 = tpu.matmul %38, %7, %cst_38 {dimension_numbers = #tpu.dot_dimension_numbers<[1], [0], [0], [1], [0, 0, 1, 1], [], []>} : vector<32x128xf32>, vector<128x32xf32>, vector<32x32xf32> -> vector<32x32xf32>
    %c4_39 = arith.constant 4 : index
    %c0_40 = arith.constant 0 : index
    %c0_41 = arith.constant 0 : index
    %40 = vector.load %arg4[%c4_39, %c0_40, %c0_41] : memref<9x32x64xf32, #tpu.memory_space<vmem>>, vector<1x32x64xf32>
    %41 = vector.shape_cast %40 : vector<1x32x64xf32> to vector<32x64xf32>
    %cst_42 = arith.constant dense<0.000000e+00> : vector<32x64xf32>
    %42 = tpu.matmul %39, %41, %cst_42 {dimension_numbers = #tpu.dot_dimension_numbers<[1], [0], [0], [1], [0, 0, 1, 1], [], []>} : vector<32x32xf32>, vector<32x64xf32>, vector<32x64xf32> -> vector<32x64xf32>
    %43 = arith.addf %36, %42 : vector<32x64xf32>
    %c5 = arith.constant 5 : index
    %c0_43 = arith.constant 0 : index
    %c0_44 = arith.constant 0 : index
    %44 = vector.load %arg3[%c5, %c0_43, %c0_44] : memref<9x32x128xf32, #tpu.memory_space<vmem>>, vector<1x32x128xf32>
    %45 = vector.shape_cast %44 : vector<1x32x128xf32> to vector<32x128xf32>
    %cst_45 = arith.constant dense<0.000000e+00> : vector<32x32xf32>
    %46 = tpu.matmul %45, %7, %cst_45 {dimension_numbers = #tpu.dot_dimension_numbers<[1], [0], [0], [1], [0, 0, 1, 1], [], []>} : vector<32x128xf32>, vector<128x32xf32>, vector<32x32xf32> -> vector<32x32xf32>
    %c5_46 = arith.constant 5 : index
    %c0_47 = arith.constant 0 : index
    %c0_48 = arith.constant 0 : index
    %47 = vector.load %arg4[%c5_46, %c0_47, %c0_48] : memref<9x32x64xf32, #tpu.memory_space<vmem>>, vector<1x32x64xf32>
    %48 = vector.shape_cast %47 : vector<1x32x64xf32> to vector<32x64xf32>
    %cst_49 = arith.constant dense<0.000000e+00> : vector<32x64xf32>
    %49 = tpu.matmul %46, %48, %cst_49 {dimension_numbers = #tpu.dot_dimension_numbers<[1], [0], [0], [1], [0, 0, 1, 1], [], []>} : vector<32x32xf32>, vector<32x64xf32>, vector<32x64xf32> -> vector<32x64xf32>
    %50 = arith.addf %43, %49 : vector<32x64xf32>
    %c6 = arith.constant 6 : index
    %c0_50 = arith.constant 0 : index
    %c0_51 = arith.constant 0 : index
    %51 = vector.load %arg3[%c6, %c0_50, %c0_51] : memref<9x32x128xf32, #tpu.memory_space<vmem>>, vector<1x32x128xf32>
    %52 = vector.shape_cast %51 : vector<1x32x128xf32> to vector<32x128xf32>
    %cst_52 = arith.constant dense<0.000000e+00> : vector<32x32xf32>
    %53 = tpu.matmul %52, %7, %cst_52 {dimension_numbers = #tpu.dot_dimension_numbers<[1], [0], [0], [1], [0, 0, 1, 1], [], []>} : vector<32x128xf32>, vector<128x32xf32>, vector<32x32xf32> -> vector<32x32xf32>
    %c6_53 = arith.constant 6 : index
    %c0_54 = arith.constant 0 : index
    %c0_55 = arith.constant 0 : index
    %54 = vector.load %arg4[%c6_53, %c0_54, %c0_55] : memref<9x32x64xf32, #tpu.memory_space<vmem>>, vector<1x32x64xf32>
    %55 = vector.shape_cast %54 : vector<1x32x64xf32> to vector<32x64xf32>
    %cst_56 = arith.constant dense<0.000000e+00> : vector<32x64xf32>
    %56 = tpu.matmul %53, %55, %cst_56 {dimension_numbers = #tpu.dot_dimension_numbers<[1], [0], [0], [1], [0, 0, 1, 1], [], []>} : vector<32x32xf32>, vector<32x64xf32>, vector<32x64xf32> -> vector<32x64xf32>
    %57 = arith.addf %50, %56 : vector<32x64xf32>
    %c7 = arith.constant 7 : index
    %c0_57 = arith.constant 0 : index
    %c0_58 = arith.constant 0 : index
    %58 = vector.load %arg3[%c7, %c0_57, %c0_58] : memref<9x32x128xf32, #tpu.memory_space<vmem>>, vector<1x32x128xf32>
    %59 = vector.shape_cast %58 : vector<1x32x128xf32> to vector<32x128xf32>
    %cst_59 = arith.constant dense<0.000000e+00> : vector<32x32xf32>
    %60 = tpu.matmul %59, %7, %cst_59 {dimension_numbers = #tpu.dot_dimension_numbers<[1], [0], [0], [1], [0, 0, 1, 1], [], []>} : vector<32x128xf32>, vector<128x32xf32>, vector<32x32xf32> -> vector<32x32xf32>
    %c7_60 = arith.constant 7 : index
    %c0_61 = arith.constant 0 : index
    %c0_62 = arith.constant 0 : index
    %61 = vector.load %arg4[%c7_60, %c0_61, %c0_62] : memref<9x32x64xf32, #tpu.memory_space<vmem>>, vector<1x32x64xf32>
    %62 = vector.shape_cast %61 : vector<1x32x64xf32> to vector<32x64xf32>
    %cst_63 = arith.constant dense<0.000000e+00> : vector<32x64xf32>
    %63 = tpu.matmul %60, %62, %cst_63 {dimension_numbers = #tpu.dot_dimension_numbers<[1], [0], [0], [1], [0, 0, 1, 1], [], []>} : vector<32x32xf32>, vector<32x64xf32>, vector<32x64xf32> -> vector<32x64xf32>
    %64 = arith.addf %57, %63 : vector<32x64xf32>
    %c8 = arith.constant 8 : index
    %c0_64 = arith.constant 0 : index
    %c0_65 = arith.constant 0 : index
    %65 = vector.load %arg3[%c8, %c0_64, %c0_65] : memref<9x32x128xf32, #tpu.memory_space<vmem>>, vector<1x32x128xf32>
    %66 = vector.shape_cast %65 : vector<1x32x128xf32> to vector<32x128xf32>
    %cst_66 = arith.constant dense<0.000000e+00> : vector<32x32xf32>
    %67 = tpu.matmul %66, %7, %cst_66 {dimension_numbers = #tpu.dot_dimension_numbers<[1], [0], [0], [1], [0, 0, 1, 1], [], []>} : vector<32x128xf32>, vector<128x32xf32>, vector<32x32xf32> -> vector<32x32xf32>
    %c8_67 = arith.constant 8 : index
    %c0_68 = arith.constant 0 : index
    %c0_69 = arith.constant 0 : index
    %68 = vector.load %arg4[%c8_67, %c0_68, %c0_69] : memref<9x32x64xf32, #tpu.memory_space<vmem>>, vector<1x32x64xf32>
    %69 = vector.shape_cast %68 : vector<1x32x64xf32> to vector<32x64xf32>
    %cst_70 = arith.constant dense<0.000000e+00> : vector<32x64xf32>
    %70 = tpu.matmul %67, %69, %cst_70 {dimension_numbers = #tpu.dot_dimension_numbers<[1], [0], [0], [1], [0, 0, 1, 1], [], []>} : vector<32x32xf32>, vector<32x64xf32>, vector<32x64xf32> -> vector<32x64xf32>
    %71 = arith.addf %64, %70 : vector<32x64xf32>
    %c0_71 = arith.constant 0 : index
    %c0_72 = arith.constant 0 : index
    %72 = vector.load %arg5[%c0_71, %c0_72] : memref<1x64xf32, #tpu.memory_space<vmem>>, vector<1x64xf32>
    %73 = vector.broadcast %72 : vector<1x64xf32> to vector<32x64xf32>
    %74 = arith.addf %71, %73 : vector<32x64xf32>
    %cst_73 = arith.constant 0.000000e+00 : f32
    %75 = vector.broadcast %cst_73 : f32 to vector<32x64xf32>
    %76 = arith.maximumf %74, %75 : vector<32x64xf32>
    %cst_74 = arith.constant 0.000000e+00 : f32
    %77 = vector.broadcast %cst_74 : f32 to vector<8x128xf32>
    %c0_75 = arith.constant 0 : index
    %c0_76 = arith.constant 0 : index
    %c0_77 = arith.constant 0 : index
    %78 = vector.load %arg6[%c0_75, %c0_76, %c0_77] : memref<9x8x32xf32, #tpu.memory_space<vmem>>, vector<1x8x32xf32>
    %79 = vector.shape_cast %78 : vector<1x8x32xf32> to vector<8x32xf32>
    %cst_78 = arith.constant dense<0.000000e+00> : vector<8x64xf32>
    %80 = tpu.matmul %79, %76, %cst_78 {dimension_numbers = #tpu.dot_dimension_numbers<[1], [0], [0], [1], [0, 0, 1, 1], [], []>} : vector<8x32xf32>, vector<32x64xf32>, vector<8x64xf32> -> vector<8x64xf32>
    %c0_79 = arith.constant 0 : index
    %c0_80 = arith.constant 0 : index
    %c0_81 = arith.constant 0 : index
    %81 = vector.load %arg7[%c0_79, %c0_80, %c0_81] : memref<9x64x128xf32, #tpu.memory_space<vmem>>, vector<1x64x128xf32>
    %82 = vector.shape_cast %81 : vector<1x64x128xf32> to vector<64x128xf32>
    %cst_82 = arith.constant dense<0.000000e+00> : vector<8x128xf32>
    %83 = tpu.matmul %80, %82, %cst_82 {dimension_numbers = #tpu.dot_dimension_numbers<[1], [0], [0], [1], [0, 0, 1, 1], [], []>} : vector<8x64xf32>, vector<64x128xf32>, vector<8x128xf32> -> vector<8x128xf32>
    %84 = arith.addf %77, %83 : vector<8x128xf32>
    %c1_83 = arith.constant 1 : index
    %c0_84 = arith.constant 0 : index
    %c0_85 = arith.constant 0 : index
    %85 = vector.load %arg6[%c1_83, %c0_84, %c0_85] : memref<9x8x32xf32, #tpu.memory_space<vmem>>, vector<1x8x32xf32>
    %86 = vector.shape_cast %85 : vector<1x8x32xf32> to vector<8x32xf32>
    %cst_86 = arith.constant dense<0.000000e+00> : vector<8x64xf32>
    %87 = tpu.matmul %86, %76, %cst_86 {dimension_numbers = #tpu.dot_dimension_numbers<[1], [0], [0], [1], [0, 0, 1, 1], [], []>} : vector<8x32xf32>, vector<32x64xf32>, vector<8x64xf32> -> vector<8x64xf32>
    %c1_87 = arith.constant 1 : index
    %c0_88 = arith.constant 0 : index
    %c0_89 = arith.constant 0 : index
    %88 = vector.load %arg7[%c1_87, %c0_88, %c0_89] : memref<9x64x128xf32, #tpu.memory_space<vmem>>, vector<1x64x128xf32>
    %89 = vector.shape_cast %88 : vector<1x64x128xf32> to vector<64x128xf32>
    %cst_90 = arith.constant dense<0.000000e+00> : vector<8x128xf32>
    %90 = tpu.matmul %87, %89, %cst_90 {dimension_numbers = #tpu.dot_dimension_numbers<[1], [0], [0], [1], [0, 0, 1, 1], [], []>} : vector<8x64xf32>, vector<64x128xf32>, vector<8x128xf32> -> vector<8x128xf32>
    %91 = arith.addf %84, %90 : vector<8x128xf32>
    %c2_91 = arith.constant 2 : index
    %c0_92 = arith.constant 0 : index
    %c0_93 = arith.constant 0 : index
    %92 = vector.load %arg6[%c2_91, %c0_92, %c0_93] : memref<9x8x32xf32, #tpu.memory_space<vmem>>, vector<1x8x32xf32>
    %93 = vector.shape_cast %92 : vector<1x8x32xf32> to vector<8x32xf32>
    %cst_94 = arith.constant dense<0.000000e+00> : vector<8x64xf32>
    %94 = tpu.matmul %93, %76, %cst_94 {dimension_numbers = #tpu.dot_dimension_numbers<[1], [0], [0], [1], [0, 0, 1, 1], [], []>} : vector<8x32xf32>, vector<32x64xf32>, vector<8x64xf32> -> vector<8x64xf32>
    %c2_95 = arith.constant 2 : index
    %c0_96 = arith.constant 0 : index
    %c0_97 = arith.constant 0 : index
    %95 = vector.load %arg7[%c2_95, %c0_96, %c0_97] : memref<9x64x128xf32, #tpu.memory_space<vmem>>, vector<1x64x128xf32>
    %96 = vector.shape_cast %95 : vector<1x64x128xf32> to vector<64x128xf32>
    %cst_98 = arith.constant dense<0.000000e+00> : vector<8x128xf32>
    %97 = tpu.matmul %94, %96, %cst_98 {dimension_numbers = #tpu.dot_dimension_numbers<[1], [0], [0], [1], [0, 0, 1, 1], [], []>} : vector<8x64xf32>, vector<64x128xf32>, vector<8x128xf32> -> vector<8x128xf32>
    %98 = arith.addf %91, %97 : vector<8x128xf32>
    %c3_99 = arith.constant 3 : index
    %c0_100 = arith.constant 0 : index
    %c0_101 = arith.constant 0 : index
    %99 = vector.load %arg6[%c3_99, %c0_100, %c0_101] : memref<9x8x32xf32, #tpu.memory_space<vmem>>, vector<1x8x32xf32>
    %100 = vector.shape_cast %99 : vector<1x8x32xf32> to vector<8x32xf32>
    %cst_102 = arith.constant dense<0.000000e+00> : vector<8x64xf32>
    %101 = tpu.matmul %100, %76, %cst_102 {dimension_numbers = #tpu.dot_dimension_numbers<[1], [0], [0], [1], [0, 0, 1, 1], [], []>} : vector<8x32xf32>, vector<32x64xf32>, vector<8x64xf32> -> vector<8x64xf32>
    %c3_103 = arith.constant 3 : index
    %c0_104 = arith.constant 0 : index
    %c0_105 = arith.constant 0 : index
    %102 = vector.load %arg7[%c3_103, %c0_104, %c0_105] : memref<9x64x128xf32, #tpu.memory_space<vmem>>, vector<1x64x128xf32>
    %103 = vector.shape_cast %102 : vector<1x64x128xf32> to vector<64x128xf32>
    %cst_106 = arith.constant dense<0.000000e+00> : vector<8x128xf32>
    %104 = tpu.matmul %101, %103, %cst_106 {dimension_numbers = #tpu.dot_dimension_numbers<[1], [0], [0], [1], [0, 0, 1, 1], [], []>} : vector<8x64xf32>, vector<64x128xf32>, vector<8x128xf32> -> vector<8x128xf32>
    %105 = arith.addf %98, %104 : vector<8x128xf32>
    %c4_107 = arith.constant 4 : index
    %c0_108 = arith.constant 0 : index
    %c0_109 = arith.constant 0 : index
    %106 = vector.load %arg6[%c4_107, %c0_108, %c0_109] : memref<9x8x32xf32, #tpu.memory_space<vmem>>, vector<1x8x32xf32>
    %107 = vector.shape_cast %106 : vector<1x8x32xf32> to vector<8x32xf32>
    %cst_110 = arith.constant dense<0.000000e+00> : vector<8x64xf32>
    %108 = tpu.matmul %107, %76, %cst_110 {dimension_numbers = #tpu.dot_dimension_numbers<[1], [0], [0], [1], [0, 0, 1, 1], [], []>} : vector<8x32xf32>, vector<32x64xf32>, vector<8x64xf32> -> vector<8x64xf32>
    %c4_111 = arith.constant 4 : index
    %c0_112 = arith.constant 0 : index
    %c0_113 = arith.constant 0 : index
    %109 = vector.load %arg7[%c4_111, %c0_112, %c0_113] : memref<9x64x128xf32, #tpu.memory_space<vmem>>, vector<1x64x128xf32>
    %110 = vector.shape_cast %109 : vector<1x64x128xf32> to vector<64x128xf32>
    %cst_114 = arith.constant dense<0.000000e+00> : vector<8x128xf32>
    %111 = tpu.matmul %108, %110, %cst_114 {dimension_numbers = #tpu.dot_dimension_numbers<[1], [0], [0], [1], [0, 0, 1, 1], [], []>} : vector<8x64xf32>, vector<64x128xf32>, vector<8x128xf32> -> vector<8x128xf32>
    %112 = arith.addf %105, %111 : vector<8x128xf32>
    %c5_115 = arith.constant 5 : index
    %c0_116 = arith.constant 0 : index
    %c0_117 = arith.constant 0 : index
    %113 = vector.load %arg6[%c5_115, %c0_116, %c0_117] : memref<9x8x32xf32, #tpu.memory_space<vmem>>, vector<1x8x32xf32>
    %114 = vector.shape_cast %113 : vector<1x8x32xf32> to vector<8x32xf32>
    %cst_118 = arith.constant dense<0.000000e+00> : vector<8x64xf32>
    %115 = tpu.matmul %114, %76, %cst_118 {dimension_numbers = #tpu.dot_dimension_numbers<[1], [0], [0], [1], [0, 0, 1, 1], [], []>} : vector<8x32xf32>, vector<32x64xf32>, vector<8x64xf32> -> vector<8x64xf32>
    %c5_119 = arith.constant 5 : index
    %c0_120 = arith.constant 0 : index
    %c0_121 = arith.constant 0 : index
    %116 = vector.load %arg7[%c5_119, %c0_120, %c0_121] : memref<9x64x128xf32, #tpu.memory_space<vmem>>, vector<1x64x128xf32>
    %117 = vector.shape_cast %116 : vector<1x64x128xf32> to vector<64x128xf32>
    %cst_122 = arith.constant dense<0.000000e+00> : vector<8x128xf32>
    %118 = tpu.matmul %115, %117, %cst_122 {dimension_numbers = #tpu.dot_dimension_numbers<[1], [0], [0], [1], [0, 0, 1, 1], [], []>} : vector<8x64xf32>, vector<64x128xf32>, vector<8x128xf32> -> vector<8x128xf32>
    %119 = arith.addf %112, %118 : vector<8x128xf32>
    %c6_123 = arith.constant 6 : index
    %c0_124 = arith.constant 0 : index
    %c0_125 = arith.constant 0 : index
    %120 = vector.load %arg6[%c6_123, %c0_124, %c0_125] : memref<9x8x32xf32, #tpu.memory_space<vmem>>, vector<1x8x32xf32>
    %121 = vector.shape_cast %120 : vector<1x8x32xf32> to vector<8x32xf32>
    %cst_126 = arith.constant dense<0.000000e+00> : vector<8x64xf32>
    %122 = tpu.matmul %121, %76, %cst_126 {dimension_numbers = #tpu.dot_dimension_numbers<[1], [0], [0], [1], [0, 0, 1, 1], [], []>} : vector<8x32xf32>, vector<32x64xf32>, vector<8x64xf32> -> vector<8x64xf32>
    %c6_127 = arith.constant 6 : index
    %c0_128 = arith.constant 0 : index
    %c0_129 = arith.constant 0 : index
    %123 = vector.load %arg7[%c6_127, %c0_128, %c0_129] : memref<9x64x128xf32, #tpu.memory_space<vmem>>, vector<1x64x128xf32>
    %124 = vector.shape_cast %123 : vector<1x64x128xf32> to vector<64x128xf32>
    %cst_130 = arith.constant dense<0.000000e+00> : vector<8x128xf32>
    %125 = tpu.matmul %122, %124, %cst_130 {dimension_numbers = #tpu.dot_dimension_numbers<[1], [0], [0], [1], [0, 0, 1, 1], [], []>} : vector<8x64xf32>, vector<64x128xf32>, vector<8x128xf32> -> vector<8x128xf32>
    %126 = arith.addf %119, %125 : vector<8x128xf32>
    %c7_131 = arith.constant 7 : index
    %c0_132 = arith.constant 0 : index
    %c0_133 = arith.constant 0 : index
    %127 = vector.load %arg6[%c7_131, %c0_132, %c0_133] : memref<9x8x32xf32, #tpu.memory_space<vmem>>, vector<1x8x32xf32>
    %128 = vector.shape_cast %127 : vector<1x8x32xf32> to vector<8x32xf32>
    %cst_134 = arith.constant dense<0.000000e+00> : vector<8x64xf32>
    %129 = tpu.matmul %128, %76, %cst_134 {dimension_numbers = #tpu.dot_dimension_numbers<[1], [0], [0], [1], [0, 0, 1, 1], [], []>} : vector<8x32xf32>, vector<32x64xf32>, vector<8x64xf32> -> vector<8x64xf32>
    %c7_135 = arith.constant 7 : index
    %c0_136 = arith.constant 0 : index
    %c0_137 = arith.constant 0 : index
    %130 = vector.load %arg7[%c7_135, %c0_136, %c0_137] : memref<9x64x128xf32, #tpu.memory_space<vmem>>, vector<1x64x128xf32>
    %131 = vector.shape_cast %130 : vector<1x64x128xf32> to vector<64x128xf32>
    %cst_138 = arith.constant dense<0.000000e+00> : vector<8x128xf32>
    %132 = tpu.matmul %129, %131, %cst_138 {dimension_numbers = #tpu.dot_dimension_numbers<[1], [0], [0], [1], [0, 0, 1, 1], [], []>} : vector<8x64xf32>, vector<64x128xf32>, vector<8x128xf32> -> vector<8x128xf32>
    %133 = arith.addf %126, %132 : vector<8x128xf32>
    %c8_139 = arith.constant 8 : index
    %c0_140 = arith.constant 0 : index
    %c0_141 = arith.constant 0 : index
    %134 = vector.load %arg6[%c8_139, %c0_140, %c0_141] : memref<9x8x32xf32, #tpu.memory_space<vmem>>, vector<1x8x32xf32>
    %135 = vector.shape_cast %134 : vector<1x8x32xf32> to vector<8x32xf32>
    %cst_142 = arith.constant dense<0.000000e+00> : vector<8x64xf32>
    %136 = tpu.matmul %135, %76, %cst_142 {dimension_numbers = #tpu.dot_dimension_numbers<[1], [0], [0], [1], [0, 0, 1, 1], [], []>} : vector<8x32xf32>, vector<32x64xf32>, vector<8x64xf32> -> vector<8x64xf32>
    %c8_143 = arith.constant 8 : index
    %c0_144 = arith.constant 0 : index
    %c0_145 = arith.constant 0 : index
    %137 = vector.load %arg7[%c8_143, %c0_144, %c0_145] : memref<9x64x128xf32, #tpu.memory_space<vmem>>, vector<1x64x128xf32>
    %138 = vector.shape_cast %137 : vector<1x64x128xf32> to vector<64x128xf32>
    %cst_146 = arith.constant dense<0.000000e+00> : vector<8x128xf32>
    %139 = tpu.matmul %136, %138, %cst_146 {dimension_numbers = #tpu.dot_dimension_numbers<[1], [0], [0], [1], [0, 0, 1, 1], [], []>} : vector<8x64xf32>, vector<64x128xf32>, vector<8x128xf32> -> vector<8x128xf32>
    %140 = arith.addf %133, %139 : vector<8x128xf32>
    %c0_147 = arith.constant 0 : index
    %c0_148 = arith.constant 0 : index
    %141 = vector.load %arg8[%c0_147, %c0_148] : memref<1x128xf32, #tpu.memory_space<vmem>>, vector<1x128xf32>
    %142 = vector.broadcast %141 : vector<1x128xf32> to vector<8x128xf32>
    %143 = arith.addf %140, %142 : vector<8x128xf32>
    %cst_149 = arith.constant 0.000000e+00 : f32
    %144 = vector.broadcast %cst_149 : f32 to vector<8x128xf32>
    %145 = arith.maximumf %143, %144 : vector<8x128xf32>
    %cst_150 = arith.constant 0.000000e+00 : f32
    %146 = vector.broadcast %cst_150 : f32 to vector<2x32xf32>
    %c0_151 = arith.constant 0 : index
    %c0_152 = arith.constant 0 : index
    %c0_153 = arith.constant 0 : index
    %147 = vector.load %arg9[%c0_151, %c0_152, %c0_153] : memref<4x2x8xf32, #tpu.memory_space<vmem>>, vector<1x2x8xf32>
    %148 = vector.shape_cast %147 : vector<1x2x8xf32> to vector<2x8xf32>
    %cst_154 = arith.constant dense<0.000000e+00> : vector<2x128xf32>
    %149 = tpu.matmul %148, %145, %cst_154 {dimension_numbers = #tpu.dot_dimension_numbers<[1], [0], [0], [1], [0, 0, 1, 1], [], []>} : vector<2x8xf32>, vector<8x128xf32>, vector<2x128xf32> -> vector<2x128xf32>
    %c0_155 = arith.constant 0 : index
    %c0_156 = arith.constant 0 : index
    %c0_157 = arith.constant 0 : index
    %150 = vector.load %arg10[%c0_155, %c0_156, %c0_157] : memref<4x128x32xf32, #tpu.memory_space<vmem>>, vector<1x128x32xf32>
    %151 = vector.shape_cast %150 : vector<1x128x32xf32> to vector<128x32xf32>
    %cst_158 = arith.constant dense<0.000000e+00> : vector<2x32xf32>
    %152 = tpu.matmul %149, %151, %cst_158 {dimension_numbers = #tpu.dot_dimension_numbers<[1], [0], [0], [1], [0, 0, 1, 1], [], []>} : vector<2x128xf32>, vector<128x32xf32>, vector<2x32xf32> -> vector<2x32xf32>
    %153 = arith.addf %146, %152 : vector<2x32xf32>
    %c1_159 = arith.constant 1 : index
    %c0_160 = arith.constant 0 : index
    %c0_161 = arith.constant 0 : index
    %154 = vector.load %arg9[%c1_159, %c0_160, %c0_161] : memref<4x2x8xf32, #tpu.memory_space<vmem>>, vector<1x2x8xf32>
    %155 = vector.shape_cast %154 : vector<1x2x8xf32> to vector<2x8xf32>
    %cst_162 = arith.constant dense<0.000000e+00> : vector<2x128xf32>
    %156 = tpu.matmul %155, %145, %cst_162 {dimension_numbers = #tpu.dot_dimension_numbers<[1], [0], [0], [1], [0, 0, 1, 1], [], []>} : vector<2x8xf32>, vector<8x128xf32>, vector<2x128xf32> -> vector<2x128xf32>
    %c1_163 = arith.constant 1 : index
    %c0_164 = arith.constant 0 : index
    %c0_165 = arith.constant 0 : index
    %157 = vector.load %arg10[%c1_163, %c0_164, %c0_165] : memref<4x128x32xf32, #tpu.memory_space<vmem>>, vector<1x128x32xf32>
    %158 = vector.shape_cast %157 : vector<1x128x32xf32> to vector<128x32xf32>
    %cst_166 = arith.constant dense<0.000000e+00> : vector<2x32xf32>
    %159 = tpu.matmul %156, %158, %cst_166 {dimension_numbers = #tpu.dot_dimension_numbers<[1], [0], [0], [1], [0, 0, 1, 1], [], []>} : vector<2x128xf32>, vector<128x32xf32>, vector<2x32xf32> -> vector<2x32xf32>
    %160 = arith.addf %153, %159 : vector<2x32xf32>
    %c2_167 = arith.constant 2 : index
    %c0_168 = arith.constant 0 : index
    %c0_169 = arith.constant 0 : index
    %161 = vector.load %arg9[%c2_167, %c0_168, %c0_169] : memref<4x2x8xf32, #tpu.memory_space<vmem>>, vector<1x2x8xf32>
    %162 = vector.shape_cast %161 : vector<1x2x8xf32> to vector<2x8xf32>
    %cst_170 = arith.constant dense<0.000000e+00> : vector<2x128xf32>
    %163 = tpu.matmul %162, %145, %cst_170 {dimension_numbers = #tpu.dot_dimension_numbers<[1], [0], [0], [1], [0, 0, 1, 1], [], []>} : vector<2x8xf32>, vector<8x128xf32>, vector<2x128xf32> -> vector<2x128xf32>
    %c2_171 = arith.constant 2 : index
    %c0_172 = arith.constant 0 : index
    %c0_173 = arith.constant 0 : index
    %164 = vector.load %arg10[%c2_171, %c0_172, %c0_173] : memref<4x128x32xf32, #tpu.memory_space<vmem>>, vector<1x128x32xf32>
    %165 = vector.shape_cast %164 : vector<1x128x32xf32> to vector<128x32xf32>
    %cst_174 = arith.constant dense<0.000000e+00> : vector<2x32xf32>
    %166 = tpu.matmul %163, %165, %cst_174 {dimension_numbers = #tpu.dot_dimension_numbers<[1], [0], [0], [1], [0, 0, 1, 1], [], []>} : vector<2x128xf32>, vector<128x32xf32>, vector<2x32xf32> -> vector<2x32xf32>
    %167 = arith.addf %160, %166 : vector<2x32xf32>
    %c3_175 = arith.constant 3 : index
    %c0_176 = arith.constant 0 : index
    %c0_177 = arith.constant 0 : index
    %168 = vector.load %arg9[%c3_175, %c0_176, %c0_177] : memref<4x2x8xf32, #tpu.memory_space<vmem>>, vector<1x2x8xf32>
    %169 = vector.shape_cast %168 : vector<1x2x8xf32> to vector<2x8xf32>
    %cst_178 = arith.constant dense<0.000000e+00> : vector<2x128xf32>
    %170 = tpu.matmul %169, %145, %cst_178 {dimension_numbers = #tpu.dot_dimension_numbers<[1], [0], [0], [1], [0, 0, 1, 1], [], []>} : vector<2x8xf32>, vector<8x128xf32>, vector<2x128xf32> -> vector<2x128xf32>
    %c3_179 = arith.constant 3 : index
    %c0_180 = arith.constant 0 : index
    %c0_181 = arith.constant 0 : index
    %171 = vector.load %arg10[%c3_179, %c0_180, %c0_181] : memref<4x128x32xf32, #tpu.memory_space<vmem>>, vector<1x128x32xf32>
    %172 = vector.shape_cast %171 : vector<1x128x32xf32> to vector<128x32xf32>
    %cst_182 = arith.constant dense<0.000000e+00> : vector<2x32xf32>
    %173 = tpu.matmul %170, %172, %cst_182 {dimension_numbers = #tpu.dot_dimension_numbers<[1], [0], [0], [1], [0, 0, 1, 1], [], []>} : vector<2x128xf32>, vector<128x32xf32>, vector<2x32xf32> -> vector<2x32xf32>
    %174 = arith.addf %167, %173 : vector<2x32xf32>
    %c0_183 = arith.constant 0 : index
    %c0_184 = arith.constant 0 : index
    %175 = vector.load %arg11[%c0_183, %c0_184] : memref<1x32xf32, #tpu.memory_space<vmem>>, vector<1x32xf32>
    %176 = vector.broadcast %175 : vector<1x32xf32> to vector<2x32xf32>
    %177 = arith.addf %174, %176 : vector<2x32xf32>
    %cst_185 = arith.constant 0.000000e+00 : f32
    %178 = vector.broadcast %cst_185 : f32 to vector<2x32xf32>
    %179 = arith.maximumf %177, %178 : vector<2x32xf32>
    %cst_186 = arith.constant 0.000000e+00 : f32
    %180 = vector.broadcast %cst_186 : f32 to vector<8x128xf32>
    %c0_187 = arith.constant 0 : index
    %c0_188 = arith.constant 0 : index
    %c0_189 = arith.constant 0 : index
    %181 = vector.load %arg12[%c0_187, %c0_188, %c0_189] : memref<4x8x2xf32, #tpu.memory_space<vmem>>, vector<1x8x2xf32>
    %182 = vector.shape_cast %181 : vector<1x8x2xf32> to vector<8x2xf32>
    %c0_190 = arith.constant 0 : index
    %c0_191 = arith.constant 0 : index
    %c0_192 = arith.constant 0 : index
    %183 = vector.load %arg13[%c0_190, %c0_191, %c0_192] : memref<4x32x128xf32, #tpu.memory_space<vmem>>, vector<1x32x128xf32>
    %184 = vector.shape_cast %183 : vector<1x32x128xf32> to vector<32x128xf32>
    %cst_193 = arith.constant dense<0.000000e+00> : vector<2x128xf32>
    %185 = tpu.matmul %179, %184, %cst_193 {dimension_numbers = #tpu.dot_dimension_numbers<[1], [0], [0], [1], [0, 0, 1, 1], [], []>} : vector<2x32xf32>, vector<32x128xf32>, vector<2x128xf32> -> vector<2x128xf32>
    %c0_194 = arith.constant 0 : index
    %c0_195 = arith.constant 0 : index
    %c0_196 = arith.constant 0 : index
    %186 = vector.load %arg14[%c0_194, %c0_195, %c0_196] : memref<4x1x128xf32, #tpu.memory_space<vmem>>, vector<1x1x128xf32>
    %187 = vector.shape_cast %186 : vector<1x1x128xf32> to vector<1x128xf32>
    %188 = vector.broadcast %187 : vector<1x128xf32> to vector<2x128xf32>
    %189 = arith.addf %185, %188 : vector<2x128xf32>
    %cst_197 = arith.constant dense<0.000000e+00> : vector<8x128xf32>
    %190 = tpu.matmul %182, %189, %cst_197 {dimension_numbers = #tpu.dot_dimension_numbers<[1], [0], [0], [1], [0, 0, 1, 1], [], []>} : vector<8x2xf32>, vector<2x128xf32>, vector<8x128xf32> -> vector<8x128xf32>
    %191 = arith.addf %180, %190 : vector<8x128xf32>
    %c1_198 = arith.constant 1 : index
    %c0_199 = arith.constant 0 : index
    %c0_200 = arith.constant 0 : index
    %192 = vector.load %arg12[%c1_198, %c0_199, %c0_200] : memref<4x8x2xf32, #tpu.memory_space<vmem>>, vector<1x8x2xf32>
    %193 = vector.shape_cast %192 : vector<1x8x2xf32> to vector<8x2xf32>
    %c1_201 = arith.constant 1 : index
    %c0_202 = arith.constant 0 : index
    %c0_203 = arith.constant 0 : index
    %194 = vector.load %arg13[%c1_201, %c0_202, %c0_203] : memref<4x32x128xf32, #tpu.memory_space<vmem>>, vector<1x32x128xf32>
    %195 = vector.shape_cast %194 : vector<1x32x128xf32> to vector<32x128xf32>
    %cst_204 = arith.constant dense<0.000000e+00> : vector<2x128xf32>
    %196 = tpu.matmul %179, %195, %cst_204 {dimension_numbers = #tpu.dot_dimension_numbers<[1], [0], [0], [1], [0, 0, 1, 1], [], []>} : vector<2x32xf32>, vector<32x128xf32>, vector<2x128xf32> -> vector<2x128xf32>
    %c1_205 = arith.constant 1 : index
    %c0_206 = arith.constant 0 : index
    %c0_207 = arith.constant 0 : index
    %197 = vector.load %arg14[%c1_205, %c0_206, %c0_207] : memref<4x1x128xf32, #tpu.memory_space<vmem>>, vector<1x1x128xf32>
    %198 = vector.shape_cast %197 : vector<1x1x128xf32> to vector<1x128xf32>
    %199 = vector.broadcast %198 : vector<1x128xf32> to vector<2x128xf32>
    %200 = arith.addf %196, %199 : vector<2x128xf32>
    %cst_208 = arith.constant dense<0.000000e+00> : vector<8x128xf32>
    %201 = tpu.matmul %193, %200, %cst_208 {dimension_numbers = #tpu.dot_dimension_numbers<[1], [0], [0], [1], [0, 0, 1, 1], [], []>} : vector<8x2xf32>, vector<2x128xf32>, vector<8x128xf32> -> vector<8x128xf32>
    %202 = arith.addf %191, %201 : vector<8x128xf32>
    %c2_209 = arith.constant 2 : index
    %c0_210 = arith.constant 0 : index
    %c0_211 = arith.constant 0 : index
    %203 = vector.load %arg12[%c2_209, %c0_210, %c0_211] : memref<4x8x2xf32, #tpu.memory_space<vmem>>, vector<1x8x2xf32>
    %204 = vector.shape_cast %203 : vector<1x8x2xf32> to vector<8x2xf32>
    %c2_212 = arith.constant 2 : index
    %c0_213 = arith.constant 0 : index
    %c0_214 = arith.constant 0 : index
    %205 = vector.load %arg13[%c2_212, %c0_213, %c0_214] : memref<4x32x128xf32, #tpu.memory_space<vmem>>, vector<1x32x128xf32>
    %206 = vector.shape_cast %205 : vector<1x32x128xf32> to vector<32x128xf32>
    %cst_215 = arith.constant dense<0.000000e+00> : vector<2x128xf32>
    %207 = tpu.matmul %179, %206, %cst_215 {dimension_numbers = #tpu.dot_dimension_numbers<[1], [0], [0], [1], [0, 0, 1, 1], [], []>} : vector<2x32xf32>, vector<32x128xf32>, vector<2x128xf32> -> vector<2x128xf32>
    %c2_216 = arith.constant 2 : index
    %c0_217 = arith.constant 0 : index
    %c0_218 = arith.constant 0 : index
    %208 = vector.load %arg14[%c2_216, %c0_217, %c0_218] : memref<4x1x128xf32, #tpu.memory_space<vmem>>, vector<1x1x128xf32>
    %209 = vector.shape_cast %208 : vector<1x1x128xf32> to vector<1x128xf32>
    %210 = vector.broadcast %209 : vector<1x128xf32> to vector<2x128xf32>
    %211 = arith.addf %207, %210 : vector<2x128xf32>
    %cst_219 = arith.constant dense<0.000000e+00> : vector<8x128xf32>
    %212 = tpu.matmul %204, %211, %cst_219 {dimension_numbers = #tpu.dot_dimension_numbers<[1], [0], [0], [1], [0, 0, 1, 1], [], []>} : vector<8x2xf32>, vector<2x128xf32>, vector<8x128xf32> -> vector<8x128xf32>
    %213 = arith.addf %202, %212 : vector<8x128xf32>
    %c3_220 = arith.constant 3 : index
    %c0_221 = arith.constant 0 : index
    %c0_222 = arith.constant 0 : index
    %214 = vector.load %arg12[%c3_220, %c0_221, %c0_222] : memref<4x8x2xf32, #tpu.memory_space<vmem>>, vector<1x8x2xf32>
    %215 = vector.shape_cast %214 : vector<1x8x2xf32> to vector<8x2xf32>
    %c3_223 = arith.constant 3 : index
    %c0_224 = arith.constant 0 : index
    %c0_225 = arith.constant 0 : index
    %216 = vector.load %arg13[%c3_223, %c0_224, %c0_225] : memref<4x32x128xf32, #tpu.memory_space<vmem>>, vector<1x32x128xf32>
    %217 = vector.shape_cast %216 : vector<1x32x128xf32> to vector<32x128xf32>
    %cst_226 = arith.constant dense<0.000000e+00> : vector<2x128xf32>
    %218 = tpu.matmul %179, %217, %cst_226 {dimension_numbers = #tpu.dot_dimension_numbers<[1], [0], [0], [1], [0, 0, 1, 1], [], []>} : vector<2x32xf32>, vector<32x128xf32>, vector<2x128xf32> -> vector<2x128xf32>
    %c3_227 = arith.constant 3 : index
    %c0_228 = arith.constant 0 : index
    %c0_229 = arith.constant 0 : index
    %219 = vector.load %arg14[%c3_227, %c0_228, %c0_229] : memref<4x1x128xf32, #tpu.memory_space<vmem>>, vector<1x1x128xf32>
    %220 = vector.shape_cast %219 : vector<1x1x128xf32> to vector<1x128xf32>
    %221 = vector.broadcast %220 : vector<1x128xf32> to vector<2x128xf32>
    %222 = arith.addf %218, %221 : vector<2x128xf32>
    %cst_230 = arith.constant dense<0.000000e+00> : vector<8x128xf32>
    %223 = tpu.matmul %215, %222, %cst_230 {dimension_numbers = #tpu.dot_dimension_numbers<[1], [0], [0], [1], [0, 0, 1, 1], [], []>} : vector<8x2xf32>, vector<2x128xf32>, vector<8x128xf32> -> vector<8x128xf32>
    %224 = arith.addf %213, %223 : vector<8x128xf32>
    %cst_231 = arith.constant 0.000000e+00 : f32
    %225 = vector.broadcast %cst_231 : f32 to vector<8x128xf32>
    %226 = arith.maximumf %224, %225 : vector<8x128xf32>
    %cst_232 = arith.constant 0.000000e+00 : f32
    %227 = vector.broadcast %cst_232 : f32 to vector<32x64xf32>
    %c0_233 = arith.constant 0 : index
    %c0_234 = arith.constant 0 : index
    %c0_235 = arith.constant 0 : index
    %228 = vector.load %arg15[%c0_233, %c0_234, %c0_235] : memref<9x32x8xf32, #tpu.memory_space<vmem>>, vector<1x32x8xf32>
    %229 = vector.shape_cast %228 : vector<1x32x8xf32> to vector<32x8xf32>
    %c0_236 = arith.constant 0 : index
    %c0_237 = arith.constant 0 : index
    %c0_238 = arith.constant 0 : index
    %230 = vector.load %arg16[%c0_236, %c0_237, %c0_238] : memref<9x128x64xf32, #tpu.memory_space<vmem>>, vector<1x128x64xf32>
    %231 = vector.shape_cast %230 : vector<1x128x64xf32> to vector<128x64xf32>
    %cst_239 = arith.constant dense<0.000000e+00> : vector<8x64xf32>
    %232 = tpu.matmul %226, %231, %cst_239 {dimension_numbers = #tpu.dot_dimension_numbers<[1], [0], [0], [1], [0, 0, 1, 1], [], []>} : vector<8x128xf32>, vector<128x64xf32>, vector<8x64xf32> -> vector<8x64xf32>
    %cst_240 = arith.constant dense<0.000000e+00> : vector<32x64xf32>
    %233 = tpu.matmul %229, %232, %cst_240 {dimension_numbers = #tpu.dot_dimension_numbers<[1], [0], [0], [1], [0, 0, 1, 1], [], []>} : vector<32x8xf32>, vector<8x64xf32>, vector<32x64xf32> -> vector<32x64xf32>
    %234 = arith.addf %227, %233 : vector<32x64xf32>
    %c1_241 = arith.constant 1 : index
    %c0_242 = arith.constant 0 : index
    %c0_243 = arith.constant 0 : index
    %235 = vector.load %arg15[%c1_241, %c0_242, %c0_243] : memref<9x32x8xf32, #tpu.memory_space<vmem>>, vector<1x32x8xf32>
    %236 = vector.shape_cast %235 : vector<1x32x8xf32> to vector<32x8xf32>
    %c1_244 = arith.constant 1 : index
    %c0_245 = arith.constant 0 : index
    %c0_246 = arith.constant 0 : index
    %237 = vector.load %arg16[%c1_244, %c0_245, %c0_246] : memref<9x128x64xf32, #tpu.memory_space<vmem>>, vector<1x128x64xf32>
    %238 = vector.shape_cast %237 : vector<1x128x64xf32> to vector<128x64xf32>
    %cst_247 = arith.constant dense<0.000000e+00> : vector<8x64xf32>
    %239 = tpu.matmul %226, %238, %cst_247 {dimension_numbers = #tpu.dot_dimension_numbers<[1], [0], [0], [1], [0, 0, 1, 1], [], []>} : vector<8x128xf32>, vector<128x64xf32>, vector<8x64xf32> -> vector<8x64xf32>
    %cst_248 = arith.constant dense<0.000000e+00> : vector<32x64xf32>
    %240 = tpu.matmul %236, %239, %cst_248 {dimension_numbers = #tpu.dot_dimension_numbers<[1], [0], [0], [1], [0, 0, 1, 1], [], []>} : vector<32x8xf32>, vector<8x64xf32>, vector<32x64xf32> -> vector<32x64xf32>
    %241 = arith.addf %234, %240 : vector<32x64xf32>
    %c2_249 = arith.constant 2 : index
    %c0_250 = arith.constant 0 : index
    %c0_251 = arith.constant 0 : index
    %242 = vector.load %arg15[%c2_249, %c0_250, %c0_251] : memref<9x32x8xf32, #tpu.memory_space<vmem>>, vector<1x32x8xf32>
    %243 = vector.shape_cast %242 : vector<1x32x8xf32> to vector<32x8xf32>
    %c2_252 = arith.constant 2 : index
    %c0_253 = arith.constant 0 : index
    %c0_254 = arith.constant 0 : index
    %244 = vector.load %arg16[%c2_252, %c0_253, %c0_254] : memref<9x128x64xf32, #tpu.memory_space<vmem>>, vector<1x128x64xf32>
    %245 = vector.shape_cast %244 : vector<1x128x64xf32> to vector<128x64xf32>
    %cst_255 = arith.constant dense<0.000000e+00> : vector<8x64xf32>
    %246 = tpu.matmul %226, %245, %cst_255 {dimension_numbers = #tpu.dot_dimension_numbers<[1], [0], [0], [1], [0, 0, 1, 1], [], []>} : vector<8x128xf32>, vector<128x64xf32>, vector<8x64xf32> -> vector<8x64xf32>
    %cst_256 = arith.constant dense<0.000000e+00> : vector<32x64xf32>
    %247 = tpu.matmul %243, %246, %cst_256 {dimension_numbers = #tpu.dot_dimension_numbers<[1], [0], [0], [1], [0, 0, 1, 1], [], []>} : vector<32x8xf32>, vector<8x64xf32>, vector<32x64xf32> -> vector<32x64xf32>
    %248 = arith.addf %241, %247 : vector<32x64xf32>
    %c3_257 = arith.constant 3 : index
    %c0_258 = arith.constant 0 : index
    %c0_259 = arith.constant 0 : index
    %249 = vector.load %arg15[%c3_257, %c0_258, %c0_259] : memref<9x32x8xf32, #tpu.memory_space<vmem>>, vector<1x32x8xf32>
    %250 = vector.shape_cast %249 : vector<1x32x8xf32> to vector<32x8xf32>
    %c3_260 = arith.constant 3 : index
    %c0_261 = arith.constant 0 : index
    %c0_262 = arith.constant 0 : index
    %251 = vector.load %arg16[%c3_260, %c0_261, %c0_262] : memref<9x128x64xf32, #tpu.memory_space<vmem>>, vector<1x128x64xf32>
    %252 = vector.shape_cast %251 : vector<1x128x64xf32> to vector<128x64xf32>
    %cst_263 = arith.constant dense<0.000000e+00> : vector<8x64xf32>
    %253 = tpu.matmul %226, %252, %cst_263 {dimension_numbers = #tpu.dot_dimension_numbers<[1], [0], [0], [1], [0, 0, 1, 1], [], []>} : vector<8x128xf32>, vector<128x64xf32>, vector<8x64xf32> -> vector<8x64xf32>
    %cst_264 = arith.constant dense<0.000000e+00> : vector<32x64xf32>
    %254 = tpu.matmul %250, %253, %cst_264 {dimension_numbers = #tpu.dot_dimension_numbers<[1], [0], [0], [1], [0, 0, 1, 1], [], []>} : vector<32x8xf32>, vector<8x64xf32>, vector<32x64xf32> -> vector<32x64xf32>
    %255 = arith.addf %248, %254 : vector<32x64xf32>
    %c4_265 = arith.constant 4 : index
    %c0_266 = arith.constant 0 : index
    %c0_267 = arith.constant 0 : index
    %256 = vector.load %arg15[%c4_265, %c0_266, %c0_267] : memref<9x32x8xf32, #tpu.memory_space<vmem>>, vector<1x32x8xf32>
    %257 = vector.shape_cast %256 : vector<1x32x8xf32> to vector<32x8xf32>
    %c4_268 = arith.constant 4 : index
    %c0_269 = arith.constant 0 : index
    %c0_270 = arith.constant 0 : index
    %258 = vector.load %arg16[%c4_268, %c0_269, %c0_270] : memref<9x128x64xf32, #tpu.memory_space<vmem>>, vector<1x128x64xf32>
    %259 = vector.shape_cast %258 : vector<1x128x64xf32> to vector<128x64xf32>
    %cst_271 = arith.constant dense<0.000000e+00> : vector<8x64xf32>
    %260 = tpu.matmul %226, %259, %cst_271 {dimension_numbers = #tpu.dot_dimension_numbers<[1], [0], [0], [1], [0, 0, 1, 1], [], []>} : vector<8x128xf32>, vector<128x64xf32>, vector<8x64xf32> -> vector<8x64xf32>
    %cst_272 = arith.constant dense<0.000000e+00> : vector<32x64xf32>
    %261 = tpu.matmul %257, %260, %cst_272 {dimension_numbers = #tpu.dot_dimension_numbers<[1], [0], [0], [1], [0, 0, 1, 1], [], []>} : vector<32x8xf32>, vector<8x64xf32>, vector<32x64xf32> -> vector<32x64xf32>
    %262 = arith.addf %255, %261 : vector<32x64xf32>
    %c5_273 = arith.constant 5 : index
    %c0_274 = arith.constant 0 : index
    %c0_275 = arith.constant 0 : index
    %263 = vector.load %arg15[%c5_273, %c0_274, %c0_275] : memref<9x32x8xf32, #tpu.memory_space<vmem>>, vector<1x32x8xf32>
    %264 = vector.shape_cast %263 : vector<1x32x8xf32> to vector<32x8xf32>
    %c5_276 = arith.constant 5 : index
    %c0_277 = arith.constant 0 : index
    %c0_278 = arith.constant 0 : index
    %265 = vector.load %arg16[%c5_276, %c0_277, %c0_278] : memref<9x128x64xf32, #tpu.memory_space<vmem>>, vector<1x128x64xf32>
    %266 = vector.shape_cast %265 : vector<1x128x64xf32> to vector<128x64xf32>
    %cst_279 = arith.constant dense<0.000000e+00> : vector<8x64xf32>
    %267 = tpu.matmul %226, %266, %cst_279 {dimension_numbers = #tpu.dot_dimension_numbers<[1], [0], [0], [1], [0, 0, 1, 1], [], []>} : vector<8x128xf32>, vector<128x64xf32>, vector<8x64xf32> -> vector<8x64xf32>
    %cst_280 = arith.constant dense<0.000000e+00> : vector<32x64xf32>
    %268 = tpu.matmul %264, %267, %cst_280 {dimension_numbers = #tpu.dot_dimension_numbers<[1], [0], [0], [1], [0, 0, 1, 1], [], []>} : vector<32x8xf32>, vector<8x64xf32>, vector<32x64xf32> -> vector<32x64xf32>
    %269 = arith.addf %262, %268 : vector<32x64xf32>
    %c6_281 = arith.constant 6 : index
    %c0_282 = arith.constant 0 : index
    %c0_283 = arith.constant 0 : index
    %270 = vector.load %arg15[%c6_281, %c0_282, %c0_283] : memref<9x32x8xf32, #tpu.memory_space<vmem>>, vector<1x32x8xf32>
    %271 = vector.shape_cast %270 : vector<1x32x8xf32> to vector<32x8xf32>
    %c6_284 = arith.constant 6 : index
    %c0_285 = arith.constant 0 : index
    %c0_286 = arith.constant 0 : index
    %272 = vector.load %arg16[%c6_284, %c0_285, %c0_286] : memref<9x128x64xf32, #tpu.memory_space<vmem>>, vector<1x128x64xf32>
    %273 = vector.shape_cast %272 : vector<1x128x64xf32> to vector<128x64xf32>
    %cst_287 = arith.constant dense<0.000000e+00> : vector<8x64xf32>
    %274 = tpu.matmul %226, %273, %cst_287 {dimension_numbers = #tpu.dot_dimension_numbers<[1], [0], [0], [1], [0, 0, 1, 1], [], []>} : vector<8x128xf32>, vector<128x64xf32>, vector<8x64xf32> -> vector<8x64xf32>
    %cst_288 = arith.constant dense<0.000000e+00> : vector<32x64xf32>
    %275 = tpu.matmul %271, %274, %cst_288 {dimension_numbers = #tpu.dot_dimension_numbers<[1], [0], [0], [1], [0, 0, 1, 1], [], []>} : vector<32x8xf32>, vector<8x64xf32>, vector<32x64xf32> -> vector<32x64xf32>
    %276 = arith.addf %269, %275 : vector<32x64xf32>
    %c7_289 = arith.constant 7 : index
    %c0_290 = arith.constant 0 : index
    %c0_291 = arith.constant 0 : index
    %277 = vector.load %arg15[%c7_289, %c0_290, %c0_291] : memref<9x32x8xf32, #tpu.memory_space<vmem>>, vector<1x32x8xf32>
    %278 = vector.shape_cast %277 : vector<1x32x8xf32> to vector<32x8xf32>
    %c7_292 = arith.constant 7 : index
    %c0_293 = arith.constant 0 : index
    %c0_294 = arith.constant 0 : index
    %279 = vector.load %arg16[%c7_292, %c0_293, %c0_294] : memref<9x128x64xf32, #tpu.memory_space<vmem>>, vector<1x128x64xf32>
    %280 = vector.shape_cast %279 : vector<1x128x64xf32> to vector<128x64xf32>
    %cst_295 = arith.constant dense<0.000000e+00> : vector<8x64xf32>
    %281 = tpu.matmul %226, %280, %cst_295 {dimension_numbers = #tpu.dot_dimension_numbers<[1], [0], [0], [1], [0, 0, 1, 1], [], []>} : vector<8x128xf32>, vector<128x64xf32>, vector<8x64xf32> -> vector<8x64xf32>
    %cst_296 = arith.constant dense<0.000000e+00> : vector<32x64xf32>
    %282 = tpu.matmul %278, %281, %cst_296 {dimension_numbers = #tpu.dot_dimension_numbers<[1], [0], [0], [1], [0, 0, 1, 1], [], []>} : vector<32x8xf32>, vector<8x64xf32>, vector<32x64xf32> -> vector<32x64xf32>
    %283 = arith.addf %276, %282 : vector<32x64xf32>
    %c8_297 = arith.constant 8 : index
    %c0_298 = arith.constant 0 : index
    %c0_299 = arith.constant 0 : index
    %284 = vector.load %arg15[%c8_297, %c0_298, %c0_299] : memref<9x32x8xf32, #tpu.memory_space<vmem>>, vector<1x32x8xf32>
    %285 = vector.shape_cast %284 : vector<1x32x8xf32> to vector<32x8xf32>
    %c8_300 = arith.constant 8 : index
    %c0_301 = arith.constant 0 : index
    %c0_302 = arith.constant 0 : index
    %286 = vector.load %arg16[%c8_300, %c0_301, %c0_302] : memref<9x128x64xf32, #tpu.memory_space<vmem>>, vector<1x128x64xf32>
    %287 = vector.shape_cast %286 : vector<1x128x64xf32> to vector<128x64xf32>
    %cst_303 = arith.constant dense<0.000000e+00> : vector<8x64xf32>
    %288 = tpu.matmul %226, %287, %cst_303 {dimension_numbers = #tpu.dot_dimension_numbers<[1], [0], [0], [1], [0, 0, 1, 1], [], []>} : vector<8x128xf32>, vector<128x64xf32>, vector<8x64xf32> -> vector<8x64xf32>
    %cst_304 = arith.constant dense<0.000000e+00> : vector<32x64xf32>
    %289 = tpu.matmul %285, %288, %cst_304 {dimension_numbers = #tpu.dot_dimension_numbers<[1], [0], [0], [1], [0, 0, 1, 1], [], []>} : vector<32x8xf32>, vector<8x64xf32>, vector<32x64xf32> -> vector<32x64xf32>
    %290 = arith.addf %283, %289 : vector<32x64xf32>
    %c0_305 = arith.constant 0 : index
    %c0_306 = arith.constant 0 : index
    %291 = vector.load %arg17[%c0_305, %c0_306] : memref<1x64xf32, #tpu.memory_space<vmem>>, vector<1x64xf32>
    %292 = vector.broadcast %291 : vector<1x64xf32> to vector<32x64xf32>
    %293 = arith.addf %290, %292 : vector<32x64xf32>
    %cst_307 = arith.constant 0.000000e+00 : f32
    %294 = vector.broadcast %cst_307 : f32 to vector<32x64xf32>
    %295 = arith.maximumf %293, %294 : vector<32x64xf32>
    %cst_308 = arith.constant 0.000000e+00 : f32
    %296 = vector.broadcast %cst_308 : f32 to vector<128x32xf32>
    %c0_309 = arith.constant 0 : index
    %c0_310 = arith.constant 0 : index
    %c0_311 = arith.constant 0 : index
    %297 = vector.load %arg18[%c0_309, %c0_310, %c0_311] : memref<9x128x32xf32, #tpu.memory_space<vmem>>, vector<1x128x32xf32>
    %298 = vector.shape_cast %297 : vector<1x128x32xf32> to vector<128x32xf32>
    %c0_312 = arith.constant 0 : index
    %c0_313 = arith.constant 0 : index
    %c0_314 = arith.constant 0 : index
    %299 = vector.load %arg19[%c0_312, %c0_313, %c0_314] : memref<9x64x32xf32, #tpu.memory_space<vmem>>, vector<1x64x32xf32>
    %300 = vector.shape_cast %299 : vector<1x64x32xf32> to vector<64x32xf32>
    %cst_315 = arith.constant dense<0.000000e+00> : vector<32x32xf32>
    %301 = tpu.matmul %295, %300, %cst_315 {dimension_numbers = #tpu.dot_dimension_numbers<[1], [0], [0], [1], [0, 0, 1, 1], [], []>} : vector<32x64xf32>, vector<64x32xf32>, vector<32x32xf32> -> vector<32x32xf32>
    %cst_316 = arith.constant dense<0.000000e+00> : vector<128x32xf32>
    %302 = tpu.matmul %298, %301, %cst_316 {dimension_numbers = #tpu.dot_dimension_numbers<[1], [0], [0], [1], [0, 0, 1, 1], [], []>} : vector<128x32xf32>, vector<32x32xf32>, vector<128x32xf32> -> vector<128x32xf32>
    %303 = arith.addf %296, %302 : vector<128x32xf32>
    %c1_317 = arith.constant 1 : index
    %c0_318 = arith.constant 0 : index
    %c0_319 = arith.constant 0 : index
    %304 = vector.load %arg18[%c1_317, %c0_318, %c0_319] : memref<9x128x32xf32, #tpu.memory_space<vmem>>, vector<1x128x32xf32>
    %305 = vector.shape_cast %304 : vector<1x128x32xf32> to vector<128x32xf32>
    %c1_320 = arith.constant 1 : index
    %c0_321 = arith.constant 0 : index
    %c0_322 = arith.constant 0 : index
    %306 = vector.load %arg19[%c1_320, %c0_321, %c0_322] : memref<9x64x32xf32, #tpu.memory_space<vmem>>, vector<1x64x32xf32>
    %307 = vector.shape_cast %306 : vector<1x64x32xf32> to vector<64x32xf32>
    %cst_323 = arith.constant dense<0.000000e+00> : vector<32x32xf32>
    %308 = tpu.matmul %295, %307, %cst_323 {dimension_numbers = #tpu.dot_dimension_numbers<[1], [0], [0], [1], [0, 0, 1, 1], [], []>} : vector<32x64xf32>, vector<64x32xf32>, vector<32x32xf32> -> vector<32x32xf32>
    %cst_324 = arith.constant dense<0.000000e+00> : vector<128x32xf32>
    %309 = tpu.matmul %305, %308, %cst_324 {dimension_numbers = #tpu.dot_dimension_numbers<[1], [0], [0], [1], [0, 0, 1, 1], [], []>} : vector<128x32xf32>, vector<32x32xf32>, vector<128x32xf32> -> vector<128x32xf32>
    %310 = arith.addf %303, %309 : vector<128x32xf32>
    %c2_325 = arith.constant 2 : index
    %c0_326 = arith.constant 0 : index
    %c0_327 = arith.constant 0 : index
    %311 = vector.load %arg18[%c2_325, %c0_326, %c0_327] : memref<9x128x32xf32, #tpu.memory_space<vmem>>, vector<1x128x32xf32>
    %312 = vector.shape_cast %311 : vector<1x128x32xf32> to vector<128x32xf32>
    %c2_328 = arith.constant 2 : index
    %c0_329 = arith.constant 0 : index
    %c0_330 = arith.constant 0 : index
    %313 = vector.load %arg19[%c2_328, %c0_329, %c0_330] : memref<9x64x32xf32, #tpu.memory_space<vmem>>, vector<1x64x32xf32>
    %314 = vector.shape_cast %313 : vector<1x64x32xf32> to vector<64x32xf32>
    %cst_331 = arith.constant dense<0.000000e+00> : vector<32x32xf32>
    %315 = tpu.matmul %295, %314, %cst_331 {dimension_numbers = #tpu.dot_dimension_numbers<[1], [0], [0], [1], [0, 0, 1, 1], [], []>} : vector<32x64xf32>, vector<64x32xf32>, vector<32x32xf32> -> vector<32x32xf32>
    %cst_332 = arith.constant dense<0.000000e+00> : vector<128x32xf32>
    %316 = tpu.matmul %312, %315, %cst_332 {dimension_numbers = #tpu.dot_dimension_numbers<[1], [0], [0], [1], [0, 0, 1, 1], [], []>} : vector<128x32xf32>, vector<32x32xf32>, vector<128x32xf32> -> vector<128x32xf32>
    %317 = arith.addf %310, %316 : vector<128x32xf32>
    %c3_333 = arith.constant 3 : index
    %c0_334 = arith.constant 0 : index
    %c0_335 = arith.constant 0 : index
    %318 = vector.load %arg18[%c3_333, %c0_334, %c0_335] : memref<9x128x32xf32, #tpu.memory_space<vmem>>, vector<1x128x32xf32>
    %319 = vector.shape_cast %318 : vector<1x128x32xf32> to vector<128x32xf32>
    %c3_336 = arith.constant 3 : index
    %c0_337 = arith.constant 0 : index
    %c0_338 = arith.constant 0 : index
    %320 = vector.load %arg19[%c3_336, %c0_337, %c0_338] : memref<9x64x32xf32, #tpu.memory_space<vmem>>, vector<1x64x32xf32>
    %321 = vector.shape_cast %320 : vector<1x64x32xf32> to vector<64x32xf32>
    %cst_339 = arith.constant dense<0.000000e+00> : vector<32x32xf32>
    %322 = tpu.matmul %295, %321, %cst_339 {dimension_numbers = #tpu.dot_dimension_numbers<[1], [0], [0], [1], [0, 0, 1, 1], [], []>} : vector<32x64xf32>, vector<64x32xf32>, vector<32x32xf32> -> vector<32x32xf32>
    %cst_340 = arith.constant dense<0.000000e+00> : vector<128x32xf32>
    %323 = tpu.matmul %319, %322, %cst_340 {dimension_numbers = #tpu.dot_dimension_numbers<[1], [0], [0], [1], [0, 0, 1, 1], [], []>} : vector<128x32xf32>, vector<32x32xf32>, vector<128x32xf32> -> vector<128x32xf32>
    %324 = arith.addf %317, %323 : vector<128x32xf32>
    %c4_341 = arith.constant 4 : index
    %c0_342 = arith.constant 0 : index
    %c0_343 = arith.constant 0 : index
    %325 = vector.load %arg18[%c4_341, %c0_342, %c0_343] : memref<9x128x32xf32, #tpu.memory_space<vmem>>, vector<1x128x32xf32>
    %326 = vector.shape_cast %325 : vector<1x128x32xf32> to vector<128x32xf32>
    %c4_344 = arith.constant 4 : index
    %c0_345 = arith.constant 0 : index
    %c0_346 = arith.constant 0 : index
    %327 = vector.load %arg19[%c4_344, %c0_345, %c0_346] : memref<9x64x32xf32, #tpu.memory_space<vmem>>, vector<1x64x32xf32>
    %328 = vector.shape_cast %327 : vector<1x64x32xf32> to vector<64x32xf32>
    %cst_347 = arith.constant dense<0.000000e+00> : vector<32x32xf32>
    %329 = tpu.matmul %295, %328, %cst_347 {dimension_numbers = #tpu.dot_dimension_numbers<[1], [0], [0], [1], [0, 0, 1, 1], [], []>} : vector<32x64xf32>, vector<64x32xf32>, vector<32x32xf32> -> vector<32x32xf32>
    %cst_348 = arith.constant dense<0.000000e+00> : vector<128x32xf32>
    %330 = tpu.matmul %326, %329, %cst_348 {dimension_numbers = #tpu.dot_dimension_numbers<[1], [0], [0], [1], [0, 0, 1, 1], [], []>} : vector<128x32xf32>, vector<32x32xf32>, vector<128x32xf32> -> vector<128x32xf32>
    %331 = arith.addf %324, %330 : vector<128x32xf32>
    %c5_349 = arith.constant 5 : index
    %c0_350 = arith.constant 0 : index
    %c0_351 = arith.constant 0 : index
    %332 = vector.load %arg18[%c5_349, %c0_350, %c0_351] : memref<9x128x32xf32, #tpu.memory_space<vmem>>, vector<1x128x32xf32>
    %333 = vector.shape_cast %332 : vector<1x128x32xf32> to vector<128x32xf32>
    %c5_352 = arith.constant 5 : index
    %c0_353 = arith.constant 0 : index
    %c0_354 = arith.constant 0 : index
    %334 = vector.load %arg19[%c5_352, %c0_353, %c0_354] : memref<9x64x32xf32, #tpu.memory_space<vmem>>, vector<1x64x32xf32>
    %335 = vector.shape_cast %334 : vector<1x64x32xf32> to vector<64x32xf32>
    %cst_355 = arith.constant dense<0.000000e+00> : vector<32x32xf32>
    %336 = tpu.matmul %295, %335, %cst_355 {dimension_numbers = #tpu.dot_dimension_numbers<[1], [0], [0], [1], [0, 0, 1, 1], [], []>} : vector<32x64xf32>, vector<64x32xf32>, vector<32x32xf32> -> vector<32x32xf32>
    %cst_356 = arith.constant dense<0.000000e+00> : vector<128x32xf32>
    %337 = tpu.matmul %333, %336, %cst_356 {dimension_numbers = #tpu.dot_dimension_numbers<[1], [0], [0], [1], [0, 0, 1, 1], [], []>} : vector<128x32xf32>, vector<32x32xf32>, vector<128x32xf32> -> vector<128x32xf32>
    %338 = arith.addf %331, %337 : vector<128x32xf32>
    %c6_357 = arith.constant 6 : index
    %c0_358 = arith.constant 0 : index
    %c0_359 = arith.constant 0 : index
    %339 = vector.load %arg18[%c6_357, %c0_358, %c0_359] : memref<9x128x32xf32, #tpu.memory_space<vmem>>, vector<1x128x32xf32>
    %340 = vector.shape_cast %339 : vector<1x128x32xf32> to vector<128x32xf32>
    %c6_360 = arith.constant 6 : index
    %c0_361 = arith.constant 0 : index
    %c0_362 = arith.constant 0 : index
    %341 = vector.load %arg19[%c6_360, %c0_361, %c0_362] : memref<9x64x32xf32, #tpu.memory_space<vmem>>, vector<1x64x32xf32>
    %342 = vector.shape_cast %341 : vector<1x64x32xf32> to vector<64x32xf32>
    %cst_363 = arith.constant dense<0.000000e+00> : vector<32x32xf32>
    %343 = tpu.matmul %295, %342, %cst_363 {dimension_numbers = #tpu.dot_dimension_numbers<[1], [0], [0], [1], [0, 0, 1, 1], [], []>} : vector<32x64xf32>, vector<64x32xf32>, vector<32x32xf32> -> vector<32x32xf32>
    %cst_364 = arith.constant dense<0.000000e+00> : vector<128x32xf32>
    %344 = tpu.matmul %340, %343, %cst_364 {dimension_numbers = #tpu.dot_dimension_numbers<[1], [0], [0], [1], [0, 0, 1, 1], [], []>} : vector<128x32xf32>, vector<32x32xf32>, vector<128x32xf32> -> vector<128x32xf32>
    %345 = arith.addf %338, %344 : vector<128x32xf32>
    %c7_365 = arith.constant 7 : index
    %c0_366 = arith.constant 0 : index
    %c0_367 = arith.constant 0 : index
    %346 = vector.load %arg18[%c7_365, %c0_366, %c0_367] : memref<9x128x32xf32, #tpu.memory_space<vmem>>, vector<1x128x32xf32>
    %347 = vector.shape_cast %346 : vector<1x128x32xf32> to vector<128x32xf32>
    %c7_368 = arith.constant 7 : index
    %c0_369 = arith.constant 0 : index
    %c0_370 = arith.constant 0 : index
    %348 = vector.load %arg19[%c7_368, %c0_369, %c0_370] : memref<9x64x32xf32, #tpu.memory_space<vmem>>, vector<1x64x32xf32>
    %349 = vector.shape_cast %348 : vector<1x64x32xf32> to vector<64x32xf32>
    %cst_371 = arith.constant dense<0.000000e+00> : vector<32x32xf32>
    %350 = tpu.matmul %295, %349, %cst_371 {dimension_numbers = #tpu.dot_dimension_numbers<[1], [0], [0], [1], [0, 0, 1, 1], [], []>} : vector<32x64xf32>, vector<64x32xf32>, vector<32x32xf32> -> vector<32x32xf32>
    %cst_372 = arith.constant dense<0.000000e+00> : vector<128x32xf32>
    %351 = tpu.matmul %347, %350, %cst_372 {dimension_numbers = #tpu.dot_dimension_numbers<[1], [0], [0], [1], [0, 0, 1, 1], [], []>} : vector<128x32xf32>, vector<32x32xf32>, vector<128x32xf32> -> vector<128x32xf32>
    %352 = arith.addf %345, %351 : vector<128x32xf32>
    %c8_373 = arith.constant 8 : index
    %c0_374 = arith.constant 0 : index
    %c0_375 = arith.constant 0 : index
    %353 = vector.load %arg18[%c8_373, %c0_374, %c0_375] : memref<9x128x32xf32, #tpu.memory_space<vmem>>, vector<1x128x32xf32>
    %354 = vector.shape_cast %353 : vector<1x128x32xf32> to vector<128x32xf32>
    %c8_376 = arith.constant 8 : index
    %c0_377 = arith.constant 0 : index
    %c0_378 = arith.constant 0 : index
    %355 = vector.load %arg19[%c8_376, %c0_377, %c0_378] : memref<9x64x32xf32, #tpu.memory_space<vmem>>, vector<1x64x32xf32>
    %356 = vector.shape_cast %355 : vector<1x64x32xf32> to vector<64x32xf32>
    %cst_379 = arith.constant dense<0.000000e+00> : vector<32x32xf32>
    %357 = tpu.matmul %295, %356, %cst_379 {dimension_numbers = #tpu.dot_dimension_numbers<[1], [0], [0], [1], [0, 0, 1, 1], [], []>} : vector<32x64xf32>, vector<64x32xf32>, vector<32x32xf32> -> vector<32x32xf32>
    %cst_380 = arith.constant dense<0.000000e+00> : vector<128x32xf32>
    %358 = tpu.matmul %354, %357, %cst_380 {dimension_numbers = #tpu.dot_dimension_numbers<[1], [0], [0], [1], [0, 0, 1, 1], [], []>} : vector<128x32xf32>, vector<32x32xf32>, vector<128x32xf32> -> vector<128x32xf32>
    %359 = arith.addf %352, %358 : vector<128x32xf32>
    %c0_381 = arith.constant 0 : index
    %c0_382 = arith.constant 0 : index
    %360 = vector.load %arg20[%c0_381, %c0_382] : memref<1x32xf32, #tpu.memory_space<vmem>>, vector<1x32xf32>
    %361 = vector.broadcast %360 : vector<1x32xf32> to vector<128x32xf32>
    %362 = arith.addf %359, %361 : vector<128x32xf32>
    %cst_383 = arith.constant 0.000000e+00 : f32
    %363 = vector.broadcast %cst_383 : f32 to vector<128x32xf32>
    %364 = arith.maximumf %362, %363 : vector<128x32xf32>
    %cst_384 = arith.constant 0.000000e+00 : f32
    %365 = vector.broadcast %cst_384 : f32 to vector<512x4xf32>
    %c0_385 = arith.constant 0 : index
    %c0_386 = arith.constant 0 : index
    %c0_387 = arith.constant 0 : index
    %366 = vector.load %arg21[%c0_385, %c0_386, %c0_387] : memref<9x512x128xf32, #tpu.memory_space<vmem>>, vector<1x512x128xf32>
    %367 = vector.shape_cast %366 : vector<1x512x128xf32> to vector<512x128xf32>
    %c0_388 = arith.constant 0 : index
    %c0_389 = arith.constant 0 : index
    %c0_390 = arith.constant 0 : index
    %368 = vector.load %arg22[%c0_388, %c0_389, %c0_390] : memref<9x32x4xf32, #tpu.memory_space<vmem>>, vector<1x32x4xf32>
    %369 = vector.shape_cast %368 : vector<1x32x4xf32> to vector<32x4xf32>
    %cst_391 = arith.constant dense<0.000000e+00> : vector<128x4xf32>
    %370 = tpu.matmul %364, %369, %cst_391 {dimension_numbers = #tpu.dot_dimension_numbers<[1], [0], [0], [1], [0, 0, 1, 1], [], []>} : vector<128x32xf32>, vector<32x4xf32>, vector<128x4xf32> -> vector<128x4xf32>
    %cst_392 = arith.constant dense<0.000000e+00> : vector<512x4xf32>
    %371 = tpu.matmul %367, %370, %cst_392 {dimension_numbers = #tpu.dot_dimension_numbers<[1], [0], [0], [1], [0, 0, 1, 1], [], []>} : vector<512x128xf32>, vector<128x4xf32>, vector<512x4xf32> -> vector<512x4xf32>
    %372 = arith.addf %365, %371 : vector<512x4xf32>
    %c1_393 = arith.constant 1 : index
    %c0_394 = arith.constant 0 : index
    %c0_395 = arith.constant 0 : index
    %373 = vector.load %arg21[%c1_393, %c0_394, %c0_395] : memref<9x512x128xf32, #tpu.memory_space<vmem>>, vector<1x512x128xf32>
    %374 = vector.shape_cast %373 : vector<1x512x128xf32> to vector<512x128xf32>
    %c1_396 = arith.constant 1 : index
    %c0_397 = arith.constant 0 : index
    %c0_398 = arith.constant 0 : index
    %375 = vector.load %arg22[%c1_396, %c0_397, %c0_398] : memref<9x32x4xf32, #tpu.memory_space<vmem>>, vector<1x32x4xf32>
    %376 = vector.shape_cast %375 : vector<1x32x4xf32> to vector<32x4xf32>
    %cst_399 = arith.constant dense<0.000000e+00> : vector<128x4xf32>
    %377 = tpu.matmul %364, %376, %cst_399 {dimension_numbers = #tpu.dot_dimension_numbers<[1], [0], [0], [1], [0, 0, 1, 1], [], []>} : vector<128x32xf32>, vector<32x4xf32>, vector<128x4xf32> -> vector<128x4xf32>
    %cst_400 = arith.constant dense<0.000000e+00> : vector<512x4xf32>
    %378 = tpu.matmul %374, %377, %cst_400 {dimension_numbers = #tpu.dot_dimension_numbers<[1], [0], [0], [1], [0, 0, 1, 1], [], []>} : vector<512x128xf32>, vector<128x4xf32>, vector<512x4xf32> -> vector<512x4xf32>
    %379 = arith.addf %372, %378 : vector<512x4xf32>
    %c2_401 = arith.constant 2 : index
    %c0_402 = arith.constant 0 : index
    %c0_403 = arith.constant 0 : index
    %380 = vector.load %arg21[%c2_401, %c0_402, %c0_403] : memref<9x512x128xf32, #tpu.memory_space<vmem>>, vector<1x512x128xf32>
    %381 = vector.shape_cast %380 : vector<1x512x128xf32> to vector<512x128xf32>
    %c2_404 = arith.constant 2 : index
    %c0_405 = arith.constant 0 : index
    %c0_406 = arith.constant 0 : index
    %382 = vector.load %arg22[%c2_404, %c0_405, %c0_406] : memref<9x32x4xf32, #tpu.memory_space<vmem>>, vector<1x32x4xf32>
    %383 = vector.shape_cast %382 : vector<1x32x4xf32> to vector<32x4xf32>
    %cst_407 = arith.constant dense<0.000000e+00> : vector<128x4xf32>
    %384 = tpu.matmul %364, %383, %cst_407 {dimension_numbers = #tpu.dot_dimension_numbers<[1], [0], [0], [1], [0, 0, 1, 1], [], []>} : vector<128x32xf32>, vector<32x4xf32>, vector<128x4xf32> -> vector<128x4xf32>
    %cst_408 = arith.constant dense<0.000000e+00> : vector<512x4xf32>
    %385 = tpu.matmul %381, %384, %cst_408 {dimension_numbers = #tpu.dot_dimension_numbers<[1], [0], [0], [1], [0, 0, 1, 1], [], []>} : vector<512x128xf32>, vector<128x4xf32>, vector<512x4xf32> -> vector<512x4xf32>
    %386 = arith.addf %379, %385 : vector<512x4xf32>
    %c3_409 = arith.constant 3 : index
    %c0_410 = arith.constant 0 : index
    %c0_411 = arith.constant 0 : index
    %387 = vector.load %arg21[%c3_409, %c0_410, %c0_411] : memref<9x512x128xf32, #tpu.memory_space<vmem>>, vector<1x512x128xf32>
    %388 = vector.shape_cast %387 : vector<1x512x128xf32> to vector<512x128xf32>
    %c3_412 = arith.constant 3 : index
    %c0_413 = arith.constant 0 : index
    %c0_414 = arith.constant 0 : index
    %389 = vector.load %arg22[%c3_412, %c0_413, %c0_414] : memref<9x32x4xf32, #tpu.memory_space<vmem>>, vector<1x32x4xf32>
    %390 = vector.shape_cast %389 : vector<1x32x4xf32> to vector<32x4xf32>
    %cst_415 = arith.constant dense<0.000000e+00> : vector<128x4xf32>
    %391 = tpu.matmul %364, %390, %cst_415 {dimension_numbers = #tpu.dot_dimension_numbers<[1], [0], [0], [1], [0, 0, 1, 1], [], []>} : vector<128x32xf32>, vector<32x4xf32>, vector<128x4xf32> -> vector<128x4xf32>
    %cst_416 = arith.constant dense<0.000000e+00> : vector<512x4xf32>
    %392 = tpu.matmul %388, %391, %cst_416 {dimension_numbers = #tpu.dot_dimension_numbers<[1], [0], [0], [1], [0, 0, 1, 1], [], []>} : vector<512x128xf32>, vector<128x4xf32>, vector<512x4xf32> -> vector<512x4xf32>
    %393 = arith.addf %386, %392 : vector<512x4xf32>
    %c4_417 = arith.constant 4 : index
    %c0_418 = arith.constant 0 : index
    %c0_419 = arith.constant 0 : index
    %394 = vector.load %arg21[%c4_417, %c0_418, %c0_419] : memref<9x512x128xf32, #tpu.memory_space<vmem>>, vector<1x512x128xf32>
    %395 = vector.shape_cast %394 : vector<1x512x128xf32> to vector<512x128xf32>
    %c4_420 = arith.constant 4 : index
    %c0_421 = arith.constant 0 : index
    %c0_422 = arith.constant 0 : index
    %396 = vector.load %arg22[%c4_420, %c0_421, %c0_422] : memref<9x32x4xf32, #tpu.memory_space<vmem>>, vector<1x32x4xf32>
    %397 = vector.shape_cast %396 : vector<1x32x4xf32> to vector<32x4xf32>
    %cst_423 = arith.constant dense<0.000000e+00> : vector<128x4xf32>
    %398 = tpu.matmul %364, %397, %cst_423 {dimension_numbers = #tpu.dot_dimension_numbers<[1], [0], [0], [1], [0, 0, 1, 1], [], []>} : vector<128x32xf32>, vector<32x4xf32>, vector<128x4xf32> -> vector<128x4xf32>
    %cst_424 = arith.constant dense<0.000000e+00> : vector<512x4xf32>
    %399 = tpu.matmul %395, %398, %cst_424 {dimension_numbers = #tpu.dot_dimension_numbers<[1], [0], [0], [1], [0, 0, 1, 1], [], []>} : vector<512x128xf32>, vector<128x4xf32>, vector<512x4xf32> -> vector<512x4xf32>
    %400 = arith.addf %393, %399 : vector<512x4xf32>
    %c5_425 = arith.constant 5 : index
    %c0_426 = arith.constant 0 : index
    %c0_427 = arith.constant 0 : index
    %401 = vector.load %arg21[%c5_425, %c0_426, %c0_427] : memref<9x512x128xf32, #tpu.memory_space<vmem>>, vector<1x512x128xf32>
    %402 = vector.shape_cast %401 : vector<1x512x128xf32> to vector<512x128xf32>
    %c5_428 = arith.constant 5 : index
    %c0_429 = arith.constant 0 : index
    %c0_430 = arith.constant 0 : index
    %403 = vector.load %arg22[%c5_428, %c0_429, %c0_430] : memref<9x32x4xf32, #tpu.memory_space<vmem>>, vector<1x32x4xf32>
    %404 = vector.shape_cast %403 : vector<1x32x4xf32> to vector<32x4xf32>
    %cst_431 = arith.constant dense<0.000000e+00> : vector<128x4xf32>
    %405 = tpu.matmul %364, %404, %cst_431 {dimension_numbers = #tpu.dot_dimension_numbers<[1], [0], [0], [1], [0, 0, 1, 1], [], []>} : vector<128x32xf32>, vector<32x4xf32>, vector<128x4xf32> -> vector<128x4xf32>
    %cst_432 = arith.constant dense<0.000000e+00> : vector<512x4xf32>
    %406 = tpu.matmul %402, %405, %cst_432 {dimension_numbers = #tpu.dot_dimension_numbers<[1], [0], [0], [1], [0, 0, 1, 1], [], []>} : vector<512x128xf32>, vector<128x4xf32>, vector<512x4xf32> -> vector<512x4xf32>
    %407 = arith.addf %400, %406 : vector<512x4xf32>
    %c6_433 = arith.constant 6 : index
    %c0_434 = arith.constant 0 : index
    %c0_435 = arith.constant 0 : index
    %408 = vector.load %arg21[%c6_433, %c0_434, %c0_435] : memref<9x512x128xf32, #tpu.memory_space<vmem>>, vector<1x512x128xf32>
    %409 = vector.shape_cast %408 : vector<1x512x128xf32> to vector<512x128xf32>
    %c6_436 = arith.constant 6 : index
    %c0_437 = arith.constant 0 : index
    %c0_438 = arith.constant 0 : index
    %410 = vector.load %arg22[%c6_436, %c0_437, %c0_438] : memref<9x32x4xf32, #tpu.memory_space<vmem>>, vector<1x32x4xf32>
    %411 = vector.shape_cast %410 : vector<1x32x4xf32> to vector<32x4xf32>
    %cst_439 = arith.constant dense<0.000000e+00> : vector<128x4xf32>
    %412 = tpu.matmul %364, %411, %cst_439 {dimension_numbers = #tpu.dot_dimension_numbers<[1], [0], [0], [1], [0, 0, 1, 1], [], []>} : vector<128x32xf32>, vector<32x4xf32>, vector<128x4xf32> -> vector<128x4xf32>
    %cst_440 = arith.constant dense<0.000000e+00> : vector<512x4xf32>
    %413 = tpu.matmul %409, %412, %cst_440 {dimension_numbers = #tpu.dot_dimension_numbers<[1], [0], [0], [1], [0, 0, 1, 1], [], []>} : vector<512x128xf32>, vector<128x4xf32>, vector<512x4xf32> -> vector<512x4xf32>
    %414 = arith.addf %407, %413 : vector<512x4xf32>
    %c7_441 = arith.constant 7 : index
    %c0_442 = arith.constant 0 : index
    %c0_443 = arith.constant 0 : index
    %415 = vector.load %arg21[%c7_441, %c0_442, %c0_443] : memref<9x512x128xf32, #tpu.memory_space<vmem>>, vector<1x512x128xf32>
    %416 = vector.shape_cast %415 : vector<1x512x128xf32> to vector<512x128xf32>
    %c7_444 = arith.constant 7 : index
    %c0_445 = arith.constant 0 : index
    %c0_446 = arith.constant 0 : index
    %417 = vector.load %arg22[%c7_444, %c0_445, %c0_446] : memref<9x32x4xf32, #tpu.memory_space<vmem>>, vector<1x32x4xf32>
    %418 = vector.shape_cast %417 : vector<1x32x4xf32> to vector<32x4xf32>
    %cst_447 = arith.constant dense<0.000000e+00> : vector<128x4xf32>
    %419 = tpu.matmul %364, %418, %cst_447 {dimension_numbers = #tpu.dot_dimension_numbers<[1], [0], [0], [1], [0, 0, 1, 1], [], []>} : vector<128x32xf32>, vector<32x4xf32>, vector<128x4xf32> -> vector<128x4xf32>
    %cst_448 = arith.constant dense<0.000000e+00> : vector<512x4xf32>
    %420 = tpu.matmul %416, %419, %cst_448 {dimension_numbers = #tpu.dot_dimension_numbers<[1], [0], [0], [1], [0, 0, 1, 1], [], []>} : vector<512x128xf32>, vector<128x4xf32>, vector<512x4xf32> -> vector<512x4xf32>
    %421 = arith.addf %414, %420 : vector<512x4xf32>
    %c8_449 = arith.constant 8 : index
    %c0_450 = arith.constant 0 : index
    %c0_451 = arith.constant 0 : index
    %422 = vector.load %arg21[%c8_449, %c0_450, %c0_451] : memref<9x512x128xf32, #tpu.memory_space<vmem>>, vector<1x512x128xf32>
    %423 = vector.shape_cast %422 : vector<1x512x128xf32> to vector<512x128xf32>
    %c8_452 = arith.constant 8 : index
    %c0_453 = arith.constant 0 : index
    %c0_454 = arith.constant 0 : index
    %424 = vector.load %arg22[%c8_452, %c0_453, %c0_454] : memref<9x32x4xf32, #tpu.memory_space<vmem>>, vector<1x32x4xf32>
    %425 = vector.shape_cast %424 : vector<1x32x4xf32> to vector<32x4xf32>
    %cst_455 = arith.constant dense<0.000000e+00> : vector<128x4xf32>
    %426 = tpu.matmul %364, %425, %cst_455 {dimension_numbers = #tpu.dot_dimension_numbers<[1], [0], [0], [1], [0, 0, 1, 1], [], []>} : vector<128x32xf32>, vector<32x4xf32>, vector<128x4xf32> -> vector<128x4xf32>
    %cst_456 = arith.constant dense<0.000000e+00> : vector<512x4xf32>
    %427 = tpu.matmul %423, %426, %cst_456 {dimension_numbers = #tpu.dot_dimension_numbers<[1], [0], [0], [1], [0, 0, 1, 1], [], []>} : vector<512x128xf32>, vector<128x4xf32>, vector<512x4xf32> -> vector<512x4xf32>
    %428 = arith.addf %421, %427 : vector<512x4xf32>
    %c0_457 = arith.constant 0 : index
    %c0_458 = arith.constant 0 : index
    %429 = vector.load %arg23[%c0_457, %c0_458] : memref<1x4xf32, #tpu.memory_space<vmem>>, vector<1x4xf32>
    %430 = vector.broadcast %429 : vector<1x4xf32> to vector<512x4xf32>
    %431 = arith.addf %428, %430 : vector<512x4xf32>
    %cst_459 = arith.constant 0.000000e+00 : f32
    %432 = vector.broadcast %cst_459 : f32 to vector<512x4xf32>
    %433 = arith.maximumf %431, %432 : vector<512x4xf32>
    %c0_460 = arith.constant 0 : index
    %c0_461 = arith.constant 0 : index
    %434 = vector.load %arg24[%c0_460, %c0_461] : memref<4x4xf32, #tpu.memory_space<vmem>>, vector<4x4xf32>
    %cst_462 = arith.constant dense<0.000000e+00> : vector<512x4xf32>
    %435 = tpu.matmul %433, %434, %cst_462 {dimension_numbers = #tpu.dot_dimension_numbers<[1], [0], [0], [1], [0, 0, 1, 1], [], []>} : vector<512x4xf32>, vector<4x4xf32>, vector<512x4xf32> -> vector<512x4xf32>
    %c0_463 = arith.constant 0 : index
    %c0_464 = arith.constant 0 : index
    %436 = vector.load %arg25[%c0_463, %c0_464] : memref<1x4xf32, #tpu.memory_space<vmem>>, vector<1x4xf32>
    %437 = vector.broadcast %436 : vector<1x4xf32> to vector<512x4xf32>
    %438 = arith.addf %435, %437 : vector<512x4xf32>
    %cst_465 = arith.constant 0.000000e+00 : f32
    %439 = vector.broadcast %cst_465 : f32 to vector<512x4xf32>
    %440 = arith.subf %439, %438 : vector<512x4xf32>
    %441 = math.exp %440 : vector<512x4xf32>
    %cst_466 = arith.constant 1.000000e+00 : f32
    %442 = vector.broadcast %cst_466 : f32 to vector<512x4xf32>
    %443 = arith.addf %442, %441 : vector<512x4xf32>
    %cst_467 = arith.constant 1.000000e+00 : f32
    %444 = vector.broadcast %cst_467 : f32 to vector<512x4xf32>
    %445 = arith.divf %444, %443 : vector<512x4xf32>
    %c0_468 = arith.constant 0 : index
    %c0_469 = arith.constant 0 : index
    %446 = vector.load %arg26[%c0_468, %c0_469] : memref<512x4xf32, #tpu.memory_space<vmem>>, vector<512x4xf32>
    tpu.vector_store %arg26[%c0_468, %c0_469], %445 {strides = array<i32>} : memref<512x4xf32, #tpu.memory_space<vmem>>, vector<512x4xf32>,
    return
  }
}

</mosaic_0001>

<bundles_post_ra>
// kernel: autoencoder_forward.1
= control target key start
LH: loop header
LB: loop body
LE: loop exit
PB: predicated region body
PF: predicated region fallthrough
CT: control target
= control target key end

     0   :  { %vm111_vm0 = vcmask 293888   ;;  %vm160_vm1 = vcmask 1043456   ;;  %vm513_vm2 = vcmask 261120   ;;  %vm25954_vm3 = vmmov 0   ;;  %s31971_s1 = inlined_call_operand.vmem [shape: f32[36,32], index: 1, kind: input, shape index: {}]   ;;  %s31972_s0 = inlined_call_operand.vmem [shape: f32[128,36], index: 0, kind: input, shape index: {}]   ;;  %s31973_s3 = inlined_call_operand.vmem [shape: f32[9,32,128], index: 3, kind: input, shape index: {}]   ;;  %s31974_s2 = inlined_call_operand.vmem [shape: f32[1,32], index: 2, kind: input, shape index: {}]   ;;  %s31975_s4 = inlined_call_operand.vmem [shape: f32[9,32,64], index: 4, kind: input, shape index: {}]   ;;  %s31976_s7 = inlined_call_operand.vmem [shape: f32[9,64,128], index: 7, kind: input, shape index: {}]   ;;  %s31977_s5 = inlined_call_operand.vmem [shape: f32[1,64], index: 5, kind: input, shape index: {}]   ;;  %s31978_s6 = inlined_call_operand.vmem [shape: f32[9,8,32], index: 6, kind: input, shape index: {}]   ;;  %s31979_s10 = inlined_call_operand.vmem [shape: f32[4,128,32], index: 10, kind: input, shape index: {}]   ;;  %s31980_s8 = inlined_call_operand.vmem [shape: f32[1,128], index: 8, kind: input, shape index: {}]   ;;  %s31981_s9 = inlined_call_operand.vmem [shape: f32[4,2,8], index: 9, kind: input, shape index: {}]   ;;  %s31982_s13 = inlined_call_operand.vmem [shape: f32[4,32,128], index: 13, kind: input, shape index: {}]   ;;  %s31983_s11 = inlined_call_operand.vmem [shape: f32[1,32], index: 11, kind: input, shape index: {}]   ;;  %s31984_s14 = inlined_call_operand.vmem [shape: f32[4,1,128], index: 14, kind: input, shape index: {}]   ;;  %s31985_s12 = inlined_call_operand.vmem [shape: f32[4,8,2], index: 12, kind: input, shape index: {}]   ;;  %s31986_s16 = inlined_call_operand.vmem [shape: f32[9,128,64], index: 16, kind: input, shape index: {}]   ;;  %s31987_s15 = inlined_call_operand.vmem [shape: f32[9,32,8], index: 15, kind: input, shape index: {}]   ;;  %s31988_s19 = inlined_call_operand.vmem [shape: f32[9,64,32], index: 19, kind: input, shape index: {}]   ;;  %s31989_s17 = inlined_call_operand.vmem [shape: f32[1,64], index: 17, kind: input, shape index: {}]   ;;  %s31990_s18 = inlined_call_operand.vmem [shape: f32[9,128,32], index: 18, kind: input, shape index: {}]   ;;  %s31991_s22 = inlined_call_operand.vmem [shape: f32[9,32,4], index: 22, kind: input, shape index: {}]   ;;  %s31992_s20 = inlined_call_operand.vmem [shape: f32[1,32], index: 20, kind: input, shape index: {}]   ;;  %s31993_s21 = inlined_call_operand.vmem [shape: f32[9,512,128], index: 21, kind: input, shape index: {}]   ;;  %s31994_s24 = inlined_call_operand.vmem [shape: f32[4,4], index: 24, kind: input, shape index: {}]   ;;  %s31995_s23 = inlined_call_operand.vmem [shape: f32[1,4], index: 23, kind: input, shape index: {}]   ;;  %s31996_s25 = inlined_call_operand.vmem [shape: f32[1,4], index: 25, kind: input, shape index: {}]   ;;  %s31997_s26 = inlined_call_operand.vmem [shape: f32[512,4], index: 26, kind: output, shape index: {}]  }
   0x1   :  { %32006 = sst [smem:[#allocation35_spill]] %s31971_s1  ;;  %vm2261_vm4 = vcmask 523264   ;;  %vm3524_vm5 = vcmask 64512   ;;  %vm4355_vm6 = vcmask 1041408   ;;  %vm4351_vm7 = vcmask 15360  }
   0x2   :  { %32007 = sst [smem:[#allocation36_spill]] %s31972_s0  ;;  %vm15506_vm8 = vcmask 31744  }
   0x3   :  { %32008 = sst [smem:[#allocation37_spill]] %s31973_s3 }
   0x4   :  { %32009 = sst [smem:[#allocation38_spill]] %s31974_s2 }
   0x5   :  { %32010 = sst [smem:[#allocation39_spill]] %s31975_s4 }
   0x6   :  { %32011 = sst [smem:[#allocation40_spill]] %s31976_s7  ;;  %s32018_s7 = sld [smem:[#allocation36_spill]] }
   0x7   :  { %32012 = sst [smem:[#allocation41_spill]] %s31977_s5  ;;  %s32021_s28 = sld [smem:[#allocation39_spill]] }
   0x8   :  { %32013 = sst [smem:[#allocation42_spill]] %s31978_s6  ;;  %s32017_s6 = sld [smem:[#allocation35_spill]] }
   0x9   :  { %32014 = sst [smem:[#allocation43_spill]] %s31979_s10  ;;  %s32019_s10 = sld [smem:[#allocation37_spill]] }
   0xa   :  { %32015 = sst [smem:[#allocation44_spill]] %s31980_s8  ;;  %s32020_s8 = sld [smem:[#allocation38_spill]] }
   0xb   :  { %32016 = sst [smem:[#allocation45_spill]] %s31981_s9  ;;  %s32022_s29 = sld [smem:[#allocation40_spill]] }
   0xc   :  { %v83_v5 = vld [vmem:[%s32018_s7] sm:$0xff]  ;;  %v84_v8 = vld [vmem:[%s32018_s7 + $0x8] sm:$0xff]  ;;  %v85_v9 = vld [vmem:[%s32018_s7 + $0x10] sm:$0xff]  ;;  %s32024_s9 = sld [smem:[#allocation42_spill]]  ;;  %s32027_s1 = sld [smem:[#allocation45_spill]] }
   0xd   :  { %20128 = vmatprep.mubr.msk.f32.mxu0 %vm111_vm0, %v83_v5  ;;  %v86_v10 = vld [vmem:[%s32018_s7 + $0x18] sm:$0xff]  ;;  %v87_v11 = vld [vmem:[%s32018_s7 + $0x20] sm:$0xff]  ;;  %v88_v12 = vld [vmem:[%s32018_s7 + $0x28] sm:$0xff] }
   0xe   :  { %v99_v0 = vld [vmem:[%s32017_s6] sm:$0xff]  ;;  %v100_v1 = vld [vmem:[%s32017_s6 + $0x8] sm:$0xff]  ;;  %v101_v2 = vld [vmem:[%s32017_s6 + $0x10] sm:$0xff] }
   0xf   :  { %v23525_v3 = vpack.c.bf16 %v100_v1, %v99_v0  ;;  %v102_v4 = vld [vmem:[%s32017_s6 + $0x18] sm:$0xff]  ;;  %v103_v7 = vld [vmem:[%s32017_s6 + $0x20] sm:$0xf]  ;;  %v89_v13 = vld [vmem:[%s32018_s7 + $0x30] sm:$0xff] }
  0x10   :  { %v23529_v6 = vpack.c.bf16 %v102_v4, %v101_v2  ;;  %v90_v14 = vld [vmem:[%s32018_s7 + $0x38] sm:$0xff]  ;;  %v91_v15 = vld [vmem:[%s32018_s7 + $0x40] sm:$0xff]  ;;  %v92_v16 = vld [vmem:[%s32018_s7 + $0x48] sm:$0xff] }
  0x11   :  { %23526 = vmatprep.subr.bf16.mxu0 %v23525_v3  ;;  %v93_v17 = vld [vmem:[%s32018_s7 + $0x50] sm:$0xff]  ;;  %v94_v18 = vld [vmem:[%s32018_s7 + $0x58] sm:$0xff]  ;;  %v95_v19 = vld [vmem:[%s32018_s7 + $0x60] sm:$0xff] }
  0x12   :  { %23528 = vmatpush3.bf16.msra.mxu0 %v23525_v3  ;;  %v96_v20 = vld [vmem:[%s32018_s7 + $0x68] sm:$0xff]  ;;  %v97_v21 = vld [vmem:[%s32018_s7 + $0x70] sm:$0xff]  ;;  %v98_v22 = vld [vmem:[%s32018_s7 + $0x78] sm:$0xff]  ;;  %s32023_s7 = sld [smem:[#allocation41_spill]] }
  0x13   :  { %23530 = vmatprep.subr.bf16.mxu0 %v23529_v6  ;;  %v16557_v23 = vld [vmem:[%s32019_s10 + $0x20] sm:$0xff] }
  0x14   :  { %v325_v24 = vld [vmem:[%s32019_s10] sm:$0xff] }
  0x15   :  { %20184 = vmatprep.mubr.f32.mxu1 %v325_v24  ;;  %v26181_v25 = vld [vmem:[%s32020_s8] ss:$0 sm:$0xff] }
  0x16   :  { %23532 = vmatpush3.bf16.msra.mxu0 %v23529_v6 }
  0x17   :  { %20126 = vmatprep.subr.msk.mxu0 %vm160_vm1, %v103_v7 }
  0x1a   :  { %20127 = vmatpush3.msk.msra.mxu0 %vm160_vm1, %v103_v7 }
  0x1b   :  { %20129 = vmatmul.mubr.msk.f32.vlgmr.msra.gmra.mrb[0].mxu0 %vm111_vm0, %v84_v8 }
  0x1c   :  { %20131 = vmatprep.mubr.msk.f32.mxu0 %vm111_vm0, %v85_v9 }
  0x1f   :  { %20132 = vmatmul.mubr.msk.f32.gmra.mrb[2].mxu0 %vm111_vm0, %v86_v10 }
  0x20   :  { %20134 = vmatprep.mubr.msk.f32.mxu0 %vm111_vm0, %v87_v11 }
  0x23   :  { %20135 = vmatmul.mubr.msk.f32.gmra.mrb[4].mxu0 %vm111_vm0, %v88_v12 }
  0x24   :  { %20137 = vmatprep.mubr.msk.f32.mxu0 %vm111_vm0, %v89_v13 }
  0x27   :  { %20138 = vmatmul.mubr.msk.f32.gmra.mrb[6].mxu0 %vm111_vm0, %v90_v14 }
  0x28   :  { %20140 = vmatprep.mubr.msk.f32.mxu0 %vm111_vm0, %v91_v15 }
  0x2b   :  { %20141 = vmatmul.mubr.msk.f32.gmra.mrb[8].mxu0 %vm111_vm0, %v92_v16 }
  0x2c   :  { %20143 = vmatprep.mubr.msk.f32.mxu0 %vm111_vm0, %v93_v17 }
  0x2f   :  { %20144 = vmatmul.mubr.msk.f32.gmra.mrb[10].mxu0 %vm111_vm0, %v94_v18  ;;  %v16558_v18 = vld [vmem:[%s32019_s10 + $0x28] sm:$0xff] }
  0x30   :  { %20146 = vmatprep.mubr.msk.f32.mxu0 %vm111_vm0, %v95_v19  ;;  %v326_v19 = vld [vmem:[%s32019_s10 + $0x8] sm:$0xff] }
  0x33   :  { %20147 = vmatmul.mubr.msk.f32.gmra.mrb[12].mxu0 %vm111_vm0, %v96_v20  ;;  %v16559_v20 = vld [vmem:[%s32019_s10 + $0x30] sm:$0xff] }
  0x34   :  { %20149 = vmatprep.mubr.msk.f32.mxu0 %vm111_vm0, %v97_v21  ;;  %v16561_v21 = vld [vmem:[%s32021_s28 + $0x20] sm:$0xff] }
  0x37   :  { %20150 = vmatmul.mubr.msk.f32.gmra.mrb[14].mxu0 %vm111_vm0, %v98_v22  ;;  %v16562_v22 = vld [vmem:[%s32021_s28 + $0x28] sm:$0xff] }
  0x38   :  { %20222 = vmatprep.mubr.f32.mxu0 %v16557_v23  ;;  %v327_v23 = vld [vmem:[%s32019_s10 + $0x10] sm:$0xff]  ;;  %v23597_v24 = vpack.c.bf16 %v16562_v22, %v16561_v21 }
  0xee   :  { %v20130_v26 = vpop.f32.mrb[0].mxu0 }
  0xef   :  { %v236_v27 = vadd.f32 %v20130_v26, %v26181_v25  ;;  %v230_v28 = vpop.f32.mrb[1].mxu0  ;;  %v16564_v26 = vld [vmem:[%s32021_s28 + $0x38] sm:$0xff] }
  0xf0   :  { %v231_v29 = vadd.f32 %v26181_v25, %v230_v28  ;;  %v328_v28 = vld [vmem:[%s32019_s10 + $0x18] sm:$0xff] }
  0xf1   :  { %v310_v30 = vmax.f32 %v236_v27, 0.0  ;;  %v16560_v27 = vld [vmem:[%s32019_s10 + $0x38] sm:$0xff] }
  0xf2   :  { %v309_v31 = vmax.f32 %v231_v29, 0.0  ;;  %v20133_v32 = vpop.f32.mrb[2].mxu0  ;;  %v16573_v29 = vld [vmem:[%s32019_s10 + $0x40] sm:$0xff] }
  0xf3   :  { %v246_v33 = vadd.f32 %v20133_v32, %v26181_v25  ;;  %v240_v34 = vpop.f32.mrb[3].mxu0  ;;  %v16575_v32 = vld [vmem:[%s32019_s10 + $0x50] sm:$0xff] }
  0xf4   :  { %v26186_v35 = vpack.c.bf16 %v310_v30, %v309_v31  ;;  %v241_v36 = vadd.f32 %v26181_v25, %v240_v34  ;;  %v16574_v31 = vld [vmem:[%s32019_s10 + $0x48] sm:$0xff]  ;;  %v16597_v34 = vld [vmem:[%s32019_s10 + $0x80] sm:$0xff] }
  0xf5   :  { %v312_v37 = vmax.f32 %v246_v33, 0.0  ;;  %v16576_v33 = vld [vmem:[%s32019_s10 + $0x58] sm:$0xff] }
  0xf6   :  { %v311_v38 = vmax.f32 %v241_v36, 0.0  ;;  %v20136_v39 = vpop.f32.mrb[4].mxu0  ;;  %23534 = vmatprep.subr.bf16.mxu1 %v26186_v35  ;;  %23566 = vmatprep.subr.bf16.mxu0 %v26186_v35  ;;  %v16598_v36 = vld [vmem:[%s32019_s10 + $0x88] sm:$0xff] }
  0xf7   :  { %v256_v40 = vadd.f32 %v20136_v39, %v26181_v25  ;;  %v250_v41 = vpop.f32.mrb[5].mxu0  ;;  %23536 = vmatpush3.bf16.msra.mxu1 %v26186_v35  ;;  %23568 = vmatpush3.bf16.msra.mxu0 %v26186_v35  ;;  %v16621_v39 = vld [vmem:[%s32019_s10 + $0xc0] sm:$0xff] }
  0xf8   :  { %v26194_v42 = vpack.c.bf16 %v312_v37, %v311_v38  ;;  %v251_v43 = vadd.f32 %v26181_v25, %v250_v41  ;;  %v16599_v37 = vld [vmem:[%s32019_s10 + $0x90] sm:$0xff]  ;;  %v16600_v38 = vld [vmem:[%s32019_s10 + $0x98] sm:$0xff]  ;;  %v415_v41 = vld [vmem:[%s32021_s28 + $0x8] sm:$0xff] }
  0xf9   :  { %v314_v44 = vmax.f32 %v256_v40, 0.0  ;;  %v414_v40 = vld [vmem:[%s32021_s28] sm:$0xff] }
  0xfa   :  { %v313_v45 = vmax.f32 %v251_v43, 0.0  ;;  %v20139_v46 = vpop.f32.mrb[6].mxu0  ;;  %23538 = vmatprep.subr.bf16.mxu1 %v26194_v42  ;;  %23570 = vmatprep.subr.bf16.mxu0 %v26194_v42  ;;  %v23605_v43 = vpack.c.bf16 %v415_v41, %v414_v40  ;;  %v16609_v41 = vld [vmem:[%s32019_s10 + $0xa0] sm:$0xff] }
  0xfb   :  { %v266_v47 = vadd.f32 %v20139_v46, %v26181_v25  ;;  %v260_v48 = vpop.f32.mrb[7].mxu0  ;;  %23540 = vmatpush3.bf16.msra.mxu1 %v26194_v42  ;;  %23572 = vmatpush3.bf16.msra.mxu0 %v26194_v42  ;;  %v417_v46 = vld [vmem:[%s32021_s28 + $0x18] sm:$0xff] }
  0xfc   :  { %v26202_v49 = vpack.c.bf16 %v314_v44, %v313_v45  ;;  %v261_v50 = vadd.f32 %v26181_v25, %v260_v48  ;;  %v16622_v44 = vld [vmem:[%s32019_s10 + $0xc8] sm:$0xff]  ;;  %v416_v45 = vld [vmem:[%s32021_s28 + $0x10] sm:$0xff] }
  0xfd   :  { %v316_v51 = vmax.f32 %v266_v47, 0.0 }
  0xfe   :  { %v315_v52 = vmax.f32 %v261_v50, 0.0  ;;  %v20142_v53 = vpop.f32.mrb[8].mxu0  ;;  %23542 = vmatprep.subr.bf16.mxu1 %v26202_v49  ;;  %23574 = vmatprep.subr.bf16.mxu0 %v26202_v49 }
  0xff   :  { %v276_v54 = vadd.f32 %v20142_v53, %v26181_v25  ;;  %v270_v55 = vpop.f32.mrb[9].mxu0  ;;  %23544 = vmatpush3.bf16.msra.mxu1 %v26202_v49  ;;  %23576 = vmatpush3.bf16.msra.mxu0 %v26202_v49  ;;  %v16577_v53 = vld [vmem:[%s32021_s28 + $0x40] sm:$0xff] }
 0x100   :  { %v26210_v56 = vpack.c.bf16 %v316_v51, %v315_v52  ;;  %v271_v57 = vadd.f32 %v26181_v25, %v270_v55  ;;  %v23609_v51 = vpack.c.bf16 %v417_v46, %v416_v45  ;;  %v16615_v46 = vld [vmem:[%s32021_s28 + $0xb0] sm:$0xff] }
 0x101   :  { %v318_v58 = vmax.f32 %v276_v54, 0.0  ;;  %v16578_v54 = vld [vmem:[%s32021_s28 + $0x48] sm:$0xff] }
 0x102   :  { %v317_v59 = vmax.f32 %v271_v57, 0.0  ;;  %v20145_v60 = vpop.f32.mrb[10].mxu0  ;;  %23546 = vmatprep.subr.bf16.mxu1 %v26210_v56  ;;  %23578 = vmatprep.subr.bf16.mxu0 %v26210_v56 }
 0x103   :  { %v286_v61 = vadd.f32 %v20145_v60, %v26181_v25  ;;  %v280_v62 = vpop.f32.mrb[11].mxu0  ;;  %23548 = vmatpush3.bf16.msra.mxu1 %v26210_v56  ;;  %23580 = vmatpush3.bf16.msra.mxu0 %v26210_v56 }
 0x104   :  { %v26218_v63 = vpack.c.bf16 %v318_v58, %v317_v59  ;;  %v281_v0 = vadd.f32 %v26181_v25, %v280_v62  ;;  %v23645_v59 = vpack.c.bf16 %v16578_v54, %v16577_v53  ;;  %v16580_v62 = vld [vmem:[%s32021_s28 + $0x58] sm:$0xff]  ;;  %v16625_v53 = vld [vmem:[%s32021_s28 + $0xc0] sm:$0xff]  ;;  %v16626_v54 = vld [vmem:[%s32021_s28 + $0xc8] sm:$0xff] }
 0x105   :  { %v320_v1 = vmax.f32 %v286_v61, 0.0  ;;  %v16579_v61 = vld [vmem:[%s32021_s28 + $0x50] sm:$0xff] }
 0x106   :  { %v319_v2 = vmax.f32 %v281_v0, 0.0  ;;  %v20148_v3 = vpop.f32.mrb[12].mxu0  ;;  %23550 = vmatprep.subr.bf16.mxu1 %v26218_v63  ;;  %23582 = vmatprep.subr.bf16.mxu0 %v26218_v63  ;;  %v23649_v0 = vpack.c.bf16 %v16580_v62, %v16579_v61 }
 0x107   :  { %v296_v4 = vadd.f32 %v20148_v3, %v26181_v25  ;;  %v290_v5 = vpop.f32.mrb[13].mxu0  ;;  %23552 = vmatpush3.bf16.msra.mxu1 %v26218_v63  ;;  %23584 = vmatpush3.bf16.msra.mxu0 %v26218_v63 }
 0x108   :  { %v26226_v6 = vpack.c.bf16 %v320_v1, %v319_v2  ;;  %v291_v7 = vadd.f32 %v26181_v25, %v290_v5  ;;  %v16585_v5 = vld [vmem:[%s32019_s10 + $0x60] sm:$0xff] }
 0x109   :  { %v322_v8 = vmax.f32 %v296_v4, 0.0 }
 0x10a   :  { %v321_v9 = vmax.f32 %v291_v7, 0.0  ;;  %v20151_v10 = vpop.f32.mrb[14].mxu0  ;;  %23554 = vmatprep.subr.bf16.mxu1 %v26226_v6  ;;  %23586 = vmatprep.subr.bf16.mxu0 %v26226_v6  ;;  %v16589_v7 = vld [vmem:[%s32021_s28 + $0x60] sm:$0xff] }
 0x10b   :  { %v306_v11 = vadd.f32 %v20151_v10, %v26181_v25  ;;  %v300_v12 = vpop.f32.mrb[15].mxu0  ;;  %23556 = vmatpush3.bf16.msra.mxu1 %v26226_v6  ;;  %23588 = vmatpush3.bf16.msra.mxu0 %v26226_v6  ;;  %v16591_v10 = vld [vmem:[%s32021_s28 + $0x70] sm:$0xff] }
 0x10c   :  { %v26234_v13 = vpack.c.bf16 %v322_v8, %v321_v9  ;;  %v301_v14 = vadd.f32 %v26181_v25, %v300_v12  ;;  %v16563_v25 = vld [vmem:[%s32021_s28 + $0x30] sm:$0xff]  ;;  %v16590_v8 = vld [vmem:[%s32021_s28 + $0x68] sm:$0xff] }
 0x10d   :  { %v324_v15 = vmax.f32 %v306_v11, 0.0  ;;  %v23601_v30 = vpack.c.bf16 %v16564_v26, %v16563_v25  ;;  %v23685_v9 = vpack.c.bf16 %v16590_v8, %v16589_v7  ;;  %v16592_v11 = vld [vmem:[%s32021_s28 + $0x78] sm:$0xff]  ;;  %v16586_v12 = vld [vmem:[%s32019_s10 + $0x68] sm:$0xff]  ;;  %v16623_v25 = vld [vmem:[%s32019_s10 + $0xd0] sm:$0xff] }
 0x10e   :  { %v323_v16 = vmax.f32 %v301_v14, 0.0  ;;  %23558 = vmatprep.subr.bf16.mxu1 %v26234_v13  ;;  %23590 = vmatprep.subr.bf16.mxu0 %v26234_v13  ;;  %v16587_v14 = vld [vmem:[%s32019_s10 + $0x70] sm:$0xff]  ;;  %v16624_v26 = vld [vmem:[%s32019_s10 + $0xd8] sm:$0xff]  ;;  %v16638_v7 = vld [vmem:[%s32021_s28 + $0xe8] sm:$0xff] }
 0x10f   :  { %23560 = vmatpush3.bf16.msra.mxu1 %v26234_v13  ;;  %23592 = vmatpush3.bf16.msra.mxu0 %v26234_v13 }
 0x110   :  { %v26241_v17 = vpack.c.bf16 %v324_v15, %v323_v16  ;;  %v23689_v15 = vpack.c.bf16 %v16592_v11, %v16591_v10  ;;  %v16588_v16 = vld [vmem:[%s32019_s10 + $0x78] sm:$0xff]  ;;  %v16639_v11 = vld [vmem:[%s32021_s28 + $0xf0] sm:$0xff] }
 0x112   :  { %23562 = vmatprep.subr.bf16.mxu1 %v26241_v17  ;;  %23594 = vmatprep.subr.bf16.mxu0 %v26241_v17 }
 0x113   :  { %23564 = vmatpush3.bf16.msra.mxu1 %v26241_v17  ;;  %23596 = vmatpush3.bf16.msra.mxu0 %v26241_v17 }
 0x114   :  { %23614 = vmatprep.subr.bf16.mxu0 %v26186_v35  ;;  %23598 = vmatprep.subr.bf16.mxu1 %v23597_v24 }
 0x116   :  { %20223 = vmatmul.mubr.f32.vlgmr.msra.gmra.mrb[16].mxu0 %v16558_v18  ;;  %20185 = vmatmul.mubr.f32.vlgmr.msra.gmra.mrb[0].mxu1 %v326_v19  ;;  %v16601_v18 = vld [vmem:[%s32021_s28 + $0x80] sm:$0xff]  ;;  %v16602_v19 = vld [vmem:[%s32021_s28 + $0x88] sm:$0xff] }
 0x117   :  { %23616 = vmatpush3.bf16.msra.mxu0 %v26186_v35  ;;  %20225 = vmatprep.mubr.f32.mxu0 %v16559_v20  ;;  %v23725_v20 = vpack.c.bf16 %v16602_v19, %v16601_v18  ;;  %v16648_v18 = vld [vmem:[%s32019_s10 + $0x118] sm:$0xff] }
 0x118   :  { %23618 = vmatprep.subr.bf16.mxu0 %v26194_v42  ;;  %20187 = vmatprep.mubr.f32.mxu1 %v327_v23 }
 0x119   :  { %23600 = vmatpush3.bf16.msra.mxu1 %v23597_v24 }
 0x11a   :  { %20226 = vmatmul.mubr.f32.gmra.mrb[18].mxu0 %v16560_v27  ;;  %20188 = vmatmul.mubr.f32.gmra.mrb[2].mxu1 %v328_v28  ;;  %v16633_v27 = vld [vmem:[%s32019_s10 + $0xe0] sm:$0xff] }
 0x11b   :  { %23620 = vmatpush3.bf16.msra.mxu0 %v26194_v42  ;;  %20288 = vmatprep.mubr.f32.mxu0 %v16573_v29 }
 0x11c   :  { %23622 = vmatprep.subr.bf16.mxu0 %v26202_v49  ;;  %23602 = vmatprep.subr.bf16.mxu1 %v23601_v30 }
 0x11d   :  { %23604 = vmatpush3.bf16.msra.mxu1 %v23601_v30  ;;  %v16634_v30 = vld [vmem:[%s32019_s10 + $0xe8] sm:$0xff] }
 0x11e   :  { %23606 = vmatprep.subr.bf16.mxu1 %v23605_v43 }
 0x11f   :  { %23624 = vmatpush3.bf16.msra.mxu0 %v26202_v49 }
 0x120   :  { %23626 = vmatprep.subr.bf16.mxu0 %v26210_v56 }
 0x123   :  { %23628 = vmatpush3.bf16.msra.mxu0 %v26210_v56 }
 0x124   :  { %23630 = vmatprep.subr.bf16.mxu0 %v26218_v63 }
 0x127   :  { %23632 = vmatpush3.bf16.msra.mxu0 %v26218_v63 }
 0x128   :  { %23634 = vmatprep.subr.bf16.mxu0 %v26226_v6 }
 0x12b   :  { %23636 = vmatpush3.bf16.msra.mxu0 %v26226_v6 }
 0x12c   :  { %23638 = vmatprep.subr.bf16.mxu0 %v26234_v13 }
 0x12f   :  { %23640 = vmatpush3.bf16.msra.mxu0 %v26234_v13 }
 0x130   :  { %23642 = vmatprep.subr.bf16.mxu0 %v26241_v17 }
 0x133   :  { %23644 = vmatpush3.bf16.msra.mxu0 %v26241_v17 }
 0x134   :  { %23694 = vmatprep.subr.bf16.mxu0 %v26186_v35 }
 0x136   :  { %20289 = vmatmul.mubr.f32.vlgmr.msra.gmra.mrb[20].mxu0 %v16574_v31  ;;  %v16635_v31 = vld [vmem:[%s32019_s10 + $0xf0] sm:$0xff] }
 0x137   :  { %23696 = vmatpush3.bf16.msra.mxu0 %v26186_v35  ;;  %20291 = vmatprep.mubr.f32.mxu0 %v16575_v32  ;;  %v16636_v32 = vld [vmem:[%s32019_s10 + $0xf8] sm:$0xff] }
 0x138   :  { %23698 = vmatprep.subr.bf16.mxu0 %v26194_v42 }
 0x13a   :  { %20292 = vmatmul.mubr.f32.gmra.mrb[22].mxu0 %v16576_v33  ;;  %v16603_v33 = vld [vmem:[%s32021_s28 + $0x90] sm:$0xff] }
 0x13b   :  { %23700 = vmatpush3.bf16.msra.mxu0 %v26194_v42  ;;  %20392 = vmatprep.mubr.f32.mxu0 %v16597_v34  ;;  %v16604_v34 = vld [vmem:[%s32021_s28 + $0x98] sm:$0xff] }
 0x13c   :  { %23702 = vmatprep.subr.bf16.mxu0 %v26202_v49 }
 0x13f   :  { %23704 = vmatpush3.bf16.msra.mxu0 %v26202_v49 }
 0x140   :  { %23706 = vmatprep.subr.bf16.mxu0 %v26210_v56 }
 0x143   :  { %23708 = vmatpush3.bf16.msra.mxu0 %v26210_v56 }
 0x144   :  { %23710 = vmatprep.subr.bf16.mxu0 %v26218_v63 }
 0x147   :  { %23712 = vmatpush3.bf16.msra.mxu0 %v26218_v63 }
 0x148   :  { %23714 = vmatprep.subr.bf16.mxu0 %v26226_v6 }
 0x14b   :  { %23716 = vmatpush3.bf16.msra.mxu0 %v26226_v6 }
 0x14c   :  { %23718 = vmatprep.subr.bf16.mxu0 %v26234_v13 }
 0x14f   :  { %23720 = vmatpush3.bf16.msra.mxu0 %v26234_v13 }
 0x150   :  { %23722 = vmatprep.subr.bf16.mxu0 %v26241_v17 }
 0x153   :  { %23724 = vmatpush3.bf16.msra.mxu0 %v26241_v17 }
 0x154   :  { %23774 = vmatprep.subr.bf16.mxu0 %v26186_v35 }
 0x156   :  { %20393 = vmatmul.mubr.f32.vlgmr.msra.gmra.mrb[24].mxu0 %v16598_v36 }
 0x157   :  { %23776 = vmatpush3.bf16.msra.mxu0 %v26186_v35  ;;  %20395 = vmatprep.mubr.f32.mxu0 %v16599_v37 }
 0x158   :  { %23778 = vmatprep.subr.bf16.mxu0 %v26194_v42 }
 0x15a   :  { %20396 = vmatmul.mubr.f32.gmra.mrb[26].mxu0 %v16600_v38  ;;  %v23729_v38 = vpack.c.bf16 %v16604_v34, %v16603_v33  ;;  %v2175_v33 = vld [vmem:[%s32022_s29 + $0x30] sm:$0xff]  ;;  %v2176_v34 = vld [vmem:[%s32022_s29 + $0x38] sm:$0xff] }
 0x15b   :  { %23780 = vmatpush3.bf16.msra.mxu0 %v26194_v42  ;;  %20496 = vmatprep.mubr.f32.mxu0 %v16621_v39 }
 0x15c   :  { %23782 = vmatprep.subr.bf16.mxu0 %v26202_v49 }
 0x15f   :  { %23784 = vmatpush3.bf16.msra.mxu0 %v26202_v49 }
 0x160   :  { %23786 = vmatprep.subr.bf16.mxu0 %v26210_v56 }
 0x163   :  { %23788 = vmatpush3.bf16.msra.mxu0 %v26210_v56 }
 0x164   :  { %23790 = vmatprep.subr.bf16.mxu0 %v26218_v63 }
 0x167   :  { %23792 = vmatpush3.bf16.msra.mxu0 %v26218_v63 }
 0x168   :  { %23794 = vmatprep.subr.bf16.mxu0 %v26226_v6 }
 0x16b   :  { %23796 = vmatpush3.bf16.msra.mxu0 %v26226_v6 }
 0x16c   :  { %23798 = vmatprep.subr.bf16.mxu0 %v26234_v13 }
 0x16f   :  { %23800 = vmatpush3.bf16.msra.mxu0 %v26234_v13 }
 0x170   :  { %23802 = vmatprep.subr.bf16.mxu0 %v26241_v17 }
 0x173   :  { %23804 = vmatpush3.bf16.msra.mxu0 %v26241_v17 }
 0x174   :  { %23814 = vmatprep.subr.bf16.mxu0 %v26186_v35 }
 0x176   :  { %20497 = vmatmul.mubr.f32.vlgmr.msra.gmra.mrb[28].mxu0 %v16622_v44  ;;  %v16614_v44 = vld [vmem:[%s32021_s28 + $0xa8] sm:$0xff] }
 0x177   :  { %23816 = vmatpush3.bf16.msra.mxu0 %v26186_v35  ;;  %20499 = vmatprep.mubr.f32.mxu0 %v16623_v25  ;;  %v2170_v25 = vld [vmem:[%s32022_s29 + $0x8] sm:$0xff] }
 0x178   :  { %23818 = vmatprep.subr.bf16.mxu0 %v26194_v42 }
 0x17a   :  { %20500 = vmatmul.mubr.f32.gmra.mrb[30].mxu0 %v16624_v26  ;;  %v2171_v26 = vld [vmem:[%s32022_s29 + $0x10] sm:$0xff] }
 0x17b   :  { %23820 = vmatpush3.bf16.msra.mxu0 %v26194_v42  ;;  %20548 = vmatprep.mubr.f32.mxu0 %v16633_v27 }
 0x17c   :  { %23822 = vmatprep.subr.bf16.mxu0 %v26202_v49 }
 0x17f   :  { %23824 = vmatpush3.bf16.msra.mxu0 %v26202_v49 }
 0x180   :  { %23826 = vmatprep.subr.bf16.mxu0 %v26210_v56 }
 0x183   :  { %23828 = vmatpush3.bf16.msra.mxu0 %v26210_v56 }
 0x184   :  { %23830 = vmatprep.subr.bf16.mxu0 %v26218_v63 }
 0x187   :  { %23832 = vmatpush3.bf16.msra.mxu0 %v26218_v63 }
 0x188   :  { %23834 = vmatprep.subr.bf16.mxu0 %v26226_v6 }
 0x18b   :  { %23836 = vmatpush3.bf16.msra.mxu0 %v26226_v6 }
 0x18c   :  { %23838 = vmatprep.subr.bf16.mxu0 %v26234_v13 }
 0x18f   :  { %23840 = vmatpush3.bf16.msra.mxu0 %v26234_v13 }
 0x190   :  { %23842 = vmatprep.subr.bf16.mxu0 %v26241_v17 }
 0x193   :  { %23844 = vmatpush3.bf16.msra.mxu0 %v26241_v17 }
 0x196   :  { %20549 = vmatmul.mubr.f32.vlgmr.msra.gmra.mrb[32].mxu0 %v16634_v30  ;;  %v2173_v30 = vld [vmem:[%s32022_s29 + $0x20] sm:$0xff] }
 0x197   :  { %20551 = vmatprep.mubr.f32.mxu0 %v16635_v31  ;;  %v2174_v31 = vld [vmem:[%s32022_s29 + $0x28] sm:$0xff] }
 0x19a   :  { %20552 = vmatmul.mubr.f32.gmra.mrb[34].mxu0 %v16636_v32  ;;  %v23924_v32 = vpack.c.bf16 %v2174_v31, %v2173_v30  ;;  %v16679_v30 = vld [vmem:[%s32022_s29 + $0xb0] sm:$0xff]  ;;  %v16680_v31 = vld [vmem:[%s32022_s29 + $0xb8] sm:$0xff] }
 0x1e9   :  { %v20224_v47 = vpop.f32.mrb[16].mxu0  ;;  %v20186_v48 = vpop.f32.mrb[0].mxu1 }
 0x1ea   :  { %v489_v50 = vpop.f32.mrb[17].mxu0  ;;  %v395_v52 = vpop.f32.mrb[1].mxu1 }
 0x1eb   :  { %20236 = vmatprep.mubr.msk.f32.mxu1 %vm513_vm2, %v489_v50  ;;  %v16611_v50 = vld [vmem:[%s32019_s10 + $0xb0] sm:$0xff] }
 0x1ec   :  { %20237 = vmatmul.mubr.msk.f32.vlgmr.msra.gmra.mrb[4].mxu1 %vm513_vm2, %v20224_v47  ;;  %v16616_v47 = vld [vmem:[%s32021_s28 + $0xb8] sm:$0xff] }
 0x1ed   :  { %23608 = vmatpush3.bf16.msra.mxu1 %v23605_v43  ;;  %v20227_v55 = vpop.f32.mrb[18].mxu0  ;;  %v20189_v57 = vpop.f32.mrb[2].mxu1  ;;  %v16613_v43 = vld [vmem:[%s32021_s28 + $0xa0] sm:$0xff] }
 0x1ee   :  { %v499_v58 = vpop.f32.mrb[19].mxu0  ;;  %23610 = vmatprep.subr.bf16.mxu1 %v23609_v51  ;;  %v405_v60 = vpop.f32.mrb[3].mxu1  ;;  %v23765_v45 = vpack.c.bf16 %v16614_v44, %v16613_v43 }
 0x1ef   :  { %20239 = vmatprep.mubr.msk.f32.mxu1 %vm513_vm2, %v499_v58 }
 0x1f0   :  { %20240 = vmatmul.mubr.msk.f32.gmra.mrb[6].mxu1 %vm513_vm2, %v20227_v55  ;;  %v23805_v55 = vpack.c.bf16 %v16626_v54, %v16625_v53  ;;  %v2095_v54 = vld [vmem:[%s32024_s9] sm:$0xff] }
 0x1f1   :  { %23612 = vmatpush3.bf16.msra.mxu1 %v23609_v51  ;;  %20250 = vmatprep.mubr.msk.f32.mxu1 %vm513_vm2, %v395_v52  ;;  %v23769_v51 = vpack.c.bf16 %v16616_v47, %v16615_v46  ;;  %v16612_v52 = vld [vmem:[%s32019_s10 + $0xb8] sm:$0xff] }
 0x1f2   :  { %23646 = vmatprep.subr.bf16.mxu1 %v23645_v59 }
 0x1f4   :  { %20251 = vmatmul.mubr.msk.f32.vlgmr.msra.gmra.mrb[4].mxu1 %vm513_vm2, %v20186_v48  ;;  %v16610_v48 = vld [vmem:[%s32019_s10 + $0xa8] sm:$0xff] }
 0x1f5   :  { %23648 = vmatpush3.bf16.msra.mxu1 %v23645_v59  ;;  %20253 = vmatprep.mubr.msk.f32.mxu1 %vm513_vm2, %v405_v60 }
 0x1f6   :  { %23650 = vmatprep.subr.bf16.mxu1 %v23649_v0 }
 0x1f8   :  { %20254 = vmatmul.mubr.msk.f32.gmra.mrb[6].mxu1 %vm513_vm2, %v20189_v57 }
 0x1f9   :  { %23652 = vmatpush3.bf16.msra.mxu1 %v23649_v0  ;;  %v16627_v0 = vld [vmem:[%s32021_s28 + $0xd0] sm:$0xff] }
 0x1fa   :  { %23654 = vmatprep.subr.bf16.mxu1 %v26186_v35 }
 0x209   :  { %v20290_v1 = vpop.f32.mrb[20].mxu0 }
 0x20a   :  { %v779_v2 = vpop.f32.mrb[21].mxu0 }
 0x20b   :  { %20302 = vmatprep.mubr.msk.f32.mxu1 %vm513_vm2, %v779_v2 }
 0x20c   :  { %20303 = vmatmul.mubr.msk.f32.vlgmr.msra.gmra.mrb[4].mxu1 %vm513_vm2, %v20290_v1  ;;  %v16628_v1 = vld [vmem:[%s32021_s28 + $0xd8] sm:$0xff] }
 0x20d   :  { %23656 = vmatpush3.bf16.msra.mxu1 %v26186_v35  ;;  %v20293_v3 = vpop.f32.mrb[22].mxu0 }
 0x20e   :  { %23658 = vmatprep.subr.bf16.mxu1 %v26194_v42  ;;  %v789_v4 = vpop.f32.mrb[23].mxu0 }
 0x20f   :  { %20305 = vmatprep.mubr.msk.f32.mxu1 %vm513_vm2, %v789_v4  ;;  %v23809_v4 = vpack.c.bf16 %v16628_v1, %v16627_v0  ;;  %v16665_v0 = vld [vmem:[%s32022_s29 + $0x60] sm:$0xff]  ;;  %v16666_v1 = vld [vmem:[%s32022_s29 + $0x68] sm:$0xff] }
 0x210   :  { %20306 = vmatmul.mubr.msk.f32.gmra.mrb[6].mxu1 %vm513_vm2, %v20293_v3 }
 0x211   :  { %23660 = vmatpush3.bf16.msra.mxu1 %v26194_v42  ;;  %20340 = vmatprep.mubr.f32.mxu1 %v16585_v5  ;;  %v16637_v5 = vld [vmem:[%s32021_s28 + $0xe0] sm:$0xff] }
 0x212   :  { %23662 = vmatprep.subr.bf16.mxu1 %v26202_v49  ;;  %v23845_v10 = vpack.c.bf16 %v16638_v7, %v16637_v5 }
 0x215   :  { %23664 = vmatpush3.bf16.msra.mxu1 %v26202_v49 }
 0x216   :  { %23666 = vmatprep.subr.bf16.mxu1 %v26210_v56 }
 0x219   :  { %23668 = vmatpush3.bf16.msra.mxu1 %v26210_v56 }
 0x21a   :  { %23670 = vmatprep.subr.bf16.mxu1 %v26218_v63 }
 0x21d   :  { %23672 = vmatpush3.bf16.msra.mxu1 %v26218_v63 }
 0x21e   :  { %23674 = vmatprep.subr.bf16.mxu1 %v26226_v6 }
 0x221   :  { %23676 = vmatpush3.bf16.msra.mxu1 %v26226_v6 }
 0x222   :  { %23678 = vmatprep.subr.bf16.mxu1 %v26234_v13 }
 0x225   :  { %23680 = vmatpush3.bf16.msra.mxu1 %v26234_v13 }
 0x226   :  { %23682 = vmatprep.subr.bf16.mxu1 %v26241_v17 }
 0x229   :  { %23684 = vmatpush3.bf16.msra.mxu1 %v26241_v17  ;;  %v20394_v21 = vpop.f32.mrb[24].mxu0 }
 0x22a   :  { %23686 = vmatprep.subr.bf16.mxu1 %v23685_v9  ;;  %v1171_v22 = vpop.f32.mrb[25].mxu0 }
 0x22c   :  { %20341 = vmatmul.mubr.f32.vlgmr.msra.gmra.mrb[8].mxu1 %v16586_v12  ;;  %v16640_v12 = vld [vmem:[%s32021_s28 + $0xf8] sm:$0xff] }
 0x22d   :  { %20343 = vmatprep.mubr.f32.mxu1 %v16587_v14  ;;  %23688 = vmatpush3.bf16.msra.mxu1 %v23685_v9  ;;  %v20397_v23 = vpop.f32.mrb[26].mxu0  ;;  %v23849_v14 = vpack.c.bf16 %v16640_v12, %v16639_v11  ;;  %v16682_v11 = vld [vmem:[%s32024_s9 + $0x18] sm:$0xff] }
 0x22e   :  { %23690 = vmatprep.subr.bf16.mxu1 %v23689_v15  ;;  %v1181_v24 = vpop.f32.mrb[27].mxu0 }
 0x230   :  { %20344 = vmatmul.mubr.f32.gmra.mrb[10].mxu1 %v16588_v16 }
 0x231   :  { %23692 = vmatpush3.bf16.msra.mxu1 %v23689_v15  ;;  %v16645_v15 = vld [vmem:[%s32019_s10 + $0x100] sm:$0xff] }
 0x232   :  { %23726 = vmatprep.subr.bf16.mxu1 %v23725_v20 }
 0x249   :  { %v26462_v28 = vpop.f32.mrb[28].mxu0 }
 0x24a   :  { %v26464_v29 = vpop.f32.mrb[29].mxu0 }
 0x24d   :  { %v20501_v57 = vpop.f32.mrb[30].mxu0 }
 0x24e   :  { %v1573_v58 = vpop.f32.mrb[31].mxu0 }
 0x269   :  { %v20550_v59 = vpop.f32.mrb[32].mxu0 }
 0x26a   :  { %v1759_v60 = vpop.f32.mrb[33].mxu0 }
 0x26d   :  { %v20553_v61 = vpop.f32.mrb[34].mxu0 }
 0x26e   :  { %v1769_v62 = vpop.f32.mrb[35].mxu0 }
 0x2ff   :  { %v20342_v36 = vpop.f32.mrb[8].mxu1 }
 0x300   :  { %v975_v37 = vpop.f32.mrb[9].mxu1 }
 0x301   :  { %20354 = vmatprep.mubr.msk.f32.mxu1 %vm513_vm2, %v975_v37  ;;  %v16657_v37 = vld [vmem:[%s32023_s7] ss:$0 sm:$0xff] }
 0x302   :  { %20355 = vmatmul.mubr.msk.f32.vlgmr.msra.gmra.mrb[4].mxu1 %vm513_vm2, %v20342_v36  ;;  %v23927_v36 = vpack.c.bf16 %v2176_v34, %v2175_v33 }
 0x303   :  { %23728 = vmatpush3.bf16.msra.mxu1 %v23725_v20  ;;  %v20345_v39 = vpop.f32.mrb[10].mxu1 }
 0x304   :  { %v985_v40 = vpop.f32.mrb[11].mxu1  ;;  %23730 = vmatprep.subr.bf16.mxu1 %v23729_v38 }
 0x305   :  { %20357 = vmatprep.mubr.msk.f32.mxu1 %vm513_vm2, %v985_v40 }
 0x306   :  { %20358 = vmatmul.mubr.msk.f32.gmra.mrb[6].mxu1 %vm513_vm2, %v20345_v39 }
 0x307   :  { %23732 = vmatpush3.bf16.msra.mxu1 %v23729_v38  ;;  %20406 = vmatprep.mubr.msk.f32.mxu1 %vm513_vm2, %v1171_v22  ;;  %v25953_v22 = vmov 0.0|0.0  }
 0x308   :  { %23734 = vmatprep.subr.bf16.mxu1 %v26186_v35  ;;  %23893 = vmatprep.subr.bf16.mxu0 %v25953_v22 }
 0x30a   :  { %20407 = vmatmul.mubr.msk.f32.vlgmr.msra.gmra.mrb[4].mxu1 %vm513_vm2, %v20394_v21 }
 0x30b   :  { %23736 = vmatpush3.bf16.msra.mxu1 %v26186_v35  ;;  %20409 = vmatprep.mubr.msk.f32.mxu1 %vm513_vm2, %v1181_v24  ;;  %v2169_v24 = vld [vmem:[%s32022_s29] sm:$0xff] }
 0x30c   :  { %23738 = vmatprep.subr.bf16.mxu1 %v26194_v42  ;;  %v23918_v27 = vpack.c.bf16 %v2170_v25, %v2169_v24  ;;  %v16691_v25 = vld [vmem:[%s32022_s29 + $0xf8] sm:$0xff] }
 0x30e   :  { %20410 = vmatmul.mubr.msk.f32.gmra.mrb[6].mxu1 %vm513_vm2, %v20397_v23  ;;  %v25955_v23 = vmov 0.0  }
 0x30f   :  { %23740 = vmatpush3.bf16.msra.mxu1 %v26194_v42  ;;  %20444 = vmatprep.mubr.f32.mxu1 %v16609_v41 }
 0x310   :  { %23742 = vmatprep.subr.bf16.mxu1 %v26202_v49  ;;  %20628 = vmatprep.mubr.msk.f32.mxu0 %vm25954_vm3, %v25955_v23 }
 0x313   :  { %23744 = vmatpush3.bf16.msra.mxu1 %v26202_v49 }
 0x314   :  { %23746 = vmatprep.subr.bf16.mxu1 %v26210_v56 }
 0x317   :  { %23748 = vmatpush3.bf16.msra.mxu1 %v26210_v56 }
 0x318   :  { %23750 = vmatprep.subr.bf16.mxu1 %v26218_v63 }
 0x31b   :  { %23752 = vmatpush3.bf16.msra.mxu1 %v26218_v63 }
 0x31c   :  { %23754 = vmatprep.subr.bf16.mxu1 %v26226_v6 }
 0x31f   :  { %23756 = vmatpush3.bf16.msra.mxu1 %v26226_v6 }
 0x320   :  { %23758 = vmatprep.subr.bf16.mxu1 %v26234_v13 }
 0x323   :  { %23760 = vmatpush3.bf16.msra.mxu1 %v26234_v13 }
 0x324   :  { %23762 = vmatprep.subr.bf16.mxu1 %v26241_v17 }
 0x327   :  { %23764 = vmatpush3.bf16.msra.mxu1 %v26241_v17 }
 0x328   :  { %23766 = vmatprep.subr.bf16.mxu1 %v23765_v45 }
 0x32a   :  { %20445 = vmatmul.mubr.f32.vlgmr.msra.gmra.mrb[12].mxu1 %v16610_v48 }
 0x32b   :  { %20447 = vmatprep.mubr.f32.mxu1 %v16611_v50  ;;  %23768 = vmatpush3.bf16.msra.mxu1 %v23765_v45 }
 0x32c   :  { %23770 = vmatprep.subr.bf16.mxu1 %v23769_v51 }
 0x32e   :  { %20448 = vmatmul.mubr.f32.gmra.mrb[14].mxu1 %v16612_v52 }
 0x32f   :  { %23772 = vmatpush3.bf16.msra.mxu1 %v23769_v51 }
 0x330   :  { %23806 = vmatprep.subr.bf16.mxu1 %v23805_v55 }
 0x3fd   :  { %v20446_v2 = vpop.f32.mrb[12].mxu1 }
 0x3fe   :  { %v1367_v3 = vpop.f32.mrb[13].mxu1 }
 0x3ff   :  { %20458 = vmatprep.mubr.msk.f32.mxu1 %vm513_vm2, %v1367_v3  ;;  %v16667_v3 = vld [vmem:[%s32022_s29 + $0x70] sm:$0xff] }
 0x400   :  { %20459 = vmatmul.mubr.msk.f32.vlgmr.msra.gmra.mrb[4].mxu1 %vm513_vm2, %v20446_v2  ;;  %v23912_v2 = vpack.c.bf16 %v16666_v1, %v16665_v0  ;;  %v16698_v0 = vld [vmem:[%s32022_s29 + $0x118] sm:$0xff]  ;;  %v16712_v1 = vld [vmem:[%s32022_s29 + $0x170] sm:$0xff] }
 0x401   :  { %23808 = vmatpush3.bf16.msra.mxu1 %v23805_v55  ;;  %v20449_v8 = vpop.f32.mrb[14].mxu1  ;;  %v16661_v55 = vld [vmem:[%s32022_s29 + $0x40] sm:$0xff] }
 0x402   :  { %v1377_v9 = vpop.f32.mrb[15].mxu1  ;;  %23810 = vmatprep.subr.bf16.mxu1 %v23809_v4 }
 0x403   :  { %20461 = vmatprep.mubr.msk.f32.mxu1 %vm513_vm2, %v1377_v9  ;;  %v16684_v9 = vld [vmem:[%s32022_s29 + $0xc0] sm:$0xff] }
 0x404   :  { %20462 = vmatmul.mubr.msk.f32.gmra.mrb[6].mxu1 %vm513_vm2, %v20449_v8 }
 0x405   :  { %23812 = vmatpush3.bf16.msra.mxu1 %v23809_v4  ;;  %20510 = vmatprep.mubr.msk.f32.mxu1 %vm513_vm2, %v26464_v29  ;;  %v16668_v4 = vld [vmem:[%s32022_s29 + $0x78] sm:$0xff] }
 0x406   :  { %23846 = vmatprep.subr.bf16.mxu1 %v23845_v10  ;;  %v23915_v5 = vpack.c.bf16 %v16668_v4, %v16667_v3 }
 0x408   :  { %20511 = vmatmul.mubr.msk.f32.vlgmr.msra.gmra.mrb[4].mxu1 %vm513_vm2, %v26462_v28  ;;  %v2172_v28 = vld [vmem:[%s32022_s29 + $0x18] sm:$0xff] }
 0x409   :  { %23848 = vmatpush3.bf16.msra.mxu1 %v23845_v10  ;;  %20513 = vmatprep.mubr.msk.f32.mxu1 %vm513_vm2, %v1573_v58  ;;  %v23921_v29 = vpack.c.bf16 %v2172_v28, %v2171_v26  ;;  %v16659_v58 = vld [vmem:[%s32024_s9 + $0x8] sm:$0xff] }
 0x40a   :  { %23850 = vmatprep.subr.bf16.mxu1 %v23849_v14  ;;  %v16685_v10 = vld [vmem:[%s32022_s29 + $0xc8] sm:$0xff] }
 0x40b   :  { %v23954_v12 = vpack.c.bf16 %v16685_v10, %v16684_v9  ;;  %v16678_v28 = vld [vmem:[%s32022_s29 + $0xa8] sm:$0xff]  ;;  %v16701_v9 = vld [vmem:[%s32022_s29 + $0x130] sm:$0xff]  ;;  %v16702_v10 = vld [vmem:[%s32022_s29 + $0x138] sm:$0xff] }
 0x40c   :  { %20514 = vmatmul.mubr.msk.f32.gmra.mrb[6].mxu1 %vm513_vm2, %v20501_v57  ;;  %v16662_v57 = vld [vmem:[%s32022_s29 + $0x48] sm:$0xff] }
 0x40d   :  { %23852 = vmatpush3.bf16.msra.mxu1 %v23849_v14  ;;  %20562 = vmatprep.mubr.msk.f32.mxu1 %vm513_vm2, %v1759_v60  ;;  %v16663_v60 = vld [vmem:[%s32022_s29 + $0x50] sm:$0xff] }
 0x40e   :  { %23854 = vmatprep.subr.bf16.mxu1 %v26186_v35 }
 0x410   :  { %20563 = vmatmul.mubr.msk.f32.vlgmr.msra.gmra.mrb[4].mxu1 %vm513_vm2, %v20550_v59  ;;  %v23906_v59 = vpack.c.bf16 %v16662_v57, %v16661_v55  ;;  %v16696_v55 = vld [vmem:[%s32022_s29 + $0x108] sm:$0xff]  ;;  %v16710_v57 = vld [vmem:[%s32022_s29 + $0x160] sm:$0xff] }
 0x411   :  { %23856 = vmatpush3.bf16.msra.mxu1 %v26186_v35  ;;  %20565 = vmatprep.mubr.msk.f32.mxu1 %vm513_vm2, %v1769_v62  ;;  %v16649_v35 = vld [vmem:[%s32021_s28 + $0x100] sm:$0xff] }
 0x412   :  { %23858 = vmatprep.subr.bf16.mxu1 %v26194_v42 }
 0x414   :  { %20566 = vmatmul.mubr.msk.f32.gmra.mrb[6].mxu1 %vm513_vm2, %v20553_v61  ;;  %v16664_v61 = vld [vmem:[%s32022_s29 + $0x58] sm:$0xff] }
 0x415   :  { %23860 = vmatpush3.bf16.msra.mxu1 %v26194_v42  ;;  %20600 = vmatprep.mubr.f32.mxu1 %v16645_v15  ;;  %v16650_v42 = vld [vmem:[%s32021_s28 + $0x108] sm:$0xff]  ;;  %v23909_v62 = vpack.c.bf16 %v16664_v61, %v16663_v60  ;;  %v16686_v15 = vld [vmem:[%s32022_s29 + $0xd0] sm:$0xff] }
 0x416   :  { %23862 = vmatprep.subr.bf16.mxu1 %v26202_v49 }
 0x419   :  { %23864 = vmatpush3.bf16.msra.mxu1 %v26202_v49  ;;  %v23885_v49 = vpack.c.bf16 %v16650_v42, %v16649_v35  ;;  %v16687_v35 = vld [vmem:[%s32022_s29 + $0xd8] sm:$0xff] }
 0x41a   :  { %23866 = vmatprep.subr.bf16.mxu1 %v26210_v56 }
 0x41d   :  { %23868 = vmatpush3.bf16.msra.mxu1 %v26210_v56  ;;  %v16651_v56 = vld [vmem:[%s32021_s28 + $0x110] sm:$0xff] }
 0x41e   :  { %23870 = vmatprep.subr.bf16.mxu1 %v26218_v63 }
 0x421   :  { %23872 = vmatpush3.bf16.msra.mxu1 %v26218_v63  ;;  %v16652_v63 = vld [vmem:[%s32021_s28 + $0x118] sm:$0xff] }
 0x422   :  { %23874 = vmatprep.subr.bf16.mxu1 %v26226_v6  ;;  %v23889_v16 = vpack.c.bf16 %v16652_v63, %v16651_v56  ;;  %v16671_v56 = vld [vmem:[%s32024_s9 + $0x10] sm:$0xff]  ;;  %v16673_v63 = vld [vmem:[%s32022_s29 + $0x80] sm:$0xff] }
 0x425   :  { %23876 = vmatpush3.bf16.msra.mxu1 %v26226_v6  ;;  %v16646_v6 = vld [vmem:[%s32019_s10 + $0x108] sm:$0xff] }
 0x426   :  { %23878 = vmatprep.subr.bf16.mxu1 %v26234_v13 }
 0x429   :  { %23880 = vmatpush3.bf16.msra.mxu1 %v26234_v13  ;;  %v16647_v13 = vld [vmem:[%s32019_s10 + $0x110] sm:$0xff] }
 0x42a   :  { %23882 = vmatprep.subr.bf16.mxu1 %v26241_v17 }
 0x42d   :  { %23884 = vmatpush3.bf16.msra.mxu1 %v26241_v17 }
 0x42e   :  { %23886 = vmatprep.subr.bf16.mxu1 %v23885_v49 }
 0x430   :  { %20601 = vmatmul.mubr.f32.vlgmr.msra.gmra.mrb[16].mxu1 %v16646_v6  ;;  %v16674_v6 = vld [vmem:[%s32022_s29 + $0x88] sm:$0xff] }
 0x431   :  { %20603 = vmatprep.mubr.f32.mxu1 %v16647_v13  ;;  %23888 = vmatpush3.bf16.msra.mxu1 %v23885_v49  ;;  %v23957_v49 = vpack.c.bf16 %v16687_v35, %v16686_v15  ;;  %v16688_v13 = vld [vmem:[%s32022_s29 + $0xe0] sm:$0xff] }
 0x432   :  { %23890 = vmatprep.subr.bf16.mxu1 %v23889_v16 }
 0x434   :  { %20604 = vmatmul.mubr.f32.gmra.mrb[18].mxu1 %v16648_v18  ;;  %v16689_v18 = vld [vmem:[%s32022_s29 + $0xe8] sm:$0xff] }
 0x435   :  { %23892 = vmatpush3.bf16.msra.mxu1 %v23889_v16  ;;  %v23936_v16 = vpack.c.bf16 %v16674_v6, %v16673_v63  ;;  %v16728_v6 = vld [vmem:[%s32022_s29 + $0x1c0] sm:$0xff] }
 0x436   :  { %23917 = vmatprep.subr.bf16.mxu1 %v25953_v22 }
 0x503   :  { %v20602_v17 = vpop.f32.mrb[16].mxu1 }
 0x504   :  { %v1955_v19 = vpop.f32.mrb[17].mxu1 }
 0x505   :  { %20614 = vmatprep.mubr.msk.f32.mxu1 %vm513_vm2, %v1955_v19  ;;  %v16675_v19 = vld [vmem:[%s32022_s29 + $0x90] sm:$0xff] }
 0x506   :  { %20615 = vmatmul.mubr.msk.f32.vlgmr.msra.gmra.mrb[4].mxu1 %vm513_vm2, %v20602_v17  ;;  %v23960_v17 = vpack.c.bf16 %v16689_v18, %v16688_v13  ;;  %v16729_v13 = vld [vmem:[%s32022_s29 + $0x1c8] sm:$0xff] }
 0x507   :  { %v20605_v20 = vpop.f32.mrb[18].mxu1  ;;  %23919 = vmatpush3.bf16.msra.mxu1 %v23918_v27  ;;  %v16677_v27 = vld [vmem:[%s32022_s29 + $0xa0] sm:$0xff]  ;;  %v24026_v18 = vpack.c.bf16 %v16729_v13, %v16728_v6 }
 0x508   :  { %v1965_v21 = vpop.f32.mrb[19].mxu1  ;;  %23920 = vmatprep.subr.bf16.mxu1 %v25953_v22 }
 0x509   :  { %20617 = vmatprep.mubr.msk.f32.mxu1 %vm513_vm2, %v1965_v21  ;;  %v16690_v21 = vld [vmem:[%s32022_s29 + $0xf0] sm:$0xff] }
 0x50a   :  { %20618 = vmatmul.mubr.msk.f32.gmra.mrb[6].mxu1 %vm513_vm2, %v20605_v20  ;;  %v16676_v20 = vld [vmem:[%s32022_s29 + $0x98] sm:$0xff]  ;;  %v23963_v26 = vpack.c.bf16 %v16691_v25, %v16690_v21  ;;  %v16718_v25 = vld [vmem:[%s32022_s29 + $0x188] sm:$0xff] }
 0x50b   :  { %20677 = vmatprep.mubr.msk.f32.mxu1 %vm25954_vm3, %v25955_v23  ;;  %23922 = vmatpush3.bf16.msra.mxu1 %v23921_v29  ;;  %v23939_v24 = vpack.c.bf16 %v16676_v20, %v16675_v19  ;;  %v23942_v29 = vpack.c.bf16 %v16678_v28, %v16677_v27  ;;  %v16730_v19 = vld [vmem:[%s32022_s29 + $0x1d0] sm:$0xff]  ;;  %v16731_v20 = vld [vmem:[%s32022_s29 + $0x1d8] sm:$0xff] }
 0x50c   :  { %23923 = vmatprep.subr.bf16.mxu1 %v25953_v22  ;;  %v16715_v27 = vld [vmem:[%s32024_s9 + $0x30] sm:$0xff] }
 0x50f   :  { %23925 = vmatpush3.bf16.msra.mxu1 %v23924_v32  ;;  %v23945_v32 = vpack.c.bf16 %v16680_v31, %v16679_v30  ;;  %v16720_v30 = vld [vmem:[%s32022_s29 + $0x198] sm:$0xff] }
 0x510   :  { %23926 = vmatprep.subr.bf16.mxu1 %v25953_v22 }
 0x513   :  { %23928 = vmatpush3.bf16.msra.mxu1 %v23927_v36 }
 0x514   :  { %23947 = vmatprep.subr.bf16.mxu1 %v25953_v22 }
 0x5d9   :  { %v20616_v38 = vpop.f32.mrb[4].mxu1 }
 0x5da   :  { %v2088_v39 = vadd.f32 %v20616_v38, %v16657_v37  ;;  %v2057_v40 = vpop.f32.mrb[5].mxu1 }
 0x5db   :  { %v2087_v41 = vadd.f32 %v16657_v37, %v2057_v40 }
 0x5dc   :  { %v2092_v43 = vmax.f32 %v2088_v39, 0.0 }
 0x5dd   :  { %v2091_v44 = vmax.f32 %v2087_v41, 0.0  ;;  %v20619_v45 = vpop.f32.mrb[6].mxu1  ;;  %v16706_v41 = vld [vmem:[%s32022_s29 + $0x140] sm:$0xff] }
 0x5de   :  { %v2090_v46 = vadd.f32 %v20619_v45, %v16657_v37  ;;  %v2067_v47 = vpop.f32.mrb[7].mxu1 }
 0x5df   :  { %v26648_v48 = vpack.c.bf16 %v2092_v43, %v2091_v44  ;;  %v2089_v50 = vadd.f32 %v16657_v37, %v2067_v47  ;;  %v16707_v43 = vld [vmem:[%s32022_s29 + $0x148] sm:$0xff]  ;;  %v16708_v47 = vld [vmem:[%s32022_s29 + $0x150] sm:$0xff] }
 0x5e0   :  { %v2094_v51 = vmax.f32 %v2090_v46, 0.0  ;;  %v16704_v44 = vld [vmem:[%s32024_s9 + $0x28] sm:$0xff]  ;;  %v23990_v45 = vpack.c.bf16 %v16707_v43, %v16706_v41  ;;  %v16734_v43 = vld [vmem:[%s32022_s29 + $0x1f0] sm:$0xff] }
 0x5e1   :  { %v2093_v52 = vmax.f32 %v2089_v50, 0.0  ;;  %23895 = vmatpush3.bf16.msra.mxu0 %v26648_v48  ;;  %v16709_v50 = vld [vmem:[%s32022_s29 + $0x158] sm:$0xff] }
 0x5e2   :  { %23896 = vmatprep.subr.bf16.mxu0 %v25953_v22 }
 0x5e3   :  { %v26652_v53 = vpack.c.bf16 %v2094_v51, %v2093_v52  ;;  %v23993_v52 = vpack.c.bf16 %v16709_v50, %v16708_v47 }
 0x5e5   :  { %23898 = vmatpush3.bf16.msra.mxu0 %v26652_v53 }
 0x5e6   :  { %23899 = vmatprep.subr.bf16.mxu0 %v25953_v22 }
 0x5e8   :  { %20629 = vmatmul.mubr.msk.f32.vlgmr.msra.gmra.mrb[36].mxu0 %vm513_vm2, %v2095_v54  ;;  %v16695_v54 = vld [vmem:[%s32022_s29 + $0x100] sm:$0xff] }
 0x5e9   :  { %23901 = vmatpush3.bf16.msra.mxu0 %v26648_v48  ;;  %20639 = vmatprep.mubr.msk.f32.mxu0 %vm25954_vm3, %v25955_v23  ;;  %v23972_v60 = vpack.c.bf16 %v16696_v55, %v16695_v54 }
 0x5ea   :  { %23902 = vmatprep.subr.bf16.mxu0 %v25953_v22 }
 0x5ed   :  { %23904 = vmatpush3.bf16.msra.mxu0 %v26652_v53 }
 0x5ee   :  { %23905 = vmatprep.subr.bf16.mxu0 %v25953_v22 }
 0x5f0   :  { %20640 = vmatmul.mubr.msk.f32.vlgmr.msra.gmra.mrb[38].mxu0 %vm513_vm2, %v16659_v58  ;;  %v16711_v58 = vld [vmem:[%s32022_s29 + $0x168] sm:$0xff] }
 0x5f1   :  { %23907 = vmatpush3.bf16.msra.mxu0 %v23906_v59  ;;  %20658 = vmatprep.mubr.msk.f32.mxu0 %vm25954_vm3, %v25955_v23  ;;  %v16693_v59 = vld [vmem:[%s32024_s9 + $0x20] sm:$0xff]  ;;  %v23996_v61 = vpack.c.bf16 %v16711_v58, %v16710_v57 }
 0x5f2   :  { %23908 = vmatprep.subr.bf16.mxu0 %v25953_v22 }
 0x5f5   :  { %23910 = vmatpush3.bf16.msra.mxu0 %v23909_v62  ;;  %v16697_v62 = vld [vmem:[%s32022_s29 + $0x110] sm:$0xff] }
 0x5f6   :  { %23911 = vmatprep.subr.bf16.mxu0 %v25953_v22  ;;  %v23975_v3 = vpack.c.bf16 %v16698_v0, %v16697_v62  ;;  %v16737_v62 = vld [vmem:[%s32024_s9 + $0x40] sm:$0xff]  ;;  %v16741_v0 = vld [vmem:[%s32022_s29 + $0x210] sm:$0xff] }
 0x5f9   :  { %23913 = vmatpush3.bf16.msra.mxu0 %v23912_v2  ;;  %v16713_v2 = vld [vmem:[%s32022_s29 + $0x178] sm:$0xff] }
 0x5fa   :  { %23914 = vmatprep.subr.bf16.mxu0 %v25953_v22  ;;  %v23999_v4 = vpack.c.bf16 %v16713_v2, %v16712_v1  ;;  %v16742_v1 = vld [vmem:[%s32022_s29 + $0x218] sm:$0xff] }
 0x5fb   :  { %v24047_v2 = vpack.c.bf16 %v16742_v1, %v16741_v0 }
 0x5fd   :  { %23916 = vmatpush3.bf16.msra.mxu0 %v23915_v5  ;;  %v16699_v5 = vld [vmem:[%s32022_s29 + $0x120] sm:$0xff] }
 0x5fe   :  { %23929 = vmatprep.subr.bf16.mxu0 %v25953_v22 }
 0x6bb   :  { %v2165_v7 = vpop.f32.mrb[36].mxu0 }
 0x6bc   :  { %v20630_v8 = vpop.f32.mrb[37].mxu0  ;;  %20678 = vmatmul.mubr.msk.f32.vlgmr.msra.gmra.mrb[20].mxu1 %vm2261_vm4, %v2165_v7  ;;  %v16700_v7 = vld [vmem:[%s32022_s29 + $0x128] sm:$0xff] }
 0x6bd   :  { %23949 = vmatpush3.bf16.msra.mxu1 %v26648_v48  ;;  %20718 = vmatprep.mubr.msk.f32.mxu1 %vm25954_vm3, %v25955_v23  ;;  %v23978_v8 = vpack.c.bf16 %v16700_v7, %v16699_v5  ;;  %v16745_v5 = vld [vmem:[%s32022_s29 + $0x230] sm:$0xff]  ;;  %v16746_v7 = vld [vmem:[%s32022_s29 + $0x238] sm:$0xff] }
 0x6be   :  { %23950 = vmatprep.subr.bf16.mxu1 %v25953_v22 }
 0x6c1   :  { %23952 = vmatpush3.bf16.msra.mxu1 %v26652_v53 }
 0x6c2   :  { %23953 = vmatprep.subr.bf16.mxu1 %v25953_v22 }
 0x6c3   :  { %v2248_v14 = vpop.f32.mrb[38].mxu0 }
 0x6c4   :  { %20719 = vmatmul.mubr.msk.f32.vlgmr.msra.gmra.mrb[22].mxu1 %vm513_vm2, %v16682_v11  ;;  %v20641_v42 = vpop.f32.mrb[39].mxu0  ;;  %20659 = vmatmul.mubr.msk.f32.vlgmr.msra.gmra.mrb[40].mxu0 %vm2261_vm4, %v2248_v14  ;;  %v23981_v11 = vpack.c.bf16 %v16702_v10, %v16701_v9 }
 0x6c5   :  { %23931 = vmatpush3.bf16.msra.mxu0 %v26648_v48  ;;  %20688 = vmatprep.mubr.msk.f32.mxu0 %vm25954_vm3, %v25955_v23 }
 0x6c6   :  { %23932 = vmatprep.subr.bf16.mxu0 %v25953_v22  ;;  %23955 = vmatpush3.bf16.msra.mxu1 %v23954_v12 }
 0x6c7   :  { %23956 = vmatprep.subr.bf16.mxu1 %v25953_v22  ;;  %20737 = vmatprep.mubr.msk.f32.mxu1 %vm25954_vm3, %v25955_v23 }
 0x6c9   :  { %23934 = vmatpush3.bf16.msra.mxu0 %v26652_v53 }
 0x6ca   :  { %23958 = vmatpush3.bf16.msra.mxu1 %v23957_v49  ;;  %23935 = vmatprep.subr.bf16.mxu0 %v25953_v22 }
 0x6cb   :  { %23959 = vmatprep.subr.bf16.mxu1 %v25953_v22 }
 0x6cc   :  { %20689 = vmatmul.mubr.msk.f32.vlgmr.msra.gmra.mrb[42].mxu0 %vm513_vm2, %v16671_v56 }
 0x6cd   :  { %20707 = vmatprep.mubr.msk.f32.mxu0 %vm25954_vm3, %v25955_v23  ;;  %23937 = vmatpush3.bf16.msra.mxu0 %v23936_v16  ;;  %v16726_v16 = vld [vmem:[%s32024_s9 + $0x38] sm:$0xff]  ;;  %s32026_s9 = sld [smem:[#allocation44_spill]] }
 0x6ce   :  { %23961 = vmatpush3.bf16.msra.mxu1 %v23960_v17  ;;  %23938 = vmatprep.subr.bf16.mxu0 %v25953_v22 }
 0x6cf   :  { %23962 = vmatprep.subr.bf16.mxu1 %v25953_v22 }
 0x6d1   :  { %23940 = vmatpush3.bf16.msra.mxu0 %v23939_v24  ;;  %v16717_v24 = vld [vmem:[%s32022_s29 + $0x180] sm:$0xff] }
 0x6d2   :  { %23964 = vmatpush3.bf16.msra.mxu1 %v23963_v26  ;;  %23941 = vmatprep.subr.bf16.mxu0 %v25953_v22  ;;  %v24029_v26 = vpack.c.bf16 %v16731_v20, %v16730_v19  ;;  %v24008_v28 = vpack.c.bf16 %v16718_v25, %v16717_v24 }
 0x6d3   :  { %23983 = vmatprep.subr.bf16.mxu1 %v25953_v22 }
 0x6d5   :  { %23943 = vmatpush3.bf16.msra.mxu0 %v23942_v29  ;;  %v16719_v29 = vld [vmem:[%s32022_s29 + $0x190] sm:$0xff] }
 0x6d6   :  { %23944 = vmatprep.subr.bf16.mxu0 %v25953_v22  ;;  %v24011_v31 = vpack.c.bf16 %v16720_v30, %v16719_v29 }
 0x6d9   :  { %23946 = vmatpush3.bf16.msra.mxu0 %v23945_v32  ;;  %v16721_v32 = vld [vmem:[%s32022_s29 + $0x1a0] sm:$0xff] }
 0x6da   :  { %23965 = vmatprep.subr.bf16.mxu0 %v25953_v22 }
 0x78f   :  { %v2404_v33 = vpop.f32.mrb[20].mxu1 }
 0x790   :  { %v20679_v34 = vpop.f32.mrb[21].mxu1 }
 0x797   :  { %v2637_v36 = vpop.f32.mrb[22].mxu1  ;;  %v2331_v37 = vpop.f32.mrb[40].mxu0 }
 0x798   :  { %v26782_v38 = vadd.f32 %v2404_v33, %v2331_v37  ;;  %20738 = vmatmul.mubr.msk.f32.vlgmr.msra.gmra.mrb[24].mxu1 %vm2261_vm4, %v2637_v36  ;;  %v20660_v39 = vpop.f32.mrb[41].mxu0  ;;  %v20720_v40 = vpop.f32.mrb[23].mxu1  ;;  %v16722_v33 = vld [vmem:[%s32022_s29 + $0x1a8] sm:$0xff]  ;;  %v16732_v36 = vld [vmem:[%s32022_s29 + $0x1e0] sm:$0xff] }
 0x799   :  { %23985 = vmatpush3.bf16.msra.mxu1 %v26648_v48  ;;  %20778 = vmatprep.mubr.msk.f32.mxu1 %vm25954_vm3, %v25955_v23  ;;  %v24014_v34 = vpack.c.bf16 %v16722_v33, %v16721_v32  ;;  %v16733_v37 = vld [vmem:[%s32022_s29 + $0x1e8] sm:$0xff]  ;;  %v16723_v39 = vld [vmem:[%s32022_s29 + $0x1b0] sm:$0xff]  ;;  %v16724_v40 = vld [vmem:[%s32022_s29 + $0x1b8] sm:$0xff] }
 0x79a   :  { %23986 = vmatprep.subr.bf16.mxu1 %v25953_v22  ;;  %v24017_v41 = vpack.c.bf16 %v16724_v40, %v16723_v39  ;;  %v16748_v39 = vld [vmem:[%s32026_s9] ss:$0 sm:$0xff] }
 0x79d   :  { %23988 = vmatpush3.bf16.msra.mxu1 %v26652_v53 }
 0x79e   :  { %23989 = vmatprep.subr.bf16.mxu1 %v25953_v22 }
 0x79f   :  { %v2479_v46 = vpop.f32.mrb[42].mxu0 }
 0x7a0   :  { %20779 = vmatmul.mubr.msk.f32.vlgmr.msra.gmra.mrb[26].mxu1 %vm513_vm2, %v16704_v44  ;;  %v20690_v51 = vpop.f32.mrb[43].mxu0  ;;  %20708 = vmatmul.mubr.msk.f32.vlgmr.msra.gmra.mrb[44].mxu0 %vm2261_vm4, %v2479_v46  ;;  %v16735_v44 = vld [vmem:[%s32022_s29 + $0x1f8] sm:$0xff] }
 0x7a1   :  { %23967 = vmatpush3.bf16.msra.mxu0 %v26648_v48  ;;  %20748 = vmatprep.mubr.msk.f32.mxu0 %vm25954_vm3, %v25955_v23 }
 0x7a2   :  { %23968 = vmatprep.subr.bf16.mxu0 %v25953_v22  ;;  %23991 = vmatpush3.bf16.msra.mxu1 %v23990_v45  ;;  %v24035_v45 = vpack.c.bf16 %v16735_v44, %v16734_v43 }
 0x7a3   :  { %23992 = vmatprep.subr.bf16.mxu1 %v25953_v22  ;;  %20797 = vmatprep.mubr.msk.f32.mxu1 %vm25954_vm3, %v25955_v23 }
 0x7a5   :  { %23970 = vmatpush3.bf16.msra.mxu0 %v26652_v53 }
 0x7a6   :  { %23994 = vmatpush3.bf16.msra.mxu1 %v23993_v52  ;;  %23971 = vmatprep.subr.bf16.mxu0 %v25953_v22 }
 0x7a7   :  { %23995 = vmatprep.subr.bf16.mxu1 %v25953_v22 }
 0x7a8   :  { %20749 = vmatmul.mubr.msk.f32.vlgmr.msra.gmra.mrb[46].mxu0 %vm513_vm2, %v16693_v59 }
 0x7a9   :  { %23973 = vmatpush3.bf16.msra.mxu0 %v23972_v60  ;;  %20767 = vmatprep.mubr.msk.f32.mxu0 %vm25954_vm3, %v25955_v23  ;;  %v16739_v60 = vld [vmem:[%s32022_s29 + $0x200] sm:$0xff] }
 0x7aa   :  { %23997 = vmatpush3.bf16.msra.mxu1 %v23996_v61  ;;  %23974 = vmatprep.subr.bf16.mxu0 %v25953_v22  ;;  %v16740_v61 = vld [vmem:[%s32022_s29 + $0x208] sm:$0xff] }
 0x7ab   :  { %23998 = vmatprep.subr.bf16.mxu1 %v25953_v22 }
 0x7ad   :  { %23976 = vmatpush3.bf16.msra.mxu0 %v23975_v3  ;;  %v16744_v3 = vld [vmem:[%s32022_s29 + $0x228] sm:$0xff] }
 0x7ae   :  { %24000 = vmatpush3.bf16.msra.mxu1 %v23999_v4  ;;  %23977 = vmatprep.subr.bf16.mxu0 %v25953_v22 }
 0x7af   :  { %24019 = vmatprep.subr.bf16.mxu1 %v25953_v22 }
 0x7b1   :  { %23979 = vmatpush3.bf16.msra.mxu0 %v23978_v8  ;;  %v24053_v8 = vpack.c.bf16 %v16746_v7, %v16745_v5 }
 0x7b2   :  { %23980 = vmatprep.subr.bf16.mxu0 %v25953_v22 }
 0x7b5   :  { %23982 = vmatpush3.bf16.msra.mxu0 %v23981_v11 }
 0x7b6   :  { %24001 = vmatprep.subr.bf16.mxu0 %v25953_v22 }
 0x86b   :  { %v2719_v12 = vpop.f32.mrb[24].mxu1 }
 0x86c   :  { %v20739_v14 = vpop.f32.mrb[25].mxu1 }
 0x873   :  { %v2953_v15 = vpop.f32.mrb[26].mxu1  ;;  %v2561_v35 = vpop.f32.mrb[44].mxu0 }
 0x874   :  { %v2565_v42 = vadd.f32 %v2561_v35, %v26782_v38  ;;  %20798 = vmatmul.mubr.msk.f32.vlgmr.msra.gmra.mrb[28].mxu1 %vm2261_vm4, %v2953_v15  ;;  %v20709_v49 = vpop.f32.mrb[45].mxu0  ;;  %v20780_v56 = vpop.f32.mrb[27].mxu1  ;;  %v24032_v38 = vpack.c.bf16 %v16733_v37, %v16732_v36 }
 0x875   :  { %24021 = vmatpush3.bf16.msra.mxu1 %v26648_v48  ;;  %20838 = vmatprep.mubr.msk.f32.mxu1 %vm25954_vm3, %v25955_v23 }
 0x876   :  { %24022 = vmatprep.subr.bf16.mxu1 %v25953_v22  ;;  %v2723_v63 = vadd.f32 %v2719_v12, %v2565_v42 }
 0x879   :  { %24024 = vmatpush3.bf16.msra.mxu1 %v26652_v53 }
 0x87a   :  { %24025 = vmatprep.subr.bf16.mxu1 %v25953_v22 }
 0x87b   :  { %v2795_v17 = vpop.f32.mrb[46].mxu0 }
 0x87c   :  { %v20750_v21 = vpop.f32.mrb[47].mxu0  ;;  %20768 = vmatmul.mubr.msk.f32.vlgmr.msra.gmra.mrb[48].mxu0 %vm2261_vm4, %v2795_v17  ;;  %20839 = vmatmul.mubr.msk.f32.vlgmr.msra.gmra.mrb[30].mxu1 %vm513_vm2, %v16726_v16 }
 0x87d   :  { %24003 = vmatpush3.bf16.msra.mxu0 %v26648_v48  ;;  %20808 = vmatprep.mubr.msk.f32.mxu0 %vm25954_vm3, %v25955_v23 }
 0x87e   :  { %24004 = vmatprep.subr.bf16.mxu0 %v25953_v22  ;;  %24027 = vmatpush3.bf16.msra.mxu1 %v24026_v18 }
 0x87f   :  { %24028 = vmatprep.subr.bf16.mxu1 %v25953_v22  ;;  %20857 = vmatprep.mubr.msk.f32.mxu1 %vm25954_vm3, %v25955_v23 }
 0x881   :  { %24006 = vmatpush3.bf16.msra.mxu0 %v26652_v53 }
 0x882   :  { %24007 = vmatprep.subr.bf16.mxu0 %v25953_v22  ;;  %24030 = vmatpush3.bf16.msra.mxu1 %v24029_v26 }
 0x883   :  { %24031 = vmatprep.subr.bf16.mxu1 %v25953_v22 }
 0x884   :  { %20809 = vmatmul.mubr.msk.f32.vlgmr.msra.gmra.mrb[50].mxu0 %vm513_vm2, %v16715_v27 }
 0x885   :  { %24009 = vmatpush3.bf16.msra.mxu0 %v24008_v28  ;;  %20827 = vmatprep.mubr.msk.f32.mxu0 %vm25954_vm3, %v25955_v23 }
 0x886   :  { %24010 = vmatprep.subr.bf16.mxu0 %v25953_v22  ;;  %24033 = vmatpush3.bf16.msra.mxu1 %v24032_v38 }
 0x887   :  { %24034 = vmatprep.subr.bf16.mxu1 %v25953_v22 }
 0x889   :  { %24012 = vmatpush3.bf16.msra.mxu0 %v24011_v31 }
 0x88a   :  { %24013 = vmatprep.subr.bf16.mxu0 %v25953_v22  ;;  %24036 = vmatpush3.bf16.msra.mxu1 %v24035_v45  ;;  %v3523_v45 = vld [vmem:[%s32027_s1] sm:$0x3] }
 0x88b   :  { %20890 = vmatprep.subr.mxu1 %v25955_v23 }
 0x88d   :  { %24015 = vmatpush3.bf16.msra.mxu0 %v24014_v34 }
 0x88e   :  { %24016 = vmatprep.subr.bf16.mxu0 %v25953_v22 }
 0x891   :  { %24018 = vmatpush3.bf16.msra.mxu0 %v24017_v41 }
 0x892   :  { %24037 = vmatprep.subr.bf16.mxu0 %v25953_v22 }
 0x947   :  { %v3035_v46 = vpop.f32.mrb[28].mxu1 }
 0x948   :  { %v20799_v47 = vpop.f32.mrb[29].mxu1 }
 0x94f   :  { %v2877_v50 = vpop.f32.mrb[48].mxu0  ;;  %v3269_v51 = vpop.f32.mrb[30].mxu1 }
 0x950   :  { %v20769_v52 = vpop.f32.mrb[49].mxu0  ;;  %v2881_v54 = vadd.f32 %v2877_v50, %v2723_v63  ;;  %20858 = vmatmul.mubr.msk.f32.vlgmr.msra.gmra.mrb[32].mxu1 %vm2261_vm4, %v3269_v51  ;;  %v20840_v55 = vpop.f32.mrb[31].mxu1  ;;  %v16750_v50 = vld [vmem:[%s32027_s1 + $0x2] sm:$0x3] }
 0x951   :  { %20892 = vmatprep.mubr.msk.f32.mxu1 %vm25954_vm3, %v25955_v23 }
 0x952   :  { %v3039_v57 = vadd.f32 %v3035_v46, %v2881_v54 }
 0x957   :  { %v3111_v58 = vpop.f32.mrb[50].mxu0 }
 0x958   :  { %v20810_v59 = vpop.f32.mrb[51].mxu0  ;;  %20828 = vmatmul.mubr.msk.f32.vlgmr.msra.gmra.mrb[52].mxu0 %vm2261_vm4, %v3111_v58 }
 0x959   :  { %24039 = vmatpush3.bf16.msra.mxu0 %v26648_v48  ;;  %20868 = vmatprep.mubr.msk.f32.mxu0 %vm25954_vm3, %v25955_v23  ;;  %v24044_v48 = vpack.c.bf16 %v16740_v61, %v16739_v60 }
 0x95a   :  { %24040 = vmatprep.subr.bf16.mxu0 %v25953_v22 }
 0x95d   :  { %24042 = vmatpush3.bf16.msra.mxu0 %v26652_v53  ;;  %v16743_v53 = vld [vmem:[%s32022_s29 + $0x220] sm:$0xff]  ;;  %s32025_s29 = sld [smem:[#allocation43_spill]] }
 0x95e   :  { %24043 = vmatprep.subr.bf16.mxu0 %v25953_v22  ;;  %v24050_v4 = vpack.c.bf16 %v16744_v3, %v16743_v53 }
 0x960   :  { %20869 = vmatmul.mubr.msk.f32.vlgmr.msra.gmra.mrb[54].mxu0 %vm513_vm2, %v16737_v62 }
 0x961   :  { %24045 = vmatpush3.bf16.msra.mxu0 %v24044_v48  ;;  %20887 = vmatprep.mubr.msk.f32.mxu0 %vm25954_vm3, %v25955_v23 }
 0x962   :  { %24046 = vmatprep.subr.bf16.mxu0 %v25953_v22 }
 0x963   :  { %v3598_v49 = vld [vmem:[%s32025_s29] sm:$0xff]  ;;  %v3599_v56 = vld [vmem:[%s32025_s29 + $0x8] sm:$0xff]  ;;  %v3600_v6 = vld [vmem:[%s32025_s29 + $0x10] sm:$0xff] }
 0x964   :  { %v24080_v63 = vpack.c.bf16 %v3599_v56, %v3598_v49  ;;  %v3601_v13 = vld [vmem:[%s32025_s29 + $0x18] sm:$0xff]  ;;  %v3602_v18 = vld [vmem:[%s32025_s29 + $0x20] sm:$0xff]  ;;  %v3603_v17 = vld [vmem:[%s32025_s29 + $0x28] sm:$0xff] }
 0x965   :  { %24048 = vmatpush3.bf16.msra.mxu0 %v24047_v2  ;;  %v24083_v16 = vpack.c.bf16 %v3601_v13, %v3600_v6  ;;  %v24086_v19 = vpack.c.bf16 %v3603_v17, %v3602_v18  ;;  %v3604_v20 = vld [vmem:[%s32025_s29 + $0x30] sm:$0xff]  ;;  %v3605_v21 = vld [vmem:[%s32025_s29 + $0x38] sm:$0xff]  ;;  %v3606_v25 = vld [vmem:[%s32025_s29 + $0x40] sm:$0xff] }
 0x966   :  { %24049 = vmatprep.subr.bf16.mxu0 %v25953_v22  ;;  %v24089_v24 = vpack.c.bf16 %v3605_v21, %v3604_v20  ;;  %v3607_v26 = vld [vmem:[%s32025_s29 + $0x48] sm:$0xff]  ;;  %v3608_v28 = vld [vmem:[%s32025_s29 + $0x50] sm:$0xff]  ;;  %v3609_v29 = vld [vmem:[%s32025_s29 + $0x58] sm:$0xff] }
 0x967   :  { %v24092_v27 = vpack.c.bf16 %v3607_v26, %v3606_v25  ;;  %v24095_v30 = vpack.c.bf16 %v3609_v29, %v3608_v28  ;;  %v3610_v31 = vld [vmem:[%s32025_s29 + $0x60] sm:$0xff]  ;;  %v3611_v32 = vld [vmem:[%s32025_s29 + $0x68] sm:$0xff]  ;;  %v3612_v34 = vld [vmem:[%s32025_s29 + $0x70] sm:$0xff] }
 0x968   :  { %v24098_v33 = vpack.c.bf16 %v3611_v32, %v3610_v31  ;;  %v3613_v36 = vld [vmem:[%s32025_s29 + $0x78] sm:$0xff]  ;;  %v16752_v46 = vld [vmem:[%s32025_s29 + $0x80] sm:$0xff]  ;;  %v16753_v47 = vld [vmem:[%s32025_s29 + $0x88] sm:$0xff] }
 0x969   :  { %24051 = vmatpush3.bf16.msra.mxu0 %v24050_v4  ;;  %v24101_v37 = vpack.c.bf16 %v3613_v36, %v3612_v34  ;;  %v24056_v51 = vpack.c.bf16 %v16753_v47, %v16752_v46  ;;  %v16754_v52 = vld [vmem:[%s32025_s29 + $0x90] sm:$0xff]  ;;  %v16755_v54 = vld [vmem:[%s32025_s29 + $0x98] sm:$0xff]  ;;  %v16757_v58 = vld [vmem:[%s32025_s29 + $0xa8] sm:$0xff] }
 0x96a   :  { %24052 = vmatprep.subr.bf16.mxu0 %v25953_v22  ;;  %v24059_v55 = vpack.c.bf16 %v16755_v54, %v16754_v52  ;;  %v16758_v60 = vld [vmem:[%s32025_s29 + $0xb0] sm:$0xff]  ;;  %v16759_v61 = vld [vmem:[%s32025_s29 + $0xb8] sm:$0xff]  ;;  %v16760_v48 = vld [vmem:[%s32025_s29 + $0xc0] sm:$0xff] }
 0x96b   :  { %v24065_v62 = vpack.c.bf16 %v16759_v61, %v16758_v60  ;;  %v16761_v0 = vld [vmem:[%s32025_s29 + $0xc8] sm:$0xff]  ;;  %v16762_v2 = vld [vmem:[%s32025_s29 + $0xd0] sm:$0xff]  ;;  %v16763_v53 = vld [vmem:[%s32025_s29 + $0xd8] sm:$0xff] }
 0x96c   :  { %v24068_v1 = vpack.c.bf16 %v16761_v0, %v16760_v48  ;;  %v24071_v3 = vpack.c.bf16 %v16763_v53, %v16762_v2  ;;  %v16764_v4 = vld [vmem:[%s32025_s29 + $0xe0] sm:$0xff]  ;;  %v16765_v5 = vld [vmem:[%s32025_s29 + $0xe8] sm:$0xff]  ;;  %v16776_v21 = vld [vmem:[%s32025_s29 + $0x130] sm:$0xff] }
 0x96d   :  { %24054 = vmatpush3.bf16.msra.mxu0 %v24053_v8  ;;  %v24074_v7 = vpack.c.bf16 %v16765_v5, %v16764_v4  ;;  %v16766_v8 = vld [vmem:[%s32025_s29 + $0xf0] sm:$0xff]  ;;  %v16774_v6 = vld [vmem:[%s32025_s29 + $0x120] sm:$0xff]  ;;  %v16775_v13 = vld [vmem:[%s32025_s29 + $0x128] sm:$0xff] }
 0x96e   :  { %24079 = vmatprep.subr.bf16.mxu0 %v25953_v22  ;;  %v16768_v18 = vld [vmem:[%s32027_s1 + $0x4] sm:$0x3]  ;;  %v24110_v20 = vpack.c.bf16 %v16775_v13, %v16774_v6  ;;  %v16786_v25 = vld [vmem:[%s32027_s1 + $0x6] sm:$0x3]  ;;  %v16791_v28 = vld [vmem:[%s32025_s29 + $0x198] sm:$0xff] }
 0x96f   :  { %v16788_v17 = vld [vmem:[%s32025_s29 + $0x180] sm:$0xff]  ;;  %v16779_v31 = vld [vmem:[%s32025_s29 + $0x148] sm:$0xff]  ;;  %v16798_v52 = vld [vmem:[%s32025_s29 + $0x1d0] sm:$0xff] }
 0x970   :  { %v16793_v34 = vld [vmem:[%s32025_s29 + $0x1a8] sm:$0xff]  ;;  %v16800_v60 = vld [vmem:[%s32025_s29 + $0x1e0] sm:$0xff]  ;;  %v16802_v0 = vld [vmem:[%s32025_s29 + $0x1f0] sm:$0xff] }
 0x971   :  { %v16797_v46 = vld [vmem:[%s32025_s29 + $0x1c8] sm:$0xff]  ;;  %v4184_v13 = vld [vmem:[%s31982_s13 + $0x10] sm:$0xff] }
 0xa23   :  { %v3351_v9 = vpop.f32.mrb[32].mxu1 }
 0xa24   :  { %v20859_v10 = vpop.f32.mrb[33].mxu1 }
 0xa2b   :  { %v3193_v11 = vpop.f32.mrb[52].mxu0 }
 0xa2c   :  { %v20829_v12 = vpop.f32.mrb[53].mxu0  ;;  %v3197_v14 = vadd.f32 %v3193_v11, %v3039_v57  ;;  %v16756_v57 = vld [vmem:[%s32025_s29 + $0xa0] sm:$0xff] }
 0xa2d   :  { %v24062_v59 = vpack.c.bf16 %v16757_v58, %v16756_v57  ;;  %v16770_v11 = vld [vmem:[%s32025_s29 + $0x100] sm:$0xff]  ;;  %v16771_v12 = vld [vmem:[%s32025_s29 + $0x108] sm:$0xff]  ;;  %v16784_v58 = vld [vmem:[%s32025_s29 + $0x170] sm:$0xff] }
 0xa2e   :  { %v3355_v15 = vadd.f32 %v3351_v9, %v3197_v14  ;;  %v16767_v9 = vld [vmem:[%s32025_s29 + $0xf8] sm:$0xff]  ;;  %v24104_v14 = vpack.c.bf16 %v16771_v12, %v16770_v11  ;;  %v16808_v12 = vld [vmem:[%s31982_s13 + $0x20] sm:$0xff] }
 0xa2f   :  { %v24077_v10 = vpack.c.bf16 %v16767_v9, %v16766_v8 }
 0xa33   :  { %v3427_v35 = vpop.f32.mrb[54].mxu0 }
 0xa34   :  { %v20870_v42 = vpop.f32.mrb[55].mxu0  ;;  %20888 = vmatmul.mubr.msk.f32.vlgmr.msra.gmra.mrb[56].mxu0 %vm2261_vm4, %v3427_v35  ;;  %v16772_v35 = vld [vmem:[%s32025_s29 + $0x110] sm:$0xff] }
 0xa35   :  { %20967 = vmatprep.mubr.msk.f32.mxu0 %vm25954_vm3, %v25955_v23  ;;  %24081 = vmatpush3.bf16.msra.mxu0 %v24080_v63  ;;  %v16773_v42 = vld [vmem:[%s32025_s29 + $0x118] sm:$0xff] }
 0xa36   :  { %24082 = vmatprep.subr.bf16.mxu0 %v25953_v22  ;;  %v24107_v56 = vpack.c.bf16 %v16773_v42, %v16772_v35  ;;  %v4182_v35 = vld [vmem:[%s31982_s13] sm:$0xff]  ;;  %v4183_v42 = vld [vmem:[%s31982_s13 + $0x8] sm:$0xff] }
 0xa39   :  { %24084 = vmatpush3.bf16.msra.mxu0 %v24083_v16 }
 0xa3a   :  { %24085 = vmatprep.subr.bf16.mxu0 %v25953_v22 }
 0xa3d   :  { %24087 = vmatpush3.bf16.msra.mxu0 %v24086_v19  ;;  %v16789_v19 = vld [vmem:[%s32025_s29 + $0x188] sm:$0xff] }
 0xa3e   :  { %24088 = vmatprep.subr.bf16.mxu0 %v25953_v22  ;;  %v24128_v26 = vpack.c.bf16 %v16789_v19, %v16788_v17 }
 0xa41   :  { %24090 = vmatpush3.bf16.msra.mxu0 %v24089_v24  ;;  %v16777_v24 = vld [vmem:[%s32025_s29 + $0x138] sm:$0xff] }
 0xa42   :  { %24091 = vmatprep.subr.bf16.mxu0 %v25953_v22  ;;  %v24113_v29 = vpack.c.bf16 %v16777_v24, %v16776_v21  ;;  %v16804_v24 = vld [vmem:[%s31983_s11] ss:$0 sm:$0xff] }
 0xa45   :  { %24093 = vmatpush3.bf16.msra.mxu0 %v24092_v27  ;;  %v16790_v27 = vld [vmem:[%s32025_s29 + $0x190] sm:$0xff] }
 0xa46   :  { %24094 = vmatprep.subr.bf16.mxu0 %v25953_v22  ;;  %v24131_v32 = vpack.c.bf16 %v16791_v28, %v16790_v27  ;;  %v16820_v27 = vld [vmem:[%s31982_s13 + $0x40] sm:$0xff]  ;;  %v16821_v28 = vld [vmem:[%s31982_s13 + $0x48] sm:$0xff] }
 0xa49   :  { %24096 = vmatpush3.bf16.msra.mxu0 %v24095_v30  ;;  %v16778_v30 = vld [vmem:[%s32025_s29 + $0x140] sm:$0xff] }
 0xa4a   :  { %24097 = vmatprep.subr.bf16.mxu0 %v25953_v22  ;;  %v24116_v36 = vpack.c.bf16 %v16779_v31, %v16778_v30  ;;  %v24164_v30 = vpack.c.bf16 %v16821_v28, %v16820_v27  ;;  %v16848_v27 = vld [vmem:[%s31986_s16 + $0xa8] sm:$0xff] }
 0xa4d   :  { %24099 = vmatpush3.bf16.msra.mxu0 %v24098_v33  ;;  %v16792_v33 = vld [vmem:[%s32025_s29 + $0x1a0] sm:$0xff] }
 0xa4e   :  { %24100 = vmatprep.subr.bf16.mxu0 %v25953_v22 }
 0xa51   :  { %24102 = vmatpush3.bf16.msra.mxu0 %v24101_v37  ;;  %v16780_v37 = vld [vmem:[%s32025_s29 + $0x150] sm:$0xff] }
 0xa52   :  { %24103 = vmatprep.subr.bf16.mxu0 %v25953_v22 }
 0xb07   :  { %v3509_v38 = vpop.f32.mrb[56].mxu0 }
 0xb08   :  { %v3513_v40 = vadd.f32 %v3509_v38, %v3355_v15  ;;  %v20889_v41 = vpop.f32.mrb[57].mxu0  ;;  %v16781_v38 = vld [vmem:[%s32025_s29 + $0x158] sm:$0xff] }
 0xb09   :  { %v16795_v41 = vld [vmem:[%s32025_s29 + $0x1b8] sm:$0xff] }
 0xb0a   :  { %v3521_v43 = vadd.f32 %v16748_v39, %v3513_v40  ;;  %v24134_v39 = vpack.c.bf16 %v16793_v34, %v16792_v33  ;;  %v16794_v40 = vld [vmem:[%s32025_s29 + $0x1b0] sm:$0xff]  ;;  %v16823_v33 = vld [vmem:[%s31982_s13 + $0x58] sm:$0xff] }
 0xb0c   :  { %v27055_v44 = vmax.f32 %v3521_v43, 0.0  ;;  %v24119_v43 = vpack.c.bf16 %v16781_v38, %v16780_v37  ;;  %v16805_v37 = vld [vmem:[%s31984_s14] ss:$0 sm:$0xff] }
 0xb0e   :  { %20891 = vmatpush3.msra.mxu1 %v27055_v44 }
 0xb0f   :  { %20893 = vmatmul.mubr.msk.f32.vlgmr.msra.gmra.mrb[34].mxu1 %vm3524_vm5, %v3523_v45  ;;  %20895 = vmatprep.subr.mxu1 %v25955_v23  ;;  %v16796_v45 = vld [vmem:[%s32025_s29 + $0x1c0] sm:$0xff] }
 0xb10   :  { %20896 = vmatpush3.msra.mxu1 %v27055_v44  ;;  %20897 = vmatprep.mubr.msk.f32.mxu1 %vm25954_vm3, %v25955_v23  ;;  %v24140_v47 = vpack.c.bf16 %v16797_v46, %v16796_v45  ;;  %v16825_v46 = vld [vmem:[%s31984_s14 + $0x2] ss:$0 sm:$0xff] }
 0xb11   :  { %24055 = vmatprep.subr.bf16.mxu1 %v25953_v22 }
 0xb13   :  { %20898 = vmatmul.mubr.msk.f32.vlgmr.msra.gmra.mrb[36].mxu1 %vm3524_vm5, %v16750_v50  ;;  %v16782_v50 = vld [vmem:[%s32025_s29 + $0x160] sm:$0xff] }
 0xb14   :  { %24057 = vmatpush3.bf16.msra.mxu1 %v24056_v51  ;;  %20932 = vmatprep.mubr.msk.f32.mxu1 %vm25954_vm3, %v25955_v23  ;;  %v16783_v51 = vld [vmem:[%s32025_s29 + $0x168] sm:$0xff] }
 0xb15   :  { %24058 = vmatprep.subr.bf16.mxu1 %v25953_v22  ;;  %v24122_v54 = vpack.c.bf16 %v16783_v51, %v16782_v50  ;;  %v4181_v51 = vld [vmem:[%s31985_s12] sm:$0xff] }
 0xb18   :  { %24060 = vmatpush3.bf16.msra.mxu1 %v24059_v55  ;;  %v16799_v55 = vld [vmem:[%s32025_s29 + $0x1d8] sm:$0xff] }
 0xb19   :  { %24061 = vmatprep.subr.bf16.mxu1 %v25953_v22  ;;  %v24143_v57 = vpack.c.bf16 %v16799_v55, %v16798_v52  ;;  %v16831_v55 = vld [vmem:[%s31982_s13 + $0x68] sm:$0xff] }
 0xb1c   :  { %24063 = vmatpush3.bf16.msra.mxu1 %v24062_v59  ;;  %v16785_v59 = vld [vmem:[%s32025_s29 + $0x178] sm:$0xff] }
 0xb1d   :  { %24064 = vmatprep.subr.bf16.mxu1 %v25953_v22  ;;  %v24125_v61 = vpack.c.bf16 %v16785_v59, %v16784_v58  ;;  %v16832_v59 = vld [vmem:[%s31982_s13 + $0x70] sm:$0xff] }
 0xb20   :  { %24066 = vmatpush3.bf16.msra.mxu1 %v24065_v62  ;;  %v16801_v62 = vld [vmem:[%s32025_s29 + $0x1e8] sm:$0xff] }
 0xb21   :  { %24067 = vmatprep.subr.bf16.mxu1 %v25953_v22  ;;  %v24146_v48 = vpack.c.bf16 %v16801_v62, %v16800_v60  ;;  %v16833_v60 = vld [vmem:[%s31982_s13 + $0x78] sm:$0xff]  ;;  %v4834_v62 = vld [vmem:[%s31986_s16] sm:$0xff] }
 0xb24   :  { %24069 = vmatpush3.bf16.msra.mxu1 %v24068_v1  ;;  %v16803_v1 = vld [vmem:[%s32025_s29 + $0x1f8] sm:$0xff] }
 0xb25   :  { %24070 = vmatprep.subr.bf16.mxu1 %v25953_v22  ;;  %v24149_v2 = vpack.c.bf16 %v16803_v1, %v16802_v0  ;;  %v4836_v1 = vld [vmem:[%s31986_s16 + $0x10] sm:$0xff] }
 0xb28   :  { %24072 = vmatpush3.bf16.msra.mxu1 %v24071_v3 }
 0xb29   :  { %24073 = vmatprep.subr.bf16.mxu1 %v25953_v22 }
 0xb2c   :  { %24075 = vmatpush3.bf16.msra.mxu1 %v24074_v7 }
 0xb2d   :  { %24076 = vmatprep.subr.bf16.mxu1 %v25953_v22 }
 0xb30   :  { %24078 = vmatpush3.bf16.msra.mxu1 %v24077_v10 }
 0xb31   :  { %20970 = vmatprep.subr.mxu1 %v25955_v23 }
 0xbe2   :  { %v3594_v15 = vpop.f32.mrb[34].mxu1 }
 0xbe3   :  { %v20894_v49 = vpop.f32.mrb[35].mxu1  ;;  %20968 = vmatmul.mubr.f32.vlgmr.msra.gmra.mrb[58].mxu0 %v3594_v15 }
 0xbe4   :  { %24105 = vmatpush3.bf16.msra.mxu0 %v24104_v14  ;;  %21007 = vmatprep.mubr.msk.f32.mxu0 %vm25954_vm3, %v25955_v23  ;;  %v16809_v14 = vld [vmem:[%s31982_s13 + $0x28] sm:$0xff]  ;;  %v24152_v49 = vpack.c.bf16 %v4183_v42, %v4182_v35  ;;  %v4846_v42 = vld [vmem:[%s31986_s16 + $0x60] sm:$0xff] }
 0xbe5   :  { %24106 = vmatprep.subr.bf16.mxu0 %v25953_v22  ;;  %v24158_v15 = vpack.c.bf16 %v16809_v14, %v16808_v12  ;;  %v4844_v14 = vld [vmem:[%s31986_s16 + $0x50] sm:$0xff] }
 0xbe6   :  { %v3685_v63 = vpop.f32.mrb[36].mxu1 }
 0xbe7   :  { %v20899_v16 = vpop.f32.mrb[37].mxu1  ;;  %20933 = vmatmul.mubr.f32.vlgmr.msra.gmra.mrb[38].mxu1 %v3685_v63  ;;  %v16811_v63 = vld [vmem:[%s31982_s13 + $0x38] sm:$0xff] }
 0xbe8   :  { %20971 = vmatpush3.msra.mxu1 %v27055_v44  ;;  %20972 = vmatprep.mubr.msk.f32.mxu1 %vm25954_vm3, %v25955_v23  ;;  %v4185_v16 = vld [vmem:[%s31982_s13 + $0x18] sm:$0xff] }
 0xbe9   :  { %21010 = vmatprep.subr.mxu1 %v25955_v23  ;;  %24108 = vmatpush3.bf16.msra.mxu0 %v24107_v56  ;;  %v16810_v56 = vld [vmem:[%s31982_s13 + $0x30] sm:$0xff] }
 0xbea   :  { %24109 = vmatprep.subr.bf16.mxu0 %v25953_v22  ;;  %v24161_v6 = vpack.c.bf16 %v16811_v63, %v16810_v56  ;;  %v16835_v63 = vld [vmem:[%s31984_s14 + $0x3] ss:$0 sm:$0xff] }
 0xbeb   :  { %20973 = vmatmul.mubr.msk.f32.vlgmr.msra.gmra.mrb[40].mxu1 %vm3524_vm5, %v16768_v18  ;;  %v24155_v18 = vpack.c.bf16 %v4185_v16, %v4184_v13  ;;  %v16844_v13 = vld [vmem:[%s31986_s16 + $0x88] sm:$0xff] }
 0xbec   :  { %21011 = vmatpush3.msra.mxu1 %v27055_v44  ;;  %21012 = vmatprep.mubr.msk.f32.mxu1 %vm25954_vm3, %v25955_v23  ;;  %v24137_v44 = vpack.c.bf16 %v16795_v41, %v16794_v40 }
 0xbed   :  { %24127 = vmatprep.subr.bf16.mxu1 %v25953_v22  ;;  %24111 = vmatpush3.bf16.msra.mxu0 %v24110_v20 }
 0xbee   :  { %24112 = vmatprep.subr.bf16.mxu0 %v25953_v22 }
 0xbef   :  { %21013 = vmatmul.mubr.msk.f32.vlgmr.msra.gmra.mrb[42].mxu1 %vm3524_vm5, %v16786_v25 }
 0xbf0   :  { %24129 = vmatpush3.bf16.msra.mxu1 %v24128_v26  ;;  %21047 = vmatprep.mubr.msk.f32.mxu1 %vm25954_vm3, %v25955_v23 }
 0xbf1   :  { %24130 = vmatprep.subr.bf16.mxu1 %v25953_v22  ;;  %24114 = vmatpush3.bf16.msra.mxu0 %v24113_v29 }
 0xbf2   :  { %24115 = vmatprep.subr.bf16.mxu0 %v25953_v22 }
 0xbf4   :  { %24132 = vmatpush3.bf16.msra.mxu1 %v24131_v32  ;;  %v16822_v32 = vld [vmem:[%s31982_s13 + $0x50] sm:$0xff] }
 0xbf5   :  { %24133 = vmatprep.subr.bf16.mxu1 %v25953_v22  ;;  %24117 = vmatpush3.bf16.msra.mxu0 %v24116_v36  ;;  %v24167_v34 = vpack.c.bf16 %v16823_v33, %v16822_v32  ;;  %v16813_v36 = vld [vmem:[%s31984_s14 + $0x1] ss:$0 sm:$0xff]  ;;  %v16852_v33 = vld [vmem:[%s31986_s16 + $0xc8] sm:$0xff] }
 0xbf6   :  { %24118 = vmatprep.subr.bf16.mxu0 %v25953_v22  ;;  %v16851_v32 = vld [vmem:[%s31986_s16 + $0xc0] sm:$0xff] }
 0xbf8   :  { %24135 = vmatpush3.bf16.msra.mxu1 %v24134_v39 }
 0xbf9   :  { %24136 = vmatprep.subr.bf16.mxu1 %v25953_v22  ;;  %24120 = vmatpush3.bf16.msra.mxu0 %v24119_v43 }
 0xbfa   :  { %24121 = vmatprep.subr.bf16.mxu0 %v25953_v22 }
 0xbfc   :  { %24138 = vmatpush3.bf16.msra.mxu1 %v24137_v44  ;;  %v16807_v44 = vld [vmem:[%s31985_s12 + $0x8] sm:$0xff] }
 0xbfd   :  { %24139 = vmatprep.subr.bf16.mxu1 %v25953_v22  ;;  %24123 = vmatpush3.bf16.msra.mxu0 %v24122_v54  ;;  %v16830_v54 = vld [vmem:[%s31982_s13 + $0x60] sm:$0xff] }
 0xbfe   :  { %24124 = vmatprep.subr.bf16.mxu0 %v25953_v22  ;;  %v24170_v58 = vpack.c.bf16 %v16831_v55, %v16830_v54 }
 0xc00   :  { %24141 = vmatpush3.bf16.msra.mxu1 %v24140_v47 }
 0xc01   :  { %24142 = vmatprep.subr.bf16.mxu1 %v25953_v22  ;;  %24126 = vmatpush3.bf16.msra.mxu0 %v24125_v61  ;;  %v24173_v61 = vpack.c.bf16 %v16833_v60, %v16832_v59  ;;  %v16873_v59 = vld [vmem:[%s31986_s16 + $0x110] sm:$0xff]  ;;  %v16874_v60 = vld [vmem:[%s31986_s16 + $0x118] sm:$0xff] }
 0xc02   :  { %24151 = vmatprep.subr.bf16.mxu0 %v25953_v22 }
 0xc04   :  { %24144 = vmatpush3.bf16.msra.mxu1 %v24143_v57  ;;  %v16819_v57 = vld [vmem:[%s31985_s12 + $0x10] sm:$0xff] }
 0xc05   :  { %24145 = vmatprep.subr.bf16.mxu1 %v25953_v22 }
 0xc08   :  { %24147 = vmatpush3.bf16.msra.mxu1 %v24146_v48  ;;  %v4835_v48 = vld [vmem:[%s31986_s16 + $0x8] sm:$0xff] }
 0xc09   :  { %24148 = vmatprep.subr.bf16.mxu1 %v25953_v22  ;;  %v24176_v0 = vpack.c.bf16 %v4835_v48, %v4834_v62  ;;  %v16875_v62 = vld [vmem:[%s31986_s16 + $0x120] sm:$0xff]  ;;  %v16876_v48 = vld [vmem:[%s31986_s16 + $0x128] sm:$0xff] }
 0xc0c   :  { %24150 = vmatpush3.bf16.msra.mxu1 %v24149_v2  ;;  %v4837_v2 = vld [vmem:[%s31986_s16 + $0x18] sm:$0xff] }
 0xc0d   :  { %24157 = vmatprep.subr.bf16.mxu1 %v25953_v22 }
 0xcb6   :  { %v3842_v53 = vpop.f32.mrb[58].mxu0 }
 0xcb7   :  { %v20969_v3 = vpop.f32.mrb[59].mxu0 }
 0xcb8   :  { %v4838_v3 = vld [vmem:[%s31986_s16 + $0x20] sm:$0xff] }
 0xcba   :  { %v3772_v4 = vpop.f32.mrb[38].mxu1 }
 0xcbb   :  { %v3843_v5 = vadd.f32 %v3842_v53, %v3772_v4  ;;  %v20934_v7 = vpop.f32.mrb[39].mxu1  ;;  %v24179_v53 = vpack.c.bf16 %v4837_v2, %v4836_v1  ;;  %v4839_v4 = vld [vmem:[%s31986_s16 + $0x28] sm:$0xff]  ;;  %v16877_v1 = vld [vmem:[%s31986_s16 + $0x130] sm:$0xff]  ;;  %v16878_v2 = vld [vmem:[%s31986_s16 + $0x138] sm:$0xff] }
 0xcbc   :  { %v4840_v7 = vld [vmem:[%s31986_s16 + $0x30] sm:$0xff] }
 0xcbe   :  { %v3917_v8 = vpop.f32.mrb[40].mxu1 }
 0xcbf   :  { %v20974_v9 = vpop.f32.mrb[41].mxu1  ;;  %21008 = vmatmul.mubr.f32.vlgmr.msra.gmra.mrb[60].mxu0 %v3917_v8  ;;  %v4841_v8 = vld [vmem:[%s31986_s16 + $0x38] sm:$0xff] }
 0xcc0   :  { %21058 = vmatprep.mubr.msk.f32.mxu0 %vm25954_vm3, %v25955_v23  ;;  %24153 = vmatpush3.bf16.msra.mxu0 %v24152_v49  ;;  %v24185_v9 = vpack.c.bf16 %v4841_v8, %v4840_v7  ;;  %v4847_v49 = vld [vmem:[%s31986_s16 + $0x68] sm:$0xff]  ;;  %v16881_v7 = vld [vmem:[%s31986_s16 + $0x150] sm:$0xff]  ;;  %v16882_v8 = vld [vmem:[%s31986_s16 + $0x158] sm:$0xff] }
 0xcc1   :  { %24154 = vmatprep.subr.bf16.mxu0 %v25953_v22  ;;  %v24194_v56 = vpack.c.bf16 %v4847_v49, %v4846_v42  ;;  %v16919_v42 = vld [vmem:[%s31986_s16 + $0x200] sm:$0xff]  ;;  %v16920_v49 = vld [vmem:[%s31986_s16 + $0x208] sm:$0xff] }
 0xcc2   :  { %v4080_v10 = vpop.f32.mrb[42].mxu1 }
 0xcc3   :  { %v21014_v11 = vpop.f32.mrb[43].mxu1  ;;  %21048 = vmatmul.mubr.f32.vlgmr.msra.gmra.mrb[44].mxu1 %v4080_v10  ;;  %v4842_v10 = vld [vmem:[%s31986_s16 + $0x40] sm:$0xff] }
 0xcc4   :  { %21069 = vmatprep.mubr.msk.f32.mxu1 %vm25954_vm3, %v25955_v23  ;;  %24159 = vmatpush3.bf16.msra.mxu1 %v24158_v15  ;;  %v4843_v11 = vld [vmem:[%s31986_s16 + $0x48] sm:$0xff]  ;;  %v4845_v15 = vld [vmem:[%s31986_s16 + $0x58] sm:$0xff] }
 0xcc5   :  { %24160 = vmatprep.subr.bf16.mxu1 %v25953_v22  ;;  %24156 = vmatpush3.bf16.msra.mxu0 %v24155_v18  ;;  %v24188_v12 = vpack.c.bf16 %v4843_v11, %v4842_v10  ;;  %v24191_v35 = vpack.c.bf16 %v4845_v15, %v4844_v14  ;;  %v16883_v10 = vld [vmem:[%s31986_s16 + $0x160] sm:$0xff]  ;;  %v16884_v11 = vld [vmem:[%s31986_s16 + $0x168] sm:$0xff]  ;;  %v16885_v14 = vld [vmem:[%s31986_s16 + $0x170] sm:$0xff] }
 0xcc6   :  { %21072 = vmatprep.subr.mxu0 %v25955_v23  ;;  %v16886_v15 = vld [vmem:[%s31986_s16 + $0x178] sm:$0xff] }
 0xcc8   :  { %24162 = vmatpush3.bf16.msra.mxu1 %v24161_v6  ;;  %v16843_v6 = vld [vmem:[%s31986_s16 + $0x80] sm:$0xff] }
 0xcc9   :  { %24163 = vmatprep.subr.bf16.mxu1 %v25953_v22 }
 0xd92   :  { %v4004_v17 = vpop.f32.mrb[60].mxu0 }
 0xd93   :  { %v21009_v19 = vpop.f32.mrb[61].mxu0  ;;  %v4008_v20 = vadd.f32 %v4004_v17, %v3843_v5  ;;  %v24182_v5 = vpack.c.bf16 %v4839_v4, %v4838_v3  ;;  %v16879_v3 = vld [vmem:[%s31986_s16 + $0x140] sm:$0xff]  ;;  %v16880_v4 = vld [vmem:[%s31986_s16 + $0x148] sm:$0xff] }
 0xd94   :  { %v16829_v19 = vld [vmem:[%s31985_s12 + $0x18] sm:$0xff] }
 0xd96   :  { %v4167_v21 = vpop.f32.mrb[44].mxu1 }
 0xd97   :  { %v4171_v25 = vadd.f32 %v4167_v21, %v4008_v20  ;;  %v21049_v26 = vpop.f32.mrb[45].mxu1  ;;  %v24200_v20 = vpack.c.bf16 %v16844_v13, %v16843_v6  ;;  %v16845_v21 = vld [vmem:[%s31986_s16 + $0x90] sm:$0xff]  ;;  %v16922_v6 = vld [vmem:[%s31986_s16 + $0x218] sm:$0xff] }
 0xd98   :  { %v16847_v26 = vld [vmem:[%s31986_s16 + $0xa0] sm:$0xff] }
 0xd99   :  { %v4179_v29 = vadd.f32 %v16804_v24, %v4171_v25  ;;  %v16846_v24 = vld [vmem:[%s31986_s16 + $0x98] sm:$0xff]  ;;  %v24206_v28 = vpack.c.bf16 %v16848_v27, %v16847_v26  ;;  %v16929_v27 = vld [vmem:[%s31986_s16 + $0x250] sm:$0xff] }
 0xd9a   :  { %v24203_v25 = vpack.c.bf16 %v16846_v24, %v16845_v21  ;;  %v16927_v24 = vld [vmem:[%s31986_s16 + $0x240] sm:$0xff] }
 0xd9b   :  { %v4180_v31 = vmax.f32 %v4179_v29, 0.0  ;;  %v16849_v29 = vld [vmem:[%s31986_s16 + $0xb0] sm:$0xff] }
 0xd9d   :  { %21059 = vmatmul.mubr.msk.f32.vlgmr.msra.gmra.mrb[62].mxu0 %vm513_vm2, %v4180_v31  ;;  %21070 = vmatmul.mubr.msk.f32.vlgmr.msra.gmra.mrb[46].mxu1 %vm513_vm2, %v4180_v31 }
 0xd9e   :  { %24165 = vmatpush3.bf16.msra.mxu1 %v24164_v30  ;;  %21090 = vmatprep.mubr.msk.f32.mxu1 %vm25954_vm3, %v25955_v23  ;;  %v16850_v30 = vld [vmem:[%s31986_s16 + $0xb8] sm:$0xff] }
 0xd9f   :  { %24166 = vmatprep.subr.bf16.mxu1 %v25953_v22  ;;  %21074 = vmatprep.mubr.msk.f32.mxu0 %vm25954_vm3, %v25955_v23 }
 0xda2   :  { %24168 = vmatpush3.bf16.msra.mxu1 %v24167_v34  ;;  %v24212_v34 = vpack.c.bf16 %v16852_v33, %v16851_v32  ;;  %v16933_v33 = vld [vmem:[%s31986_s16 + $0x270] sm:$0xff] }
 0xda3   :  { %24175 = vmatprep.subr.bf16.mxu1 %v25953_v22 }
 0xda5   :  { %21091 = vmatmul.mubr.msk.f32.vlgmr.msra.gmra.mrb[48].mxu1 %vm513_vm2, %v4180_v31 }
 0xda6   :  { %21146 = vmatprep.mubr.msk.f32.mxu1 %vm25954_vm3, %v25955_v23  ;;  %24177 = vmatpush3.bf16.msra.mxu1 %v24176_v0  ;;  %v24230_v0 = vpack.c.bf16 %v16876_v48, %v16875_v62  ;;  %v16980_v62 = vld [vmem:[%s31986_s16 + $0x368] sm:$0xff] }
 0xda7   :  { %24178 = vmatprep.subr.bf16.mxu1 %v25953_v22 }
 0xdaa   :  { %24180 = vmatpush3.bf16.msra.mxu1 %v24179_v53  ;;  %v24233_v53 = vpack.c.bf16 %v16878_v2, %v16877_v1  ;;  %v16982_v1 = vld [vmem:[%s31986_s16 + $0x378] sm:$0xff]  ;;  %v16839_v2 = vld [vmem:[%s31987_s15 + $0x20] sm:$0xff] }
 0xdab   :  { %24181 = vmatprep.subr.bf16.mxu1 %v25953_v22 }
 0xdae   :  { %24183 = vmatpush3.bf16.msra.mxu1 %v24182_v5  ;;  %v24236_v5 = vpack.c.bf16 %v16880_v4, %v16879_v3  ;;  %v16991_v3 = vld [vmem:[%s31986_s16 + $0x380] sm:$0xff]  ;;  %v16992_v4 = vld [vmem:[%s31986_s16 + $0x388] sm:$0xff] }
 0xdaf   :  { %24184 = vmatprep.subr.bf16.mxu1 %v25953_v22 }
 0xdb2   :  { %24186 = vmatpush3.bf16.msra.mxu1 %v24185_v9  ;;  %v24239_v9 = vpack.c.bf16 %v16882_v8, %v16881_v7  ;;  %v16993_v7 = vld [vmem:[%s31986_s16 + $0x390] sm:$0xff]  ;;  %v16994_v8 = vld [vmem:[%s31986_s16 + $0x398] sm:$0xff] }
 0xdb3   :  { %24187 = vmatprep.subr.bf16.mxu1 %v25953_v22 }
 0xdb6   :  { %24189 = vmatpush3.bf16.msra.mxu1 %v24188_v12  ;;  %v24242_v12 = vpack.c.bf16 %v16884_v11, %v16883_v10  ;;  %v16995_v10 = vld [vmem:[%s31986_s16 + $0x3a0] sm:$0xff]  ;;  %v16996_v11 = vld [vmem:[%s31986_s16 + $0x3a8] sm:$0xff] }
 0xdb7   :  { %24190 = vmatprep.subr.bf16.mxu1 %v25953_v22 }
 0xdba   :  { %24192 = vmatpush3.bf16.msra.mxu1 %v24191_v35  ;;  %v24245_v35 = vpack.c.bf16 %v16886_v15, %v16885_v14  ;;  %v16997_v14 = vld [vmem:[%s31986_s16 + $0x3b0] sm:$0xff]  ;;  %v16998_v15 = vld [vmem:[%s31986_s16 + $0x3b8] sm:$0xff] }
 0xdbb   :  { %24193 = vmatprep.subr.bf16.mxu1 %v25953_v22 }
 0xdbe   :  { %24195 = vmatpush3.bf16.msra.mxu1 %v24194_v56  ;;  %v24272_v56 = vpack.c.bf16 %v16920_v49, %v16919_v42  ;;  %v16999_v42 = vld [vmem:[%s31986_s16 + $0x3c0] sm:$0xff]  ;;  %v17000_v49 = vld [vmem:[%s31986_s16 + $0x3c8] sm:$0xff] }
 0xdbf   :  { %24196 = vmatprep.subr.bf16.mxu1 %v25953_v22 }
 0xe70   :  { %v4262_v38 = vpop.f32.mrb[62].mxu0  ;;  %v4347_v39 = vpop.f32.mrb[46].mxu1 }
 0xe71   :  { %v4348_v40 = vadd.f32 %v16813_v36, %v4347_v39  ;;  %v21060_v41 = vpop.f32.mrb[63].mxu0  ;;  %v21071_v43 = vpop.f32.mrb[47].mxu1  ;;  %v4263_v45 = vadd.f32 %v16805_v37, %v4262_v38  ;;  %v16853_v36 = vld [vmem:[%s31986_s16 + $0xd0] sm:$0xff]  ;;  %v16854_v37 = vld [vmem:[%s31986_s16 + $0xd8] sm:$0xff]  ;;  %v16855_v39 = vld [vmem:[%s31986_s16 + $0xe0] sm:$0xff] }
 0xe72   :  { %v24215_v38 = vpack.c.bf16 %v16854_v37, %v16853_v36  ;;  %v16857_v43 = vld [vmem:[%s31986_s16 + $0xf0] sm:$0xff]  ;;  %v16967_v37 = vld [vmem:[%s31986_s16 + $0x300] sm:$0xff] }
 0xe73   :  { %21073 = vmatpush3.msk.msra.mxu0 %vm4355_vm6, %v4348_v40  ;;  %v16856_v40 = vld [vmem:[%s31986_s16 + $0xe8] sm:$0xff] }
 0xe74   :  { %21075 = vmatmul.mubr.msk.f32.vlgmr.msra.gmra.mrb[64].mxu0 %vm4351_vm7, %v16807_v44  ;;  %21077 = vmatprep.subr.mxu0 %v25955_v23  ;;  %v24218_v41 = vpack.c.bf16 %v16856_v40, %v16855_v39  ;;  %v16858_v44 = vld [vmem:[%s31986_s16 + $0xf8] sm:$0xff]  ;;  %v16969_v40 = vld [vmem:[%s31986_s16 + $0x310] sm:$0xff] }
 0xe75   :  { %21078 = vmatpush3.msk.msra.mxu0 %vm4355_vm6, %v4263_v45  ;;  %21079 = vmatprep.mubr.msk.f32.mxu0 %vm25954_vm3, %v25955_v23  ;;  %v24221_v45 = vpack.c.bf16 %v16858_v44, %v16857_v43  ;;  %v16971_v44 = vld [vmem:[%s31986_s16 + $0x320] sm:$0xff] }
 0xe76   :  { %21093 = vmatprep.subr.mxu0 %v25955_v23 }
 0xe78   :  { %v4586_v47 = vpop.f32.mrb[48].mxu1 }
 0xe79   :  { %v21092_v50 = vpop.f32.mrb[49].mxu1  ;;  %v4587_v52 = vadd.f32 %v16825_v46, %v4586_v47  ;;  %v4848_v46 = vld [vmem:[%s31986_s16 + $0x70] sm:$0xff]  ;;  %v4849_v47 = vld [vmem:[%s31986_s16 + $0x78] sm:$0xff] }
 0xe7a   :  { %v24197_v50 = vpack.c.bf16 %v4849_v47, %v4848_v46  ;;  %v16973_v47 = vld [vmem:[%s31986_s16 + $0x330] sm:$0xff] }
 0xe7c   :  { %21080 = vmatmul.mubr.msk.f32.vlgmr.msra.gmra.mrb[64].mxu0 %vm4351_vm7, %v4181_v51  ;;  %24198 = vmatpush3.bf16.msra.mxu1 %v24197_v50  ;;  %v16871_v51 = vld [vmem:[%s31986_s16 + $0x100] sm:$0xff]  ;;  %v16974_v50 = vld [vmem:[%s31986_s16 + $0x338] sm:$0xff] }
 0xe7d   :  { %21094 = vmatpush3.msk.msra.mxu0 %vm4355_vm6, %v4587_v52  ;;  %21095 = vmatprep.mubr.msk.f32.mxu0 %vm25954_vm3, %v25955_v23  ;;  %v16872_v52 = vld [vmem:[%s31986_s16 + $0x108] sm:$0xff] }
 0xe7e   :  { %24169 = vmatprep.subr.bf16.mxu0 %v25953_v22  ;;  %v24224_v55 = vpack.c.bf16 %v16872_v52, %v16871_v51  ;;  %v24329_v51 = vpack.c.bf16 %v16974_v50, %v16973_v47  ;;  %v16975_v52 = vld [vmem:[%s31986_s16 + $0x340] sm:$0xff]  ;;  %v16870_v50 = vld [vmem:[%s31987_s15 + $0x58] sm:$0xff] }
 0xe84   :  { %21096 = vmatmul.mubr.msk.f32.vlgmr.msra.gmra.mrb[64].mxu0 %vm4351_vm7, %v16819_v57 }
 0xe85   :  { %24171 = vmatpush3.bf16.msra.mxu0 %v24170_v58  ;;  %21106 = vmatprep.mubr.msk.f32.mxu0 %vm25954_vm3, %v25955_v23 }
 0xe86   :  { %24172 = vmatprep.subr.bf16.mxu0 %v25953_v22 }
 0xe89   :  { %24174 = vmatpush3.bf16.msra.mxu0 %v24173_v61  ;;  %v24227_v61 = vpack.c.bf16 %v16874_v60, %v16873_v59  ;;  %v16978_v59 = vld [vmem:[%s31986_s16 + $0x358] sm:$0xff] }
 0xe8a   :  { %21109 = vmatprep.subr.mxu0 %v25955_v23 }
 0xe8c   :  { %21107 = vmatmul.mubr.msk.f32.vlgmr.msra.gmra.mrb[66].mxu0 %vm513_vm2, %v4180_v31  ;;  %v24209_v31 = vpack.c.bf16 %v16850_v30, %v16849_v29  ;;  %v16931_v30 = vld [vmem:[%s31986_s16 + $0x260] sm:$0xff] }
 0xe8d   :  { %21111 = vmatprep.mubr.msk.f32.mxu0 %vm25954_vm3, %v25955_v23 }
 0xf5f   :  { %v4748_v16 = vpop.f32.mrb[66].mxu0 }
 0xf60   :  { %v4749_v18 = vadd.f32 %v16835_v63, %v4748_v16  ;;  %v21108_v17 = vpop.f32.mrb[67].mxu0  ;;  %v16921_v63 = vld [vmem:[%s31986_s16 + $0x210] sm:$0xff]  ;;  %v16923_v16 = vld [vmem:[%s31986_s16 + $0x220] sm:$0xff] }
 0xf61   :  { %v24275_v13 = vpack.c.bf16 %v16922_v6, %v16921_v63  ;;  %v17001_v63 = vld [vmem:[%s31986_s16 + $0x3d0] sm:$0xff]  ;;  %v17002_v6 = vld [vmem:[%s31986_s16 + $0x3d8] sm:$0xff] }
 0xf62   :  { %21110 = vmatpush3.msk.msra.mxu0 %vm4355_vm6, %v4749_v18  ;;  %v16924_v18 = vld [vmem:[%s31986_s16 + $0x228] sm:$0xff] }
 0xf63   :  { %21112 = vmatmul.mubr.msk.f32.vlgmr.msra.gmra.mrb[64].mxu0 %vm4351_vm7, %v16829_v19  ;;  %24199 = vmatprep.subr.bf16.mxu0 %v25953_v22  ;;  %v24278_v17 = vpack.c.bf16 %v16924_v18, %v16923_v16  ;;  %v16925_v19 = vld [vmem:[%s31986_s16 + $0x230] sm:$0xff]  ;;  %v17003_v16 = vld [vmem:[%s31986_s16 + $0x3e0] sm:$0xff]  ;;  %v17004_v18 = vld [vmem:[%s31986_s16 + $0x3e8] sm:$0xff] }
 0xf64   :  { %24201 = vmatpush3.bf16.msra.mxu0 %v24200_v20  ;;  %21181 = vmatprep.mubr.msk.f32.mxu0 %vm25954_vm3, %v25955_v23  ;;  %v16926_v20 = vld [vmem:[%s31986_s16 + $0x238] sm:$0xff] }
 0xf65   :  { %24202 = vmatprep.subr.bf16.mxu0 %v25953_v22  ;;  %v24281_v21 = vpack.c.bf16 %v16926_v20, %v16925_v19  ;;  %v17005_v19 = vld [vmem:[%s31986_s16 + $0x3f0] sm:$0xff]  ;;  %v17006_v20 = vld [vmem:[%s31986_s16 + $0x3f8] sm:$0xff] }
 0xf68   :  { %24204 = vmatpush3.bf16.msra.mxu0 %v24203_v25  ;;  %v16928_v25 = vld [vmem:[%s31986_s16 + $0x248] sm:$0xff] }
 0xf69   :  { %24205 = vmatprep.subr.bf16.mxu0 %v25953_v22  ;;  %v24284_v26 = vpack.c.bf16 %v16928_v25, %v16927_v24 }
 0xf6c   :  { %24207 = vmatpush3.bf16.msra.mxu0 %v24206_v28  ;;  %v16930_v28 = vld [vmem:[%s31986_s16 + $0x258] sm:$0xff] }
 0xf6d   :  { %24208 = vmatprep.subr.bf16.mxu0 %v25953_v22  ;;  %v24287_v29 = vpack.c.bf16 %v16930_v28, %v16929_v27 }
 0xf70   :  { %24210 = vmatpush3.bf16.msra.mxu0 %v24209_v31  ;;  %v16932_v31 = vld [vmem:[%s31986_s16 + $0x268] sm:$0xff] }
 0xf71   :  { %24211 = vmatprep.subr.bf16.mxu0 %v25953_v22  ;;  %v24290_v32 = vpack.c.bf16 %v16932_v31, %v16931_v30  ;;  %v16842_v30 = vld [vmem:[%s31987_s15 + $0x38] sm:$0xff]  ;;  %v4830_v31 = vld [vmem:[%s31987_s15] sm:$0xff] }
 0xf74   :  { %24213 = vmatpush3.bf16.msra.mxu0 %v24212_v34  ;;  %v16934_v34 = vld [vmem:[%s31986_s16 + $0x278] sm:$0xff] }
 0xf75   :  { %24214 = vmatprep.subr.bf16.mxu0 %v25953_v22  ;;  %v24293_v36 = vpack.c.bf16 %v16934_v34, %v16933_v33  ;;  %v4832_v33 = vld [vmem:[%s31987_s15 + $0x10] sm:$0xff]  ;;  %v4833_v34 = vld [vmem:[%s31987_s15 + $0x18] sm:$0xff] }
 0xf78   :  { %24216 = vmatpush3.bf16.msra.mxu0 %v24215_v38  ;;  %v16968_v38 = vld [vmem:[%s31986_s16 + $0x308] sm:$0xff] }
 0xf79   :  { %24217 = vmatprep.subr.bf16.mxu0 %v25953_v22  ;;  %v24320_v39 = vpack.c.bf16 %v16968_v38, %v16967_v37  ;;  %v16895_v37 = vld [vmem:[%s31986_s16 + $0x180] sm:$0xff]  ;;  %v16896_v38 = vld [vmem:[%s31986_s16 + $0x188] sm:$0xff] }
 0xf7c   :  { %24219 = vmatpush3.bf16.msra.mxu0 %v24218_v41  ;;  %v16970_v41 = vld [vmem:[%s31986_s16 + $0x318] sm:$0xff] }
 0xf7d   :  { %24220 = vmatprep.subr.bf16.mxu0 %v25953_v22  ;;  %v24323_v43 = vpack.c.bf16 %v16970_v41, %v16969_v40  ;;  %v16868_v40 = vld [vmem:[%s31987_s15 + $0x48] sm:$0xff]  ;;  %v24248_v41 = vpack.c.bf16 %v16896_v38, %v16895_v37  ;;  %v16954_v37 = vld [vmem:[%s31986_s16 + $0x2d8] sm:$0xff] }
 0xf80   :  { %24222 = vmatpush3.bf16.msra.mxu0 %v24221_v45  ;;  %v16972_v45 = vld [vmem:[%s31986_s16 + $0x328] sm:$0xff] }
 0xf81   :  { %24223 = vmatprep.subr.bf16.mxu0 %v25953_v22  ;;  %v24326_v46 = vpack.c.bf16 %v16972_v45, %v16971_v44  ;;  %v16897_v44 = vld [vmem:[%s31986_s16 + $0x190] sm:$0xff]  ;;  %v16898_v45 = vld [vmem:[%s31986_s16 + $0x198] sm:$0xff] }
 0xf82   :  { %v24251_v47 = vpack.c.bf16 %v16898_v45, %v16897_v44  ;;  %v16958_v44 = vld [vmem:[%s31986_s16 + $0x2f8] sm:$0xff] }
0x1036   :  { %v4824_v54 = vpop.f32.mrb[64].mxu0 }
0x1037   :  { %v27497_v57 = vmax.f32 %v4824_v54, 0.0  ;;  %v21113_v58 = vpop.f32.mrb[65].mxu0  ;;  %v16976_v54 = vld [vmem:[%s31986_s16 + $0x348] sm:$0xff] }
0x1038   :  { %v16977_v58 = vld [vmem:[%s31986_s16 + $0x350] sm:$0xff] }
0x1039   :  { %21147 = vmatmul.mubr.f32.vlgmr.msra.gmra.mrb[50].mxu1 %v27497_v57  ;;  %21182 = vmatmul.mubr.f32.vlgmr.msra.gmra.mrb[68].mxu0 %v27497_v57  ;;  %v24335_v60 = vpack.c.bf16 %v16978_v59, %v16977_v58  ;;  %v16902_v58 = vld [vmem:[%s31986_s16 + $0x1b8] sm:$0xff] }
0x103a   :  { %24225 = vmatpush3.bf16.msra.mxu0 %v24224_v55  ;;  %21232 = vmatprep.mubr.msk.f32.mxu0 %vm25954_vm3, %v25955_v23  ;;  %v24332_v55 = vpack.c.bf16 %v16976_v54, %v16975_v52  ;;  %v16900_v52 = vld [vmem:[%s31986_s16 + $0x1a8] sm:$0xff] }
0x103b   :  { %24226 = vmatprep.subr.bf16.mxu0 %v25953_v22  ;;  %21186 = vmatprep.mubr.msk.f32.mxu1 %vm3524_vm5, %v16839_v2  ;;  %v16907_v2 = vld [vmem:[%s31986_s16 + $0x1e0] sm:$0xff] }
0x103e   :  { %24228 = vmatpush3.bf16.msra.mxu0 %v24227_v61  ;;  %v16979_v61 = vld [vmem:[%s31986_s16 + $0x360] sm:$0xff] }
0x103f   :  { %24229 = vmatprep.subr.bf16.mxu0 %v25953_v22  ;;  %v24338_v48 = vpack.c.bf16 %v16980_v62, %v16979_v61  ;;  %v16904_v61 = vld [vmem:[%s31986_s16 + $0x1c8] sm:$0xff] }
0x1042   :  { %24231 = vmatpush3.bf16.msra.mxu0 %v24230_v0  ;;  %v16981_v0 = vld [vmem:[%s31986_s16 + $0x370] sm:$0xff] }
0x1043   :  { %24232 = vmatprep.subr.bf16.mxu0 %v25953_v22 }
0x1046   :  { %24234 = vmatpush3.bf16.msra.mxu0 %v24233_v53  ;;  %v24341_v53 = vpack.c.bf16 %v16982_v1, %v16981_v0  ;;  %v16906_v0 = vld [vmem:[%s31986_s16 + $0x1d8] sm:$0xff] }
0x1047   :  { %24235 = vmatprep.subr.bf16.mxu0 %v25953_v22 }
0x104a   :  { %24237 = vmatpush3.bf16.msra.mxu0 %v24236_v5  ;;  %v24344_v5 = vpack.c.bf16 %v16992_v4, %v16991_v3  ;;  %v16909_v4 = vld [vmem:[%s31986_s16 + $0x1f0] sm:$0xff] }
0x104b   :  { %24238 = vmatprep.subr.bf16.mxu0 %v25953_v22 }
0x104e   :  { %24240 = vmatpush3.bf16.msra.mxu0 %v24239_v9  ;;  %v24347_v9 = vpack.c.bf16 %v16994_v8, %v16993_v7 }
0x104f   :  { %24241 = vmatprep.subr.bf16.mxu0 %v25953_v22 }
0x1052   :  { %24243 = vmatpush3.bf16.msra.mxu0 %v24242_v12  ;;  %v24350_v12 = vpack.c.bf16 %v16996_v11, %v16995_v10 }
0x1053   :  { %24244 = vmatprep.subr.bf16.mxu0 %v25953_v22 }
0x1056   :  { %24246 = vmatpush3.bf16.msra.mxu0 %v24245_v35  ;;  %v24353_v35 = vpack.c.bf16 %v16998_v15, %v16997_v14  ;;  %v16891_v15 = vld [vmem:[%s31987_s15 + $0x60] sm:$0xff] }
0x1057   :  { %24271 = vmatprep.subr.bf16.mxu0 %v25953_v22 }
0x1059   :  { %21233 = vmatmul.mubr.f32.vlgmr.msra.gmra.mrb[70].mxu0 %v27497_v57 }
0x105a   :  { %24273 = vmatpush3.bf16.msra.mxu0 %v24272_v56  ;;  %21318 = vmatprep.mubr.msk.f32.mxu0 %vm25954_vm3, %v25955_v23  ;;  %v24356_v56 = vpack.c.bf16 %v17000_v49, %v16999_v42  ;;  %v16892_v42 = vld [vmem:[%s31987_s15 + $0x68] sm:$0xff] }
0x105b   :  { %24274 = vmatprep.subr.bf16.mxu0 %v25953_v22 }
0x105e   :  { %24276 = vmatpush3.bf16.msra.mxu0 %v24275_v13  ;;  %v24359_v13 = vpack.c.bf16 %v17002_v6, %v17001_v63  ;;  %v16894_v63 = vld [vmem:[%s31987_s15 + $0x78] sm:$0xff]  ;;  %v16915_v6 = vld [vmem:[%s31987_s15 + $0x80] sm:$0xff] }
0x105f   :  { %24277 = vmatprep.subr.bf16.mxu0 %v25953_v22 }
0x1062   :  { %24279 = vmatpush3.bf16.msra.mxu0 %v24278_v17  ;;  %v24362_v17 = vpack.c.bf16 %v17004_v18, %v17003_v16  ;;  %v16944_v16 = vld [vmem:[%s31986_s16 + $0x288] sm:$0xff] }
0x1063   :  { %24280 = vmatprep.subr.bf16.mxu0 %v25953_v22  ;;  %v16916_v18 = vld [vmem:[%s31987_s15 + $0x88] sm:$0xff] }
0x1066   :  { %24282 = vmatpush3.bf16.msra.mxu0 %v24281_v21  ;;  %v24365_v21 = vpack.c.bf16 %v17006_v20, %v17005_v19  ;;  %v16945_v19 = vld [vmem:[%s31986_s16 + $0x290] sm:$0xff]  ;;  %v16946_v20 = vld [vmem:[%s31986_s16 + $0x298] sm:$0xff] }
0x1067   :  { %24283 = vmatprep.subr.bf16.mxu0 %v25953_v22 }
0x106a   :  { %24285 = vmatpush3.bf16.msra.mxu0 %v24284_v26  ;;  %v16840_v26 = vld [vmem:[%s31987_s15 + $0x28] sm:$0xff] }
0x106b   :  { %24286 = vmatprep.subr.bf16.mxu0 %v25953_v22 }
0x106e   :  { %24288 = vmatpush3.bf16.msra.mxu0 %v24287_v29  ;;  %v16841_v29 = vld [vmem:[%s31987_s15 + $0x30] sm:$0xff] }
0x106f   :  { %24289 = vmatprep.subr.bf16.mxu0 %v25953_v22 }
0x1072   :  { %24291 = vmatpush3.bf16.msra.mxu0 %v24290_v32  ;;  %v4831_v32 = vld [vmem:[%s31987_s15 + $0x8] sm:$0xff] }
0x1073   :  { %24292 = vmatprep.subr.bf16.mxu0 %v25953_v22 }
0x1076   :  { %24294 = vmatpush3.bf16.msra.mxu0 %v24293_v36  ;;  %v16867_v36 = vld [vmem:[%s31987_s15 + $0x40] sm:$0xff] }
0x1077   :  { %24319 = vmatprep.subr.bf16.mxu0 %v25953_v22 }
0x1079   :  { %21319 = vmatmul.mubr.f32.vlgmr.msra.gmra.mrb[72].mxu0 %v27497_v57 }
0x107a   :  { %24321 = vmatpush3.bf16.msra.mxu0 %v24320_v39  ;;  %21404 = vmatprep.mubr.msk.f32.mxu0 %vm25954_vm3, %v25955_v23 }
0x107b   :  { %24322 = vmatprep.subr.bf16.mxu0 %v25953_v22 }
0x107e   :  { %24324 = vmatpush3.bf16.msra.mxu0 %v24323_v43 }
0x107f   :  { %24325 = vmatprep.subr.bf16.mxu0 %v25953_v22 }
0x1082   :  { %24327 = vmatpush3.bf16.msra.mxu0 %v24326_v46  ;;  %v16869_v46 = vld [vmem:[%s31987_s15 + $0x50] sm:$0xff] }
0x1083   :  { %24328 = vmatprep.subr.bf16.mxu0 %v25953_v22 }
0x1086   :  { %24330 = vmatpush3.bf16.msra.mxu0 %v24329_v51  ;;  %v16899_v51 = vld [vmem:[%s31986_s16 + $0x1a0] sm:$0xff] }
0x1087   :  { %24331 = vmatprep.subr.bf16.mxu0 %v25953_v22  ;;  %v24254_v54 = vpack.c.bf16 %v16900_v52, %v16899_v51  ;;  %v16941_v52 = vld [vmem:[%s31987_s15 + $0xb0] sm:$0xff] }
0x108a   :  { %24333 = vmatpush3.bf16.msra.mxu0 %v24332_v55  ;;  %v16901_v55 = vld [vmem:[%s31986_s16 + $0x1b0] sm:$0xff] }
0x108b   :  { %24334 = vmatprep.subr.bf16.mxu0 %v25953_v22  ;;  %v24257_v59 = vpack.c.bf16 %v16902_v58, %v16901_v55  ;;  %v16963_v55 = vld [vmem:[%s31987_s15 + $0xc0] sm:$0xff]  ;;  %v16964_v58 = vld [vmem:[%s31987_s15 + $0xc8] sm:$0xff] }
0x108e   :  { %24336 = vmatpush3.bf16.msra.mxu0 %v24335_v60  ;;  %v16903_v60 = vld [vmem:[%s31986_s16 + $0x1c0] sm:$0xff] }
0x108f   :  { %24337 = vmatprep.subr.bf16.mxu0 %v25953_v22  ;;  %v24260_v62 = vpack.c.bf16 %v16904_v61, %v16903_v60  ;;  %v16966_v60 = vld [vmem:[%s31987_s15 + $0xd8] sm:$0xff]  ;;  %v16987_v61 = vld [vmem:[%s31987_s15 + $0xe0] sm:$0xff] }
0x1092   :  { %24339 = vmatpush3.bf16.msra.mxu0 %v24338_v48  ;;  %v16905_v48 = vld [vmem:[%s31986_s16 + $0x1d0] sm:$0xff] }
0x1093   :  { %24340 = vmatprep.subr.bf16.mxu0 %v25953_v22  ;;  %v24263_v1 = vpack.c.bf16 %v16906_v0, %v16905_v48  ;;  %v17016_v48 = vld [vmem:[%s31986_s16 + $0x408] sm:$0xff] }
0x1094   :  { %v16988_v0 = vld [vmem:[%s31987_s15 + $0xe8] sm:$0xff] }
0x1096   :  { %24342 = vmatpush3.bf16.msra.mxu0 %v24341_v53  ;;  %v16908_v53 = vld [vmem:[%s31986_s16 + $0x1e8] sm:$0xff] }
0x1097   :  { %24343 = vmatprep.subr.bf16.mxu0 %v25953_v22  ;;  %v24266_v3 = vpack.c.bf16 %v16908_v53, %v16907_v2  ;;  %v17017_v2 = vld [vmem:[%s31986_s16 + $0x410] sm:$0xff]  ;;  %v17018_v53 = vld [vmem:[%s31986_s16 + $0x418] sm:$0xff] }
0x1099   :  { %21405 = vmatmul.mubr.f32.vlgmr.msra.gmra.mrb[74].mxu0 %v27497_v57 }
0x109a   :  { %24345 = vmatpush3.bf16.msra.mxu0 %v24344_v5  ;;  %21447 = vmatprep.mubr.msk.f32.mxu0 %vm25954_vm3, %v25955_v23  ;;  %v16910_v5 = vld [vmem:[%s31986_s16 + $0x1f8] sm:$0xff] }
0x109b   :  { %24346 = vmatprep.subr.bf16.mxu0 %v25953_v22  ;;  %v24269_v7 = vpack.c.bf16 %v16910_v5, %v16909_v4  ;;  %v24371_v4 = vpack.c.bf16 %v17018_v53, %v17017_v2  ;;  %v16990_v5 = vld [vmem:[%s31987_s15 + $0xf8] sm:$0xff] }
0x109e   :  { %24348 = vmatpush3.bf16.msra.mxu0 %v24347_v9 }
0x109f   :  { %24349 = vmatprep.subr.bf16.mxu0 %v25953_v22 }
0x10a2   :  { %24351 = vmatpush3.bf16.msra.mxu0 %v24350_v12 }
0x10a3   :  { %24352 = vmatprep.subr.bf16.mxu0 %v25953_v22 }
0x10a6   :  { %24354 = vmatpush3.bf16.msra.mxu0 %v24353_v35 }
0x10a7   :  { %24355 = vmatprep.subr.bf16.mxu0 %v25953_v22 }
0x10aa   :  { %24357 = vmatpush3.bf16.msra.mxu0 %v24356_v56  ;;  %v16893_v56 = vld [vmem:[%s31987_s15 + $0x70] sm:$0xff] }
0x10ab   :  { %24358 = vmatprep.subr.bf16.mxu0 %v25953_v22 }
0x10ae   :  { %24360 = vmatpush3.bf16.msra.mxu0 %v24359_v13  ;;  %v16943_v13 = vld [vmem:[%s31986_s16 + $0x280] sm:$0xff] }
0x10af   :  { %24361 = vmatprep.subr.bf16.mxu0 %v25953_v22 }
0x10b2   :  { %24363 = vmatpush3.bf16.msra.mxu0 %v24362_v17  ;;  %v24296_v17 = vpack.c.bf16 %v16944_v16, %v16943_v13  ;;  %v17029_v13 = vld [vmem:[%s31986_s16 + $0x470] sm:$0xff]  ;;  %v17030_v16 = vld [vmem:[%s31986_s16 + $0x478] sm:$0xff] }
0x10b3   :  { %24364 = vmatprep.subr.bf16.mxu0 %v25953_v22 }
0x10b6   :  { %24366 = vmatpush3.bf16.msra.mxu0 %v24365_v21  ;;  %v16917_v21 = vld [vmem:[%s31987_s15 + $0x90] sm:$0xff] }
0x10b9   :  { %21448 = vmatmul.mubr.f32.vlgmr.msra.gmra.mrb[76].mxu0 %v27497_v57 }
0x110c   :  { %v4916_v24 = vpop.f32.mrb[50].mxu1  ;;  %v5008_v25 = vpop.f32.mrb[68].mxu0 }
0x110d   :  { %v21148_v27 = vpop.f32.mrb[51].mxu1  ;;  %v21183_v28 = vpop.f32.mrb[69].mxu0  ;;  %21184 = vmatprep.subr.mxu1 %v5008_v25 }
0x110e   :  { %21185 = vmatpush3.msra.mxu1 %v5008_v25  ;;  %v16918_v25 = vld [vmem:[%s31987_s15 + $0x98] sm:$0xff]  ;;  %v16948_v27 = vld [vmem:[%s31986_s16 + $0x2a8] sm:$0xff] }
0x110f   :  { %21192 = vmatprep.subr.mxu1 %v4916_v24  ;;  %21187 = vmatmul.mubr.msk.f32.vlgmr.msra.gmra.mrb[52].mxu1 %vm3524_vm5, %v16840_v26  ;;  %v16947_v26 = vld [vmem:[%s31986_s16 + $0x2a0] sm:$0xff] }
0x1110   :  { %21193 = vmatpush3.msra.mxu1 %v4916_v24  ;;  %21189 = vmatprep.mubr.msk.f32.mxu1 %vm3524_vm5, %v16841_v29  ;;  %v24299_v24 = vpack.c.bf16 %v16946_v20, %v16945_v19  ;;  %v24302_v28 = vpack.c.bf16 %v16948_v27, %v16947_v26  ;;  %v16949_v29 = vld [vmem:[%s31986_s16 + $0x2b0] sm:$0xff]  ;;  %v6588_v19 = vld [vmem:[%s31988_s19] sm:$0xff]  ;;  %v6589_v20 = vld [vmem:[%s31988_s19 + $0x8] sm:$0xff] }
0x1111   :  { %v6593_v26 = vld [vmem:[%s31988_s19 + $0x28] sm:$0xff] }
0x1113   :  { %21190 = vmatmul.mubr.msk.f32.gmra.mrb[54].mxu1 %vm3524_vm5, %v16842_v30  ;;  %v16950_v30 = vld [vmem:[%s31986_s16 + $0x2b8] sm:$0xff] }
0x1114   :  { %21194 = vmatprep.mubr.msk.f32.mxu1 %vm3524_vm5, %v4830_v31  ;;  %v24305_v31 = vpack.c.bf16 %v16950_v30, %v16949_v29  ;;  %v17057_v29 = vld [vmem:[%s31988_s19 + $0x48] sm:$0xff]  ;;  %v17058_v30 = vld [vmem:[%s31988_s19 + $0x50] sm:$0xff] }
0x1117   :  { %21195 = vmatmul.mubr.msk.f32.vlgmr.msra.gmra.mrb[52].mxu1 %vm3524_vm5, %v4831_v32  ;;  %v16951_v32 = vld [vmem:[%s31986_s16 + $0x2c0] sm:$0xff] }
0x1118   :  { %21197 = vmatprep.mubr.msk.f32.mxu1 %vm3524_vm5, %v4832_v33  ;;  %v16952_v33 = vld [vmem:[%s31986_s16 + $0x2c8] sm:$0xff] }
0x111b   :  { %21198 = vmatmul.mubr.msk.f32.gmra.mrb[54].mxu1 %vm3524_vm5, %v4833_v34  ;;  %v24308_v34 = vpack.c.bf16 %v16952_v33, %v16951_v32 }
0x111c   :  { %21237 = vmatprep.mubr.msk.f32.mxu1 %vm3524_vm5, %v16867_v36  ;;  %v16953_v36 = vld [vmem:[%s31986_s16 + $0x2d0] sm:$0xff] }
0x111d   :  { %v24311_v38 = vpack.c.bf16 %v16954_v37, %v16953_v36  ;;  %v17013_v37 = vld [vmem:[%s31987_s15 + $0x110] sm:$0xff] }
0x112c   :  { %v5294_v39 = vpop.f32.mrb[70].mxu0 }
0x112d   :  { %v21234_v43 = vpop.f32.mrb[71].mxu0  ;;  %21235 = vmatprep.subr.mxu1 %v5294_v39 }
0x112e   :  { %21236 = vmatpush3.msra.mxu1 %v5294_v39  ;;  %v16955_v39 = vld [vmem:[%s31986_s16 + $0x2e0] sm:$0xff]  ;;  %v16957_v43 = vld [vmem:[%s31986_s16 + $0x2f0] sm:$0xff] }
0x112f   :  { %24247 = vmatprep.subr.bf16.mxu1 %v25953_v22  ;;  %21238 = vmatmul.mubr.msk.f32.vlgmr.msra.gmra.mrb[52].mxu1 %vm3524_vm5, %v16868_v40  ;;  %v16956_v40 = vld [vmem:[%s31986_s16 + $0x2e8] sm:$0xff]  ;;  %v24317_v45 = vpack.c.bf16 %v16958_v44, %v16957_v43  ;;  %v17062_v44 = vld [vmem:[%s31988_s19 + $0x70] sm:$0xff] }
0x1130   :  { %24249 = vmatpush3.bf16.msra.mxu1 %v24248_v41  ;;  %21240 = vmatprep.mubr.msk.f32.mxu1 %vm3524_vm5, %v16869_v46  ;;  %v24314_v41 = vpack.c.bf16 %v16956_v40, %v16955_v39  ;;  %v16939_v46 = vld [vmem:[%s31987_s15 + $0xa0] sm:$0xff]  ;;  %v17061_v40 = vld [vmem:[%s31988_s19 + $0x68] sm:$0xff] }
0x1131   :  { %24250 = vmatprep.subr.bf16.mxu1 %v25953_v22  ;;  %v17060_v39 = vld [vmem:[%s31988_s19 + $0x60] sm:$0xff] }
0x1132   :  { %v24415_v43 = vpack.c.bf16 %v17061_v40, %v17060_v39  ;;  %v17252_v40 = vld [vmem:[%s31988_s19 + $0x160] sm:$0xff] }
0x1133   :  { %21241 = vmatmul.mubr.msk.f32.gmra.mrb[54].mxu1 %vm3524_vm5, %v16870_v50  ;;  %v16940_v50 = vld [vmem:[%s31987_s15 + $0xa8] sm:$0xff] }
0x1134   :  { %24252 = vmatpush3.bf16.msra.mxu1 %v24251_v47  ;;  %21275 = vmatprep.mubr.msk.f32.mxu1 %vm25954_vm3, %v25955_v23 }
0x1135   :  { %24253 = vmatprep.subr.bf16.mxu1 %v25953_v22 }
0x1138   :  { %24255 = vmatpush3.bf16.msra.mxu1 %v24254_v54  ;;  %v16942_v54 = vld [vmem:[%s31987_s15 + $0xb8] sm:$0xff] }
0x1139   :  { %24256 = vmatprep.subr.bf16.mxu1 %v25953_v22 }
0x113c   :  { %24258 = vmatpush3.bf16.msra.mxu1 %v24257_v59  ;;  %v16965_v59 = vld [vmem:[%s31987_s15 + $0xd0] sm:$0xff] }
0x113d   :  { %24259 = vmatprep.subr.bf16.mxu1 %v25953_v22 }
0x1140   :  { %24261 = vmatpush3.bf16.msra.mxu1 %v24260_v62  ;;  %v17015_v62 = vld [vmem:[%s31986_s16 + $0x400] sm:$0xff] }
0x1141   :  { %24262 = vmatprep.subr.bf16.mxu1 %v25953_v22 }
0x1144   :  { %24264 = vmatpush3.bf16.msra.mxu1 %v24263_v1  ;;  %v24368_v1 = vpack.c.bf16 %v17016_v48, %v17015_v62  ;;  %v17118_v48 = vld [vmem:[%s31988_s19 + $0x90] sm:$0xff] }
0x1145   :  { %24265 = vmatprep.subr.bf16.mxu1 %v25953_v22 }
0x1148   :  { %24267 = vmatpush3.bf16.msra.mxu1 %v24266_v3  ;;  %v16989_v3 = vld [vmem:[%s31987_s15 + $0xf0] sm:$0xff] }
0x1149   :  { %24268 = vmatprep.subr.bf16.mxu1 %v25953_v22 }
0x114c   :  { %24270 = vmatpush3.bf16.msra.mxu1 %v24269_v7  ;;  %v5680_v8 = vpop.f32.mrb[72].mxu0  ;;  %v17019_v7 = vld [vmem:[%s31986_s16 + $0x420] sm:$0xff] }
0x114d   :  { %v21320_v9 = vpop.f32.mrb[73].mxu0 }
0x114f   :  { %21276 = vmatmul.mubr.f32.vlgmr.msra.gmra.mrb[56].mxu1 %v27497_v57 }
0x1150   :  { %21280 = vmatprep.mubr.msk.f32.mxu1 %vm3524_vm5, %v16891_v15 }
0x116c   :  { %v27837_v10 = vpop.f32.mrb[74].mxu0 }
0x116d   :  { %v21406_v11 = vpop.f32.mrb[75].mxu0 }
0x116e   :  { %v17022_v11 = vld [vmem:[%s31986_s16 + $0x438] sm:$0xff] }
0x118c   :  { %v27839_v12 = vpop.f32.mrb[76].mxu0 }
0x118d   :  { %v21449_v14 = vpop.f32.mrb[77].mxu0 }
0x118e   :  { %v17023_v14 = vld [vmem:[%s31986_s16 + $0x440] sm:$0xff] }
0x1222   :  { %v5487_v35 = vpop.f32.mrb[56].mxu1 }
0x1223   :  { %v21277_v49 = vpop.f32.mrb[57].mxu1  ;;  %21278 = vmatprep.subr.mxu1 %v5487_v35 }
0x1224   :  { %21279 = vmatpush3.msra.mxu1 %v5487_v35  ;;  %v17025_v35 = vld [vmem:[%s31986_s16 + $0x450] sm:$0xff] }
0x1225   :  { %21281 = vmatmul.mubr.msk.f32.vlgmr.msra.gmra.mrb[52].mxu1 %vm3524_vm5, %v16892_v42  ;;  %21321 = vmatprep.subr.mxu1 %v5680_v8  ;;  %v17026_v42 = vld [vmem:[%s31986_s16 + $0x458] sm:$0xff] }
0x1226   :  { %21322 = vmatpush3.msra.mxu1 %v5680_v8  ;;  %21283 = vmatprep.mubr.msk.f32.mxu1 %vm3524_vm5, %v16893_v56  ;;  %v17020_v8 = vld [vmem:[%s31986_s16 + $0x428] sm:$0xff]  ;;  %v24383_v49 = vpack.c.bf16 %v17026_v42, %v17025_v35  ;;  %v17027_v56 = vld [vmem:[%s31986_s16 + $0x460] sm:$0xff] }
0x1227   :  { %24295 = vmatprep.subr.bf16.mxu1 %v25953_v22  ;;  %v24374_v9 = vpack.c.bf16 %v17020_v8, %v17019_v7  ;;  %v17120_v8 = vld [vmem:[%s31988_s19 + $0xa0] sm:$0xff]  ;;  %v17161_v42 = vld [vmem:[%s31988_s19 + $0xc8] sm:$0xff] }
0x1228   :  { %v17160_v35 = vld [vmem:[%s31988_s19 + $0xc0] sm:$0xff] }
0x1229   :  { %21284 = vmatmul.mubr.msk.f32.gmra.mrb[54].mxu1 %vm3524_vm5, %v16894_v63  ;;  %v17028_v63 = vld [vmem:[%s31986_s16 + $0x468] sm:$0xff] }
0x122a   :  { %21323 = vmatprep.mubr.msk.f32.mxu1 %vm3524_vm5, %v16915_v6  ;;  %v24386_v6 = vpack.c.bf16 %v17028_v63, %v17027_v56  ;;  %v17162_v56 = vld [vmem:[%s31988_s19 + $0xd0] sm:$0xff]  ;;  %v17163_v63 = vld [vmem:[%s31988_s19 + $0xd8] sm:$0xff] }
0x122d   :  { %21324 = vmatmul.mubr.msk.f32.vlgmr.msra.gmra.mrb[52].mxu1 %vm3524_vm5, %v16916_v18  ;;  %v24389_v18 = vpack.c.bf16 %v17030_v16, %v17029_v13  ;;  %v17164_v13 = vld [vmem:[%s31988_s19 + $0xe0] sm:$0xff]  ;;  %v17165_v16 = vld [vmem:[%s31988_s19 + $0xe8] sm:$0xff] }
0x122e   :  { %24297 = vmatpush3.bf16.msra.mxu1 %v24296_v17  ;;  %21326 = vmatprep.mubr.msk.f32.mxu1 %vm3524_vm5, %v16917_v21  ;;  %v17011_v17 = vld [vmem:[%s31987_s15 + $0x100] sm:$0xff]  ;;  %v24391_v21 = vpack.c.bf16 %v6589_v20, %v6588_v19  ;;  %v17167_v19 = vld [vmem:[%s31988_s19 + $0xf8] sm:$0xff] }
0x122f   :  { %24298 = vmatprep.subr.bf16.mxu1 %v25953_v22 }
0x1230   :  { %24392 = vmatprep.subr.bf16.mxu0 %v24391_v21 }
0x1231   :  { %21327 = vmatmul.mubr.msk.f32.gmra.mrb[54].mxu1 %vm3524_vm5, %v16918_v25  ;;  %v6592_v25 = vld [vmem:[%s31988_s19 + $0x20] sm:$0xff]  ;;  %24394 = vmatpush3.bf16.msra.mxu0 %v24391_v21 }
0x1232   :  { %24300 = vmatpush3.bf16.msra.mxu1 %v24299_v24  ;;  %21361 = vmatprep.mubr.msk.f32.mxu1 %vm25954_vm3, %v25955_v23  ;;  %v24399_v27 = vpack.c.bf16 %v6593_v26, %v6592_v25  ;;  %v17204_v21 = vld [vmem:[%s31988_s19 + $0x100] sm:$0xff]  ;;  %v17207_v25 = vld [vmem:[%s31988_s19 + $0x118] sm:$0xff] }
0x1233   :  { %24301 = vmatprep.subr.bf16.mxu1 %v25953_v22 }
0x1236   :  { %24303 = vmatpush3.bf16.msra.mxu1 %v24302_v28  ;;  %v17056_v28 = vld [vmem:[%s31988_s19 + $0x40] sm:$0xff] }
0x1237   :  { %24304 = vmatprep.subr.bf16.mxu1 %v25953_v22  ;;  %v24407_v32 = vpack.c.bf16 %v17057_v29, %v17056_v28  ;;  %v17209_v28 = vld [vmem:[%s31988_s19 + $0x128] sm:$0xff] }
0x123a   :  { %24306 = vmatpush3.bf16.msra.mxu1 %v24305_v31  ;;  %v17059_v31 = vld [vmem:[%s31988_s19 + $0x58] sm:$0xff] }
0x123b   :  { %24307 = vmatprep.subr.bf16.mxu1 %v25953_v22 }
0x123e   :  { %24309 = vmatpush3.bf16.msra.mxu1 %v24308_v34  ;;  %v17012_v34 = vld [vmem:[%s31987_s15 + $0x108] sm:$0xff] }
0x123f   :  { %24310 = vmatprep.subr.bf16.mxu1 %v25953_v22 }
0x1242   :  { %24312 = vmatpush3.bf16.msra.mxu1 %v24311_v38  ;;  %v24411_v38 = vpack.c.bf16 %v17059_v31, %v17058_v30  ;;  %v17210_v30 = vld [vmem:[%s31988_s19 + $0x130] sm:$0xff]  ;;  %v17211_v31 = vld [vmem:[%s31988_s19 + $0x138] sm:$0xff] }
0x1243   :  { %24313 = vmatprep.subr.bf16.mxu1 %v25953_v22 }
0x1246   :  { %24315 = vmatpush3.bf16.msra.mxu1 %v24314_v41  ;;  %v17014_v41 = vld [vmem:[%s31987_s15 + $0x118] sm:$0xff] }
0x1247   :  { %24316 = vmatprep.subr.bf16.mxu1 %v25953_v22 }
0x124a   :  { %24318 = vmatpush3.bf16.msra.mxu1 %v24317_v45  ;;  %v17063_v45 = vld [vmem:[%s31988_s19 + $0x78] sm:$0xff] }
0x124d   :  { %21362 = vmatmul.mubr.f32.vlgmr.msra.gmra.mrb[58].mxu1 %v27497_v57 }
0x124e   :  { %21366 = vmatprep.mubr.msk.f32.mxu1 %vm3524_vm5, %v16939_v46  ;;  %v24419_v46 = vpack.c.bf16 %v17063_v45, %v17062_v44  ;;  %v17254_v44 = vld [vmem:[%s31988_s19 + $0x170] sm:$0xff]  ;;  %v17255_v45 = vld [vmem:[%s31988_s19 + $0x178] sm:$0xff] }
0x1320   :  { %v5873_v47 = vpop.f32.mrb[58].mxu1 }
0x1321   :  { %v21363_v51 = vpop.f32.mrb[59].mxu1  ;;  %21364 = vmatprep.subr.mxu1 %v5873_v47 }
0x1322   :  { %21365 = vmatpush3.msra.mxu1 %v5873_v47  ;;  %v6594_v47 = vld [vmem:[%s31988_s19 + $0x30] sm:$0xff] }
0x1323   :  { %21367 = vmatmul.mubr.msk.f32.vlgmr.msra.gmra.mrb[52].mxu1 %vm3524_vm5, %v16940_v50  ;;  %21407 = vmatprep.subr.mxu1 %v27837_v10  ;;  %v6595_v50 = vld [vmem:[%s31988_s19 + $0x38] sm:$0xff] }
0x1324   :  { %21408 = vmatpush3.msra.mxu1 %v27837_v10  ;;  %21369 = vmatprep.mubr.msk.f32.mxu1 %vm3524_vm5, %v16941_v52  ;;  %v17021_v10 = vld [vmem:[%s31986_s16 + $0x430] sm:$0xff]  ;;  %v24403_v51 = vpack.c.bf16 %v6595_v50, %v6594_v47  ;;  %v17116_v52 = vld [vmem:[%s31988_s19 + $0x80] sm:$0xff]  ;;  %v17293_v50 = vld [vmem:[%s31988_s19 + $0x188] sm:$0xff] }
0x1325   :  { %21450 = vmatprep.subr.mxu1 %v27839_v12  ;;  %v17292_v47 = vld [vmem:[%s31988_s19 + $0x180] sm:$0xff] }
0x1327   :  { %21370 = vmatmul.mubr.msk.f32.gmra.mrb[54].mxu1 %vm3524_vm5, %v16942_v54  ;;  %v17117_v54 = vld [vmem:[%s31988_s19 + $0x88] sm:$0xff] }
0x1328   :  { %21409 = vmatprep.mubr.msk.f32.mxu1 %vm3524_vm5, %v16963_v55  ;;  %v24439_v55 = vpack.c.bf16 %v17117_v54, %v17116_v52  ;;  %v17294_v52 = vld [vmem:[%s31988_s19 + $0x190] sm:$0xff]  ;;  %v17295_v54 = vld [vmem:[%s31988_s19 + $0x198] sm:$0xff] }
0x132b   :  { %21410 = vmatmul.mubr.msk.f32.vlgmr.msra.gmra.mrb[52].mxu1 %vm3524_vm5, %v16964_v58  ;;  %v17035_v58 = vld [vmem:[%s31989_s17] ss:$0 sm:$0xff] }
0x132c   :  { %21451 = vmatpush3.msra.mxu1 %v27839_v12  ;;  %21412 = vmatprep.mubr.msk.f32.mxu1 %vm3524_vm5, %v16965_v59  ;;  %v24377_v12 = vpack.c.bf16 %v17022_v11, %v17021_v10 }
0x132d   :  { %24367 = vmatprep.subr.bf16.mxu1 %v25953_v22 }
0x132f   :  { %21413 = vmatmul.mubr.msk.f32.gmra.mrb[54].mxu1 %vm3524_vm5, %v16966_v60 }
0x1330   :  { %21452 = vmatprep.mubr.msk.f32.mxu1 %vm3524_vm5, %v16987_v61 }
0x1333   :  { %21453 = vmatmul.mubr.msk.f32.vlgmr.msra.gmra.mrb[52].mxu1 %vm3524_vm5, %v16988_v0  ;;  %v17119_v0 = vld [vmem:[%s31988_s19 + $0x98] sm:$0xff] }
0x1334   :  { %24369 = vmatpush3.bf16.msra.mxu1 %v24368_v1  ;;  %21455 = vmatprep.mubr.msk.f32.mxu1 %vm3524_vm5, %v16989_v3 }
0x1335   :  { %24370 = vmatprep.subr.bf16.mxu1 %v25953_v22 }
0x1337   :  { %21456 = vmatmul.mubr.msk.f32.gmra.mrb[54].mxu1 %vm3524_vm5, %v16990_v5  ;;  %v24443_v5 = vpack.c.bf16 %v17119_v0, %v17118_v48  ;;  %v17336_v0 = vld [vmem:[%s31988_s19 + $0x1c0] sm:$0xff] }
0x1338   :  { %24372 = vmatpush3.bf16.msra.mxu1 %v24371_v4  ;;  %21490 = vmatprep.mubr.msk.f32.mxu1 %vm25954_vm3, %v25955_v23  ;;  %v17024_v23 = vld [vmem:[%s31986_s16 + $0x448] sm:$0xff] }
0x1339   :  { %24373 = vmatprep.subr.bf16.mxu1 %v25953_v22  ;;  %v24380_v15 = vpack.c.bf16 %v17024_v23, %v17023_v14  ;;  %v17122_v14 = vld [vmem:[%s31988_s19 + $0xb0] sm:$0xff]  ;;  %v17123_v23 = vld [vmem:[%s31988_s19 + $0xb8] sm:$0xff] }
0x133c   :  { %24375 = vmatpush3.bf16.msra.mxu1 %v24374_v9  ;;  %v17121_v9 = vld [vmem:[%s31988_s19 + $0xa8] sm:$0xff] }
0x133d   :  { %24376 = vmatprep.subr.bf16.mxu1 %v25953_v22 }
0x1340   :  { %24378 = vmatpush3.bf16.msra.mxu1 %v24377_v12  ;;  %v24447_v12 = vpack.c.bf16 %v17121_v9, %v17120_v8  ;;  %v17340_v8 = vld [vmem:[%s31988_s19 + $0x1e0] sm:$0xff]  ;;  %v17341_v9 = vld [vmem:[%s31988_s19 + $0x1e8] sm:$0xff] }
0x1341   :  { %24379 = vmatprep.subr.bf16.mxu1 %v25953_v22 }
0x1344   :  { %24381 = vmatpush3.bf16.msra.mxu1 %v24380_v15  ;;  %v24451_v15 = vpack.c.bf16 %v17123_v23, %v17122_v14  ;;  %v17342_v14 = vld [vmem:[%s31988_s19 + $0x1f0] sm:$0xff]  ;;  %v17343_v23 = vld [vmem:[%s31988_s19 + $0x1f8] sm:$0xff] }
0x1345   :  { %24382 = vmatprep.subr.bf16.mxu1 %v25953_v22 }
0x1348   :  { %24384 = vmatpush3.bf16.msra.mxu1 %v24383_v49  ;;  %v24463_v49 = vpack.c.bf16 %v17161_v42, %v17160_v35  ;;  %v17380_v35 = vld [vmem:[%s31988_s19 + $0x200] sm:$0xff]  ;;  %v17381_v42 = vld [vmem:[%s31988_s19 + $0x208] sm:$0xff] }
0x1349   :  { %24385 = vmatprep.subr.bf16.mxu1 %v25953_v22 }
0x134c   :  { %24387 = vmatpush3.bf16.msra.mxu1 %v24386_v6  ;;  %v24467_v6 = vpack.c.bf16 %v17163_v63, %v17162_v56  ;;  %v17382_v56 = vld [vmem:[%s31988_s19 + $0x210] sm:$0xff]  ;;  %v17383_v63 = vld [vmem:[%s31988_s19 + $0x218] sm:$0xff] }
0x134d   :  { %24388 = vmatprep.subr.bf16.mxu1 %v25953_v22  ;;  %v6590_v22 = vld [vmem:[%s31988_s19 + $0x10] sm:$0xff] }
0x1350   :  { %24390 = vmatpush3.bf16.msra.mxu1 %v24389_v18  ;;  %v24471_v18 = vpack.c.bf16 %v17165_v16, %v17164_v13  ;;  %v17040_v13 = vld [vmem:[%s31990_s18 + $0x80] sm:$0xff] }
0x1351   :  { %v17384_v16 = vld [vmem:[%s31988_s19 + $0x220] sm:$0xff] }
0x1353   :  { %21491 = vmatmul.mubr.f32.vlgmr.msra.gmra.mrb[60].mxu1 %v27497_v57  ;;  %v6591_v57 = vld [vmem:[%s31988_s19 + $0x18] sm:$0xff] }
0x1354   :  { %21495 = vmatprep.mubr.msk.f32.mxu1 %vm3524_vm5, %v17011_v17  ;;  %v24395_v24 = vpack.c.bf16 %v6591_v57, %v6590_v22  ;;  %v17166_v17 = vld [vmem:[%s31988_s19 + $0xf0] sm:$0xff]  ;;  %v17205_v22 = vld [vmem:[%s31988_s19 + $0x108] sm:$0xff] }
0x1355   :  { %v24475_v20 = vpack.c.bf16 %v17167_v19, %v17166_v17  ;;  %v24487_v57 = vpack.c.bf16 %v17205_v22, %v17204_v21  ;;  %v17386_v19 = vld [vmem:[%s31988_s19 + $0x230] sm:$0xff] }
0x1356   :  { %24396 = vmatprep.subr.bf16.mxu0 %v24395_v24 }
0x1357   :  { %24398 = vmatpush3.bf16.msra.mxu0 %v24395_v24  ;;  %v17206_v24 = vld [vmem:[%s31988_s19 + $0x110] sm:$0xff] }
0x1358   :  { %24400 = vmatprep.subr.bf16.mxu0 %v24399_v27  ;;  %v24491_v26 = vpack.c.bf16 %v17207_v25, %v17206_v24 }
0x135b   :  { %24402 = vmatpush3.bf16.msra.mxu0 %v24399_v27  ;;  %v17208_v27 = vld [vmem:[%s31988_s19 + $0x120] sm:$0xff] }
0x135c   :  { %24404 = vmatprep.subr.bf16.mxu0 %v24403_v51  ;;  %v24495_v29 = vpack.c.bf16 %v17209_v28, %v17208_v27 }
0x135f   :  { %24406 = vmatpush3.bf16.msra.mxu0 %v24403_v51  ;;  %v24535_v51 = vpack.c.bf16 %v17293_v50, %v17292_v47  ;;  %v17050_v47 = vld [vmem:[%s31990_s18 + $0xd0] sm:$0xff]  ;;  %v17051_v50 = vld [vmem:[%s31990_s18 + $0xd8] sm:$0xff] }
0x1426   :  { %v6452_v33 = vpop.f32.mrb[60].mxu1 }
0x1427   :  { %v21492_v36 = vpop.f32.mrb[61].mxu1  ;;  %21493 = vmatprep.subr.mxu1 %v6452_v33 }
0x1428   :  { %21494 = vmatpush3.msra.mxu1 %v6452_v33  ;;  %v17248_v33 = vld [vmem:[%s31988_s19 + $0x140] sm:$0xff] }
0x1429   :  { %21496 = vmatmul.mubr.msk.f32.vlgmr.msra.gmra.mrb[52].mxu1 %vm3524_vm5, %v17012_v34  ;;  %24408 = vmatprep.subr.bf16.mxu1 %v24407_v32  ;;  %v17249_v34 = vld [vmem:[%s31988_s19 + $0x148] sm:$0xff] }
0x142a   :  { %21498 = vmatprep.mubr.msk.f32.mxu1 %vm3524_vm5, %v17013_v37  ;;  %24410 = vmatpush3.bf16.msra.mxu1 %v24407_v32  ;;  %v24499_v32 = vpack.c.bf16 %v17211_v31, %v17210_v30  ;;  %v24511_v36 = vpack.c.bf16 %v17249_v34, %v17248_v33  ;;  %v17250_v37 = vld [vmem:[%s31988_s19 + $0x150] sm:$0xff]  ;;  %v17044_v33 = vld [vmem:[%s31990_s18 + $0xa0] sm:$0xff] }
0x142b   :  { %24412 = vmatprep.subr.bf16.mxu1 %v24411_v38 }
0x142d   :  { %21499 = vmatmul.mubr.msk.f32.gmra.mrb[54].mxu1 %vm3524_vm5, %v17014_v41  ;;  %v17253_v41 = vld [vmem:[%s31988_s19 + $0x168] sm:$0xff] }
0x142e   :  { %24414 = vmatpush3.bf16.msra.mxu1 %v24411_v38  ;;  %v17251_v38 = vld [vmem:[%s31988_s19 + $0x158] sm:$0xff] }
0x142f   :  { %24416 = vmatprep.subr.bf16.mxu1 %v24415_v43  ;;  %v24515_v39 = vpack.c.bf16 %v17251_v38, %v17250_v37  ;;  %v17045_v37 = vld [vmem:[%s31990_s18 + $0xa8] sm:$0xff] }
0x1432   :  { %24418 = vmatpush3.bf16.msra.mxu1 %v24415_v43  ;;  %v24519_v43 = vpack.c.bf16 %v17253_v41, %v17252_v40 }
0x1433   :  { %24420 = vmatprep.subr.bf16.mxu1 %v24419_v46 }
0x1436   :  { %24422 = vmatpush3.bf16.msra.mxu1 %v24419_v46  ;;  %v24523_v46 = vpack.c.bf16 %v17255_v45, %v17254_v44  ;;  %v17048_v45 = vld [vmem:[%s31990_s18 + $0xc0] sm:$0xff] }
0x1437   :  { %24440 = vmatprep.subr.bf16.mxu1 %v24439_v55 }
0x14fc   :  { %v21497_v59 = vpop.f32.mrb[52].mxu1 }
0x14fd   :  { %v6565_v60 = vadd.f32 %v21497_v59, %v17035_v58  ;;  %v6534_v61 = vpop.f32.mrb[53].mxu1  ;;  %v17297_v59 = vld [vmem:[%s31988_s19 + $0x1a8] sm:$0xff] }
0x14fe   :  { %v6564_v62 = vadd.f32 %v17035_v58, %v6534_v61  ;;  %v17298_v61 = vld [vmem:[%s31988_s19 + $0x1b0] sm:$0xff] }
0x14ff   :  { %v28124_v53 = vmax.f32 %v6565_v60, 0.0 }
0x1500   :  { %v28122_v1 = vmax.f32 %v6564_v62, 0.0  ;;  %v21500_v2 = vpop.f32.mrb[54].mxu1  ;;  %v17299_v62 = vld [vmem:[%s31988_s19 + $0x1b8] sm:$0xff] }
0x1501   :  { %v6567_v3 = vadd.f32 %v21500_v2, %v17035_v58  ;;  %v6544_v4 = vpop.f32.mrb[55].mxu1  ;;  %v24547_v48 = vpack.c.bf16 %v17299_v62, %v17298_v61  ;;  %v17337_v2 = vld [vmem:[%s31988_s19 + $0x1c8] sm:$0xff]  ;;  %v17055_v62 = vld [vmem:[%s31990_s18 + $0xf8] sm:$0xff] }
0x1502   :  { %v6566_v7 = vadd.f32 %v17035_v58, %v6544_v4  ;;  %21517 = vmatprep.mubr.msk.f32.mxu0 %vm2261_vm4, %v28122_v1  ;;  %21539 = vmatprep.mubr.msk.f32.mxu1 %vm2261_vm4, %v28122_v1  ;;  %v17296_v58 = vld [vmem:[%s31988_s19 + $0x1a0] sm:$0xff]  ;;  %v17338_v4 = vld [vmem:[%s31988_s19 + $0x1d0] sm:$0xff] }
0x1503   :  { %21518 = vmatmul.mubr.msk.f32.vlgmr.msra.gmra.mrb[78].mxu0 %vm2261_vm4, %v28124_v53  ;;  %21540 = vmatmul.mubr.msk.f32.vlgmr.msra.gmra.mrb[62].mxu1 %vm2261_vm4, %v28124_v53  ;;  %v28142_v11 = vmax.f32 %v6567_v3, 0.0  ;;  %v24543_v60 = vpack.c.bf16 %v17297_v59, %v17296_v58  ;;  %v24559_v3 = vpack.c.bf16 %v17337_v2, %v17336_v0  ;;  %v17054_v59 = vld [vmem:[%s31990_s18 + $0xf0] sm:$0xff]  ;;  %v6572_v0 = vld [vmem:[%s31990_s18] sm:$0xff]  ;;  %v6573_v2 = vld [vmem:[%s31990_s18 + $0x8] sm:$0xff] }
0x1504   :  { %v28140_v10 = vmax.f32 %v6566_v7, 0.0  ;;  %24442 = vmatpush3.bf16.msra.mxu1 %v24439_v55  ;;  %v24539_v55 = vpack.c.bf16 %v17295_v54, %v17294_v52 }
0x1505   :  { %24444 = vmatprep.subr.bf16.mxu1 %v24443_v5 }
0x1506   :  { %21520 = vmatprep.mubr.msk.f32.mxu0 %vm2261_vm4, %v28140_v10  ;;  %21542 = vmatprep.mubr.msk.f32.mxu1 %vm2261_vm4, %v28140_v10 }
0x1507   :  { %21521 = vmatmul.mubr.msk.f32.gmra.mrb[80].mxu0 %vm2261_vm4, %v28142_v11  ;;  %21543 = vmatmul.mubr.msk.f32.gmra.mrb[64].mxu1 %vm2261_vm4, %v28142_v11 }
0x1508   :  { %24446 = vmatpush3.bf16.msra.mxu1 %v24443_v5  ;;  %21625 = vmatprep.mubr.msk.f32.mxu1 %vm2261_vm4, %v28122_v1  ;;  %v17339_v5 = vld [vmem:[%s31988_s19 + $0x1d8] sm:$0xff] }
0x1509   :  { %24448 = vmatprep.subr.bf16.mxu1 %v24447_v12  ;;  %v24563_v7 = vpack.c.bf16 %v17339_v5, %v17338_v4  ;;  %21553 = vmatprep.mubr.msk.f32.mxu0 %vm513_vm2, %v17040_v13  ;;  %v6575_v4 = vld [vmem:[%s31990_s18 + $0x18] sm:$0xff]  ;;  %v6576_v5 = vld [vmem:[%s31990_s18 + $0x20] sm:$0xff] }
0x150a   :  { %v6584_v13 = vld [vmem:[%s31990_s18 + $0x60] sm:$0xff] }
0x150c   :  { %24450 = vmatpush3.bf16.msra.mxu1 %v24447_v12  ;;  %v24567_v12 = vpack.c.bf16 %v17341_v9, %v17340_v8  ;;  %v6577_v9 = vld [vmem:[%s31990_s18 + $0x28] sm:$0xff] }
0x150d   :  { %24452 = vmatprep.subr.bf16.mxu1 %v24451_v15 }
0x1510   :  { %24454 = vmatpush3.bf16.msra.mxu1 %v24451_v15  ;;  %v24571_v15 = vpack.c.bf16 %v17343_v23, %v17342_v14  ;;  %v6578_v14 = vld [vmem:[%s31990_s18 + $0x30] sm:$0xff] }
0x1511   :  { %24464 = vmatprep.subr.bf16.mxu1 %v24463_v49 }
0x1513   :  { %21626 = vmatmul.mubr.msk.f32.vlgmr.msra.gmra.mrb[66].mxu1 %vm2261_vm4, %v28124_v53 }
0x1514   :  { %21628 = vmatprep.mubr.msk.f32.mxu1 %vm2261_vm4, %v28140_v10  ;;  %24466 = vmatpush3.bf16.msra.mxu1 %v24463_v49  ;;  %v24583_v49 = vpack.c.bf16 %v17381_v42, %v17380_v35  ;;  %v6579_v35 = vld [vmem:[%s31990_s18 + $0x38] sm:$0xff] }
0x1515   :  { %24468 = vmatprep.subr.bf16.mxu1 %v24467_v6 }
0x1517   :  { %21629 = vmatmul.mubr.msk.f32.gmra.mrb[68].mxu1 %vm2261_vm4, %v28142_v11 }
0x1518   :  { %24470 = vmatpush3.bf16.msra.mxu1 %v24467_v6  ;;  %21679 = vmatprep.mubr.msk.f32.mxu1 %vm2261_vm4, %v28122_v1  ;;  %v24587_v6 = vpack.c.bf16 %v17383_v63, %v17382_v56  ;;  %v6581_v56 = vld [vmem:[%s31990_s18 + $0x48] sm:$0xff]  ;;  %v6582_v63 = vld [vmem:[%s31990_s18 + $0x50] sm:$0xff] }
0x1519   :  { %24472 = vmatprep.subr.bf16.mxu1 %v24471_v18 }
0x151c   :  { %24474 = vmatpush3.bf16.msra.mxu1 %v24471_v18  ;;  %v17385_v18 = vld [vmem:[%s31988_s19 + $0x228] sm:$0xff] }
0x151d   :  { %24476 = vmatprep.subr.bf16.mxu1 %v24475_v20  ;;  %v24591_v17 = vpack.c.bf16 %v17385_v18, %v17384_v16 }
0x1520   :  { %24478 = vmatpush3.bf16.msra.mxu1 %v24475_v20  ;;  %v17387_v20 = vld [vmem:[%s31988_s19 + $0x238] sm:$0xff] }
0x1521   :  { %24488 = vmatprep.subr.bf16.mxu1 %v24487_v57  ;;  %v24595_v21 = vpack.c.bf16 %v17387_v20, %v17386_v19  ;;  %v6586_v20 = vld [vmem:[%s31990_s18 + $0x70] sm:$0xff] }
0x1523   :  { %21680 = vmatmul.mubr.msk.f32.vlgmr.msra.gmra.mrb[70].mxu1 %vm2261_vm4, %v28124_v53 }
0x1524   :  { %21682 = vmatprep.mubr.msk.f32.mxu1 %vm2261_vm4, %v28140_v10  ;;  %24490 = vmatpush3.bf16.msra.mxu1 %v24487_v57 }
0x1525   :  { %24492 = vmatprep.subr.bf16.mxu1 %v24491_v26 }
0x1527   :  { %21683 = vmatmul.mubr.msk.f32.gmra.mrb[72].mxu1 %vm2261_vm4, %v28142_v11 }
0x1528   :  { %24494 = vmatpush3.bf16.msra.mxu1 %v24491_v26  ;;  %21733 = vmatprep.mubr.msk.f32.mxu1 %vm2261_vm4, %v28122_v1 }
0x1529   :  { %24496 = vmatprep.subr.bf16.mxu1 %v24495_v29 }
0x152c   :  { %24498 = vmatpush3.bf16.msra.mxu1 %v24495_v29 }
0x152d   :  { %24500 = vmatprep.subr.bf16.mxu1 %v24499_v32 }
0x1530   :  { %24502 = vmatpush3.bf16.msra.mxu1 %v24499_v32  ;;  %v17043_v32 = vld [vmem:[%s31990_s18 + $0x98] sm:$0xff] }
0x1531   :  { %24512 = vmatprep.subr.bf16.mxu1 %v24511_v36 }
0x1533   :  { %21734 = vmatmul.mubr.msk.f32.vlgmr.msra.gmra.mrb[74].mxu1 %vm2261_vm4, %v28124_v53 }
0x1534   :  { %21736 = vmatprep.mubr.msk.f32.mxu1 %vm2261_vm4, %v28140_v10  ;;  %24514 = vmatpush3.bf16.msra.mxu1 %v24511_v36 }
0x1535   :  { %24516 = vmatprep.subr.bf16.mxu1 %v24515_v39 }
0x1537   :  { %21737 = vmatmul.mubr.msk.f32.gmra.mrb[76].mxu1 %vm2261_vm4, %v28142_v11 }
0x1538   :  { %24518 = vmatpush3.bf16.msra.mxu1 %v24515_v39  ;;  %21787 = vmatprep.mubr.msk.f32.mxu1 %vm2261_vm4, %v28122_v1  ;;  %v17046_v39 = vld [vmem:[%s31990_s18 + $0xb0] sm:$0xff] }
0x1539   :  { %24520 = vmatprep.subr.bf16.mxu1 %v24519_v43 }
0x153c   :  { %24522 = vmatpush3.bf16.msra.mxu1 %v24519_v43  ;;  %v17047_v43 = vld [vmem:[%s31990_s18 + $0xb8] sm:$0xff] }
0x153d   :  { %24524 = vmatprep.subr.bf16.mxu1 %v24523_v46 }
0x1540   :  { %24526 = vmatpush3.bf16.msra.mxu1 %v24523_v46  ;;  %v17049_v46 = vld [vmem:[%s31990_s18 + $0xc8] sm:$0xff] }
0x1541   :  { %24536 = vmatprep.subr.bf16.mxu1 %v24535_v51 }
0x1543   :  { %21788 = vmatmul.mubr.msk.f32.vlgmr.msra.gmra.mrb[78].mxu1 %vm2261_vm4, %v28124_v53 }
0x1544   :  { %21790 = vmatprep.mubr.msk.f32.mxu1 %vm2261_vm4, %v28140_v10  ;;  %24538 = vmatpush3.bf16.msra.mxu1 %v24535_v51  ;;  %v17052_v51 = vld [vmem:[%s31990_s18 + $0xe0] sm:$0xff] }
0x1545   :  { %24540 = vmatprep.subr.bf16.mxu1 %v24539_v55 }
0x1547   :  { %21791 = vmatmul.mubr.msk.f32.gmra.mrb[80].mxu1 %vm2261_vm4, %v28142_v11 }
0x1548   :  { %24542 = vmatpush3.bf16.msra.mxu1 %v24539_v55  ;;  %21841 = vmatprep.mubr.msk.f32.mxu1 %vm2261_vm4, %v28122_v1  ;;  %v17053_v55 = vld [vmem:[%s31990_s18 + $0xe8] sm:$0xff] }
0x1549   :  { %24544 = vmatprep.subr.bf16.mxu1 %v24543_v60 }
0x154c   :  { %24546 = vmatpush3.bf16.msra.mxu1 %v24543_v60 }
0x154d   :  { %24548 = vmatprep.subr.bf16.mxu1 %v24547_v48 }
0x1550   :  { %24550 = vmatpush3.bf16.msra.mxu1 %v24547_v48 }
0x1551   :  { %24560 = vmatprep.subr.bf16.mxu1 %v24559_v3 }
0x1553   :  { %21842 = vmatmul.mubr.msk.f32.vlgmr.msra.gmra.mrb[82].mxu1 %vm2261_vm4, %v28124_v53 }
0x1554   :  { %21844 = vmatprep.mubr.msk.f32.mxu1 %vm2261_vm4, %v28140_v10  ;;  %24562 = vmatpush3.bf16.msra.mxu1 %v24559_v3  ;;  %v6574_v3 = vld [vmem:[%s31990_s18 + $0x10] sm:$0xff] }
0x1555   :  { %24564 = vmatprep.subr.bf16.mxu1 %v24563_v7 }
0x1557   :  { %21845 = vmatmul.mubr.msk.f32.gmra.mrb[84].mxu1 %vm2261_vm4, %v28142_v11 }
0x1558   :  { %24566 = vmatpush3.bf16.msra.mxu1 %v24563_v7  ;;  %21895 = vmatprep.mubr.msk.f32.mxu1 %vm2261_vm4, %v28122_v1 }
0x1559   :  { %24568 = vmatprep.subr.bf16.mxu1 %v24567_v12 }
0x155c   :  { %24570 = vmatpush3.bf16.msra.mxu1 %v24567_v12 }
0x155d   :  { %24572 = vmatprep.subr.bf16.mxu1 %v24571_v15 }
0x1560   :  { %24574 = vmatpush3.bf16.msra.mxu1 %v24571_v15 }
0x1561   :  { %24584 = vmatprep.subr.bf16.mxu1 %v24583_v49 }
0x1563   :  { %21896 = vmatmul.mubr.msk.f32.vlgmr.msra.gmra.mrb[86].mxu1 %vm2261_vm4, %v28124_v53 }
0x1564   :  { %21898 = vmatprep.mubr.msk.f32.mxu1 %vm2261_vm4, %v28140_v10  ;;  %24586 = vmatpush3.bf16.msra.mxu1 %v24583_v49  ;;  %v6580_v49 = vld [vmem:[%s31990_s18 + $0x40] sm:$0xff] }
0x1565   :  { %24588 = vmatprep.subr.bf16.mxu1 %v24587_v6 }
0x1567   :  { %21899 = vmatmul.mubr.msk.f32.gmra.mrb[88].mxu1 %vm2261_vm4, %v28142_v11 }
0x1568   :  { %24590 = vmatpush3.bf16.msra.mxu1 %v24587_v6  ;;  %21949 = vmatprep.mubr.msk.f32.mxu1 %vm2261_vm4, %v28122_v1  ;;  %v6583_v6 = vld [vmem:[%s31990_s18 + $0x58] sm:$0xff] }
0x1569   :  { %24592 = vmatprep.subr.bf16.mxu1 %v24591_v17 }
0x156c   :  { %24594 = vmatpush3.bf16.msra.mxu1 %v24591_v17  ;;  %v6585_v17 = vld [vmem:[%s31990_s18 + $0x68] sm:$0xff] }
0x156d   :  { %24596 = vmatprep.subr.bf16.mxu1 %v24595_v21 }
0x1570   :  { %24598 = vmatpush3.bf16.msra.mxu1 %v24595_v21 }
0x1573   :  { %21950 = vmatmul.mubr.msk.f32.vlgmr.msra.gmra.mrb[90].mxu1 %vm2261_vm4, %v28124_v53 }
0x1574   :  { %21952 = vmatprep.mubr.msk.f32.mxu1 %vm2261_vm4, %v28140_v10  ;;  %v17041_v10 = vld [vmem:[%s31990_s18 + $0x88] sm:$0xff] }
0x1577   :  { %21953 = vmatmul.mubr.msk.f32.gmra.mrb[92].mxu1 %vm2261_vm4, %v28142_v11  ;;  %v17042_v11 = vld [vmem:[%s31990_s18 + $0x90] sm:$0xff] }
0x15d6   :  { %v21519_v22 = vpop.f32.mrb[78].mxu0  ;;  %v21541_v57 = vpop.f32.mrb[62].mxu1 }
0x15d7   :  { %v6674_v24 = vpop.f32.mrb[79].mxu0  ;;  %v6785_v25 = vpop.f32.mrb[63].mxu1 }
0x15d8   :  { %v24431_v26 = vpack.c.bf16 %v21519_v22, %v6674_v24  ;;  %v24423_v1 = vpack.c.bf16 %v21541_v57, %v6785_v25  ;;  %v6587_v57 = vld [vmem:[%s31990_s18 + $0x78] sm:$0xff]  ;;  %v17100_v25 = vld [vmem:[%s31990_s18 + $0x100] sm:$0xff] }
0x15da   :  { %v21522_v27 = vpop.f32.mrb[80].mxu0  ;;  %v21544_v28 = vpop.f32.mrb[64].mxu1  ;;  %24424 = vmatprep.subr.bf16.mxu0 %v24423_v1 }
0x15db   :  { %v6684_v29 = vpop.f32.mrb[81].mxu0  ;;  %v6795_v30 = vpop.f32.mrb[65].mxu1  ;;  %24426 = vmatpush3.bf16.msra.mxu0 %v24423_v1  ;;  %v17102_v1 = vld [vmem:[%s31990_s18 + $0x110] sm:$0xff] }
0x15dc   :  { %v24435_v31 = vpack.c.bf16 %v21522_v27, %v6684_v29  ;;  %v24427_v53 = vpack.c.bf16 %v21544_v28, %v6795_v30  ;;  %v17103_v27 = vld [vmem:[%s31990_s18 + $0x118] sm:$0xff]  ;;  %v17104_v28 = vld [vmem:[%s31990_s18 + $0x120] sm:$0xff] }
0x15de   :  { %24428 = vmatprep.subr.bf16.mxu0 %v24427_v53 }
0x15df   :  { %24430 = vmatpush3.bf16.msra.mxu0 %v24427_v53 }
0x15e0   :  { %24432 = vmatprep.subr.bf16.mxu0 %v24431_v26 }
0x15e2   :  { %21554 = vmatmul.mubr.msk.f32.vlgmr.msra.gmra.mrb[82].mxu0 %vm513_vm2, %v17041_v10  ;;  %v17106_v10 = vld [vmem:[%s31990_s18 + $0x130] sm:$0xff] }
0x15e3   :  { %24434 = vmatpush3.bf16.msra.mxu0 %v24431_v26  ;;  %21556 = vmatprep.mubr.msk.f32.mxu0 %vm513_vm2, %v17042_v11  ;;  %v17101_v26 = vld [vmem:[%s31990_s18 + $0x108] sm:$0xff] }
0x15e4   :  { %24436 = vmatprep.subr.bf16.mxu0 %v24435_v31 }
0x15e6   :  { %v21627_v34 = vpop.f32.mrb[66].mxu1  ;;  %21557 = vmatmul.mubr.msk.f32.gmra.mrb[84].mxu0 %vm513_vm2, %v17043_v32 }
0x15e7   :  { %v7282_v36 = vpop.f32.mrb[67].mxu1  ;;  %24438 = vmatpush3.bf16.msra.mxu0 %v24435_v31  ;;  %21559 = vmatprep.mubr.msk.f32.mxu0 %vm513_vm2, %v17044_v33  ;;  %v17105_v31 = vld [vmem:[%s31990_s18 + $0x128] sm:$0xff]  ;;  %v17107_v33 = vld [vmem:[%s31990_s18 + $0x138] sm:$0xff] }
0x15e8   :  { %v24455_v38 = vpack.c.bf16 %v21627_v34, %v7282_v36  ;;  %v17108_v36 = vld [vmem:[%s31990_s18 + $0x140] sm:$0xff] }
0x15ea   :  { %v21630_v40 = vpop.f32.mrb[68].mxu1  ;;  %24456 = vmatprep.subr.bf16.mxu0 %v24455_v38  ;;  %21560 = vmatmul.mubr.msk.f32.gmra.mrb[86].mxu0 %vm513_vm2, %v17045_v37  ;;  %v17109_v37 = vld [vmem:[%s31990_s18 + $0x148] sm:$0xff] }
0x15eb   :  { %v7292_v41 = vpop.f32.mrb[69].mxu1  ;;  %21562 = vmatprep.mubr.msk.f32.mxu0 %vm513_vm2, %v17046_v39  ;;  %v17111_v39 = vld [vmem:[%s31990_s18 + $0x158] sm:$0xff] }
0x15ec   :  { %v24459_v44 = vpack.c.bf16 %v21630_v40, %v7292_v41  ;;  %v17112_v40 = vld [vmem:[%s31990_s18 + $0x160] sm:$0xff] }
0x15ee   :  { %21563 = vmatmul.mubr.msk.f32.gmra.mrb[88].mxu0 %vm513_vm2, %v17047_v43 }
0x15ef   :  { %21565 = vmatprep.mubr.msk.f32.mxu0 %vm513_vm2, %v17048_v45 }
0x15f2   :  { %21566 = vmatmul.mubr.msk.f32.gmra.mrb[90].mxu0 %vm513_vm2, %v17049_v46  ;;  %v17114_v46 = vld [vmem:[%s31990_s18 + $0x170] sm:$0xff] }
0x15f3   :  { %21568 = vmatprep.mubr.msk.f32.mxu0 %vm513_vm2, %v17050_v47 }
0x15f6   :  { %v21681_v52 = vpop.f32.mrb[70].mxu1  ;;  %21569 = vmatmul.mubr.msk.f32.gmra.mrb[92].mxu0 %vm513_vm2, %v17051_v50 }
0x15f7   :  { %v7602_v54 = vpop.f32.mrb[71].mxu1  ;;  %21571 = vmatprep.mubr.msk.f32.mxu0 %vm513_vm2, %v17052_v51  ;;  %v17115_v51 = vld [vmem:[%s31990_s18 + $0x178] sm:$0xff] }
0x15f8   :  { %v24479_v58 = vpack.c.bf16 %v21681_v52, %v7602_v54  ;;  %v17144_v54 = vld [vmem:[%s31990_s18 + $0x180] sm:$0xff] }
0x15fa   :  { %v21684_v60 = vpop.f32.mrb[72].mxu1  ;;  %21572 = vmatmul.mubr.msk.f32.gmra.mrb[94].mxu0 %vm513_vm2, %v17053_v55  ;;  %v17145_v55 = vld [vmem:[%s31990_s18 + $0x188] sm:$0xff] }
0x15fb   :  { %v7612_v61 = vpop.f32.mrb[73].mxu1  ;;  %21574 = vmatprep.mubr.msk.f32.mxu0 %vm513_vm2, %v17054_v59  ;;  %v17147_v59 = vld [vmem:[%s31990_s18 + $0x198] sm:$0xff] }
0x15fc   :  { %v24483_v48 = vpack.c.bf16 %v21684_v60, %v7612_v61  ;;  %v17148_v60 = vld [vmem:[%s31990_s18 + $0x1a0] sm:$0xff] }
0x15fe   :  { %21575 = vmatmul.mubr.msk.f32.gmra.mrb[96].mxu0 %vm513_vm2, %v17055_v62 }
0x15ff   :  { %21585 = vmatprep.mubr.msk.f32.mxu0 %vm513_vm2, %v6572_v0 }
0x1602   :  { %21586 = vmatmul.mubr.msk.f32.vlgmr.msra.gmra.mrb[82].mxu0 %vm513_vm2, %v6573_v2  ;;  %v17150_v2 = vld [vmem:[%s31990_s18 + $0x1b0] sm:$0xff] }
0x1603   :  { %24458 = vmatpush3.bf16.msra.mxu0 %v24455_v38  ;;  %21588 = vmatprep.mubr.msk.f32.mxu0 %vm513_vm2, %v6574_v3  ;;  %v17110_v38 = vld [vmem:[%s31990_s18 + $0x150] sm:$0xff] }
0x1604   :  { %24460 = vmatprep.subr.bf16.mxu0 %v24459_v44 }
0x1606   :  { %v21735_v7 = vpop.f32.mrb[74].mxu1  ;;  %21589 = vmatmul.mubr.msk.f32.gmra.mrb[84].mxu0 %vm513_vm2, %v6575_v4 }
0x1607   :  { %24462 = vmatpush3.bf16.msra.mxu0 %v24459_v44  ;;  %v7922_v8 = vpop.f32.mrb[75].mxu1  ;;  %21591 = vmatprep.mubr.msk.f32.mxu0 %vm513_vm2, %v6576_v5  ;;  %v17113_v44 = vld [vmem:[%s31990_s18 + $0x168] sm:$0xff]  ;;  %v17151_v5 = vld [vmem:[%s31990_s18 + $0x1b8] sm:$0xff] }
0x1608   :  { %v28445_v12 = vpack.c.bf16 %v21735_v7, %v7922_v8  ;;  %24480 = vmatprep.subr.bf16.mxu0 %v24479_v58  ;;  %v17152_v8 = vld [vmem:[%s31990_s18 + $0x1c0] sm:$0xff] }
0x160a   :  { %v21738_v23 = vpop.f32.mrb[76].mxu1  ;;  %21592 = vmatmul.mubr.msk.f32.gmra.mrb[86].mxu0 %vm513_vm2, %v6577_v9  ;;  %v17153_v9 = vld [vmem:[%s31990_s18 + $0x1c8] sm:$0xff] }
0x160b   :  { %v7932_v15 = vpop.f32.mrb[77].mxu1  ;;  %21594 = vmatprep.mubr.msk.f32.mxu0 %vm513_vm2, %v6578_v14  ;;  %v17155_v14 = vld [vmem:[%s31990_s18 + $0x1d8] sm:$0xff] }
0x160c   :  { %v28455_v42 = vpack.c.bf16 %v21738_v23, %v7932_v15  ;;  %v17156_v23 = vld [vmem:[%s31990_s18 + $0x1e0] sm:$0xff]  ;;  %v17157_v15 = vld [vmem:[%s31990_s18 + $0x1e8] sm:$0xff] }
0x160e   :  { %21595 = vmatmul.mubr.msk.f32.gmra.mrb[88].mxu0 %vm513_vm2, %v6579_v35  ;;  %v17158_v35 = vld [vmem:[%s31990_s18 + $0x1f0] sm:$0xff] }
0x160f   :  { %21597 = vmatprep.mubr.msk.f32.mxu0 %vm513_vm2, %v6580_v49  ;;  %v17188_v49 = vld [vmem:[%s31990_s18 + $0x200] sm:$0xff] }
0x1612   :  { %21598 = vmatmul.mubr.msk.f32.gmra.mrb[90].mxu0 %vm513_vm2, %v6581_v56  ;;  %v17189_v56 = vld [vmem:[%s31990_s18 + $0x208] sm:$0xff] }
0x1613   :  { %21600 = vmatprep.mubr.msk.f32.mxu0 %vm513_vm2, %v6582_v63  ;;  %v17190_v63 = vld [vmem:[%s31990_s18 + $0x210] sm:$0xff] }
0x1616   :  { %v21789_v16 = vpop.f32.mrb[78].mxu1  ;;  %21601 = vmatmul.mubr.msk.f32.gmra.mrb[92].mxu0 %vm513_vm2, %v6583_v6  ;;  %v17191_v6 = vld [vmem:[%s31990_s18 + $0x218] sm:$0xff] }
0x1617   :  { %v8242_v18 = vpop.f32.mrb[79].mxu1  ;;  %21603 = vmatprep.mubr.msk.f32.mxu0 %vm513_vm2, %v6584_v13  ;;  %v17192_v13 = vld [vmem:[%s31990_s18 + $0x220] sm:$0xff] }
0x1618   :  { %v28481_v19 = vpack.c.bf16 %v21789_v16, %v8242_v18  ;;  %v17193_v16 = vld [vmem:[%s31990_s18 + $0x228] sm:$0xff]  ;;  %v17194_v18 = vld [vmem:[%s31990_s18 + $0x230] sm:$0xff] }
0x161a   :  { %v21792_v21 = vpop.f32.mrb[80].mxu1  ;;  %21604 = vmatmul.mubr.msk.f32.gmra.mrb[94].mxu0 %vm513_vm2, %v6585_v17  ;;  %v17195_v17 = vld [vmem:[%s31990_s18 + $0x238] sm:$0xff] }
0x161b   :  { %v8252_v22 = vpop.f32.mrb[81].mxu1  ;;  %21606 = vmatprep.mubr.msk.f32.mxu0 %vm513_vm2, %v6586_v20  ;;  %v17197_v20 = vld [vmem:[%s31990_s18 + $0x248] sm:$0xff] }
0x161c   :  { %v28491_v24 = vpack.c.bf16 %v21792_v21, %v8252_v22  ;;  %v17198_v21 = vld [vmem:[%s31990_s18 + $0x250] sm:$0xff]  ;;  %v17199_v22 = vld [vmem:[%s31990_s18 + $0x258] sm:$0xff] }
0x161e   :  { %21607 = vmatmul.mubr.msk.f32.gmra.mrb[96].mxu0 %vm513_vm2, %v6587_v57  ;;  %v17200_v57 = vld [vmem:[%s31990_s18 + $0x260] sm:$0xff] }
0x161f   :  { %21639 = vmatprep.mubr.msk.f32.mxu0 %vm513_vm2, %v17100_v25  ;;  %v17202_v25 = vld [vmem:[%s31990_s18 + $0x270] sm:$0xff] }
0x1622   :  { %21640 = vmatmul.mubr.msk.f32.vlgmr.msra.gmra.mrb[82].mxu0 %vm513_vm2, %v17101_v26  ;;  %v17203_v26 = vld [vmem:[%s31990_s18 + $0x278] sm:$0xff] }
0x1623   :  { %24482 = vmatpush3.bf16.msra.mxu0 %v24479_v58  ;;  %21642 = vmatprep.mubr.msk.f32.mxu0 %vm513_vm2, %v17102_v1  ;;  %v17146_v58 = vld [vmem:[%s31990_s18 + $0x190] sm:$0xff]  ;;  %v17232_v1 = vld [vmem:[%s31990_s18 + $0x280] sm:$0xff] }
0x1624   :  { %24484 = vmatprep.subr.bf16.mxu0 %v24483_v48 }
0x1626   :  { %v21843_v29 = vpop.f32.mrb[82].mxu1  ;;  %21643 = vmatmul.mubr.msk.f32.gmra.mrb[84].mxu0 %vm513_vm2, %v17103_v27  ;;  %v17233_v27 = vld [vmem:[%s31990_s18 + $0x288] sm:$0xff] }
0x1627   :  { %24486 = vmatpush3.bf16.msra.mxu0 %v24483_v48  ;;  %v8562_v30 = vpop.f32.mrb[83].mxu1  ;;  %21645 = vmatprep.mubr.msk.f32.mxu0 %vm513_vm2, %v17104_v28  ;;  %v17149_v48 = vld [vmem:[%s31990_s18 + $0x1a8] sm:$0xff]  ;;  %v9533_v28 = vld [vmem:[%s31991_s22] sm:$0xff] }
0x1628   :  { %v28517_v53 = vpack.c.bf16 %v21843_v29, %v8562_v30  ;;  %24504 = vmatprep.subr.bf16.mxu0 %v28445_v12  ;;  %v9534_v29 = vld [vmem:[%s31991_s22 + $0x8] sm:$0xff]  ;;  %v17234_v30 = vld [vmem:[%s31990_s18 + $0x290] sm:$0xff] }
0x162a   :  { %v21846_v11 = vpop.f32.mrb[84].mxu1  ;;  %21646 = vmatmul.mubr.msk.f32.gmra.mrb[86].mxu0 %vm513_vm2, %v17105_v31  ;;  %v24607_v31 = vpack.c.bf16 %v9534_v29, %v9533_v28  ;;  %v17379_v28 = vld [vmem:[%s31990_s18 + $0x478] sm:$0xff]  ;;  %v9535_v29 = vld [vmem:[%s31991_s22 + $0x10] sm:$0xff] }
0x162b   :  { %v8572_v32 = vpop.f32.mrb[85].mxu1  ;;  %21648 = vmatprep.mubr.msk.f32.mxu0 %vm513_vm2, %v17106_v10  ;;  %v17235_v10 = vld [vmem:[%s31990_s18 + $0x298] sm:$0xff] }
0x162c   :  { %v28528_v34 = vpack.c.bf16 %v21846_v11, %v8572_v32  ;;  %24608 = vmatprep.subr.bf16.mxu1 %v24607_v31  ;;  %v17236_v11 = vld [vmem:[%s31990_s18 + $0x2a0] sm:$0xff]  ;;  %v17238_v32 = vld [vmem:[%s31990_s18 + $0x2b0] sm:$0xff] }
0x162d   :  { %24610 = vmatpush3.bf16.msra.mxu1 %v24607_v31 }
0x162e   :  { %21649 = vmatmul.mubr.msk.f32.gmra.mrb[88].mxu0 %vm513_vm2, %v17107_v33  ;;  %v17239_v33 = vld [vmem:[%s31990_s18 + $0x2b8] sm:$0xff] }
0x162f   :  { %21651 = vmatprep.mubr.msk.f32.mxu0 %vm513_vm2, %v17108_v36  ;;  %v17241_v36 = vld [vmem:[%s31990_s18 + $0x2c8] sm:$0xff] }
0x1632   :  { %21652 = vmatmul.mubr.msk.f32.gmra.mrb[90].mxu0 %vm513_vm2, %v17109_v37  ;;  %v17242_v37 = vld [vmem:[%s31990_s18 + $0x2d0] sm:$0xff] }
0x1633   :  { %21654 = vmatprep.mubr.msk.f32.mxu0 %vm513_vm2, %v17110_v38  ;;  %v17243_v38 = vld [vmem:[%s31990_s18 + $0x2d8] sm:$0xff] }
0x1636   :  { %v21897_v41 = vpop.f32.mrb[86].mxu1  ;;  %21655 = vmatmul.mubr.msk.f32.gmra.mrb[92].mxu0 %vm513_vm2, %v17111_v39  ;;  %v17244_v39 = vld [vmem:[%s31990_s18 + $0x2e0] sm:$0xff] }
0x1637   :  { %v8882_v43 = vpop.f32.mrb[87].mxu1  ;;  %21657 = vmatprep.mubr.msk.f32.mxu0 %vm513_vm2, %v17112_v40  ;;  %v17245_v40 = vld [vmem:[%s31990_s18 + $0x2e8] sm:$0xff] }
0x1638   :  { %v28554_v45 = vpack.c.bf16 %v21897_v41, %v8882_v43  ;;  %v17246_v41 = vld [vmem:[%s31990_s18 + $0x2f0] sm:$0xff]  ;;  %v17247_v43 = vld [vmem:[%s31990_s18 + $0x2f8] sm:$0xff] }
0x163a   :  { %v21900_v47 = vpop.f32.mrb[88].mxu1  ;;  %21658 = vmatmul.mubr.msk.f32.gmra.mrb[94].mxu0 %vm513_vm2, %v17113_v44  ;;  %v17276_v44 = vld [vmem:[%s31990_s18 + $0x300] sm:$0xff] }
0x163b   :  { %v8892_v50 = vpop.f32.mrb[89].mxu1  ;;  %21660 = vmatprep.mubr.msk.f32.mxu0 %vm513_vm2, %v17114_v46  ;;  %v17277_v46 = vld [vmem:[%s31990_s18 + $0x308] sm:$0xff] }
0x163c   :  { %v28564_v52 = vpack.c.bf16 %v21900_v47, %v8892_v50  ;;  %v17278_v47 = vld [vmem:[%s31990_s18 + $0x310] sm:$0xff]  ;;  %v17279_v50 = vld [vmem:[%s31990_s18 + $0x318] sm:$0xff] }
0x163e   :  { %21661 = vmatmul.mubr.msk.f32.gmra.mrb[96].mxu0 %vm513_vm2, %v17115_v51  ;;  %v17280_v51 = vld [vmem:[%s31990_s18 + $0x320] sm:$0xff] }
0x163f   :  { %21693 = vmatprep.mubr.msk.f32.mxu0 %vm513_vm2, %v17144_v54  ;;  %v17282_v54 = vld [vmem:[%s31990_s18 + $0x330] sm:$0xff] }
0x1642   :  { %21694 = vmatmul.mubr.msk.f32.vlgmr.msra.gmra.mrb[82].mxu0 %vm513_vm2, %v17145_v55  ;;  %v17284_v55 = vld [vmem:[%s31990_s18 + $0x340] sm:$0xff] }
0x1643   :  { %24506 = vmatpush3.bf16.msra.mxu0 %v28445_v12  ;;  %21696 = vmatprep.mubr.msk.f32.mxu0 %vm513_vm2, %v17146_v58  ;;  %v17154_v12 = vld [vmem:[%s31990_s18 + $0x1d0] sm:$0xff]  ;;  %v17285_v58 = vld [vmem:[%s31990_s18 + $0x348] sm:$0xff] }
0x1644   :  { %24508 = vmatprep.subr.bf16.mxu0 %v28455_v42 }
0x1646   :  { %v21951_v61 = vpop.f32.mrb[90].mxu1  ;;  %21697 = vmatmul.mubr.msk.f32.gmra.mrb[84].mxu0 %vm513_vm2, %v17147_v59  ;;  %v17286_v59 = vld [vmem:[%s31990_s18 + $0x350] sm:$0xff] }
0x1647   :  { %24510 = vmatpush3.bf16.msra.mxu0 %v28455_v42  ;;  %v9202_v62 = vpop.f32.mrb[91].mxu1  ;;  %21699 = vmatprep.mubr.msk.f32.mxu0 %vm513_vm2, %v17148_v60  ;;  %v17159_v42 = vld [vmem:[%s31990_s18 + $0x1f8] sm:$0xff] }
0x1648   :  { %v28593_v0 = vpack.c.bf16 %v21951_v61, %v9202_v62  ;;  %24528 = vmatprep.subr.bf16.mxu0 %v28481_v19  ;;  %v17287_v60 = vld [vmem:[%s31990_s18 + $0x358] sm:$0xff]  ;;  %v17288_v61 = vld [vmem:[%s31990_s18 + $0x360] sm:$0xff]  ;;  %v17289_v62 = vld [vmem:[%s31990_s18 + $0x368] sm:$0xff] }
0x164a   :  { %v21954_v3 = vpop.f32.mrb[92].mxu1  ;;  %21700 = vmatmul.mubr.msk.f32.gmra.mrb[86].mxu0 %vm513_vm2, %v17149_v48  ;;  %v17290_v48 = vld [vmem:[%s31990_s18 + $0x370] sm:$0xff] }
0x164b   :  { %v9212_v4 = vpop.f32.mrb[93].mxu1  ;;  %21702 = vmatprep.mubr.msk.f32.mxu0 %vm513_vm2, %v17150_v2  ;;  %v17291_v2 = vld [vmem:[%s31990_s18 + $0x378] sm:$0xff] }
0x164c   :  { %v28604_v7 = vpack.c.bf16 %v21954_v3, %v9212_v4  ;;  %v17320_v3 = vld [vmem:[%s31990_s18 + $0x380] sm:$0xff]  ;;  %v17321_v4 = vld [vmem:[%s31990_s18 + $0x388] sm:$0xff] }
0x164e   :  { %21703 = vmatmul.mubr.msk.f32.gmra.mrb[88].mxu0 %vm513_vm2, %v17151_v5  ;;  %v17322_v5 = vld [vmem:[%s31990_s18 + $0x390] sm:$0xff] }
0x164f   :  { %21705 = vmatprep.mubr.msk.f32.mxu0 %vm513_vm2, %v17152_v8  ;;  %v17323_v8 = vld [vmem:[%s31990_s18 + $0x398] sm:$0xff] }
0x1652   :  { %21706 = vmatmul.mubr.msk.f32.gmra.mrb[90].mxu0 %vm513_vm2, %v17153_v9  ;;  %v17324_v9 = vld [vmem:[%s31990_s18 + $0x3a0] sm:$0xff] }
0x1653   :  { %21708 = vmatprep.mubr.msk.f32.mxu0 %vm513_vm2, %v17154_v12  ;;  %v17326_v12 = vld [vmem:[%s31990_s18 + $0x3b0] sm:$0xff] }
0x1656   :  { %21709 = vmatmul.mubr.msk.f32.gmra.mrb[92].mxu0 %vm513_vm2, %v17155_v14  ;;  %v17327_v14 = vld [vmem:[%s31990_s18 + $0x3b8] sm:$0xff] }
0x1657   :  { %21711 = vmatprep.mubr.msk.f32.mxu0 %vm513_vm2, %v17156_v23  ;;  %v17329_v23 = vld [vmem:[%s31990_s18 + $0x3c8] sm:$0xff] }
0x165a   :  { %21712 = vmatmul.mubr.msk.f32.gmra.mrb[94].mxu0 %vm513_vm2, %v17157_v15  ;;  %v17330_v15 = vld [vmem:[%s31990_s18 + $0x3d0] sm:$0xff] }
0x165b   :  { %21714 = vmatprep.mubr.msk.f32.mxu0 %vm513_vm2, %v17158_v35  ;;  %v17331_v35 = vld [vmem:[%s31990_s18 + $0x3d8] sm:$0xff] }
0x165e   :  { %21715 = vmatmul.mubr.msk.f32.gmra.mrb[96].mxu0 %vm513_vm2, %v17159_v42  ;;  %v17332_v42 = vld [vmem:[%s31990_s18 + $0x3e0] sm:$0xff] }
0x165f   :  { %21747 = vmatprep.mubr.msk.f32.mxu0 %vm513_vm2, %v17188_v49  ;;  %v17333_v49 = vld [vmem:[%s31990_s18 + $0x3e8] sm:$0xff] }
0x1662   :  { %21748 = vmatmul.mubr.msk.f32.vlgmr.msra.gmra.mrb[82].mxu0 %vm513_vm2, %v17189_v56  ;;  %v17334_v56 = vld [vmem:[%s31990_s18 + $0x3f0] sm:$0xff] }
0x1663   :  { %24530 = vmatpush3.bf16.msra.mxu0 %v28481_v19  ;;  %21750 = vmatprep.mubr.msk.f32.mxu0 %vm513_vm2, %v17190_v63  ;;  %v17196_v19 = vld [vmem:[%s31990_s18 + $0x240] sm:$0xff]  ;;  %v17335_v63 = vld [vmem:[%s31990_s18 + $0x3f8] sm:$0xff] }
0x1664   :  { %24532 = vmatprep.subr.bf16.mxu0 %v28491_v24 }
0x1666   :  { %21751 = vmatmul.mubr.msk.f32.gmra.mrb[84].mxu0 %vm513_vm2, %v17191_v6  ;;  %v17364_v6 = vld [vmem:[%s31990_s18 + $0x400] sm:$0xff] }
0x1667   :  { %24534 = vmatpush3.bf16.msra.mxu0 %v28491_v24  ;;  %21753 = vmatprep.mubr.msk.f32.mxu0 %vm513_vm2, %v17192_v13  ;;  %v17201_v24 = vld [vmem:[%s31990_s18 + $0x268] sm:$0xff] }
0x1668   :  { %24552 = vmatprep.subr.bf16.mxu0 %v28517_v53  ;;  %v17365_v13 = vld [vmem:[%s31990_s18 + $0x408] sm:$0xff] }
0x166a   :  { %21754 = vmatmul.mubr.msk.f32.gmra.mrb[86].mxu0 %vm513_vm2, %v17193_v16  ;;  %v17366_v16 = vld [vmem:[%s31990_s18 + $0x410] sm:$0xff] }
0x166b   :  { %21756 = vmatprep.mubr.msk.f32.mxu0 %vm513_vm2, %v17194_v18  ;;  %v17367_v18 = vld [vmem:[%s31990_s18 + $0x418] sm:$0xff] }
0x166e   :  { %21757 = vmatmul.mubr.msk.f32.gmra.mrb[88].mxu0 %vm513_vm2, %v17195_v17  ;;  %v17368_v17 = vld [vmem:[%s31990_s18 + $0x420] sm:$0xff] }
0x166f   :  { %21759 = vmatprep.mubr.msk.f32.mxu0 %vm513_vm2, %v17196_v19  ;;  %v17369_v19 = vld [vmem:[%s31990_s18 + $0x428] sm:$0xff] }
0x1672   :  { %21760 = vmatmul.mubr.msk.f32.gmra.mrb[90].mxu0 %vm513_vm2, %v17197_v20  ;;  %v17370_v20 = vld [vmem:[%s31990_s18 + $0x430] sm:$0xff] }
0x1673   :  { %21762 = vmatprep.mubr.msk.f32.mxu0 %vm513_vm2, %v17198_v21  ;;  %v17371_v21 = vld [vmem:[%s31990_s18 + $0x438] sm:$0xff] }
0x1676   :  { %21763 = vmatmul.mubr.msk.f32.gmra.mrb[92].mxu0 %vm513_vm2, %v17199_v22  ;;  %v17372_v22 = vld [vmem:[%s31990_s18 + $0x440] sm:$0xff] }
0x1677   :  { %21765 = vmatprep.mubr.msk.f32.mxu0 %vm513_vm2, %v17200_v57  ;;  %v17373_v57 = vld [vmem:[%s31990_s18 + $0x448] sm:$0xff] }
0x167a   :  { %21766 = vmatmul.mubr.msk.f32.gmra.mrb[94].mxu0 %vm513_vm2, %v17201_v24  ;;  %v17374_v24 = vld [vmem:[%s31990_s18 + $0x450] sm:$0xff] }
0x167b   :  { %21768 = vmatprep.mubr.msk.f32.mxu0 %vm513_vm2, %v17202_v25  ;;  %v17375_v25 = vld [vmem:[%s31990_s18 + $0x458] sm:$0xff] }
0x167e   :  { %21769 = vmatmul.mubr.msk.f32.gmra.mrb[96].mxu0 %vm513_vm2, %v17203_v26  ;;  %v17376_v26 = vld [vmem:[%s31990_s18 + $0x460] sm:$0xff] }
0x167f   :  { %21801 = vmatprep.mubr.msk.f32.mxu0 %vm513_vm2, %v17232_v1  ;;  %v17377_v1 = vld [vmem:[%s31990_s18 + $0x468] sm:$0xff] }
0x1682   :  { %21802 = vmatmul.mubr.msk.f32.vlgmr.msra.gmra.mrb[82].mxu0 %vm513_vm2, %v17233_v27  ;;  %v17378_v27 = vld [vmem:[%s31990_s18 + $0x470] sm:$0xff] }
0x1683   :  { %24554 = vmatpush3.bf16.msra.mxu0 %v28517_v53  ;;  %21804 = vmatprep.mubr.msk.f32.mxu0 %vm513_vm2, %v17234_v30  ;;  %v17237_v53 = vld [vmem:[%s31990_s18 + $0x2a8] sm:$0xff]  ;;  %v9536_v30 = vld [vmem:[%s31991_s22 + $0x18] sm:$0xff] }
0x1684   :  { %24556 = vmatprep.subr.bf16.mxu0 %v28528_v34  ;;  %v24611_v31 = vpack.c.bf16 %v9536_v30, %v9535_v29 }
0x1686   :  { %21805 = vmatmul.mubr.msk.f32.gmra.mrb[84].mxu0 %vm513_vm2, %v17235_v10  ;;  %24612 = vmatprep.subr.bf16.mxu1 %v24611_v31  ;;  %v17489_v10 = vld [vmem:[%s31991_s22 + $0x20] sm:$0xff] }
0x1687   :  { %24558 = vmatpush3.bf16.msra.mxu0 %v28528_v34  ;;  %21807 = vmatprep.mubr.msk.f32.mxu0 %vm513_vm2, %v17236_v11  ;;  %v17240_v34 = vld [vmem:[%s31990_s18 + $0x2c0] sm:$0xff]  ;;  %v17490_v11 = vld [vmem:[%s31991_s22 + $0x28] sm:$0xff] }
0x1688   :  { %24576 = vmatprep.subr.bf16.mxu0 %v28554_v45  ;;  %24614 = vmatpush3.bf16.msra.mxu1 %v24611_v31 }
0x168a   :  { %21808 = vmatmul.mubr.msk.f32.gmra.mrb[86].mxu0 %vm513_vm2, %v17237_v53  ;;  %v24615_v53 = vpack.c.bf16 %v17490_v11, %v17489_v10 }
0x168b   :  { %21810 = vmatprep.mubr.msk.f32.mxu0 %vm513_vm2, %v17238_v32  ;;  %v28995_v32 = vld [vmem:[%s31992_s20] ss:$0 sm:$0xff] }
0x168c   :  { %24616 = vmatprep.subr.bf16.mxu1 %v24615_v53 }
0x168e   :  { %21811 = vmatmul.mubr.msk.f32.gmra.mrb[88].mxu0 %vm513_vm2, %v17239_v33 }
0x168f   :  { %21813 = vmatprep.mubr.msk.f32.mxu0 %vm513_vm2, %v17240_v34 }
0x1692   :  { %21814 = vmatmul.mubr.msk.f32.gmra.mrb[90].mxu0 %vm513_vm2, %v17241_v36 }
0x1693   :  { %21816 = vmatprep.mubr.msk.f32.mxu0 %vm513_vm2, %v17242_v37 }
0x1696   :  { %21817 = vmatmul.mubr.msk.f32.gmra.mrb[92].mxu0 %vm513_vm2, %v17243_v38  ;;  %v17491_v38 = vld [vmem:[%s31991_s22 + $0x30] sm:$0xff] }
0x1697   :  { %21819 = vmatprep.mubr.msk.f32.mxu0 %vm513_vm2, %v17244_v39  ;;  %v17492_v39 = vld [vmem:[%s31991_s22 + $0x38] sm:$0xff] }
0x169a   :  { %21820 = vmatmul.mubr.msk.f32.gmra.mrb[94].mxu0 %vm513_vm2, %v17245_v40 }
0x169b   :  { %21822 = vmatprep.mubr.msk.f32.mxu0 %vm513_vm2, %v17246_v41 }
0x169e   :  { %21823 = vmatmul.mubr.msk.f32.gmra.mrb[96].mxu0 %vm513_vm2, %v17247_v43 }
0x169f   :  { %21855 = vmatprep.mubr.msk.f32.mxu0 %vm513_vm2, %v17276_v44 }
0x16a2   :  { %21856 = vmatmul.mubr.msk.f32.vlgmr.msra.gmra.mrb[82].mxu0 %vm513_vm2, %v17277_v46 }
0x16a3   :  { %24578 = vmatpush3.bf16.msra.mxu0 %v28554_v45  ;;  %21858 = vmatprep.mubr.msk.f32.mxu0 %vm513_vm2, %v17278_v47  ;;  %v17281_v45 = vld [vmem:[%s31990_s18 + $0x328] sm:$0xff]  ;;  %v24619_v47 = vpack.c.bf16 %v17492_v39, %v17491_v38 }
0x16a4   :  { %24580 = vmatprep.subr.bf16.mxu0 %v28564_v52 }
0x16a6   :  { %21859 = vmatmul.mubr.msk.f32.gmra.mrb[84].mxu0 %vm513_vm2, %v17279_v50 }
0x16a7   :  { %24582 = vmatpush3.bf16.msra.mxu0 %v28564_v52  ;;  %21861 = vmatprep.mubr.msk.f32.mxu0 %vm513_vm2, %v17280_v51  ;;  %v17283_v52 = vld [vmem:[%s31990_s18 + $0x338] sm:$0xff] }
0x16a8   :  { %24600 = vmatprep.subr.bf16.mxu0 %v28593_v0 }
0x16aa   :  { %21862 = vmatmul.mubr.msk.f32.gmra.mrb[86].mxu0 %vm513_vm2, %v17281_v45 }
0x16ab   :  { %21864 = vmatprep.mubr.msk.f32.mxu0 %vm513_vm2, %v17282_v54 }
0x16ae   :  { %21865 = vmatmul.mubr.msk.f32.gmra.mrb[88].mxu0 %vm513_vm2, %v17283_v52 }
0x16af   :  { %21867 = vmatprep.mubr.msk.f32.mxu0 %vm513_vm2, %v17284_v55 }
0x16b2   :  { %21868 = vmatmul.mubr.msk.f32.gmra.mrb[90].mxu0 %vm513_vm2, %v17285_v58 }
0x16b3   :  { %21870 = vmatprep.mubr.msk.f32.mxu0 %vm513_vm2, %v17286_v59 }
0x16b6   :  { %21871 = vmatmul.mubr.msk.f32.gmra.mrb[92].mxu0 %vm513_vm2, %v17287_v60 }
0x16b7   :  { %21873 = vmatprep.mubr.msk.f32.mxu0 %vm513_vm2, %v17288_v61 }
0x16ba   :  { %21874 = vmatmul.mubr.msk.f32.gmra.mrb[94].mxu0 %vm513_vm2, %v17289_v62 }
0x16bb   :  { %21876 = vmatprep.mubr.msk.f32.mxu0 %vm513_vm2, %v17290_v48 }
0x16be   :  { %21877 = vmatmul.mubr.msk.f32.gmra.mrb[96].mxu0 %vm513_vm2, %v17291_v2 }
0x16bf   :  { %21909 = vmatprep.mubr.msk.f32.mxu0 %vm513_vm2, %v17320_v3 }
0x16c2   :  { %21910 = vmatmul.mubr.msk.f32.vlgmr.msra.gmra.mrb[82].mxu0 %vm513_vm2, %v17321_v4 }
0x16c3   :  { %24602 = vmatpush3.bf16.msra.mxu0 %v28593_v0  ;;  %21912 = vmatprep.mubr.msk.f32.mxu0 %vm513_vm2, %v17322_v5  ;;  %v17325_v0 = vld [vmem:[%s31990_s18 + $0x3a8] sm:$0xff] }
0x16c4   :  { %24604 = vmatprep.subr.bf16.mxu0 %v28604_v7 }
0x16c6   :  { %21913 = vmatmul.mubr.msk.f32.gmra.mrb[84].mxu0 %vm513_vm2, %v17323_v8 }
0x16c7   :  { %24606 = vmatpush3.bf16.msra.mxu0 %v28604_v7  ;;  %21915 = vmatprep.mubr.msk.f32.mxu0 %vm513_vm2, %v17324_v9  ;;  %v17328_v7 = vld [vmem:[%s31990_s18 + $0x3c0] sm:$0xff] }
0x16ca   :  { %21916 = vmatmul.mubr.msk.f32.gmra.mrb[86].mxu0 %vm513_vm2, %v17325_v0 }
0x16cb   :  { %21918 = vmatprep.mubr.msk.f32.mxu0 %vm513_vm2, %v17326_v12 }
0x16ce   :  { %21919 = vmatmul.mubr.msk.f32.gmra.mrb[88].mxu0 %vm513_vm2, %v17327_v14 }
0x16cf   :  { %21921 = vmatprep.mubr.msk.f32.mxu0 %vm513_vm2, %v17328_v7 }
0x16d2   :  { %21922 = vmatmul.mubr.msk.f32.gmra.mrb[90].mxu0 %vm513_vm2, %v17329_v23 }
0x16d3   :  { %21924 = vmatprep.mubr.msk.f32.mxu0 %vm513_vm2, %v17330_v15 }
0x16d6   :  { %21925 = vmatmul.mubr.msk.f32.gmra.mrb[92].mxu0 %vm513_vm2, %v17331_v35 }
0x16d7   :  { %21927 = vmatprep.mubr.msk.f32.mxu0 %vm513_vm2, %v17332_v42 }
0x16da   :  { %21928 = vmatmul.mubr.msk.f32.gmra.mrb[94].mxu0 %vm513_vm2, %v17333_v49 }
0x16db   :  { %21930 = vmatprep.mubr.msk.f32.mxu0 %vm513_vm2, %v17334_v56 }
0x16de   :  { %21931 = vmatmul.mubr.msk.f32.gmra.mrb[96].mxu0 %vm513_vm2, %v17335_v63 }
0x16df   :  { %21963 = vmatprep.mubr.msk.f32.mxu0 %vm513_vm2, %v17364_v6 }
0x16e2   :  { %21964 = vmatmul.mubr.msk.f32.vlgmr.msra.gmra.mrb[82].mxu0 %vm513_vm2, %v17365_v13 }
0x16e3   :  { %21966 = vmatprep.mubr.msk.f32.mxu0 %vm513_vm2, %v17366_v16 }
0x16e6   :  { %21967 = vmatmul.mubr.msk.f32.gmra.mrb[84].mxu0 %vm513_vm2, %v17367_v18 }
0x16e7   :  { %21969 = vmatprep.mubr.msk.f32.mxu0 %vm513_vm2, %v17368_v17 }
0x16ea   :  { %21970 = vmatmul.mubr.msk.f32.gmra.mrb[86].mxu0 %vm513_vm2, %v17369_v19 }
0x16eb   :  { %21972 = vmatprep.mubr.msk.f32.mxu0 %vm513_vm2, %v17370_v20 }
0x16ee   :  { %21973 = vmatmul.mubr.msk.f32.gmra.mrb[88].mxu0 %vm513_vm2, %v17371_v21 }
0x16ef   :  { %21975 = vmatprep.mubr.msk.f32.mxu0 %vm513_vm2, %v17372_v22 }
0x16f2   :  { %21976 = vmatmul.mubr.msk.f32.gmra.mrb[90].mxu0 %vm513_vm2, %v17373_v57 }
0x16f3   :  { %21978 = vmatprep.mubr.msk.f32.mxu0 %vm513_vm2, %v17374_v24  ;;  %v17425_v24 = vld [vmem:[%s31993_s21 + $0x200] sm:$0xff] }
0x16f6   :  { %21979 = vmatmul.mubr.msk.f32.gmra.mrb[92].mxu0 %vm513_vm2, %v17375_v25 }
0x16f7   :  { %21981 = vmatprep.mubr.msk.f32.mxu0 %vm513_vm2, %v17376_v26 }
0x16fa   :  { %21982 = vmatmul.mubr.msk.f32.gmra.mrb[94].mxu0 %vm513_vm2, %v17377_v1 }
0x16fb   :  { %21984 = vmatprep.mubr.msk.f32.mxu0 %vm513_vm2, %v17378_v27 }
0x16fe   :  { %21985 = vmatmul.mubr.msk.f32.gmra.mrb[96].mxu0 %vm513_vm2, %v17379_v28 }
0x16ff   :  { %22083 = vmatprep.mubr.f32.mxu0 %v17425_v24 }
0x17b5   :  { %v21965_v33 = vpop.f32.mrb[82].mxu0 }
0x17b6   :  { %v9438_v34 = vadd.f32 %v21965_v33, %v28995_v32  ;;  %v9335_v36 = vpop.f32.mrb[83].mxu0 }
0x17b7   :  { %v9437_v37 = vadd.f32 %v28995_v32, %v9335_v36 }
0x17b8   :  { %v29007_v43 = vmax.f32 %v9438_v34, 0.0 }
0x17b9   :  { %v29005_v40 = vmax.f32 %v9437_v37, 0.0  ;;  %v21968_v41 = vpop.f32.mrb[84].mxu0 }
0x17ba   :  { %v9440_v44 = vadd.f32 %v21968_v41, %v28995_v32  ;;  %v9345_v46 = vpop.f32.mrb[85].mxu0 }
0x17bb   :  { %v9439_v50 = vadd.f32 %v28995_v32, %v9345_v46  ;;  %21995 = vmatprep.mubr.msk.f32.mxu1 %vm513_vm2, %v29005_v40 }
0x17bc   :  { %21996 = vmatmul.mubr.msk.f32.vlgmr.msra.gmra.mrb[94].mxu1 %vm513_vm2, %v29007_v43  ;;  %v29017_v54 = vmax.f32 %v9440_v44, 0.0 }
0x17bd   :  { %v29015_v51 = vmax.f32 %v9439_v50, 0.0  ;;  %v21971_v45 = vpop.f32.mrb[86].mxu0  ;;  %24618 = vmatpush3.bf16.msra.mxu1 %v24615_v53 }
0x17be   :  { %v9442_v52 = vadd.f32 %v21971_v45, %v28995_v32  ;;  %v9355_v55 = vpop.f32.mrb[87].mxu0  ;;  %24620 = vmatprep.subr.bf16.mxu1 %v24619_v47 }
0x17bf   :  { %v9441_v58 = vadd.f32 %v28995_v32, %v9355_v55  ;;  %21998 = vmatprep.mubr.msk.f32.mxu1 %vm513_vm2, %v29015_v51 }
0x17c0   :  { %21999 = vmatmul.mubr.msk.f32.gmra.mrb[96].mxu1 %vm513_vm2, %v29017_v54  ;;  %v29027_v61 = vmax.f32 %v9442_v52, 0.0 }
0x17c1   :  { %v29025_v59 = vmax.f32 %v9441_v58, 0.0  ;;  %v21974_v60 = vpop.f32.mrb[88].mxu0  ;;  %24622 = vmatpush3.bf16.msra.mxu1 %v24619_v47 }
0x17c2   :  { %v9444_v62 = vadd.f32 %v21974_v60, %v28995_v32  ;;  %v9365_v48 = vpop.f32.mrb[89].mxu0 }
0x17c3   :  { %v9443_v2 = vadd.f32 %v28995_v32, %v9365_v48  ;;  %22001 = vmatprep.mubr.msk.f32.mxu1 %vm513_vm2, %v29025_v59 }
0x17c4   :  { %22002 = vmatmul.mubr.msk.f32.gmra.mrb[98].mxu1 %vm513_vm2, %v29027_v61  ;;  %v29037_v5 = vmax.f32 %v9444_v62, 0.0 }
0x17c5   :  { %v29035_v3 = vmax.f32 %v9443_v2, 0.0  ;;  %v21977_v4 = vpop.f32.mrb[90].mxu0 }
0x17c6   :  { %v9446_v8 = vadd.f32 %v21977_v4, %v28995_v32  ;;  %v9375_v9 = vpop.f32.mrb[91].mxu0 }
0x17c7   :  { %v9445_v0 = vadd.f32 %v28995_v32, %v9375_v9  ;;  %22004 = vmatprep.mubr.msk.f32.mxu1 %vm513_vm2, %v29035_v3 }
0x17c8   :  { %22005 = vmatmul.mubr.msk.f32.gmra.mrb[100].mxu1 %vm513_vm2, %v29037_v5  ;;  %v29047_v7 = vmax.f32 %v9446_v8, 0.0 }
0x17c9   :  { %v29045_v12 = vmax.f32 %v9445_v0, 0.0  ;;  %v21980_v14 = vpop.f32.mrb[92].mxu0 }
0x17ca   :  { %v9448_v23 = vadd.f32 %v21980_v14, %v28995_v32  ;;  %v9385_v15 = vpop.f32.mrb[93].mxu0 }
0x17cb   :  { %v9447_v35 = vadd.f32 %v28995_v32, %v9385_v15  ;;  %22007 = vmatprep.mubr.msk.f32.mxu1 %vm513_vm2, %v29045_v12 }
0x17cc   :  { %22008 = vmatmul.mubr.msk.f32.gmra.mrb[102].mxu1 %vm513_vm2, %v29047_v7  ;;  %v29057_v56 = vmax.f32 %v9448_v23, 0.0 }
0x17cd   :  { %v29055_v42 = vmax.f32 %v9447_v35, 0.0  ;;  %v21983_v49 = vpop.f32.mrb[94].mxu0 }
0x17ce   :  { %v9450_v63 = vadd.f32 %v21983_v49, %v28995_v32  ;;  %v9395_v6 = vpop.f32.mrb[95].mxu0 }
0x17cf   :  { %v9449_v13 = vadd.f32 %v28995_v32, %v9395_v6  ;;  %22010 = vmatprep.mubr.msk.f32.mxu1 %vm513_vm2, %v29055_v42 }
0x17d0   :  { %22011 = vmatmul.mubr.msk.f32.gmra.mrb[104].mxu1 %vm513_vm2, %v29057_v56  ;;  %v29067_v17 = vmax.f32 %v9450_v63, 0.0 }
0x17d1   :  { %v29065_v16 = vmax.f32 %v9449_v13, 0.0  ;;  %v21986_v18 = vpop.f32.mrb[96].mxu0 }
0x17d2   :  { %v9452_v19 = vadd.f32 %v21986_v18, %v28995_v32  ;;  %v9405_v20 = vpop.f32.mrb[97].mxu0 }
0x17d3   :  { %v9451_v21 = vadd.f32 %v28995_v32, %v9405_v20  ;;  %22013 = vmatprep.mubr.msk.f32.mxu1 %vm513_vm2, %v29065_v16 }
0x17d4   :  { %22014 = vmatmul.mubr.msk.f32.gmra.mrb[106].mxu1 %vm513_vm2, %v29067_v17  ;;  %v29077_v57 = vmax.f32 %v9452_v19, 0.0 }
0x17d5   :  { %v29075_v22 = vmax.f32 %v9451_v21, 0.0 }
0x17d7   :  { %22016 = vmatprep.mubr.msk.f32.mxu1 %vm513_vm2, %v29075_v22 }
0x17d8   :  { %22017 = vmatmul.mubr.msk.f32.gmra.mrb[108].mxu1 %vm513_vm2, %v29077_v57 }
0x17d9   :  { %22027 = vmatprep.mubr.msk.f32.mxu1 %vm513_vm2, %v29005_v40 }
0x17dc   :  { %22028 = vmatmul.mubr.msk.f32.vlgmr.msra.gmra.mrb[110].mxu1 %vm513_vm2, %v29007_v43 }
0x17dd   :  { %22030 = vmatprep.mubr.msk.f32.mxu1 %vm513_vm2, %v29015_v51 }
0x17e0   :  { %22031 = vmatmul.mubr.msk.f32.gmra.mrb[112].mxu1 %vm513_vm2, %v29017_v54 }
0x17e1   :  { %22033 = vmatprep.mubr.msk.f32.mxu1 %vm513_vm2, %v29025_v59 }
0x17e4   :  { %22034 = vmatmul.mubr.msk.f32.gmra.mrb[114].mxu1 %vm513_vm2, %v29027_v61 }
0x17e5   :  { %22036 = vmatprep.mubr.msk.f32.mxu1 %vm513_vm2, %v29035_v3 }
0x17e8   :  { %22037 = vmatmul.mubr.msk.f32.gmra.mrb[116].mxu1 %vm513_vm2, %v29037_v5 }
0x17e9   :  { %22039 = vmatprep.mubr.msk.f32.mxu1 %vm513_vm2, %v29045_v12 }
0x17ec   :  { %22040 = vmatmul.mubr.msk.f32.gmra.mrb[118].mxu1 %vm513_vm2, %v29047_v7 }
0x17ed   :  { %22042 = vmatprep.mubr.msk.f32.mxu1 %vm513_vm2, %v29055_v42 }
0x17f0   :  { %22043 = vmatmul.mubr.msk.f32.gmra.mrb[120].mxu1 %vm513_vm2, %v29057_v56 }
0x17f1   :  { %22045 = vmatprep.mubr.msk.f32.mxu1 %vm513_vm2, %v29065_v16 }
0x17f4   :  { %22046 = vmatmul.mubr.msk.f32.gmra.mrb[122].mxu1 %vm513_vm2, %v29067_v17 }
0x17f5   :  { %22048 = vmatprep.mubr.msk.f32.mxu1 %vm513_vm2, %v29075_v22 }
0x17f8   :  { %22049 = vmatmul.mubr.msk.f32.gmra.mrb[124].mxu1 %vm513_vm2, %v29077_v57 }
0x188f   :  { %v21997_v25 = vpop.f32.mrb[94].mxu1 }
0x1890   :  { %v9651_v26 = vpop.f32.mrb[95].mxu1 }
0x1891   :  { %v29118_v1 = vpack.c.bf16 %v21997_v25, %v9651_v26  ;;  %v17426_v25 = vld [vmem:[%s31993_s21 + $0x208] sm:$0xff]  ;;  %v17427_v26 = vld [vmem:[%s31993_s21 + $0x210] sm:$0xff] }
0x1893   :  { %v22000_v27 = vpop.f32.mrb[96].mxu1 }
0x1894   :  { %v9661_v28 = vpop.f32.mrb[97].mxu1 }
0x1895   :  { %v29120_v29 = vpack.c.bf16 %v22000_v27, %v9661_v28  ;;  %v17428_v27 = vld [vmem:[%s31993_s21 + $0x218] sm:$0xff]  ;;  %v17429_v28 = vld [vmem:[%s31993_s21 + $0x220] sm:$0xff] }
0x1897   :  { %v22003_v30 = vpop.f32.mrb[98].mxu1 }
0x1898   :  { %v9671_v31 = vpop.f32.mrb[99].mxu1 }
0x1899   :  { %v29122_v10 = vpack.c.bf16 %v22003_v30, %v9671_v31  ;;  %v17430_v30 = vld [vmem:[%s31993_s21 + $0x228] sm:$0xff]  ;;  %v17432_v31 = vld [vmem:[%s31993_s21 + $0x238] sm:$0xff] }
0x189b   :  { %v22006_v11 = vpop.f32.mrb[100].mxu1 }
0x189c   :  { %v9681_v53 = vpop.f32.mrb[101].mxu1 }
0x189d   :  { %v29124_v32 = vpack.c.bf16 %v22006_v11, %v9681_v53  ;;  %v17434_v11 = vld [vmem:[%s31993_s21 + $0x248] sm:$0xff]  ;;  %v17436_v53 = vld [vmem:[%s31993_s21 + $0x258] sm:$0xff] }
0x189f   :  { %v22009_v33 = vpop.f32.mrb[102].mxu1 }
0x18a0   :  { %v9691_v34 = vpop.f32.mrb[103].mxu1 }
0x18a1   :  { %v29126_v36 = vpack.c.bf16 %v22009_v33, %v9691_v34  ;;  %v17438_v33 = vld [vmem:[%s31993_s21 + $0x268] sm:$0xff]  ;;  %v17439_v34 = vld [vmem:[%s31993_s21 + $0x270] sm:$0xff] }
0x18a3   :  { %v22012_v37 = vpop.f32.mrb[104].mxu1 }
0x18a4   :  { %v9701_v38 = vpop.f32.mrb[105].mxu1 }
0x18a5   :  { %v29128_v39 = vpack.c.bf16 %v22012_v37, %v9701_v38  ;;  %v17574_v37 = vld [vmem:[%s31991_s22 + $0x48] sm:$0xff]  ;;  %v17440_v38 = vld [vmem:[%s31993_s21 + $0x278] sm:$0xff] }
0x18a7   :  { %v22015_v41 = vpop.f32.mrb[106].mxu1 }
0x18a8   :  { %v9711_v44 = vpop.f32.mrb[107].mxu1 }
0x18a9   :  { %v29130_v46 = vpack.c.bf16 %v22015_v41, %v9711_v44  ;;  %v17442_v44 = vld [vmem:[%s31993_s21 + $0x288] sm:$0xff] }
0x18ab   :  { %v22018_v47 = vpop.f32.mrb[108].mxu1 }
0x18ac   :  { %v9721_v50 = vpop.f32.mrb[109].mxu1 }
0x18ad   :  { %v29132_v45 = vpack.c.bf16 %v22018_v47, %v9721_v50  ;;  %v17444_v47 = vld [vmem:[%s31993_s21 + $0x298] sm:$0xff]  ;;  %v17445_v50 = vld [vmem:[%s31993_s21 + $0x2a0] sm:$0xff] }
0x18af   :  { %v22029_v52 = vpop.f32.mrb[110].mxu1 }
0x18b0   :  { %v9866_v55 = vpop.f32.mrb[111].mxu1 }
0x18b1   :  { %v24623_v58 = vpack.c.bf16 %v22029_v52, %v9866_v55  ;;  %v17447_v52 = vld [vmem:[%s31993_s21 + $0x2b0] sm:$0xff]  ;;  %v17448_v55 = vld [vmem:[%s31993_s21 + $0x2b8] sm:$0xff] }
0x18b3   :  { %v22032_v60 = vpop.f32.mrb[112].mxu1  ;;  %24624 = vmatprep.subr.bf16.mxu0 %v24623_v58 }
0x18b4   :  { %v9876_v62 = vpop.f32.mrb[113].mxu1  ;;  %24626 = vmatpush3.bf16.msra.mxu0 %v24623_v58  ;;  %v17449_v58 = vld [vmem:[%s31993_s21 + $0x2c0] sm:$0xff] }
0x18b5   :  { %v24627_v48 = vpack.c.bf16 %v22032_v60, %v9876_v62  ;;  %v17450_v60 = vld [vmem:[%s31993_s21 + $0x2c8] sm:$0xff]  ;;  %v17451_v62 = vld [vmem:[%s31993_s21 + $0x2d0] sm:$0xff] }
0x18b7   :  { %v22035_v2 = vpop.f32.mrb[114].mxu1  ;;  %24628 = vmatprep.subr.bf16.mxu0 %v24627_v48 }
0x18b8   :  { %v9886_v4 = vpop.f32.mrb[115].mxu1  ;;  %24630 = vmatpush3.bf16.msra.mxu0 %v24627_v48  ;;  %v17452_v48 = vld [vmem:[%s31993_s21 + $0x2d8] sm:$0xff] }
0x18b9   :  { %v24631_v8 = vpack.c.bf16 %v22035_v2, %v9886_v4  ;;  %v17453_v2 = vld [vmem:[%s31993_s21 + $0x2e0] sm:$0xff]  ;;  %v17454_v4 = vld [vmem:[%s31993_s21 + $0x2e8] sm:$0xff] }
0x18bb   :  { %v22038_v9 = vpop.f32.mrb[116].mxu1  ;;  %24632 = vmatprep.subr.bf16.mxu0 %v24631_v8 }
0x18bc   :  { %v9896_v0 = vpop.f32.mrb[117].mxu1  ;;  %24634 = vmatpush3.bf16.msra.mxu0 %v24631_v8  ;;  %v17455_v8 = vld [vmem:[%s31993_s21 + $0x2f0] sm:$0xff] }
0x18bd   :  { %v24635_v14 = vpack.c.bf16 %v22038_v9, %v9896_v0  ;;  %v17456_v9 = vld [vmem:[%s31993_s21 + $0x2f8] sm:$0xff]  ;;  %v17457_v0 = vld [vmem:[%s31993_s21 + $0x300] sm:$0xff] }
0x18bf   :  { %v22041_v23 = vpop.f32.mrb[118].mxu1  ;;  %24636 = vmatprep.subr.bf16.mxu0 %v24635_v14 }
0x18c0   :  { %v9906_v15 = vpop.f32.mrb[119].mxu1  ;;  %24638 = vmatpush3.bf16.msra.mxu0 %v24635_v14  ;;  %v17458_v14 = vld [vmem:[%s31993_s21 + $0x308] sm:$0xff] }
0x18c1   :  { %v24639_v35 = vpack.c.bf16 %v22041_v23, %v9906_v15  ;;  %v17459_v23 = vld [vmem:[%s31993_s21 + $0x310] sm:$0xff]  ;;  %v17460_v15 = vld [vmem:[%s31993_s21 + $0x318] sm:$0xff] }
0x18c3   :  { %v22044_v49 = vpop.f32.mrb[120].mxu1  ;;  %24640 = vmatprep.subr.bf16.mxu0 %v24639_v35 }
0x18c4   :  { %v9916_v63 = vpop.f32.mrb[121].mxu1  ;;  %24642 = vmatpush3.bf16.msra.mxu0 %v24639_v35  ;;  %v17461_v35 = vld [vmem:[%s31993_s21 + $0x320] sm:$0xff] }
0x18c5   :  { %v24643_v6 = vpack.c.bf16 %v22044_v49, %v9916_v63  ;;  %v17462_v49 = vld [vmem:[%s31993_s21 + $0x328] sm:$0xff]  ;;  %v17463_v63 = vld [vmem:[%s31993_s21 + $0x330] sm:$0xff] }
0x18c7   :  { %v22047_v13 = vpop.f32.mrb[122].mxu1  ;;  %24644 = vmatprep.subr.bf16.mxu0 %v24643_v6 }
0x18c8   :  { %v9926_v18 = vpop.f32.mrb[123].mxu1  ;;  %24646 = vmatpush3.bf16.msra.mxu0 %v24643_v6  ;;  %v17464_v6 = vld [vmem:[%s31993_s21 + $0x338] sm:$0xff] }
0x18c9   :  { %v24647_v19 = vpack.c.bf16 %v22047_v13, %v9926_v18  ;;  %v17465_v13 = vld [vmem:[%s31993_s21 + $0x340] sm:$0xff]  ;;  %v17466_v18 = vld [vmem:[%s31993_s21 + $0x348] sm:$0xff] }
0x18cb   :  { %v22050_v20 = vpop.f32.mrb[124].mxu1  ;;  %24648 = vmatprep.subr.bf16.mxu0 %v24647_v19 }
0x18cc   :  { %v9936_v21 = vpop.f32.mrb[125].mxu1  ;;  %24650 = vmatpush3.bf16.msra.mxu0 %v24647_v19  ;;  %v17467_v19 = vld [vmem:[%s31993_s21 + $0x350] sm:$0xff] }
0x18cd   :  { %v24651_v24 = vpack.c.bf16 %v22050_v20, %v9936_v21  ;;  %v17468_v20 = vld [vmem:[%s31993_s21 + $0x358] sm:$0xff]  ;;  %v17469_v21 = vld [vmem:[%s31993_s21 + $0x360] sm:$0xff] }
0x18cf   :  { %24652 = vmatprep.subr.bf16.mxu0 %v24651_v24 }
0x18d0   :  { %24654 = vmatpush3.bf16.msra.mxu0 %v24651_v24  ;;  %v17470_v24 = vld [vmem:[%s31993_s21 + $0x368] sm:$0xff] }
0x18d1   :  { %24656 = vmatprep.subr.bf16.mxu0 %v29118_v1 }
0x18d3   :  { %22084 = vmatmul.mubr.f32.vlgmr.msra.gmra.mrb[98].mxu0 %v17426_v25  ;;  %v17471_v25 = vld [vmem:[%s31993_s21 + $0x370] sm:$0xff] }
0x18d4   :  { %24658 = vmatpush3.bf16.msra.mxu0 %v29118_v1  ;;  %22086 = vmatprep.mubr.f32.mxu0 %v17427_v26  ;;  %v17431_v1 = vld [vmem:[%s31993_s21 + $0x230] sm:$0xff]  ;;  %v17472_v26 = vld [vmem:[%s31993_s21 + $0x378] sm:$0xff] }
0x18d5   :  { %24660 = vmatprep.subr.bf16.mxu0 %v29120_v29 }
0x18d7   :  { %22087 = vmatmul.mubr.f32.gmra.mrb[100].mxu0 %v17428_v27  ;;  %v17473_v27 = vld [vmem:[%s31993_s21 + $0x380] sm:$0xff] }
0x18d8   :  { %24662 = vmatpush3.bf16.msra.mxu0 %v29120_v29  ;;  %22089 = vmatprep.mubr.f32.mxu0 %v17429_v28  ;;  %v17433_v29 = vld [vmem:[%s31993_s21 + $0x240] sm:$0xff]  ;;  %v17474_v28 = vld [vmem:[%s31993_s21 + $0x388] sm:$0xff] }
0x18d9   :  { %24664 = vmatprep.subr.bf16.mxu0 %v29122_v10 }
0x18db   :  { %22090 = vmatmul.mubr.f32.gmra.mrb[102].mxu0 %v17430_v30  ;;  %v17475_v30 = vld [vmem:[%s31993_s21 + $0x390] sm:$0xff] }
0x18dc   :  { %24666 = vmatpush3.bf16.msra.mxu0 %v29122_v10  ;;  %22092 = vmatprep.mubr.f32.mxu0 %v17431_v1  ;;  %v17435_v10 = vld [vmem:[%s31993_s21 + $0x250] sm:$0xff]  ;;  %v17476_v1 = vld [vmem:[%s31993_s21 + $0x398] sm:$0xff] }
0x18dd   :  { %24668 = vmatprep.subr.bf16.mxu0 %v29124_v32 }
0x18df   :  { %22093 = vmatmul.mubr.f32.gmra.mrb[104].mxu0 %v17432_v31  ;;  %v17477_v31 = vld [vmem:[%s31993_s21 + $0x3a0] sm:$0xff] }
0x18e0   :  { %24670 = vmatpush3.bf16.msra.mxu0 %v29124_v32  ;;  %22095 = vmatprep.mubr.f32.mxu0 %v17433_v29  ;;  %v17437_v32 = vld [vmem:[%s31993_s21 + $0x260] sm:$0xff]  ;;  %v17478_v29 = vld [vmem:[%s31993_s21 + $0x3a8] sm:$0xff] }
0x18e1   :  { %24672 = vmatprep.subr.bf16.mxu0 %v29126_v36 }
0x18e3   :  { %22096 = vmatmul.mubr.f32.gmra.mrb[106].mxu0 %v17434_v11  ;;  %v17479_v11 = vld [vmem:[%s31993_s21 + $0x3b0] sm:$0xff] }
0x18e4   :  { %24674 = vmatpush3.bf16.msra.mxu0 %v29126_v36  ;;  %22098 = vmatprep.mubr.f32.mxu0 %v17435_v10  ;;  %v17573_v36 = vld [vmem:[%s31991_s22 + $0x40] sm:$0xff]  ;;  %v17480_v10 = vld [vmem:[%s31993_s21 + $0x3b8] sm:$0xff] }
0x18e5   :  { %24676 = vmatprep.subr.bf16.mxu0 %v29128_v39  ;;  %v29203_v41 = vpack.c.bf16 %v17574_v37, %v17573_v36  ;;  %v17485_v36 = vld [vmem:[%s31993_s21 + $0x3e0] sm:$0xff]  ;;  %v17486_v37 = vld [vmem:[%s31993_s21 + $0x3e8] sm:$0xff] }
0x18e7   :  { %22099 = vmatmul.mubr.f32.gmra.mrb[108].mxu0 %v17436_v53  ;;  %v17481_v53 = vld [vmem:[%s31993_s21 + $0x3c0] sm:$0xff] }
0x18e8   :  { %24678 = vmatpush3.bf16.msra.mxu0 %v29128_v39  ;;  %22101 = vmatprep.mubr.f32.mxu0 %v17437_v32  ;;  %v17441_v39 = vld [vmem:[%s31993_s21 + $0x280] sm:$0xff]  ;;  %v17482_v32 = vld [vmem:[%s31993_s21 + $0x3c8] sm:$0xff] }
0x18e9   :  { %24680 = vmatprep.subr.bf16.mxu0 %v29130_v46 }
0x18eb   :  { %22102 = vmatmul.mubr.f32.gmra.mrb[110].mxu0 %v17438_v33  ;;  %v17483_v33 = vld [vmem:[%s31993_s21 + $0x3d0] sm:$0xff] }
0x18ec   :  { %24682 = vmatpush3.bf16.msra.mxu0 %v29130_v46  ;;  %22104 = vmatprep.mubr.f32.mxu0 %v17439_v34  ;;  %v17443_v46 = vld [vmem:[%s31993_s21 + $0x290] sm:$0xff]  ;;  %v17484_v34 = vld [vmem:[%s31993_s21 + $0x3d8] sm:$0xff] }
0x18ed   :  { %24684 = vmatprep.subr.bf16.mxu0 %v29132_v45 }
0x18ef   :  { %22105 = vmatmul.mubr.f32.gmra.mrb[112].mxu0 %v17440_v38  ;;  %v17487_v38 = vld [vmem:[%s31993_s21 + $0x3f0] sm:$0xff] }
0x18f0   :  { %24686 = vmatpush3.bf16.msra.mxu0 %v29132_v45  ;;  %22107 = vmatprep.mubr.f32.mxu0 %v17441_v39  ;;  %v17446_v45 = vld [vmem:[%s31993_s21 + $0x2a8] sm:$0xff]  ;;  %v17488_v39 = vld [vmem:[%s31993_s21 + $0x3f8] sm:$0xff] }
0x18f1   :  { %24688 = vmatprep.subr.bf16.mxu0 %v29203_v41 }
0x18f3   :  { %22108 = vmatmul.mubr.f32.gmra.mrb[114].mxu0 %v17442_v44  ;;  %v9469_v44 = vld [vmem:[%s31993_s21] sm:$0xff] }
0x18f4   :  { %22110 = vmatprep.mubr.f32.mxu0 %v17443_v46  ;;  %v17575_v46 = vld [vmem:[%s31991_s22 + $0x50] sm:$0xff] }
0x18f7   :  { %22111 = vmatmul.mubr.f32.gmra.mrb[116].mxu0 %v17444_v47  ;;  %v17576_v47 = vld [vmem:[%s31991_s22 + $0x58] sm:$0xff] }
0x18f8   :  { %22113 = vmatprep.mubr.f32.mxu0 %v17445_v50  ;;  %v9470_v50 = vld [vmem:[%s31993_s21 + $0x8] sm:$0xff] }
0x18fb   :  { %22114 = vmatmul.mubr.f32.gmra.mrb[118].mxu0 %v17446_v45  ;;  %v9471_v45 = vld [vmem:[%s31993_s21 + $0x10] sm:$0xff] }
0x18fc   :  { %22116 = vmatprep.mubr.f32.mxu0 %v17447_v52  ;;  %v24691_v52 = vpack.c.bf16 %v17576_v47, %v17575_v46  ;;  %v9515_v46 = vld [vmem:[%s31993_s21 + $0x170] sm:$0xff]  ;;  %v9516_v47 = vld [vmem:[%s31993_s21 + $0x178] sm:$0xff] }
0x18ff   :  { %22117 = vmatmul.mubr.f32.gmra.mrb[120].mxu0 %v17448_v55  ;;  %v9472_v55 = vld [vmem:[%s31993_s21 + $0x18] sm:$0xff] }
0x1900   :  { %22119 = vmatprep.mubr.f32.mxu0 %v17449_v58  ;;  %v9473_v58 = vld [vmem:[%s31993_s21 + $0x20] sm:$0xff] }
0x1903   :  { %22120 = vmatmul.mubr.f32.gmra.mrb[122].mxu0 %v17450_v60  ;;  %v9474_v60 = vld [vmem:[%s31993_s21 + $0x28] sm:$0xff] }
0x1904   :  { %22122 = vmatprep.mubr.f32.mxu0 %v17451_v62  ;;  %v9475_v62 = vld [vmem:[%s31993_s21 + $0x30] sm:$0xff] }
0x1907   :  { %22123 = vmatmul.mubr.f32.gmra.mrb[124].mxu0 %v17452_v48  ;;  %v9477_v48 = vld [vmem:[%s31993_s21 + $0x40] sm:$0xff] }
0x1908   :  { %22125 = vmatprep.mubr.f32.mxu0 %v17453_v2  ;;  %v9478_v2 = vld [vmem:[%s31993_s21 + $0x48] sm:$0xff] }
0x190b   :  { %22126 = vmatmul.mubr.f32.gmra.mrb[126].mxu0 %v17454_v4  ;;  %v9479_v4 = vld [vmem:[%s31993_s21 + $0x50] sm:$0xff] }
0x190c   :  { %22128 = vmatprep.mubr.f32.mxu0 %v17455_v8  ;;  %v9480_v8 = vld [vmem:[%s31993_s21 + $0x58] sm:$0xff] }
0x190f   :  { %22129 = vmatmul.mubr.f32.gmra.mrb[128].mxu0 %v17456_v9  ;;  %v9481_v9 = vld [vmem:[%s31993_s21 + $0x60] sm:$0xff] }
0x1910   :  { %22131 = vmatprep.mubr.f32.mxu0 %v17457_v0  ;;  %v9482_v0 = vld [vmem:[%s31993_s21 + $0x68] sm:$0xff] }
0x1913   :  { %22132 = vmatmul.mubr.f32.gmra.mrb[130].mxu0 %v17458_v14  ;;  %v9483_v14 = vld [vmem:[%s31993_s21 + $0x70] sm:$0xff] }
0x1914   :  { %22134 = vmatprep.mubr.f32.mxu0 %v17459_v23  ;;  %v9484_v23 = vld [vmem:[%s31993_s21 + $0x78] sm:$0xff] }
0x1917   :  { %22135 = vmatmul.mubr.f32.gmra.mrb[132].mxu0 %v17460_v15  ;;  %v9485_v15 = vld [vmem:[%s31993_s21 + $0x80] sm:$0xff] }
0x1918   :  { %22137 = vmatprep.mubr.f32.mxu0 %v17461_v35  ;;  %v9486_v35 = vld [vmem:[%s31993_s21 + $0x88] sm:$0xff] }
0x191b   :  { %22138 = vmatmul.mubr.f32.gmra.mrb[134].mxu0 %v17462_v49  ;;  %v9487_v49 = vld [vmem:[%s31993_s21 + $0x90] sm:$0xff] }
0x191c   :  { %22140 = vmatprep.mubr.f32.mxu0 %v17463_v63  ;;  %v9488_v63 = vld [vmem:[%s31993_s21 + $0x98] sm:$0xff] }
0x191f   :  { %22141 = vmatmul.mubr.f32.gmra.mrb[136].mxu0 %v17464_v6  ;;  %v9489_v6 = vld [vmem:[%s31993_s21 + $0xa0] sm:$0xff] }
0x1920   :  { %22143 = vmatprep.mubr.f32.mxu0 %v17465_v13  ;;  %v9490_v13 = vld [vmem:[%s31993_s21 + $0xa8] sm:$0xff] }
0x1923   :  { %22144 = vmatmul.mubr.f32.gmra.mrb[138].mxu0 %v17466_v18  ;;  %v9491_v18 = vld [vmem:[%s31993_s21 + $0xb0] sm:$0xff] }
0x1924   :  { %22146 = vmatprep.mubr.f32.mxu0 %v17467_v19  ;;  %v9492_v19 = vld [vmem:[%s31993_s21 + $0xb8] sm:$0xff] }
0x1927   :  { %22147 = vmatmul.mubr.f32.gmra.mrb[140].mxu0 %v17468_v20  ;;  %v9493_v20 = vld [vmem:[%s31993_s21 + $0xc0] sm:$0xff] }
0x1928   :  { %22149 = vmatprep.mubr.f32.mxu0 %v17469_v21  ;;  %v9494_v21 = vld [vmem:[%s31993_s21 + $0xc8] sm:$0xff] }
0x192b   :  { %22150 = vmatmul.mubr.f32.gmra.mrb[142].mxu0 %v17470_v24  ;;  %v9495_v24 = vld [vmem:[%s31993_s21 + $0xd0] sm:$0xff] }
0x192c   :  { %22152 = vmatprep.mubr.f32.mxu0 %v17471_v25  ;;  %v9496_v25 = vld [vmem:[%s31993_s21 + $0xd8] sm:$0xff] }
0x192f   :  { %22153 = vmatmul.mubr.f32.gmra.mrb[144].mxu0 %v17472_v26  ;;  %v9497_v26 = vld [vmem:[%s31993_s21 + $0xe0] sm:$0xff] }
0x1930   :  { %22155 = vmatprep.mubr.f32.mxu0 %v17473_v27  ;;  %v9498_v27 = vld [vmem:[%s31993_s21 + $0xe8] sm:$0xff] }
0x1933   :  { %22156 = vmatmul.mubr.f32.gmra.mrb[146].mxu0 %v17474_v28  ;;  %v9499_v28 = vld [vmem:[%s31993_s21 + $0xf0] sm:$0xff] }
0x1934   :  { %22158 = vmatprep.mubr.f32.mxu0 %v17475_v30  ;;  %v9500_v30 = vld [vmem:[%s31993_s21 + $0xf8] sm:$0xff] }
0x1937   :  { %22159 = vmatmul.mubr.f32.gmra.mrb[148].mxu0 %v17476_v1  ;;  %v9501_v1 = vld [vmem:[%s31993_s21 + $0x100] sm:$0xff] }
0x1938   :  { %22161 = vmatprep.mubr.f32.mxu0 %v17477_v31  ;;  %v9502_v31 = vld [vmem:[%s31993_s21 + $0x108] sm:$0xff] }
0x193b   :  { %22162 = vmatmul.mubr.f32.gmra.mrb[150].mxu0 %v17478_v29  ;;  %v9503_v29 = vld [vmem:[%s31993_s21 + $0x110] sm:$0xff] }
0x193c   :  { %22164 = vmatprep.mubr.f32.mxu0 %v17479_v11  ;;  %v9504_v11 = vld [vmem:[%s31993_s21 + $0x118] sm:$0xff] }
0x193f   :  { %22165 = vmatmul.mubr.f32.gmra.mrb[152].mxu0 %v17480_v10  ;;  %v9505_v10 = vld [vmem:[%s31993_s21 + $0x120] sm:$0xff] }
0x1940   :  { %22167 = vmatprep.mubr.f32.mxu0 %v17481_v53  ;;  %v9506_v53 = vld [vmem:[%s31993_s21 + $0x128] sm:$0xff] }
0x1943   :  { %22168 = vmatmul.mubr.f32.gmra.mrb[154].mxu0 %v17482_v32  ;;  %v9507_v32 = vld [vmem:[%s31993_s21 + $0x130] sm:$0xff] }
0x1944   :  { %22170 = vmatprep.mubr.f32.mxu0 %v17483_v33  ;;  %v9508_v33 = vld [vmem:[%s31993_s21 + $0x138] sm:$0xff] }
0x1947   :  { %22171 = vmatmul.mubr.f32.gmra.mrb[156].mxu0 %v17484_v34  ;;  %v9509_v34 = vld [vmem:[%s31993_s21 + $0x140] sm:$0xff] }
0x1948   :  { %22173 = vmatprep.mubr.f32.mxu0 %v17485_v36  ;;  %v9510_v36 = vld [vmem:[%s31993_s21 + $0x148] sm:$0xff] }
0x194b   :  { %22174 = vmatmul.mubr.f32.gmra.mrb[158].mxu0 %v17486_v37  ;;  %v9511_v37 = vld [vmem:[%s31993_s21 + $0x150] sm:$0xff] }
0x194c   :  { %22176 = vmatprep.mubr.f32.mxu0 %v17487_v38  ;;  %v9512_v38 = vld [vmem:[%s31993_s21 + $0x158] sm:$0xff] }
0x194f   :  { %22177 = vmatmul.mubr.f32.gmra.mrb[160].mxu0 %v17488_v39  ;;  %v9513_v39 = vld [vmem:[%s31993_s21 + $0x160] sm:$0xff] }
0x1950   :  { %22211 = vmatprep.mubr.f32.mxu0 %v9469_v44  ;;  %v9514_v44 = vld [vmem:[%s31993_s21 + $0x168] sm:$0xff] }
0x1953   :  { %22212 = vmatmul.mubr.f32.vlgmr.msra.gmra.mrb[98].mxu0 %v9470_v50  ;;  %v9517_v50 = vld [vmem:[%s31993_s21 + $0x180] sm:$0xff] }
0x1954   :  { %22214 = vmatprep.mubr.f32.mxu0 %v9471_v45  ;;  %24690 = vmatpush3.bf16.msra.mxu0 %v29203_v41  ;;  %v9476_v41 = vld [vmem:[%s31993_s21 + $0x38] sm:$0xff]  ;;  %v9518_v45 = vld [vmem:[%s31993_s21 + $0x188] sm:$0xff] }
0x1955   :  { %24692 = vmatprep.subr.bf16.mxu0 %v24691_v52 }
0x1957   :  { %22215 = vmatmul.mubr.f32.gmra.mrb[100].mxu0 %v9472_v55  ;;  %v9520_v55 = vld [vmem:[%s31993_s21 + $0x198] sm:$0xff] }
0x1958   :  { %22217 = vmatprep.mubr.f32.mxu0 %v9473_v58  ;;  %24694 = vmatpush3.bf16.msra.mxu0 %v24691_v52  ;;  %v9519_v52 = vld [vmem:[%s31993_s21 + $0x190] sm:$0xff]  ;;  %v9521_v58 = vld [vmem:[%s31993_s21 + $0x1a0] sm:$0xff] }
0x195b   :  { %22218 = vmatmul.mubr.f32.gmra.mrb[102].mxu0 %v9474_v60  ;;  %v9522_v60 = vld [vmem:[%s31993_s21 + $0x1a8] sm:$0xff] }
0x195c   :  { %22220 = vmatprep.mubr.f32.mxu0 %v9475_v62  ;;  %v9523_v62 = vld [vmem:[%s31993_s21 + $0x1b0] sm:$0xff] }
0x195f   :  { %22221 = vmatmul.mubr.f32.gmra.mrb[104].mxu0 %v9476_v41  ;;  %v9524_v41 = vld [vmem:[%s31993_s21 + $0x1b8] sm:$0xff] }
0x1960   :  { %22223 = vmatprep.mubr.f32.mxu0 %v9477_v48  ;;  %v9525_v48 = vld [vmem:[%s31993_s21 + $0x1c0] sm:$0xff] }
0x1963   :  { %22224 = vmatmul.mubr.f32.gmra.mrb[106].mxu0 %v9478_v2  ;;  %v9526_v2 = vld [vmem:[%s31993_s21 + $0x1c8] sm:$0xff] }
0x1964   :  { %22226 = vmatprep.mubr.f32.mxu0 %v9479_v4  ;;  %v9527_v4 = vld [vmem:[%s31993_s21 + $0x1d0] sm:$0xff] }
0x1967   :  { %22227 = vmatmul.mubr.f32.gmra.mrb[108].mxu0 %v9480_v8  ;;  %v9528_v8 = vld [vmem:[%s31993_s21 + $0x1d8] sm:$0xff] }
0x1968   :  { %22229 = vmatprep.mubr.f32.mxu0 %v9481_v9  ;;  %v9529_v9 = vld [vmem:[%s31993_s21 + $0x1e0] sm:$0xff] }
0x196b   :  { %22230 = vmatmul.mubr.f32.gmra.mrb[110].mxu0 %v9482_v0  ;;  %v9530_v0 = vld [vmem:[%s31993_s21 + $0x1e8] sm:$0xff] }
0x196c   :  { %22232 = vmatprep.mubr.f32.mxu0 %v9483_v14  ;;  %v9531_v14 = vld [vmem:[%s31993_s21 + $0x1f0] sm:$0xff] }
0x196f   :  { %22233 = vmatmul.mubr.f32.gmra.mrb[112].mxu0 %v9484_v23  ;;  %v9532_v23 = vld [vmem:[%s31993_s21 + $0x1f8] sm:$0xff] }
0x1970   :  { %22235 = vmatprep.mubr.f32.mxu0 %v9485_v15  ;;  %v17509_v15 = vld [vmem:[%s31993_s21 + $0x400] sm:$0xff] }
0x1973   :  { %22236 = vmatmul.mubr.f32.gmra.mrb[114].mxu0 %v9486_v35 }
0x1974   :  { %22238 = vmatprep.mubr.f32.mxu0 %v9487_v49 }
0x1977   :  { %22239 = vmatmul.mubr.f32.gmra.mrb[116].mxu0 %v9488_v63 }
0x1978   :  { %22241 = vmatprep.mubr.f32.mxu0 %v9489_v6 }
0x197b   :  { %22242 = vmatmul.mubr.f32.gmra.mrb[118].mxu0 %v9490_v13 }
0x197c   :  { %22244 = vmatprep.mubr.f32.mxu0 %v9491_v18 }
0x197f   :  { %22245 = vmatmul.mubr.f32.gmra.mrb[120].mxu0 %v9492_v19 }
0x1980   :  { %22247 = vmatprep.mubr.f32.mxu0 %v9493_v20 }
0x1983   :  { %22248 = vmatmul.mubr.f32.gmra.mrb[122].mxu0 %v9494_v21 }
0x1984   :  { %22250 = vmatprep.mubr.f32.mxu0 %v9495_v24 }
0x1987   :  { %22251 = vmatmul.mubr.f32.gmra.mrb[124].mxu0 %v9496_v25 }
0x1988   :  { %22253 = vmatprep.mubr.f32.mxu0 %v9497_v26 }
0x198b   :  { %22254 = vmatmul.mubr.f32.gmra.mrb[126].mxu0 %v9498_v27 }
0x198c   :  { %22256 = vmatprep.mubr.f32.mxu0 %v9499_v28 }
0x198f   :  { %22257 = vmatmul.mubr.f32.gmra.mrb[128].mxu0 %v9500_v30 }
0x1990   :  { %22259 = vmatprep.mubr.f32.mxu0 %v9501_v1 }
0x1993   :  { %22260 = vmatmul.mubr.f32.gmra.mrb[130].mxu0 %v9502_v31 }
0x1994   :  { %22262 = vmatprep.mubr.f32.mxu0 %v9503_v29 }
0x1997   :  { %22263 = vmatmul.mubr.f32.gmra.mrb[132].mxu0 %v9504_v11 }
0x1998   :  { %22265 = vmatprep.mubr.f32.mxu0 %v9505_v10 }
0x199b   :  { %22266 = vmatmul.mubr.f32.gmra.mrb[134].mxu0 %v9506_v53 }
0x199c   :  { %22268 = vmatprep.mubr.f32.mxu0 %v9507_v32 }
0x199f   :  { %22269 = vmatmul.mubr.f32.gmra.mrb[136].mxu0 %v9508_v33 }
0x19a0   :  { %22271 = vmatprep.mubr.f32.mxu0 %v9509_v34 }
0x19a3   :  { %22272 = vmatmul.mubr.f32.gmra.mrb[138].mxu0 %v9510_v36 }
0x19a4   :  { %22274 = vmatprep.mubr.f32.mxu0 %v9511_v37 }
0x19a7   :  { %22275 = vmatmul.mubr.f32.gmra.mrb[140].mxu0 %v9512_v38 }
0x19a8   :  { %22277 = vmatprep.mubr.f32.mxu0 %v9513_v39 }
0x19ab   :  { %22278 = vmatmul.mubr.f32.gmra.mrb[142].mxu0 %v9514_v44 }
0x19ac   :  { %22280 = vmatprep.mubr.f32.mxu0 %v9515_v46 }
0x19af   :  { %22281 = vmatmul.mubr.f32.gmra.mrb[144].mxu0 %v9516_v47 }
0x19b0   :  { %22283 = vmatprep.mubr.f32.mxu0 %v9517_v50 }
0x19b3   :  { %22284 = vmatmul.mubr.f32.gmra.mrb[146].mxu0 %v9518_v45 }
0x19b4   :  { %22286 = vmatprep.mubr.f32.mxu0 %v9519_v52 }
0x19b7   :  { %22287 = vmatmul.mubr.f32.gmra.mrb[148].mxu0 %v9520_v55 }
0x19b8   :  { %22289 = vmatprep.mubr.f32.mxu0 %v9521_v58 }
0x19bb   :  { %22290 = vmatmul.mubr.f32.gmra.mrb[150].mxu0 %v9522_v60 }
0x19bc   :  { %22292 = vmatprep.mubr.f32.mxu0 %v9523_v62  ;;  %v17657_v62 = vld [vmem:[%s31991_s22 + $0x60] sm:$0xff] }
0x19bf   :  { %22293 = vmatmul.mubr.f32.gmra.mrb[152].mxu0 %v9524_v41  ;;  %v17658_v41 = vld [vmem:[%s31991_s22 + $0x68] sm:$0xff] }
0x19c0   :  { %22295 = vmatprep.mubr.f32.mxu0 %v9525_v48 }
0x19c3   :  { %22296 = vmatmul.mubr.f32.gmra.mrb[154].mxu0 %v9526_v2 }
0x19c4   :  { %22298 = vmatprep.mubr.f32.mxu0 %v9527_v4 }
0x19c7   :  { %22299 = vmatmul.mubr.f32.gmra.mrb[156].mxu0 %v9528_v8  ;;  %v24727_v8 = vpack.c.bf16 %v17658_v41, %v17657_v62  ;;  %v17530_v62 = vld [vmem:[%s31993_s21 + $0x4a8] sm:$0xff]  ;;  %v17531_v41 = vld [vmem:[%s31993_s21 + $0x4b0] sm:$0xff] }
0x19c8   :  { %22301 = vmatprep.mubr.f32.mxu0 %v9529_v9  ;;  %v17659_v9 = vld [vmem:[%s31991_s22 + $0x70] sm:$0xff] }
0x19cb   :  { %22302 = vmatmul.mubr.f32.gmra.mrb[158].mxu0 %v9530_v0  ;;  %v17660_v0 = vld [vmem:[%s31991_s22 + $0x78] sm:$0xff] }
0x19cc   :  { %22304 = vmatprep.mubr.f32.mxu0 %v9531_v14  ;;  %v17510_v14 = vld [vmem:[%s31993_s21 + $0x408] sm:$0xff] }
0x19cf   :  { %22305 = vmatmul.mubr.f32.gmra.mrb[160].mxu0 %v9532_v23  ;;  %v17511_v23 = vld [vmem:[%s31993_s21 + $0x410] sm:$0xff] }
0x19d0   :  { %22315 = vmatprep.mubr.msk.f32.mxu0 %vm513_vm2, %v29005_v40 }
0x19d3   :  { %22316 = vmatmul.mubr.msk.f32.vlgmr.msra.gmra.mrb[162].mxu0 %vm513_vm2, %v29007_v43 }
0x19d4   :  { %22318 = vmatprep.mubr.msk.f32.mxu0 %vm513_vm2, %v29015_v51 }
0x19d7   :  { %22319 = vmatmul.mubr.msk.f32.gmra.mrb[164].mxu0 %vm513_vm2, %v29017_v54 }
0x19d8   :  { %22321 = vmatprep.mubr.msk.f32.mxu0 %vm513_vm2, %v29025_v59 }
0x19db   :  { %22322 = vmatmul.mubr.msk.f32.gmra.mrb[166].mxu0 %vm513_vm2, %v29027_v61 }
0x19dc   :  { %22324 = vmatprep.mubr.msk.f32.mxu0 %vm513_vm2, %v29035_v3 }
0x19df   :  { %22325 = vmatmul.mubr.msk.f32.gmra.mrb[168].mxu0 %vm513_vm2, %v29037_v5 }
0x19e0   :  { %22327 = vmatprep.mubr.msk.f32.mxu0 %vm513_vm2, %v29045_v12 }
0x19e3   :  { %22328 = vmatmul.mubr.msk.f32.gmra.mrb[170].mxu0 %vm513_vm2, %v29047_v7 }
0x19e4   :  { %22330 = vmatprep.mubr.msk.f32.mxu0 %vm513_vm2, %v29055_v42 }
0x19e7   :  { %22331 = vmatmul.mubr.msk.f32.gmra.mrb[172].mxu0 %vm513_vm2, %v29057_v56 }
0x19e8   :  { %22333 = vmatprep.mubr.msk.f32.mxu0 %vm513_vm2, %v29065_v16 }
0x19eb   :  { %22334 = vmatmul.mubr.msk.f32.gmra.mrb[174].mxu0 %vm513_vm2, %v29067_v17 }
0x19ec   :  { %22336 = vmatprep.mubr.msk.f32.mxu0 %vm513_vm2, %v29075_v22 }
0x19ef   :  { %22337 = vmatmul.mubr.msk.f32.gmra.mrb[176].mxu0 %vm513_vm2, %v29077_v57 }
0x19f0   :  { %22371 = vmatprep.mubr.f32.mxu0 %v17509_v15  ;;  %v24731_v15 = vpack.c.bf16 %v17660_v0, %v17659_v9  ;;  %v17536_v9 = vld [vmem:[%s31993_s21 + $0x4d8] sm:$0xff]  ;;  %v17537_v0 = vld [vmem:[%s31993_s21 + $0x4e0] sm:$0xff] }
0x1a86   :  { %v29582_v35 = vpop.f32.mrb[146].mxu0 }
0x1a87   :  { %32028 = vst [vmem:[#allocation2_spill] sm:$0xff] %v29582_v35  ;;  %v29584_v49 = vpop.f32.mrb[147].mxu0 }
0x1a88   :  { %32029 = vst [vmem:[#allocation3_spill] sm:$0xff] %v29584_v49 }
0x1a8a   :  { %v29586_v63 = vpop.f32.mrb[148].mxu0 }
0x1a8b   :  { %32030 = vst [vmem:[#allocation4_spill] sm:$0xff] %v29586_v63  ;;  %v29588_v6 = vpop.f32.mrb[149].mxu0 }
0x1a8c   :  { %32031 = vst [vmem:[#allocation5_spill] sm:$0xff] %v29588_v6 }
0x1a8e   :  { %v29590_v13 = vpop.f32.mrb[150].mxu0 }
0x1a8f   :  { %32032 = vst [vmem:[#allocation6_spill] sm:$0xff] %v29590_v13  ;;  %v29592_v18 = vpop.f32.mrb[151].mxu0 }
0x1a90   :  { %32033 = vst [vmem:[#allocation7_spill] sm:$0xff] %v29592_v18 }
0x1a92   :  { %v29594_v19 = vpop.f32.mrb[152].mxu0 }
0x1a93   :  { %32034 = vst [vmem:[#allocation8_spill] sm:$0xff] %v29594_v19  ;;  %v29596_v20 = vpop.f32.mrb[153].mxu0 }
0x1a94   :  { %32035 = vst [vmem:[#allocation9_spill] sm:$0xff] %v29596_v20 }
0x1a96   :  { %v29598_v21 = vpop.f32.mrb[154].mxu0 }
0x1a97   :  { %32036 = vst [vmem:[#allocation10_spill] sm:$0xff] %v29598_v21  ;;  %v29600_v24 = vpop.f32.mrb[155].mxu0 }
0x1a98   :  { %32037 = vst [vmem:[#allocation11_spill] sm:$0xff] %v29600_v24 }
0x1a9a   :  { %v29602_v25 = vpop.f32.mrb[156].mxu0 }
0x1a9b   :  { %32038 = vst [vmem:[#allocation12_spill] sm:$0xff] %v29602_v25  ;;  %v29604_v26 = vpop.f32.mrb[157].mxu0 }
0x1a9c   :  { %32039 = vst [vmem:[#allocation13_spill] sm:$0xff] %v29604_v26 }
0x1a9e   :  { %v29606_v27 = vpop.f32.mrb[158].mxu0 }
0x1a9f   :  { %32040 = vst [vmem:[#allocation14_spill] sm:$0xff] %v29606_v27  ;;  %v29608_v28 = vpop.f32.mrb[159].mxu0 }
0x1aa0   :  { %32041 = vst [vmem:[#allocation15_spill] sm:$0xff] %v29608_v28 }
0x1aa2   :  { %v29610_v30 = vpop.f32.mrb[160].mxu0 }
0x1aa3   :  { %32042 = vst [vmem:[#allocation16_spill] sm:$0xff] %v29610_v30  ;;  %v29612_v1 = vpop.f32.mrb[161].mxu0 }
0x1aa4   :  { %32043 = vst [vmem:[#allocation17_spill] sm:$0xff] %v29612_v1 }
0x1aa6   :  { %v22317_v31 = vpop.f32.mrb[162].mxu0 }
0x1aa7   :  { %v10851_v29 = vpop.f32.mrb[163].mxu0 }
0x1aa8   :  { %v24695_v11 = vpack.c.bf16 %v22317_v31, %v10851_v29  ;;  %v17741_v31 = vld [vmem:[%s31991_s22 + $0x80] sm:$0xff]  ;;  %v17742_v29 = vld [vmem:[%s31991_s22 + $0x88] sm:$0xff] }
0x1aaa   :  { %v22320_v10 = vpop.f32.mrb[164].mxu0  ;;  %24696 = vmatprep.subr.bf16.mxu0 %v24695_v11  ;;  %24967 = vmatprep.subr.bf16.mxu1 %v24695_v11 }
0x1aab   :  { %v10861_v53 = vpop.f32.mrb[165].mxu0  ;;  %24698 = vmatpush3.bf16.msra.mxu0 %v24695_v11  ;;  %24975 = vmatpush3.bf16.msra.mxu1 %v24695_v11  ;;  %v17512_v11 = vld [vmem:[%s31993_s21 + $0x418] sm:$0xff] }
0x1aac   :  { %v24699_v32 = vpack.c.bf16 %v22320_v10, %v10861_v53  ;;  %v17513_v10 = vld [vmem:[%s31993_s21 + $0x420] sm:$0xff]  ;;  %v29644_v53 = vpack.c.bf16 %v17742_v29, %v17741_v31  ;;  %v17542_v29 = vld [vmem:[%s31993_s21 + $0x508] sm:$0xff] }
0x1aad   :  { %v17541_v31 = vld [vmem:[%s31993_s21 + $0x500] sm:$0xff] }
0x1aae   :  { %v22323_v33 = vpop.f32.mrb[166].mxu0  ;;  %24700 = vmatprep.subr.bf16.mxu0 %v24699_v32  ;;  %24968 = vmatprep.subr.bf16.mxu1 %v24699_v32 }
0x1aaf   :  { %v10871_v34 = vpop.f32.mrb[167].mxu0  ;;  %24702 = vmatpush3.bf16.msra.mxu0 %v24699_v32  ;;  %24976 = vmatpush3.bf16.msra.mxu1 %v24699_v32  ;;  %v17514_v32 = vld [vmem:[%s31993_s21 + $0x428] sm:$0xff] }
0x1ab0   :  { %v24703_v36 = vpack.c.bf16 %v22323_v33, %v10871_v34  ;;  %v17515_v33 = vld [vmem:[%s31993_s21 + $0x430] sm:$0xff]  ;;  %v17516_v34 = vld [vmem:[%s31993_s21 + $0x438] sm:$0xff] }
0x1ab2   :  { %v22326_v37 = vpop.f32.mrb[168].mxu0  ;;  %24704 = vmatprep.subr.bf16.mxu0 %v24703_v36  ;;  %24969 = vmatprep.subr.bf16.mxu1 %v24703_v36 }
0x1ab3   :  { %v10881_v38 = vpop.f32.mrb[169].mxu0  ;;  %24706 = vmatpush3.bf16.msra.mxu0 %v24703_v36  ;;  %24977 = vmatpush3.bf16.msra.mxu1 %v24703_v36  ;;  %v17517_v36 = vld [vmem:[%s31993_s21 + $0x440] sm:$0xff] }
0x1ab4   :  { %v24707_v39 = vpack.c.bf16 %v22326_v37, %v10881_v38  ;;  %v17518_v37 = vld [vmem:[%s31993_s21 + $0x448] sm:$0xff]  ;;  %v17519_v38 = vld [vmem:[%s31993_s21 + $0x450] sm:$0xff] }
0x1ab6   :  { %v22329_v44 = vpop.f32.mrb[170].mxu0  ;;  %24708 = vmatprep.subr.bf16.mxu0 %v24707_v39  ;;  %24970 = vmatprep.subr.bf16.mxu1 %v24707_v39 }
0x1ab7   :  { %v10891_v46 = vpop.f32.mrb[171].mxu0  ;;  %24710 = vmatpush3.bf16.msra.mxu0 %v24707_v39  ;;  %24978 = vmatpush3.bf16.msra.mxu1 %v24707_v39  ;;  %v17520_v39 = vld [vmem:[%s31993_s21 + $0x458] sm:$0xff] }
0x1ab8   :  { %v24711_v47 = vpack.c.bf16 %v22329_v44, %v10891_v46  ;;  %v17521_v44 = vld [vmem:[%s31993_s21 + $0x460] sm:$0xff]  ;;  %v17522_v46 = vld [vmem:[%s31993_s21 + $0x468] sm:$0xff] }
0x1aba   :  { %v22332_v50 = vpop.f32.mrb[172].mxu0  ;;  %24712 = vmatprep.subr.bf16.mxu0 %v24711_v47  ;;  %24971 = vmatprep.subr.bf16.mxu1 %v24711_v47 }
0x1abb   :  { %v10901_v45 = vpop.f32.mrb[173].mxu0  ;;  %24714 = vmatpush3.bf16.msra.mxu0 %v24711_v47  ;;  %24979 = vmatpush3.bf16.msra.mxu1 %v24711_v47  ;;  %v17523_v47 = vld [vmem:[%s31993_s21 + $0x470] sm:$0xff] }
0x1abc   :  { %v24715_v52 = vpack.c.bf16 %v22332_v50, %v10901_v45  ;;  %v17524_v50 = vld [vmem:[%s31993_s21 + $0x478] sm:$0xff]  ;;  %v17525_v45 = vld [vmem:[%s31993_s21 + $0x480] sm:$0xff] }
0x1abe   :  { %v22335_v55 = vpop.f32.mrb[174].mxu0  ;;  %24716 = vmatprep.subr.bf16.mxu0 %v24715_v52  ;;  %24972 = vmatprep.subr.bf16.mxu1 %v24715_v52 }
0x1abf   :  { %v10911_v58 = vpop.f32.mrb[175].mxu0  ;;  %24718 = vmatpush3.bf16.msra.mxu0 %v24715_v52  ;;  %24980 = vmatpush3.bf16.msra.mxu1 %v24715_v52  ;;  %v17526_v52 = vld [vmem:[%s31993_s21 + $0x488] sm:$0xff] }
0x1ac0   :  { %v24719_v60 = vpack.c.bf16 %v22335_v55, %v10911_v58  ;;  %v17527_v55 = vld [vmem:[%s31993_s21 + $0x490] sm:$0xff]  ;;  %v17528_v58 = vld [vmem:[%s31993_s21 + $0x498] sm:$0xff] }
0x1ac2   :  { %v22338_v48 = vpop.f32.mrb[176].mxu0  ;;  %24720 = vmatprep.subr.bf16.mxu0 %v24719_v60  ;;  %24973 = vmatprep.subr.bf16.mxu1 %v24719_v60 }
0x1ac3   :  { %v10921_v2 = vpop.f32.mrb[177].mxu0  ;;  %24722 = vmatpush3.bf16.msra.mxu0 %v24719_v60  ;;  %24981 = vmatpush3.bf16.msra.mxu1 %v24719_v60  ;;  %v17529_v60 = vld [vmem:[%s31993_s21 + $0x4a0] sm:$0xff] }
0x1ac4   :  { %v24723_v4 = vpack.c.bf16 %v22338_v48, %v10921_v2  ;;  %v17532_v48 = vld [vmem:[%s31993_s21 + $0x4b8] sm:$0xff]  ;;  %v17533_v2 = vld [vmem:[%s31993_s21 + $0x4c0] sm:$0xff] }
0x1ac6   :  { %24724 = vmatprep.subr.bf16.mxu0 %v24723_v4  ;;  %24974 = vmatprep.subr.bf16.mxu1 %v24723_v4 }
0x1ac7   :  { %24726 = vmatpush3.bf16.msra.mxu0 %v24723_v4  ;;  %24982 = vmatpush3.bf16.msra.mxu1 %v24723_v4  ;;  %v17534_v4 = vld [vmem:[%s31993_s21 + $0x4c8] sm:$0xff] }
0x1ac8   :  { %24728 = vmatprep.subr.bf16.mxu0 %v24727_v8 }
0x1aca   :  { %22372 = vmatmul.mubr.f32.vlgmr.msra.gmra.mrb[98].mxu0 %v17510_v14  ;;  %v17538_v14 = vld [vmem:[%s31993_s21 + $0x4e8] sm:$0xff] }
0x1acb   :  { %22374 = vmatprep.mubr.f32.mxu0 %v17511_v23  ;;  %24730 = vmatpush3.bf16.msra.mxu0 %v24727_v8  ;;  %v17535_v8 = vld [vmem:[%s31993_s21 + $0x4d0] sm:$0xff] }
0x1acc   :  { %24732 = vmatprep.subr.bf16.mxu0 %v24731_v15  ;;  %v17539_v23 = vld [vmem:[%s31993_s21 + $0x4f0] sm:$0xff] }
0x1ace   :  { %22375 = vmatmul.mubr.f32.gmra.mrb[100].mxu0 %v17512_v11  ;;  %v17543_v11 = vld [vmem:[%s31993_s21 + $0x510] sm:$0xff] }
0x1acf   :  { %22377 = vmatprep.mubr.f32.mxu0 %v17513_v10  ;;  %24734 = vmatpush3.bf16.msra.mxu0 %v24731_v15  ;;  %v17540_v15 = vld [vmem:[%s31993_s21 + $0x4f8] sm:$0xff] }
0x1ad0   :  { %24768 = vmatprep.subr.bf16.mxu0 %v29644_v53  ;;  %v17544_v10 = vld [vmem:[%s31993_s21 + $0x518] sm:$0xff] }
0x1ad2   :  { %22378 = vmatmul.mubr.f32.gmra.mrb[102].mxu0 %v17514_v32  ;;  %v17545_v32 = vld [vmem:[%s31993_s21 + $0x520] sm:$0xff] }
0x1ad3   :  { %22380 = vmatprep.mubr.f32.mxu0 %v17515_v33  ;;  %v17546_v33 = vld [vmem:[%s31993_s21 + $0x528] sm:$0xff] }
0x1ad6   :  { %22381 = vmatmul.mubr.f32.gmra.mrb[104].mxu0 %v17516_v34  ;;  %v17547_v34 = vld [vmem:[%s31993_s21 + $0x530] sm:$0xff] }
0x1ad7   :  { %22383 = vmatprep.mubr.f32.mxu0 %v17517_v36  ;;  %v17548_v36 = vld [vmem:[%s31993_s21 + $0x538] sm:$0xff] }
0x1ada   :  { %22384 = vmatmul.mubr.f32.gmra.mrb[106].mxu0 %v17518_v37  ;;  %v17549_v37 = vld [vmem:[%s31993_s21 + $0x540] sm:$0xff] }
0x1adb   :  { %22386 = vmatprep.mubr.f32.mxu0 %v17519_v38  ;;  %v17550_v38 = vld [vmem:[%s31993_s21 + $0x548] sm:$0xff] }
0x1ade   :  { %22387 = vmatmul.mubr.f32.gmra.mrb[108].mxu0 %v17520_v39  ;;  %v17551_v39 = vld [vmem:[%s31993_s21 + $0x550] sm:$0xff] }
0x1adf   :  { %22389 = vmatprep.mubr.f32.mxu0 %v17521_v44  ;;  %v17552_v44 = vld [vmem:[%s31993_s21 + $0x558] sm:$0xff] }
0x1ae2   :  { %22390 = vmatmul.mubr.f32.gmra.mrb[110].mxu0 %v17522_v46  ;;  %v17553_v46 = vld [vmem:[%s31993_s21 + $0x560] sm:$0xff] }
0x1ae3   :  { %22392 = vmatprep.mubr.f32.mxu0 %v17523_v47  ;;  %v17554_v47 = vld [vmem:[%s31993_s21 + $0x568] sm:$0xff] }
0x1ae6   :  { %22393 = vmatmul.mubr.f32.gmra.mrb[112].mxu0 %v17524_v50  ;;  %v17555_v50 = vld [vmem:[%s31993_s21 + $0x570] sm:$0xff] }
0x1ae7   :  { %22395 = vmatprep.mubr.f32.mxu0 %v17525_v45  ;;  %v17556_v45 = vld [vmem:[%s31993_s21 + $0x578] sm:$0xff] }
0x1aea   :  { %22396 = vmatmul.mubr.f32.gmra.mrb[114].mxu0 %v17526_v52  ;;  %v17743_v52 = vld [vmem:[%s31991_s22 + $0x90] sm:$0xff] }
0x1aeb   :  { %22398 = vmatprep.mubr.f32.mxu0 %v17527_v55  ;;  %v17744_v55 = vld [vmem:[%s31991_s22 + $0x98] sm:$0xff] }
0x1aee   :  { %22399 = vmatmul.mubr.f32.gmra.mrb[116].mxu0 %v17528_v58  ;;  %v24771_v58 = vpack.c.bf16 %v17744_v55, %v17743_v52  ;;  %v17565_v52 = vld [vmem:[%s31993_s21 + $0x5c0] sm:$0xff]  ;;  %v17566_v55 = vld [vmem:[%s31993_s21 + $0x5c8] sm:$0xff] }
0x1aef   :  { %22401 = vmatprep.mubr.f32.mxu0 %v17529_v60  ;;  %v17825_v60 = vld [vmem:[%s31991_s22 + $0xa0] sm:$0xff] }
0x1af2   :  { %22402 = vmatmul.mubr.f32.gmra.mrb[118].mxu0 %v17530_v62  ;;  %v17826_v62 = vld [vmem:[%s31991_s22 + $0xa8] sm:$0xff] }
0x1af3   :  { %22404 = vmatprep.mubr.f32.mxu0 %v17531_v41  ;;  %v24807_v41 = vpack.c.bf16 %v17826_v62, %v17825_v60  ;;  %v17568_v60 = vld [vmem:[%s31993_s21 + $0x5d8] sm:$0xff]  ;;  %v17569_v62 = vld [vmem:[%s31993_s21 + $0x5e0] sm:$0xff] }
0x1af6   :  { %22405 = vmatmul.mubr.f32.gmra.mrb[120].mxu0 %v17532_v48  ;;  %v17828_v48 = vld [vmem:[%s31991_s22 + $0xb8] sm:$0xff] }
0x1af7   :  { %22407 = vmatprep.mubr.f32.mxu0 %v17533_v2 }
0x1afa   :  { %22408 = vmatmul.mubr.f32.gmra.mrb[122].mxu0 %v17534_v4  ;;  %v17909_v4 = vld [vmem:[%s31991_s22 + $0xc0] sm:$0xff] }
0x1afb   :  { %22410 = vmatprep.mubr.f32.mxu0 %v17535_v8  ;;  %v17910_v8 = vld [vmem:[%s31991_s22 + $0xc8] sm:$0xff] }
0x1afe   :  { %22411 = vmatmul.mubr.f32.gmra.mrb[124].mxu0 %v17536_v9  ;;  %v24847_v9 = vpack.c.bf16 %v17910_v8, %v17909_v4  ;;  %v17593_v8 = vld [vmem:[%s31993_s21 + $0x600] sm:$0xff] }
0x1aff   :  { %22413 = vmatprep.mubr.f32.mxu0 %v17537_v0  ;;  %v17911_v0 = vld [vmem:[%s31991_s22 + $0xd0] sm:$0xff] }
0x1b02   :  { %22414 = vmatmul.mubr.f32.gmra.mrb[126].mxu0 %v17538_v14  ;;  %v17912_v14 = vld [vmem:[%s31991_s22 + $0xd8] sm:$0xff] }
0x1b03   :  { %22416 = vmatprep.mubr.f32.mxu0 %v17539_v23  ;;  %v24851_v23 = vpack.c.bf16 %v17912_v14, %v17911_v0 }
0x1b06   :  { %22417 = vmatmul.mubr.f32.gmra.mrb[128].mxu0 %v17540_v15  ;;  %v17993_v15 = vld [vmem:[%s31991_s22 + $0xe0] sm:$0xff] }
0x1b07   :  { %22419 = vmatprep.mubr.f32.mxu0 %v17541_v31  ;;  %v17994_v31 = vld [vmem:[%s31991_s22 + $0xe8] sm:$0xff] }
0x1b0a   :  { %22420 = vmatmul.mubr.f32.gmra.mrb[130].mxu0 %v17542_v29  ;;  %v24887_v29 = vpack.c.bf16 %v17994_v31, %v17993_v15  ;;  %v18080_v15 = vld [vmem:[%s31991_s22 + $0x118] sm:$0xff] }
0x1b0b   :  { %22422 = vmatprep.mubr.f32.mxu0 %v17543_v11  ;;  %v17557_v11 = vld [vmem:[%s31993_s21 + $0x580] sm:$0xff] }
0x1b0c   :  { %22443 = vmatprep.mubr.f32.mxu1 %v17557_v11 }
0x1b0e   :  { %22423 = vmatmul.mubr.f32.gmra.mrb[132].mxu0 %v17544_v10  ;;  %v17558_v10 = vld [vmem:[%s31993_s21 + $0x588] sm:$0xff] }
0x1b0f   :  { %22425 = vmatprep.mubr.f32.mxu0 %v17545_v32  ;;  %22444 = vmatmul.mubr.f32.vlgmr.msra.gmra.mrb[126].mxu1 %v17558_v10  ;;  %v17559_v32 = vld [vmem:[%s31993_s21 + $0x590] sm:$0xff] }
0x1b10   :  { %22446 = vmatprep.mubr.f32.mxu1 %v17559_v32 }
0x1b12   :  { %22426 = vmatmul.mubr.f32.gmra.mrb[134].mxu0 %v17546_v33  ;;  %v17560_v33 = vld [vmem:[%s31993_s21 + $0x598] sm:$0xff] }
0x1b13   :  { %22428 = vmatprep.mubr.f32.mxu0 %v17547_v34  ;;  %v17995_v34 = vld [vmem:[%s31991_s22 + $0xf0] sm:$0xff]  ;;  %22447 = vmatmul.mubr.f32.gmra.mrb[128].mxu1 %v17560_v33 }
0x1b16   :  { %22429 = vmatmul.mubr.f32.gmra.mrb[136].mxu0 %v17548_v36  ;;  %v17996_v36 = vld [vmem:[%s31991_s22 + $0xf8] sm:$0xff] }
0x1b17   :  { %22431 = vmatprep.mubr.f32.mxu0 %v17549_v37  ;;  %v17561_v37 = vld [vmem:[%s31993_s21 + $0x5a0] sm:$0xff] }
0x1b18   :  { %22449 = vmatprep.mubr.f32.mxu1 %v17561_v37 }
0x1b1a   :  { %22432 = vmatmul.mubr.f32.gmra.mrb[138].mxu0 %v17550_v38  ;;  %v17562_v38 = vld [vmem:[%s31993_s21 + $0x5a8] sm:$0xff] }
0x1b1b   :  { %22434 = vmatprep.mubr.f32.mxu0 %v17551_v39  ;;  %v24891_v39 = vpack.c.bf16 %v17996_v36, %v17995_v34  ;;  %22450 = vmatmul.mubr.f32.gmra.mrb[130].mxu1 %v17562_v38 }
0x1b1e   :  { %22435 = vmatmul.mubr.f32.gmra.mrb[140].mxu0 %v17552_v44  ;;  %v18077_v44 = vld [vmem:[%s31991_s22 + $0x100] sm:$0xff] }
0x1b1f   :  { %22437 = vmatprep.mubr.f32.mxu0 %v17553_v46  ;;  %v18078_v46 = vld [vmem:[%s31991_s22 + $0x108] sm:$0xff] }
0x1b22   :  { %22438 = vmatmul.mubr.f32.gmra.mrb[142].mxu0 %v17554_v47  ;;  %v17563_v47 = vld [vmem:[%s31993_s21 + $0x5b0] sm:$0xff] }
0x1b23   :  { %22440 = vmatprep.mubr.f32.mxu0 %v17555_v50  ;;  %v17564_v50 = vld [vmem:[%s31993_s21 + $0x5b8] sm:$0xff]  ;;  %22452 = vmatprep.mubr.f32.mxu1 %v17563_v47 }
0x1b24   :  { %22453 = vmatmul.mubr.f32.gmra.mrb[132].mxu1 %v17564_v50 }
0x1b25   :  { %22455 = vmatprep.mubr.f32.mxu1 %v17565_v52 }
0x1b26   :  { %22441 = vmatmul.mubr.f32.gmra.mrb[144].mxu0 %v17556_v45  ;;  %v24927_v45 = vpack.c.bf16 %v18078_v46, %v18077_v44 }
0x1b27   :  { %22475 = vmatprep.mubr.msk.f32.mxu0 %vm513_vm2, %v29005_v40 }
0x1b28   :  { %22456 = vmatmul.mubr.f32.gmra.mrb[134].mxu1 %v17566_v55 }
0x1b2a   :  { %22476 = vmatmul.mubr.msk.f32.vlgmr.msra.gmra.mrb[178].mxu0 %vm513_vm2, %v29007_v43 }
0x1b2b   :  { %22478 = vmatprep.mubr.msk.f32.mxu0 %vm513_vm2, %v29015_v51  ;;  %24770 = vmatpush3.bf16.msra.mxu0 %v29644_v53  ;;  %v17827_v53 = vld [vmem:[%s31991_s22 + $0xb0] sm:$0xff] }
0x1b2c   :  { %24772 = vmatprep.subr.bf16.mxu0 %v24771_v58  ;;  %v24811_v2 = vpack.c.bf16 %v17828_v48, %v17827_v53  ;;  %v17571_v53 = vld [vmem:[%s31993_s21 + $0x5f0] sm:$0xff]  ;;  %v17572_v48 = vld [vmem:[%s31993_s21 + $0x5f8] sm:$0xff] }
0x1b2e   :  { %22479 = vmatmul.mubr.msk.f32.gmra.mrb[180].mxu0 %vm513_vm2, %v29017_v54 }
0x1b2f   :  { %22481 = vmatprep.mubr.msk.f32.mxu0 %vm513_vm2, %v29025_v59  ;;  %24774 = vmatpush3.bf16.msra.mxu0 %v24771_v58  ;;  %v17567_v58 = vld [vmem:[%s31993_s21 + $0x5d0] sm:$0xff] }
0x1b30   :  { %24808 = vmatprep.subr.bf16.mxu0 %v24807_v41  ;;  %22458 = vmatprep.mubr.f32.mxu1 %v17567_v58 }
0x1b31   :  { %22459 = vmatmul.mubr.f32.gmra.mrb[136].mxu1 %v17568_v60 }
0x1b32   :  { %22482 = vmatmul.mubr.msk.f32.gmra.mrb[182].mxu0 %vm513_vm2, %v29027_v61  ;;  %22461 = vmatprep.mubr.f32.mxu1 %v17569_v62 }
0x1b33   :  { %22484 = vmatprep.mubr.msk.f32.mxu0 %vm513_vm2, %v29035_v3 }
0x1b36   :  { %22485 = vmatmul.mubr.msk.f32.gmra.mrb[184].mxu0 %vm513_vm2, %v29037_v5 }
0x1b37   :  { %22487 = vmatprep.mubr.msk.f32.mxu0 %vm513_vm2, %v29045_v12 }
0x1b3a   :  { %22488 = vmatmul.mubr.msk.f32.gmra.mrb[186].mxu0 %vm513_vm2, %v29047_v7 }
0x1b3b   :  { %22490 = vmatprep.mubr.msk.f32.mxu0 %vm513_vm2, %v29055_v42 }
0x1b3e   :  { %22491 = vmatmul.mubr.msk.f32.gmra.mrb[188].mxu0 %vm513_vm2, %v29057_v56 }
0x1b3f   :  { %22493 = vmatprep.mubr.msk.f32.mxu0 %vm513_vm2, %v29065_v16 }
0x1b42   :  { %22494 = vmatmul.mubr.msk.f32.gmra.mrb[190].mxu0 %vm513_vm2, %v29067_v17 }
0x1b43   :  { %22496 = vmatprep.mubr.msk.f32.mxu0 %vm513_vm2, %v29075_v22 }
0x1b46   :  { %22497 = vmatmul.mubr.msk.f32.gmra.mrb[192].mxu0 %vm513_vm2, %v29077_v57 }
0x1b47   :  { %22635 = vmatprep.mubr.msk.f32.mxu0 %vm513_vm2, %v29005_v40 }
0x1b4a   :  { %22636 = vmatmul.mubr.msk.f32.vlgmr.msra.gmra.mrb[194].mxu0 %vm513_vm2, %v29007_v43 }
0x1b4b   :  { %22638 = vmatprep.mubr.msk.f32.mxu0 %vm513_vm2, %v29015_v51  ;;  %24810 = vmatpush3.bf16.msra.mxu0 %v24807_v41  ;;  %v17570_v41 = vld [vmem:[%s31993_s21 + $0x5e8] sm:$0xff] }
0x1b4c   :  { %24812 = vmatprep.subr.bf16.mxu0 %v24811_v2  ;;  %22462 = vmatmul.mubr.f32.gmra.mrb[138].mxu1 %v17570_v41 }
0x1b4d   :  { %22464 = vmatprep.mubr.f32.mxu1 %v17571_v53 }
0x1b4e   :  { %22639 = vmatmul.mubr.msk.f32.gmra.mrb[196].mxu0 %vm513_vm2, %v29017_v54 }
0x1b4f   :  { %22641 = vmatprep.mubr.msk.f32.mxu0 %vm513_vm2, %v29025_v59  ;;  %24814 = vmatpush3.bf16.msra.mxu0 %v24811_v2 }
0x1b50   :  { %24848 = vmatprep.subr.bf16.mxu0 %v24847_v9  ;;  %22465 = vmatmul.mubr.f32.gmra.mrb[140].mxu1 %v17572_v48 }
0x1b51   :  { %22531 = vmatprep.mubr.f32.mxu1 %v17593_v8 }
0x1b52   :  { %22642 = vmatmul.mubr.msk.f32.gmra.mrb[198].mxu0 %vm513_vm2, %v29027_v61 }
0x1b53   :  { %22644 = vmatprep.mubr.msk.f32.mxu0 %vm513_vm2, %v29035_v3 }
0x1b56   :  { %22645 = vmatmul.mubr.msk.f32.gmra.mrb[200].mxu0 %vm513_vm2, %v29037_v5 }
0x1b57   :  { %22647 = vmatprep.mubr.msk.f32.mxu0 %vm513_vm2, %v29045_v12 }
0x1b5a   :  { %22648 = vmatmul.mubr.msk.f32.gmra.mrb[202].mxu0 %vm513_vm2, %v29047_v7 }
0x1b5b   :  { %22650 = vmatprep.mubr.msk.f32.mxu0 %vm513_vm2, %v29055_v42 }
0x1b5e   :  { %22651 = vmatmul.mubr.msk.f32.gmra.mrb[204].mxu0 %vm513_vm2, %v29057_v56 }
0x1b5f   :  { %22653 = vmatprep.mubr.msk.f32.mxu0 %vm513_vm2, %v29065_v16 }
0x1b62   :  { %22654 = vmatmul.mubr.msk.f32.gmra.mrb[206].mxu0 %vm513_vm2, %v29067_v17 }
0x1b63   :  { %22656 = vmatprep.mubr.msk.f32.mxu0 %vm513_vm2, %v29075_v22 }
0x1b66   :  { %22657 = vmatmul.mubr.msk.f32.gmra.mrb[208].mxu0 %vm513_vm2, %v29077_v57 }
0x1b67   :  { %22795 = vmatprep.mubr.msk.f32.mxu0 %vm513_vm2, %v29005_v40 }
0x1b6a   :  { %22796 = vmatmul.mubr.msk.f32.vlgmr.msra.gmra.mrb[210].mxu0 %vm513_vm2, %v29007_v43 }
0x1b6b   :  { %22798 = vmatprep.mubr.msk.f32.mxu0 %vm513_vm2, %v29015_v51  ;;  %24850 = vmatpush3.bf16.msra.mxu0 %v24847_v9 }
0x1b6c   :  { %24852 = vmatprep.subr.bf16.mxu0 %v24851_v23 }
0x1b6e   :  { %22799 = vmatmul.mubr.msk.f32.gmra.mrb[212].mxu0 %vm513_vm2, %v29017_v54 }
0x1b6f   :  { %22801 = vmatprep.mubr.msk.f32.mxu0 %vm513_vm2, %v29025_v59  ;;  %24854 = vmatpush3.bf16.msra.mxu0 %v24851_v23  ;;  %v18079_v23 = vld [vmem:[%s31991_s22 + $0x110] sm:$0xff] }
0x1b70   :  { %24888 = vmatprep.subr.bf16.mxu0 %v24887_v29 }
0x1b72   :  { %22802 = vmatmul.mubr.msk.f32.gmra.mrb[214].mxu0 %vm513_vm2, %v29027_v61 }
0x1b73   :  { %22804 = vmatprep.mubr.msk.f32.mxu0 %vm513_vm2, %v29035_v3 }
0x1b76   :  { %22805 = vmatmul.mubr.msk.f32.gmra.mrb[216].mxu0 %vm513_vm2, %v29037_v5 }
0x1b77   :  { %22807 = vmatprep.mubr.msk.f32.mxu0 %vm513_vm2, %v29045_v12 }
0x1b7a   :  { %22808 = vmatmul.mubr.msk.f32.gmra.mrb[218].mxu0 %vm513_vm2, %v29047_v7 }
0x1b7b   :  { %22810 = vmatprep.mubr.msk.f32.mxu0 %vm513_vm2, %v29055_v42 }
0x1b7e   :  { %22811 = vmatmul.mubr.msk.f32.gmra.mrb[220].mxu0 %vm513_vm2, %v29057_v56 }
0x1b7f   :  { %22813 = vmatprep.mubr.msk.f32.mxu0 %vm513_vm2, %v29065_v16 }
0x1b82   :  { %22814 = vmatmul.mubr.msk.f32.gmra.mrb[222].mxu0 %vm513_vm2, %v29067_v17 }
0x1b83   :  { %22816 = vmatprep.mubr.msk.f32.mxu0 %vm513_vm2, %v29075_v22 }
0x1b86   :  { %22817 = vmatmul.mubr.msk.f32.gmra.mrb[224].mxu0 %vm513_vm2, %v29077_v57 }
0x1b87   :  { %22955 = vmatprep.mubr.msk.f32.mxu0 %vm513_vm2, %v29005_v40 }
0x1b8a   :  { %22956 = vmatmul.mubr.msk.f32.vlgmr.msra.gmra.mrb[226].mxu0 %vm513_vm2, %v29007_v43 }
0x1b8b   :  { %22958 = vmatprep.mubr.msk.f32.mxu0 %vm513_vm2, %v29015_v51  ;;  %24890 = vmatpush3.bf16.msra.mxu0 %v24887_v29  ;;  %v24931_v29 = vpack.c.bf16 %v18080_v15, %v18079_v23 }
0x1b8c   :  { %24892 = vmatprep.subr.bf16.mxu0 %v24891_v39 }
0x1b8e   :  { %22959 = vmatmul.mubr.msk.f32.gmra.mrb[228].mxu0 %vm513_vm2, %v29017_v54 }
0x1b8f   :  { %22961 = vmatprep.mubr.msk.f32.mxu0 %vm513_vm2, %v29025_v59  ;;  %24894 = vmatpush3.bf16.msra.mxu0 %v24891_v39 }
0x1b90   :  { %24928 = vmatprep.subr.bf16.mxu0 %v24927_v45 }
0x1b92   :  { %22962 = vmatmul.mubr.msk.f32.gmra.mrb[230].mxu0 %vm513_vm2, %v29027_v61 }
0x1b93   :  { %22964 = vmatprep.mubr.msk.f32.mxu0 %vm513_vm2, %v29035_v3 }
0x1b96   :  { %22965 = vmatmul.mubr.msk.f32.gmra.mrb[232].mxu0 %vm513_vm2, %v29037_v5 }
0x1b97   :  { %22967 = vmatprep.mubr.msk.f32.mxu0 %vm513_vm2, %v29045_v12 }
0x1b9a   :  { %22968 = vmatmul.mubr.msk.f32.gmra.mrb[234].mxu0 %vm513_vm2, %v29047_v7 }
0x1b9b   :  { %22970 = vmatprep.mubr.msk.f32.mxu0 %vm513_vm2, %v29055_v42 }
0x1b9d   :  { %v29991_v2 = vpop.f32.mrb[98].mxu0 }
0x1b9e   :  { %v29993_v4 = vpop.f32.mrb[99].mxu0  ;;  %22971 = vmatmul.mubr.msk.f32.gmra.mrb[236].mxu0 %vm513_vm2, %v29057_v56 }
0x1b9f   :  { %22973 = vmatprep.mubr.msk.f32.mxu0 %vm513_vm2, %v29065_v16 }
0x1ba1   :  { %v30002_v9 = vpop.f32.mrb[100].mxu0 }
0x1ba2   :  { %v30004_v0 = vpop.f32.mrb[101].mxu0  ;;  %22974 = vmatmul.mubr.msk.f32.gmra.mrb[238].mxu0 %vm513_vm2, %v29067_v17 }
0x1ba3   :  { %22976 = vmatprep.mubr.msk.f32.mxu0 %vm513_vm2, %v29075_v22 }
0x1ba5   :  { %v30010_v14 = vpop.f32.mrb[102].mxu0 }
0x1ba6   :  { %v30018_v31 = vpop.f32.mrb[103].mxu0  ;;  %22977 = vmatmul.mubr.msk.f32.gmra.mrb[240].mxu0 %vm513_vm2, %v29077_v57 }
0x1ba7   :  { %23115 = vmatprep.mubr.msk.f32.mxu0 %vm513_vm2, %v29005_v40 }
0x1ba9   :  { %v30024_v11 = vpop.f32.mrb[104].mxu0 }
0x1baa   :  { %v30026_v10 = vpop.f32.mrb[105].mxu0  ;;  %23116 = vmatmul.mubr.msk.f32.vlgmr.msra.gmra.mrb[242].mxu0 %vm513_vm2, %v29007_v43 }
0x1bab   :  { %23118 = vmatprep.mubr.msk.f32.mxu0 %vm513_vm2, %v29015_v51  ;;  %24930 = vmatpush3.bf16.msra.mxu0 %v24927_v45 }
0x1bac   :  { %24932 = vmatprep.subr.bf16.mxu0 %v24931_v29 }
0x1bad   :  { %v30032_v32 = vpop.f32.mrb[106].mxu0 }
0x1bae   :  { %v30034_v33 = vpop.f32.mrb[107].mxu0  ;;  %23119 = vmatmul.mubr.msk.f32.gmra.mrb[244].mxu0 %vm513_vm2, %v29017_v54 }
0x1baf   :  { %23121 = vmatprep.mubr.msk.f32.mxu0 %vm513_vm2, %v29025_v59  ;;  %24934 = vmatpush3.bf16.msra.mxu0 %v24931_v29 }
0x1bb1   :  { %v30040_v34 = vpop.f32.mrb[108].mxu0 }
0x1bb2   :  { %v30042_v36 = vpop.f32.mrb[109].mxu0  ;;  %23122 = vmatmul.mubr.msk.f32.gmra.mrb[246].mxu0 %vm513_vm2, %v29027_v61 }
0x1bb3   :  { %23124 = vmatprep.mubr.msk.f32.mxu0 %vm513_vm2, %v29035_v3 }
0x1bb5   :  { %v30048_v37 = vpop.f32.mrb[110].mxu0 }
0x1bb6   :  { %v30050_v38 = vpop.f32.mrb[111].mxu0  ;;  %23125 = vmatmul.mubr.msk.f32.gmra.mrb[248].mxu0 %vm513_vm2, %v29037_v5 }
0x1bb7   :  { %23127 = vmatprep.mubr.msk.f32.mxu0 %vm513_vm2, %v29045_v12 }
0x1bb9   :  { %v30056_v39 = vpop.f32.mrb[112].mxu0 }
0x1bba   :  { %v30058_v44 = vpop.f32.mrb[113].mxu0  ;;  %23128 = vmatmul.mubr.msk.f32.gmra.mrb[250].mxu0 %vm513_vm2, %v29047_v7 }
0x1bbb   :  { %23130 = vmatprep.mubr.msk.f32.mxu0 %vm513_vm2, %v29055_v42 }
0x1bbd   :  { %v30064_v46 = vpop.f32.mrb[114].mxu0 }
0x1bbe   :  { %v30066_v47 = vpop.f32.mrb[115].mxu0  ;;  %23131 = vmatmul.mubr.msk.f32.gmra.mrb[252].mxu0 %vm513_vm2, %v29057_v56 }
0x1bbf   :  { %23133 = vmatprep.mubr.msk.f32.mxu0 %vm513_vm2, %v29065_v16 }
0x1bc1   :  { %v30072_v50 = vpop.f32.mrb[116].mxu0 }
0x1bc2   :  { %v30074_v45 = vpop.f32.mrb[117].mxu0  ;;  %23134 = vmatmul.mubr.msk.f32.gmra.mrb[254].mxu0 %vm513_vm2, %v29067_v17 }
0x1bc3   :  { %23136 = vmatprep.mubr.msk.f32.mxu0 %vm513_vm2, %v29075_v22 }
0x1bc5   :  { %v30080_v52 = vpop.f32.mrb[118].mxu0 }
0x1bc6   :  { %v30082_v55 = vpop.f32.mrb[119].mxu0  ;;  %23137 = vmatmul.mubr.msk.f32.gmra.mrb[0].mxu0 %vm513_vm2, %v29077_v57 }
0x1bc7   :  { %23275 = vmatprep.mubr.msk.f32.mxu0 %vm513_vm2, %v29005_v40 }
0x1bc9   :  { %v30088_v58 = vpop.f32.mrb[120].mxu0 }
0x1bca   :  { %v30090_v60 = vpop.f32.mrb[121].mxu0  ;;  %23276 = vmatmul.mubr.msk.f32.vlgmr.msra.gmra.mrb[2].mxu0 %vm513_vm2, %v29007_v43 }
0x1bcb   :  { %23278 = vmatprep.mubr.msk.f32.mxu0 %vm513_vm2, %v29015_v51 }
0x1bcd   :  { %v30096_v62 = vpop.f32.mrb[122].mxu0 }
0x1bce   :  { %v30098_v41 = vpop.f32.mrb[123].mxu0  ;;  %23279 = vmatmul.mubr.msk.f32.gmra.mrb[4].mxu0 %vm513_vm2, %v29017_v54 }
0x1bcf   :  { %23281 = vmatprep.mubr.msk.f32.mxu0 %vm513_vm2, %v29025_v59 }
0x1bd1   :  { %v30104_v40 = vpop.f32.mrb[124].mxu0 }
0x1bd2   :  { %v30106_v53 = vpop.f32.mrb[125].mxu0  ;;  %23282 = vmatmul.mubr.msk.f32.gmra.mrb[6].mxu0 %vm513_vm2, %v29027_v61 }
0x1bd3   :  { %23284 = vmatprep.mubr.msk.f32.mxu0 %vm513_vm2, %v29035_v3 }
0x1bd5   :  { %v30112_v43 = vpop.f32.mrb[126].mxu0 }
0x1bd6   :  { %v30114_v51 = vpop.f32.mrb[127].mxu0  ;;  %23285 = vmatmul.mubr.msk.f32.gmra.mrb[8].mxu0 %vm513_vm2, %v29037_v5 }
0x1bd7   :  { %23287 = vmatprep.mubr.msk.f32.mxu0 %vm513_vm2, %v29045_v12 }
0x1bd9   :  { %v30120_v54 = vpop.f32.mrb[128].mxu0 }
0x1bda   :  { %v30122_v59 = vpop.f32.mrb[129].mxu0  ;;  %23288 = vmatmul.mubr.msk.f32.gmra.mrb[10].mxu0 %vm513_vm2, %v29047_v7 }
0x1bdb   :  { %32044 = vst [vmem:[#allocation18_spill] sm:$0xff] %v30122_v59  ;;  %23290 = vmatprep.mubr.msk.f32.mxu0 %vm513_vm2, %v29055_v42 }
0x1bdd   :  { %v30128_v61 = vpop.f32.mrb[130].mxu0 }
0x1bde   :  { %32045 = vst [vmem:[#allocation19_spill] sm:$0xff] %v30128_v61  ;;  %v30130_v3 = vpop.f32.mrb[131].mxu0  ;;  %23291 = vmatmul.mubr.msk.f32.gmra.mrb[12].mxu0 %vm513_vm2, %v29057_v56 }
0x1bdf   :  { %32046 = vst [vmem:[#allocation20_spill] sm:$0xff] %v30130_v3  ;;  %23293 = vmatprep.mubr.msk.f32.mxu0 %vm513_vm2, %v29065_v16 }
0x1be1   :  { %v30136_v5 = vpop.f32.mrb[132].mxu0 }
0x1be2   :  { %32047 = vst [vmem:[#allocation21_spill] sm:$0xff] %v30136_v5  ;;  %v30138_v12 = vpop.f32.mrb[133].mxu0  ;;  %23294 = vmatmul.mubr.msk.f32.gmra.mrb[14].mxu0 %vm513_vm2, %v29067_v17 }
0x1be3   :  { %32048 = vst [vmem:[#allocation22_spill] sm:$0xff] %v30138_v12  ;;  %23296 = vmatprep.mubr.msk.f32.mxu0 %vm513_vm2, %v29075_v22 }
0x1be5   :  { %v30144_v7 = vpop.f32.mrb[134].mxu0 }
0x1be6   :  { %32049 = vst [vmem:[#allocation23_spill] sm:$0xff] %v30144_v7  ;;  %v30146_v42 = vpop.f32.mrb[135].mxu0  ;;  %23297 = vmatmul.mubr.msk.f32.gmra.mrb[16].mxu0 %vm513_vm2, %v29077_v57 }
0x1be7   :  { %32050 = vst [vmem:[#allocation24_spill] sm:$0xff] %v30146_v42 }
0x1be9   :  { %v30150_v56 = vpop.f32.mrb[136].mxu0 }
0x1bea   :  { %32051 = vst [vmem:[#allocation25_spill] sm:$0xff] %v30150_v56  ;;  %v30152_v16 = vpop.f32.mrb[137].mxu0 }
0x1beb   :  { %32052 = vst [vmem:[#allocation26_spill] sm:$0xff] %v30152_v16 }
0x1bed   :  { %v30154_v48 = vpop.f32.mrb[138].mxu0 }
0x1bee   :  { %32053 = vst [vmem:[#allocation27_spill] sm:$0xff] %v30154_v48  ;;  %v30156_v8 = vpop.f32.mrb[139].mxu0 }
0x1bef   :  { %32054 = vst [vmem:[#allocation28_spill] sm:$0xff] %v30156_v8 }
0x1bf1   :  { %v30158_v23 = vpop.f32.mrb[140].mxu0 }
0x1bf2   :  { %32055 = vst [vmem:[#allocation29_spill] sm:$0xff] %v30158_v23  ;;  %v30160_v17 = vpop.f32.mrb[141].mxu0 }
0x1bf3   :  { %32056 = vst [vmem:[#allocation30_spill] sm:$0xff] %v30160_v17 }
0x1bf5   :  { %v30162_v22 = vpop.f32.mrb[142].mxu0 }
0x1bf6   :  { %32057 = vst [vmem:[#allocation31_spill] sm:$0xff] %v30162_v22  ;;  %v30164_v15 = vpop.f32.mrb[143].mxu0 }
0x1bf7   :  { %32058 = vst [vmem:[#allocation32_spill] sm:$0xff] %v30164_v15 }
0x1bf9   :  { %v30166_v29 = vpop.f32.mrb[144].mxu0 }
0x1bfa   :  { %32059 = vst [vmem:[#allocation33_spill] sm:$0xff] %v30166_v29  ;;  %v30168_v1 = vpop.f32.mrb[145].mxu0 }
0x1bfb   :  { %32060 = vst [vmem:[#allocation34_spill] sm:$0xff] %v30168_v1 }
0x1bfd   :  { %v22477_v57 = vpop.f32.mrb[178].mxu0 }
0x1bfe   :  { %v11515_v30 = vpop.f32.mrb[179].mxu0 }
0x1bff   :  { %v24735_v28 = vpack.c.bf16 %v22477_v57, %v11515_v30 }
0x1c01   :  { %v22480_v27 = vpop.f32.mrb[180].mxu0  ;;  %24736 = vmatprep.subr.bf16.mxu1 %v24735_v28 }
0x1c02   :  { %v11525_v26 = vpop.f32.mrb[181].mxu0  ;;  %24738 = vmatpush3.bf16.msra.mxu1 %v24735_v28 }
0x1c03   :  { %v24739_v25 = vpack.c.bf16 %v22480_v27, %v11525_v26 }
0x1c05   :  { %v22483_v24 = vpop.f32.mrb[182].mxu0  ;;  %24740 = vmatprep.subr.bf16.mxu1 %v24739_v25 }
0x1c06   :  { %v11535_v21 = vpop.f32.mrb[183].mxu0  ;;  %24742 = vmatpush3.bf16.msra.mxu1 %v24739_v25 }
0x1c07   :  { %v24743_v20 = vpack.c.bf16 %v22483_v24, %v11535_v21 }
0x1c09   :  { %v22486_v19 = vpop.f32.mrb[184].mxu0  ;;  %24744 = vmatprep.subr.bf16.mxu1 %v24743_v20 }
0x1c0a   :  { %v11545_v18 = vpop.f32.mrb[185].mxu0  ;;  %24746 = vmatpush3.bf16.msra.mxu1 %v24743_v20 }
0x1c0b   :  { %v24747_v13 = vpack.c.bf16 %v22486_v19, %v11545_v18 }
0x1c0d   :  { %v22489_v6 = vpop.f32.mrb[186].mxu0  ;;  %24748 = vmatprep.subr.bf16.mxu1 %v24747_v13 }
0x1c0e   :  { %v11555_v63 = vpop.f32.mrb[187].mxu0  ;;  %24750 = vmatpush3.bf16.msra.mxu1 %v24747_v13 }
0x1c0f   :  { %v24751_v30 = vpack.c.bf16 %v22489_v6, %v11555_v63  ;;  %v17594_v63 = vld [vmem:[%s31993_s21 + $0x608] sm:$0xff] }
0x1c11   :  { %v22492_v57 = vpop.f32.mrb[188].mxu0  ;;  %24752 = vmatprep.subr.bf16.mxu1 %v24751_v30 }
0x1c12   :  { %v11565_v49 = vpop.f32.mrb[189].mxu0  ;;  %24754 = vmatpush3.bf16.msra.mxu1 %v24751_v30 }
0x1c13   :  { %v24755_v26 = vpack.c.bf16 %v22492_v57, %v11565_v49  ;;  %v17595_v49 = vld [vmem:[%s31993_s21 + $0x610] sm:$0xff]  ;;  %v17596_v57 = vld [vmem:[%s31993_s21 + $0x618] sm:$0xff] }
0x1c15   :  { %v22495_v27 = vpop.f32.mrb[190].mxu0  ;;  %24756 = vmatprep.subr.bf16.mxu1 %v24755_v26 }
0x1c16   :  { %v11575_v28 = vpop.f32.mrb[191].mxu0  ;;  %24758 = vmatpush3.bf16.msra.mxu1 %v24755_v26 }
0x1c17   :  { %v24759_v21 = vpack.c.bf16 %v22495_v27, %v11575_v28  ;;  %v17597_v27 = vld [vmem:[%s31993_s21 + $0x620] sm:$0xff] }
0x1c19   :  { %v22498_v24 = vpop.f32.mrb[192].mxu0  ;;  %24760 = vmatprep.subr.bf16.mxu1 %v24759_v21 }
0x1c1a   :  { %v11585_v25 = vpop.f32.mrb[193].mxu0  ;;  %24762 = vmatpush3.bf16.msra.mxu1 %v24759_v21 }
0x1c1b   :  { %v24763_v18 = vpack.c.bf16 %v22498_v24, %v11585_v25  ;;  %v17598_v24 = vld [vmem:[%s31993_s21 + $0x628] sm:$0xff] }
0x1c1d   :  { %24764 = vmatprep.subr.bf16.mxu1 %v24763_v18  ;;  %v22637_v19 = vpop.f32.mrb[194].mxu0 }
0x1c1e   :  { %24766 = vmatpush3.bf16.msra.mxu1 %v24763_v18  ;;  %v12179_v13 = vpop.f32.mrb[195].mxu0  ;;  %v17599_v18 = vld [vmem:[%s31993_s21 + $0x630] sm:$0xff] }
0x1c1f   :  { %v24775_v6 = vpack.c.bf16 %v22637_v19, %v12179_v13 }
0x1c21   :  { %22532 = vmatmul.mubr.f32.vlgmr.msra.gmra.mrb[142].mxu1 %v17594_v63  ;;  %v22640_v20 = vpop.f32.mrb[196].mxu0  ;;  %24776 = vmatprep.subr.bf16.mxu1 %v24775_v6  ;;  %v17600_v63 = vld [vmem:[%s31993_s21 + $0x638] sm:$0xff] }
0x1c22   :  { %v12189_v30 = vpop.f32.mrb[197].mxu0  ;;  %24778 = vmatpush3.bf16.msra.mxu1 %v24775_v6  ;;  %22534 = vmatprep.mubr.f32.mxu1 %v17595_v49  ;;  %v17601_v49 = vld [vmem:[%s31993_s21 + $0x640] sm:$0xff] }
0x1c23   :  { %v24779_v26 = vpack.c.bf16 %v22640_v20, %v12189_v30 }
0x1c25   :  { %22535 = vmatmul.mubr.f32.gmra.mrb[144].mxu1 %v17596_v57  ;;  %v22643_v28 = vpop.f32.mrb[198].mxu0  ;;  %24780 = vmatprep.subr.bf16.mxu1 %v24779_v26  ;;  %v17602_v57 = vld [vmem:[%s31993_s21 + $0x648] sm:$0xff] }
0x1c26   :  { %v12199_v21 = vpop.f32.mrb[199].mxu0  ;;  %24782 = vmatpush3.bf16.msra.mxu1 %v24779_v26  ;;  %22537 = vmatprep.mubr.f32.mxu1 %v17597_v27  ;;  %v17603_v27 = vld [vmem:[%s31993_s21 + $0x650] sm:$0xff] }
0x1c27   :  { %v24783_v25 = vpack.c.bf16 %v22643_v28, %v12199_v21 }
0x1c29   :  { %22538 = vmatmul.mubr.f32.gmra.mrb[146].mxu1 %v17598_v24  ;;  %v22646_v19 = vpop.f32.mrb[200].mxu0  ;;  %24784 = vmatprep.subr.bf16.mxu1 %v24783_v25  ;;  %v17604_v24 = vld [vmem:[%s31993_s21 + $0x658] sm:$0xff] }
0x1c2a   :  { %v12209_v13 = vpop.f32.mrb[201].mxu0  ;;  %24786 = vmatpush3.bf16.msra.mxu1 %v24783_v25  ;;  %22540 = vmatprep.mubr.f32.mxu1 %v17599_v18  ;;  %v17605_v18 = vld [vmem:[%s31993_s21 + $0x660] sm:$0xff] }
0x1c2b   :  { %v24787_v6 = vpack.c.bf16 %v22646_v19, %v12209_v13 }
0x1c2d   :  { %22541 = vmatmul.mubr.f32.gmra.mrb[148].mxu1 %v17600_v63  ;;  %v22649_v20 = vpop.f32.mrb[202].mxu0  ;;  %24788 = vmatprep.subr.bf16.mxu1 %v24787_v6  ;;  %v17606_v63 = vld [vmem:[%s31993_s21 + $0x668] sm:$0xff] }
0x1c2e   :  { %v12219_v30 = vpop.f32.mrb[203].mxu0  ;;  %24790 = vmatpush3.bf16.msra.mxu1 %v24787_v6  ;;  %22543 = vmatprep.mubr.f32.mxu1 %v17601_v49  ;;  %v17607_v49 = vld [vmem:[%s31993_s21 + $0x670] sm:$0xff] }
0x1c2f   :  { %v24791_v26 = vpack.c.bf16 %v22649_v20, %v12219_v30 }
0x1c31   :  { %22544 = vmatmul.mubr.f32.gmra.mrb[150].mxu1 %v17602_v57  ;;  %v22652_v28 = vpop.f32.mrb[204].mxu0  ;;  %24792 = vmatprep.subr.bf16.mxu1 %v24791_v26  ;;  %v17608_v57 = vld [vmem:[%s31993_s21 + $0x678] sm:$0xff] }
0x1c32   :  { %v12229_v21 = vpop.f32.mrb[205].mxu0  ;;  %24794 = vmatpush3.bf16.msra.mxu1 %v24791_v26  ;;  %22546 = vmatprep.mubr.f32.mxu1 %v17603_v27  ;;  %v17609_v27 = vld [vmem:[%s31993_s21 + $0x680] sm:$0xff] }
0x1c33   :  { %v24795_v25 = vpack.c.bf16 %v22652_v28, %v12229_v21 }
0x1c35   :  { %22547 = vmatmul.mubr.f32.gmra.mrb[152].mxu1 %v17604_v24  ;;  %v22655_v19 = vpop.f32.mrb[206].mxu0  ;;  %24796 = vmatprep.subr.bf16.mxu1 %v24795_v25  ;;  %v17610_v24 = vld [vmem:[%s31993_s21 + $0x688] sm:$0xff] }
0x1c36   :  { %v12239_v13 = vpop.f32.mrb[207].mxu0  ;;  %24798 = vmatpush3.bf16.msra.mxu1 %v24795_v25  ;;  %22549 = vmatprep.mubr.f32.mxu1 %v17605_v18  ;;  %v17611_v18 = vld [vmem:[%s31993_s21 + $0x690] sm:$0xff] }
0x1c37   :  { %v24799_v6 = vpack.c.bf16 %v22655_v19, %v12239_v13 }
0x1c39   :  { %22550 = vmatmul.mubr.f32.gmra.mrb[154].mxu1 %v17606_v63  ;;  %v22658_v20 = vpop.f32.mrb[208].mxu0  ;;  %24800 = vmatprep.subr.bf16.mxu1 %v24799_v6  ;;  %v17612_v63 = vld [vmem:[%s31993_s21 + $0x698] sm:$0xff] }
0x1c3a   :  { %v12249_v30 = vpop.f32.mrb[209].mxu0  ;;  %24802 = vmatpush3.bf16.msra.mxu1 %v24799_v6  ;;  %22552 = vmatprep.mubr.f32.mxu1 %v17607_v49  ;;  %v17613_v49 = vld [vmem:[%s31993_s21 + $0x6a0] sm:$0xff] }
0x1c3b   :  { %v24803_v26 = vpack.c.bf16 %v22658_v20, %v12249_v30 }
0x1c3d   :  { %22553 = vmatmul.mubr.f32.gmra.mrb[156].mxu1 %v17608_v57  ;;  %24804 = vmatprep.subr.bf16.mxu1 %v24803_v26  ;;  %v22797_v28 = vpop.f32.mrb[210].mxu0  ;;  %v17614_v57 = vld [vmem:[%s31993_s21 + $0x6a8] sm:$0xff] }
0x1c3e   :  { %24806 = vmatpush3.bf16.msra.mxu1 %v24803_v26  ;;  %v12843_v21 = vpop.f32.mrb[211].mxu0  ;;  %22555 = vmatprep.mubr.f32.mxu1 %v17609_v27  ;;  %v17615_v27 = vld [vmem:[%s31993_s21 + $0x6b0] sm:$0xff] }
0x1c3f   :  { %v30221_v25 = vpack.c.bf16 %v22797_v28, %v12843_v21 }
0x1c41   :  { %22556 = vmatmul.mubr.f32.gmra.mrb[158].mxu1 %v17610_v24  ;;  %v22800_v19 = vpop.f32.mrb[212].mxu0  ;;  %24816 = vmatprep.subr.bf16.mxu1 %v30221_v25  ;;  %v17616_v24 = vld [vmem:[%s31993_s21 + $0x6b8] sm:$0xff] }
0x1c42   :  { %v12853_v13 = vpop.f32.mrb[213].mxu0  ;;  %22558 = vmatprep.mubr.f32.mxu1 %v17611_v18 }
0x1c43   :  { %v30230_v6 = vpack.c.bf16 %v22800_v19, %v12853_v13  ;;  %v17617_v19 = vld [vmem:[%s31993_s21 + $0x6c0] sm:$0xff] }
0x1c45   :  { %22559 = vmatmul.mubr.f32.gmra.mrb[160].mxu1 %v17612_v63  ;;  %v22803_v20 = vpop.f32.mrb[214].mxu0 }
0x1c46   :  { %v12863_v30 = vpop.f32.mrb[215].mxu0  ;;  %22561 = vmatprep.mubr.f32.mxu1 %v17613_v49  ;;  %v17618_v49 = vld [vmem:[%s31993_s21 + $0x6c8] sm:$0xff] }
0x1c47   :  { %v30238_v26 = vpack.c.bf16 %v22803_v20, %v12863_v30  ;;  %v17619_v30 = vld [vmem:[%s31993_s21 + $0x6d0] sm:$0xff] }
0x1c49   :  { %22562 = vmatmul.mubr.f32.gmra.mrb[162].mxu1 %v17614_v57  ;;  %v22806_v28 = vpop.f32.mrb[216].mxu0 }
0x1c4a   :  { %v12873_v21 = vpop.f32.mrb[217].mxu0  ;;  %22564 = vmatprep.mubr.f32.mxu1 %v17615_v27 }
0x1c4b   :  { %v30246_v18 = vpack.c.bf16 %v22806_v28, %v12873_v21  ;;  %v17620_v28 = vld [vmem:[%s31993_s21 + $0x6d8] sm:$0xff] }
0x1c4d   :  { %22565 = vmatmul.mubr.f32.gmra.mrb[164].mxu1 %v17616_v24  ;;  %v22809_v13 = vpop.f32.mrb[218].mxu0  ;;  %v17621_v24 = vld [vmem:[%s31993_s21 + $0x6e0] sm:$0xff] }
0x1c4e   :  { %v12883_v63 = vpop.f32.mrb[219].mxu0  ;;  %22567 = vmatprep.mubr.f32.mxu1 %v17617_v19 }
0x1c4f   :  { %v30254_v20 = vpack.c.bf16 %v22809_v13, %v12883_v63  ;;  %v17622_v63 = vld [vmem:[%s31993_s21 + $0x6e8] sm:$0xff] }
0x1c51   :  { %22568 = vmatmul.mubr.f32.gmra.mrb[166].mxu1 %v17618_v49  ;;  %v22812_v57 = vpop.f32.mrb[220].mxu0 }
0x1c52   :  { %v12893_v27 = vpop.f32.mrb[221].mxu0  ;;  %22570 = vmatprep.mubr.f32.mxu1 %v17619_v30  ;;  %v17623_v30 = vld [vmem:[%s31993_s21 + $0x6f0] sm:$0xff] }
0x1c53   :  { %v30262_v21 = vpack.c.bf16 %v22812_v57, %v12893_v27 }
0x1c55   :  { %22571 = vmatmul.mubr.f32.gmra.mrb[168].mxu1 %v17620_v28  ;;  %v22815_v19 = vpop.f32.mrb[222].mxu0  ;;  %v17624_v28 = vld [vmem:[%s31993_s21 + $0x6f8] sm:$0xff] }
0x1c56   :  { %v12903_v13 = vpop.f32.mrb[223].mxu0  ;;  %22573 = vmatprep.mubr.f32.mxu1 %v17621_v24  ;;  %v17625_v24 = vld [vmem:[%s31993_s21 + $0x700] sm:$0xff] }
0x1c57   :  { %v30270_v49 = vpack.c.bf16 %v22815_v19, %v12903_v13 }
0x1c59   :  { %22574 = vmatmul.mubr.f32.gmra.mrb[170].mxu1 %v17622_v63  ;;  %v22818_v57 = vpop.f32.mrb[224].mxu0  ;;  %v17626_v63 = vld [vmem:[%s31993_s21 + $0x708] sm:$0xff] }
0x1c5a   :  { %v12913_v27 = vpop.f32.mrb[225].mxu0  ;;  %22576 = vmatprep.mubr.f32.mxu1 %v17623_v30  ;;  %v17627_v30 = vld [vmem:[%s31993_s21 + $0x710] sm:$0xff] }
0x1c5b   :  { %v30278_v35 = vpack.c.bf16 %v22818_v57, %v12913_v27 }
0x1c5d   :  { %22577 = vmatmul.mubr.f32.gmra.mrb[172].mxu1 %v17624_v28  ;;  %v22957_v19 = vpop.f32.mrb[226].mxu0  ;;  %v17628_v28 = vld [vmem:[%s31993_s21 + $0x718] sm:$0xff] }
0x1c5e   :  { %v13507_v13 = vpop.f32.mrb[227].mxu0  ;;  %22579 = vmatprep.mubr.f32.mxu1 %v17625_v24  ;;  %v17629_v24 = vld [vmem:[%s31993_s21 + $0x720] sm:$0xff] }
0x1c5f   :  { %v30286_v1 = vpack.c.bf16 %v22957_v19, %v13507_v13 }
0x1c61   :  { %22580 = vmatmul.mubr.f32.gmra.mrb[174].mxu1 %v17626_v63  ;;  %v22960_v57 = vpop.f32.mrb[228].mxu0  ;;  %v17630_v63 = vld [vmem:[%s31993_s21 + $0x728] sm:$0xff] }
0x1c62   :  { %v13517_v27 = vpop.f32.mrb[229].mxu0  ;;  %22582 = vmatprep.mubr.f32.mxu1 %v17627_v30  ;;  %v17631_v30 = vld [vmem:[%s31993_s21 + $0x730] sm:$0xff] }
0x1c63   :  { %v30294_v29 = vpack.c.bf16 %v22960_v57, %v13517_v27 }
0x1c65   :  { %22583 = vmatmul.mubr.f32.gmra.mrb[176].mxu1 %v17628_v28  ;;  %v22963_v19 = vpop.f32.mrb[230].mxu0  ;;  %v17632_v28 = vld [vmem:[%s31993_s21 + $0x738] sm:$0xff] }
0x1c66   :  { %v13527_v13 = vpop.f32.mrb[231].mxu0  ;;  %22585 = vmatprep.mubr.f32.mxu1 %v17629_v24  ;;  %v17633_v24 = vld [vmem:[%s31993_s21 + $0x740] sm:$0xff] }
0x1c67   :  { %v30302_v15 = vpack.c.bf16 %v22963_v19, %v13527_v13 }
0x1c69   :  { %22586 = vmatmul.mubr.f32.gmra.mrb[178].mxu1 %v17630_v63  ;;  %v22966_v57 = vpop.f32.mrb[232].mxu0  ;;  %v17634_v63 = vld [vmem:[%s31993_s21 + $0x748] sm:$0xff] }
0x1c6a   :  { %v13537_v27 = vpop.f32.mrb[233].mxu0  ;;  %22588 = vmatprep.mubr.f32.mxu1 %v17631_v30  ;;  %v17635_v30 = vld [vmem:[%s31993_s21 + $0x750] sm:$0xff] }
0x1c6b   :  { %v30310_v22 = vpack.c.bf16 %v22966_v57, %v13537_v27 }
0x1c6d   :  { %22589 = vmatmul.mubr.f32.gmra.mrb[180].mxu1 %v17632_v28  ;;  %v22969_v19 = vpop.f32.mrb[234].mxu0  ;;  %v17636_v28 = vld [vmem:[%s31993_s21 + $0x758] sm:$0xff] }
0x1c6e   :  { %v13547_v13 = vpop.f32.mrb[235].mxu0  ;;  %22591 = vmatprep.mubr.f32.mxu1 %v17633_v24  ;;  %v17637_v24 = vld [vmem:[%s31993_s21 + $0x760] sm:$0xff] }
0x1c6f   :  { %v30318_v17 = vpack.c.bf16 %v22969_v19, %v13547_v13 }
0x1c71   :  { %22592 = vmatmul.mubr.f32.gmra.mrb[182].mxu1 %v17634_v63  ;;  %v22972_v57 = vpop.f32.mrb[236].mxu0  ;;  %v17638_v63 = vld [vmem:[%s31993_s21 + $0x768] sm:$0xff] }
0x1c72   :  { %v13557_v27 = vpop.f32.mrb[237].mxu0  ;;  %22594 = vmatprep.mubr.f32.mxu1 %v17635_v30  ;;  %v17639_v30 = vld [vmem:[%s31993_s21 + $0x770] sm:$0xff] }
0x1c73   :  { %v30326_v23 = vpack.c.bf16 %v22972_v57, %v13557_v27 }
0x1c75   :  { %22595 = vmatmul.mubr.f32.gmra.mrb[184].mxu1 %v17636_v28  ;;  %v22975_v19 = vpop.f32.mrb[238].mxu0  ;;  %v17640_v28 = vld [vmem:[%s31993_s21 + $0x778] sm:$0xff] }
0x1c76   :  { %v13567_v13 = vpop.f32.mrb[239].mxu0  ;;  %22597 = vmatprep.mubr.f32.mxu1 %v17637_v24  ;;  %v17641_v24 = vld [vmem:[%s31993_s21 + $0x780] sm:$0xff] }
0x1c77   :  { %v30334_v8 = vpack.c.bf16 %v22975_v19, %v13567_v13 }
0x1c79   :  { %22598 = vmatmul.mubr.f32.gmra.mrb[186].mxu1 %v17638_v63  ;;  %v22978_v57 = vpop.f32.mrb[240].mxu0  ;;  %v17642_v63 = vld [vmem:[%s31993_s21 + $0x788] sm:$0xff] }
0x1c7a   :  { %v13577_v27 = vpop.f32.mrb[241].mxu0  ;;  %22600 = vmatprep.mubr.f32.mxu1 %v17639_v30  ;;  %v17643_v30 = vld [vmem:[%s31993_s21 + $0x790] sm:$0xff] }
0x1c7b   :  { %v30342_v48 = vpack.c.bf16 %v22978_v57, %v13577_v27 }
0x1c7d   :  { %22601 = vmatmul.mubr.f32.gmra.mrb[188].mxu1 %v17640_v28  ;;  %v23117_v19 = vpop.f32.mrb[242].mxu0  ;;  %v17644_v28 = vld [vmem:[%s31993_s21 + $0x798] sm:$0xff] }
0x1c7e   :  { %v14171_v13 = vpop.f32.mrb[243].mxu0  ;;  %22603 = vmatprep.mubr.f32.mxu1 %v17641_v24  ;;  %v17645_v24 = vld [vmem:[%s31993_s21 + $0x7a0] sm:$0xff] }
0x1c7f   :  { %v30350_v16 = vpack.c.bf16 %v23117_v19, %v14171_v13 }
0x1c81   :  { %22604 = vmatmul.mubr.f32.gmra.mrb[126].mxu1 %v17642_v63  ;;  %v23120_v57 = vpop.f32.mrb[244].mxu0  ;;  %v17646_v63 = vld [vmem:[%s31993_s21 + $0x7a8] sm:$0xff] }
0x1c82   :  { %v14181_v27 = vpop.f32.mrb[245].mxu0  ;;  %22606 = vmatprep.mubr.f32.mxu1 %v17643_v30  ;;  %v17647_v30 = vld [vmem:[%s31993_s21 + $0x7b0] sm:$0xff] }
0x1c83   :  { %v30358_v56 = vpack.c.bf16 %v23120_v57, %v14181_v27 }
0x1c85   :  { %22607 = vmatmul.mubr.f32.gmra.mrb[128].mxu1 %v17644_v28  ;;  %v23123_v19 = vpop.f32.mrb[246].mxu0  ;;  %v17648_v28 = vld [vmem:[%s31993_s21 + $0x7b8] sm:$0xff] }
0x1c86   :  { %v14191_v13 = vpop.f32.mrb[247].mxu0  ;;  %22609 = vmatprep.mubr.f32.mxu1 %v17645_v24  ;;  %v17649_v24 = vld [vmem:[%s31993_s21 + $0x7c0] sm:$0xff] }
0x1c87   :  { %v30366_v42 = vpack.c.bf16 %v23123_v19, %v14191_v13 }
0x1c89   :  { %22610 = vmatmul.mubr.f32.gmra.mrb[130].mxu1 %v17646_v63  ;;  %v23126_v57 = vpop.f32.mrb[248].mxu0  ;;  %v17650_v63 = vld [vmem:[%s31993_s21 + $0x7c8] sm:$0xff] }
0x1c8a   :  { %v14201_v27 = vpop.f32.mrb[249].mxu0  ;;  %22612 = vmatprep.mubr.f32.mxu1 %v17647_v30  ;;  %v17651_v30 = vld [vmem:[%s31993_s21 + $0x7d0] sm:$0xff] }
0x1c8b   :  { %v30374_v7 = vpack.c.bf16 %v23126_v57, %v14201_v27 }
0x1c8d   :  { %22613 = vmatmul.mubr.f32.gmra.mrb[132].mxu1 %v17648_v28  ;;  %v23129_v19 = vpop.f32.mrb[250].mxu0  ;;  %v17652_v28 = vld [vmem:[%s31993_s21 + $0x7d8] sm:$0xff] }
0x1c8e   :  { %v14211_v13 = vpop.f32.mrb[251].mxu0  ;;  %22615 = vmatprep.mubr.f32.mxu1 %v17649_v24  ;;  %v17653_v24 = vld [vmem:[%s31993_s21 + $0x7e0] sm:$0xff] }
0x1c8f   :  { %v30382_v12 = vpack.c.bf16 %v23129_v19, %v14211_v13 }
0x1c91   :  { %22616 = vmatmul.mubr.f32.gmra.mrb[134].mxu1 %v17650_v63  ;;  %v23132_v57 = vpop.f32.mrb[252].mxu0  ;;  %v17654_v63 = vld [vmem:[%s31993_s21 + $0x7e8] sm:$0xff] }
0x1c92   :  { %v14221_v27 = vpop.f32.mrb[253].mxu0  ;;  %22618 = vmatprep.mubr.f32.mxu1 %v17651_v30  ;;  %v17655_v30 = vld [vmem:[%s31993_s21 + $0x7f0] sm:$0xff] }
0x1c93   :  { %v30390_v5 = vpack.c.bf16 %v23132_v57, %v14221_v27 }
0x1c95   :  { %22619 = vmatmul.mubr.f32.gmra.mrb[136].mxu1 %v17652_v28  ;;  %v23135_v19 = vpop.f32.mrb[254].mxu0  ;;  %v17656_v28 = vld [vmem:[%s31993_s21 + $0x7f8] sm:$0xff] }
0x1c96   :  { %v14231_v13 = vpop.f32.mrb[255].mxu0  ;;  %22621 = vmatprep.mubr.f32.mxu1 %v17653_v24  ;;  %v17677_v24 = vld [vmem:[%s31993_s21 + $0x800] sm:$0xff] }
0x1c97   :  { %v30398_v3 = vpack.c.bf16 %v23135_v19, %v14231_v13 }
0x1c99   :  { %22622 = vmatmul.mubr.f32.gmra.mrb[138].mxu1 %v17654_v63  ;;  %v23138_v57 = vpop.f32.mrb[0].mxu0  ;;  %v17678_v63 = vld [vmem:[%s31993_s21 + $0x808] sm:$0xff] }
0x1c9a   :  { %v14241_v27 = vpop.f32.mrb[1].mxu0  ;;  %22624 = vmatprep.mubr.f32.mxu1 %v17655_v30  ;;  %v17679_v30 = vld [vmem:[%s31993_s21 + $0x810] sm:$0xff] }
0x1c9b   :  { %v30406_v61 = vpack.c.bf16 %v23138_v57, %v14241_v27 }
0x1c9d   :  { %22625 = vmatmul.mubr.f32.gmra.mrb[140].mxu1 %v17656_v28  ;;  %v23277_v19 = vpop.f32.mrb[2].mxu0  ;;  %v17680_v28 = vld [vmem:[%s31993_s21 + $0x818] sm:$0xff] }
0x1c9e   :  { %v14835_v13 = vpop.f32.mrb[3].mxu0  ;;  %22691 = vmatprep.mubr.f32.mxu1 %v17677_v24 }
0x1c9f   :  { %v30414_v59 = vpack.c.bf16 %v23277_v19, %v14835_v13  ;;  %v17681_v19 = vld [vmem:[%s31993_s21 + $0x820] sm:$0xff] }
0x1ca1   :  { %22692 = vmatmul.mubr.f32.vlgmr.msra.gmra.mrb[142].mxu1 %v17678_v63  ;;  %v23280_v57 = vpop.f32.mrb[4].mxu0 }
0x1ca2   :  { %24818 = vmatpush3.bf16.msra.mxu1 %v30221_v25  ;;  %v14845_v27 = vpop.f32.mrb[5].mxu0  ;;  %22694 = vmatprep.mubr.f32.mxu1 %v17679_v30  ;;  %v17682_v25 = vld [vmem:[%s31993_s21 + $0x828] sm:$0xff] }
0x1ca3   :  { %24820 = vmatprep.subr.bf16.mxu1 %v30230_v6  ;;  %v30424_v24 = vpack.c.bf16 %v23280_v57, %v14845_v27  ;;  %v17683_v57 = vld [vmem:[%s31993_s21 + $0x830] sm:$0xff] }
0x1ca5   :  { %22695 = vmatmul.mubr.f32.gmra.mrb[144].mxu1 %v17680_v28  ;;  %v23283_v13 = vpop.f32.mrb[6].mxu0 }
0x1ca6   :  { %24822 = vmatpush3.bf16.msra.mxu1 %v30230_v6  ;;  %v14855_v63 = vpop.f32.mrb[7].mxu0  ;;  %22697 = vmatprep.mubr.f32.mxu1 %v17681_v19  ;;  %v17684_v6 = vld [vmem:[%s31993_s21 + $0x838] sm:$0xff] }
0x1ca7   :  { %24824 = vmatprep.subr.bf16.mxu1 %v30238_v26  ;;  %v30434_v30 = vpack.c.bf16 %v23283_v13, %v14855_v63  ;;  %v17685_v13 = vld [vmem:[%s31993_s21 + $0x840] sm:$0xff] }
0x1ca9   :  { %22698 = vmatmul.mubr.f32.gmra.mrb[146].mxu1 %v17682_v25  ;;  %v23286_v27 = vpop.f32.mrb[8].mxu0 }
0x1caa   :  { %24826 = vmatpush3.bf16.msra.mxu1 %v30238_v26  ;;  %v14865_v28 = vpop.f32.mrb[9].mxu0  ;;  %22700 = vmatprep.mubr.f32.mxu1 %v17683_v57  ;;  %v17686_v26 = vld [vmem:[%s31993_s21 + $0x848] sm:$0xff] }
0x1cab   :  { %24828 = vmatprep.subr.bf16.mxu1 %v30246_v18  ;;  %v30444_v19 = vpack.c.bf16 %v23286_v27, %v14865_v28  ;;  %v17687_v27 = vld [vmem:[%s31993_s21 + $0x850] sm:$0xff] }
0x1cad   :  { %22701 = vmatmul.mubr.f32.gmra.mrb[148].mxu1 %v17684_v6  ;;  %v23289_v63 = vpop.f32.mrb[10].mxu0 }
0x1cae   :  { %24830 = vmatpush3.bf16.msra.mxu1 %v30246_v18  ;;  %v14875_v25 = vpop.f32.mrb[11].mxu0  ;;  %22703 = vmatprep.mubr.f32.mxu1 %v17685_v13  ;;  %v17688_v18 = vld [vmem:[%s31993_s21 + $0x858] sm:$0xff] }
0x1caf   :  { %24832 = vmatprep.subr.bf16.mxu1 %v30254_v20  ;;  %v30454_v57 = vpack.c.bf16 %v23289_v63, %v14875_v25  ;;  %v17689_v63 = vld [vmem:[%s31993_s21 + $0x860] sm:$0xff] }
0x1cb1   :  { %22704 = vmatmul.mubr.f32.gmra.mrb[150].mxu1 %v17686_v26  ;;  %v23292_v28 = vpop.f32.mrb[12].mxu0 }
0x1cb2   :  { %24834 = vmatpush3.bf16.msra.mxu1 %v30254_v20  ;;  %v14885_v6 = vpop.f32.mrb[13].mxu0  ;;  %22706 = vmatprep.mubr.f32.mxu1 %v17687_v27  ;;  %v17690_v20 = vld [vmem:[%s31993_s21 + $0x868] sm:$0xff] }
0x1cb3   :  { %24836 = vmatprep.subr.bf16.mxu1 %v30262_v21  ;;  %v30464_v13 = vpack.c.bf16 %v23292_v28, %v14885_v6  ;;  %v17691_v28 = vld [vmem:[%s31993_s21 + $0x870] sm:$0xff] }
0x1cb5   :  { %22707 = vmatmul.mubr.f32.gmra.mrb[152].mxu1 %v17688_v18  ;;  %v23295_v25 = vpop.f32.mrb[14].mxu0 }
0x1cb6   :  { %24838 = vmatpush3.bf16.msra.mxu1 %v30262_v21  ;;  %v14895_v26 = vpop.f32.mrb[15].mxu0  ;;  %22709 = vmatprep.mubr.f32.mxu1 %v17689_v63  ;;  %v17692_v21 = vld [vmem:[%s31993_s21 + $0x878] sm:$0xff] }
0x1cb7   :  { %24840 = vmatprep.subr.bf16.mxu1 %v30270_v49  ;;  %v30474_v27 = vpack.c.bf16 %v23295_v25, %v14895_v26  ;;  %v17693_v25 = vld [vmem:[%s31993_s21 + $0x880] sm:$0xff]  ;;  %v17695_v26 = vld [vmem:[%s31993_s21 + $0x890] sm:$0xff] }
0x1cb9   :  { %22710 = vmatmul.mubr.f32.gmra.mrb[154].mxu1 %v17690_v20  ;;  %v23298_v6 = vpop.f32.mrb[16].mxu0  ;;  %v17696_v20 = vld [vmem:[%s31993_s21 + $0x898] sm:$0xff] }
0x1cba   :  { %24842 = vmatpush3.bf16.msra.mxu1 %v30270_v49  ;;  %v14905_v18 = vpop.f32.mrb[17].mxu0  ;;  %22712 = vmatprep.mubr.f32.mxu1 %v17691_v28  ;;  %v17694_v49 = vld [vmem:[%s31993_s21 + $0x888] sm:$0xff] }
0x1cbb   :  { %24844 = vmatprep.subr.bf16.mxu1 %v30278_v35  ;;  %v30484_v63 = vpack.c.bf16 %v23298_v6, %v14905_v18  ;;  %v17698_v28 = vld [vmem:[%s31993_s21 + $0x8a8] sm:$0xff]  ;;  %v17699_v6 = vld [vmem:[%s31993_s21 + $0x8b0] sm:$0xff]  ;;  %v17700_v18 = vld [vmem:[%s31993_s21 + $0x8b8] sm:$0xff] }
0x1cbd   :  { %22713 = vmatmul.mubr.f32.gmra.mrb[156].mxu1 %v17692_v21  ;;  %v17701_v21 = vld [vmem:[%s31993_s21 + $0x8c0] sm:$0xff] }
0x1cbe   :  { %24846 = vmatpush3.bf16.msra.mxu1 %v30278_v35  ;;  %22715 = vmatprep.mubr.f32.mxu1 %v17693_v25  ;;  %v17697_v35 = vld [vmem:[%s31993_s21 + $0x8a0] sm:$0xff]  ;;  %v17702_v25 = vld [vmem:[%s31993_s21 + $0x8c8] sm:$0xff] }
0x1cbf   :  { %24856 = vmatprep.subr.bf16.mxu1 %v30286_v1 }
0x1cc1   :  { %22716 = vmatmul.mubr.f32.gmra.mrb[158].mxu1 %v17694_v49  ;;  %v17703_v49 = vld [vmem:[%s31993_s21 + $0x8d0] sm:$0xff] }
0x1cc2   :  { %22718 = vmatprep.mubr.f32.mxu1 %v17695_v26  ;;  %v17704_v26 = vld [vmem:[%s31993_s21 + $0x8d8] sm:$0xff] }
0x1cc5   :  { %22719 = vmatmul.mubr.f32.gmra.mrb[160].mxu1 %v17696_v20  ;;  %v17705_v20 = vld [vmem:[%s31993_s21 + $0x8e0] sm:$0xff] }
0x1cc6   :  { %22721 = vmatprep.mubr.f32.mxu1 %v17697_v35  ;;  %v17706_v35 = vld [vmem:[%s31993_s21 + $0x8e8] sm:$0xff] }
0x1cc9   :  { %22722 = vmatmul.mubr.f32.gmra.mrb[162].mxu1 %v17698_v28  ;;  %v17707_v28 = vld [vmem:[%s31993_s21 + $0x8f0] sm:$0xff] }
0x1cca   :  { %22724 = vmatprep.mubr.f32.mxu1 %v17699_v6  ;;  %v17708_v6 = vld [vmem:[%s31993_s21 + $0x8f8] sm:$0xff] }
0x1ccd   :  { %22725 = vmatmul.mubr.f32.gmra.mrb[164].mxu1 %v17700_v18  ;;  %v17709_v18 = vld [vmem:[%s31993_s21 + $0x900] sm:$0xff] }
0x1cce   :  { %22727 = vmatprep.mubr.f32.mxu1 %v17701_v21  ;;  %v17710_v21 = vld [vmem:[%s31993_s21 + $0x908] sm:$0xff] }
0x1cd1   :  { %22728 = vmatmul.mubr.f32.gmra.mrb[166].mxu1 %v17702_v25  ;;  %v17711_v25 = vld [vmem:[%s31993_s21 + $0x910] sm:$0xff] }
0x1cd2   :  { %22730 = vmatprep.mubr.f32.mxu1 %v17703_v49  ;;  %v17712_v49 = vld [vmem:[%s31993_s21 + $0x918] sm:$0xff] }
0x1cd5   :  { %22731 = vmatmul.mubr.f32.gmra.mrb[168].mxu1 %v17704_v26  ;;  %v17713_v26 = vld [vmem:[%s31993_s21 + $0x920] sm:$0xff] }
0x1cd6   :  { %22733 = vmatprep.mubr.f32.mxu1 %v17705_v20  ;;  %v17714_v20 = vld [vmem:[%s31993_s21 + $0x928] sm:$0xff] }
0x1cd9   :  { %22734 = vmatmul.mubr.f32.gmra.mrb[170].mxu1 %v17706_v35  ;;  %v17715_v35 = vld [vmem:[%s31993_s21 + $0x930] sm:$0xff] }
0x1cda   :  { %22736 = vmatprep.mubr.f32.mxu1 %v17707_v28  ;;  %v17716_v28 = vld [vmem:[%s31993_s21 + $0x938] sm:$0xff] }
0x1cdd   :  { %22737 = vmatmul.mubr.f32.gmra.mrb[172].mxu1 %v17708_v6  ;;  %v17717_v6 = vld [vmem:[%s31993_s21 + $0x940] sm:$0xff] }
0x1cde   :  { %22739 = vmatprep.mubr.f32.mxu1 %v17709_v18  ;;  %v17718_v18 = vld [vmem:[%s31993_s21 + $0x948] sm:$0xff] }
0x1ce1   :  { %22740 = vmatmul.mubr.f32.gmra.mrb[174].mxu1 %v17710_v21  ;;  %v17719_v21 = vld [vmem:[%s31993_s21 + $0x950] sm:$0xff] }
0x1ce2   :  { %22742 = vmatprep.mubr.f32.mxu1 %v17711_v25  ;;  %v17720_v25 = vld [vmem:[%s31993_s21 + $0x958] sm:$0xff] }
0x1ce5   :  { %22743 = vmatmul.mubr.f32.gmra.mrb[176].mxu1 %v17712_v49  ;;  %v17721_v49 = vld [vmem:[%s31993_s21 + $0x960] sm:$0xff] }
0x1ce6   :  { %22745 = vmatprep.mubr.f32.mxu1 %v17713_v26  ;;  %v17722_v26 = vld [vmem:[%s31993_s21 + $0x968] sm:$0xff] }
0x1ce9   :  { %22746 = vmatmul.mubr.f32.gmra.mrb[178].mxu1 %v17714_v20  ;;  %v17723_v20 = vld [vmem:[%s31993_s21 + $0x970] sm:$0xff] }
0x1cea   :  { %22748 = vmatprep.mubr.f32.mxu1 %v17715_v35  ;;  %v17724_v35 = vld [vmem:[%s31993_s21 + $0x978] sm:$0xff] }
0x1ced   :  { %22749 = vmatmul.mubr.f32.gmra.mrb[180].mxu1 %v17716_v28  ;;  %v17725_v28 = vld [vmem:[%s31993_s21 + $0x980] sm:$0xff] }
0x1cee   :  { %22751 = vmatprep.mubr.f32.mxu1 %v17717_v6  ;;  %v17726_v6 = vld [vmem:[%s31993_s21 + $0x988] sm:$0xff] }
0x1cf1   :  { %22752 = vmatmul.mubr.f32.gmra.mrb[182].mxu1 %v17718_v18  ;;  %v17727_v18 = vld [vmem:[%s31993_s21 + $0x990] sm:$0xff] }
0x1cf2   :  { %22754 = vmatprep.mubr.f32.mxu1 %v17719_v21  ;;  %v17728_v21 = vld [vmem:[%s31993_s21 + $0x998] sm:$0xff] }
0x1cf5   :  { %22755 = vmatmul.mubr.f32.gmra.mrb[184].mxu1 %v17720_v25  ;;  %v17729_v25 = vld [vmem:[%s31993_s21 + $0x9a0] sm:$0xff] }
0x1cf6   :  { %22757 = vmatprep.mubr.f32.mxu1 %v17721_v49  ;;  %v17730_v49 = vld [vmem:[%s31993_s21 + $0x9a8] sm:$0xff] }
0x1cf9   :  { %22758 = vmatmul.mubr.f32.gmra.mrb[186].mxu1 %v17722_v26  ;;  %v17731_v26 = vld [vmem:[%s31993_s21 + $0x9b0] sm:$0xff] }
0x1cfa   :  { %22760 = vmatprep.mubr.f32.mxu1 %v17723_v20  ;;  %v17732_v20 = vld [vmem:[%s31993_s21 + $0x9b8] sm:$0xff] }
0x1cfd   :  { %22761 = vmatmul.mubr.f32.gmra.mrb[188].mxu1 %v17724_v35  ;;  %v17733_v35 = vld [vmem:[%s31993_s21 + $0x9c0] sm:$0xff] }
0x1cfe   :  { %22763 = vmatprep.mubr.f32.mxu1 %v17725_v28  ;;  %v17734_v28 = vld [vmem:[%s31993_s21 + $0x9c8] sm:$0xff] }
0x1d01   :  { %22764 = vmatmul.mubr.f32.gmra.mrb[126].mxu1 %v17726_v6  ;;  %v17735_v6 = vld [vmem:[%s31993_s21 + $0x9d0] sm:$0xff] }
0x1d02   :  { %22766 = vmatprep.mubr.f32.mxu1 %v17727_v18  ;;  %v17736_v18 = vld [vmem:[%s31993_s21 + $0x9d8] sm:$0xff] }
0x1d05   :  { %22767 = vmatmul.mubr.f32.gmra.mrb[128].mxu1 %v17728_v21  ;;  %v17737_v21 = vld [vmem:[%s31993_s21 + $0x9e0] sm:$0xff] }
0x1d06   :  { %22769 = vmatprep.mubr.f32.mxu1 %v17729_v25  ;;  %v17738_v25 = vld [vmem:[%s31993_s21 + $0x9e8] sm:$0xff] }
0x1d09   :  { %22770 = vmatmul.mubr.f32.gmra.mrb[130].mxu1 %v17730_v49  ;;  %v17739_v49 = vld [vmem:[%s31993_s21 + $0x9f0] sm:$0xff] }
0x1d0a   :  { %22772 = vmatprep.mubr.f32.mxu1 %v17731_v26  ;;  %v17740_v26 = vld [vmem:[%s31993_s21 + $0x9f8] sm:$0xff] }
0x1d0d   :  { %22773 = vmatmul.mubr.f32.gmra.mrb[132].mxu1 %v17732_v20  ;;  %v17761_v20 = vld [vmem:[%s31993_s21 + $0xa00] sm:$0xff] }
0x1d0e   :  { %22775 = vmatprep.mubr.f32.mxu1 %v17733_v35  ;;  %v17762_v35 = vld [vmem:[%s31993_s21 + $0xa08] sm:$0xff] }
0x1d11   :  { %22776 = vmatmul.mubr.f32.gmra.mrb[134].mxu1 %v17734_v28  ;;  %v17763_v28 = vld [vmem:[%s31993_s21 + $0xa10] sm:$0xff] }
0x1d12   :  { %22778 = vmatprep.mubr.f32.mxu1 %v17735_v6  ;;  %v17764_v6 = vld [vmem:[%s31993_s21 + $0xa18] sm:$0xff] }
0x1d15   :  { %22779 = vmatmul.mubr.f32.gmra.mrb[136].mxu1 %v17736_v18  ;;  %v17765_v18 = vld [vmem:[%s31993_s21 + $0xa20] sm:$0xff] }
0x1d16   :  { %22781 = vmatprep.mubr.f32.mxu1 %v17737_v21  ;;  %v17766_v21 = vld [vmem:[%s31993_s21 + $0xa28] sm:$0xff] }
0x1d19   :  { %22782 = vmatmul.mubr.f32.gmra.mrb[138].mxu1 %v17738_v25  ;;  %v17768_v25 = vld [vmem:[%s31993_s21 + $0xa38] sm:$0xff] }
0x1d1a   :  { %22784 = vmatprep.mubr.f32.mxu1 %v17739_v49  ;;  %v17770_v49 = vld [vmem:[%s31993_s21 + $0xa48] sm:$0xff] }
0x1d1d   :  { %22785 = vmatmul.mubr.f32.gmra.mrb[140].mxu1 %v17740_v26  ;;  %v17772_v26 = vld [vmem:[%s31993_s21 + $0xa58] sm:$0xff] }
0x1d1e   :  { %22851 = vmatprep.mubr.f32.mxu1 %v17761_v20  ;;  %v17774_v20 = vld [vmem:[%s31993_s21 + $0xa68] sm:$0xff] }
0x1d21   :  { %22852 = vmatmul.mubr.f32.vlgmr.msra.gmra.mrb[142].mxu1 %v17762_v35  ;;  %v17776_v35 = vld [vmem:[%s31993_s21 + $0xa78] sm:$0xff] }
0x1d22   :  { %24858 = vmatpush3.bf16.msra.mxu1 %v30286_v1  ;;  %22854 = vmatprep.mubr.f32.mxu1 %v17763_v28  ;;  %v17767_v1 = vld [vmem:[%s31993_s21 + $0xa30] sm:$0xff]  ;;  %v17778_v28 = vld [vmem:[%s31993_s21 + $0xa88] sm:$0xff] }
0x1d23   :  { %24860 = vmatprep.subr.bf16.mxu1 %v30294_v29 }
0x1d25   :  { %22855 = vmatmul.mubr.f32.gmra.mrb[144].mxu1 %v17764_v6  ;;  %v17780_v6 = vld [vmem:[%s31993_s21 + $0xa98] sm:$0xff] }
0x1d26   :  { %24862 = vmatpush3.bf16.msra.mxu1 %v30294_v29  ;;  %22857 = vmatprep.mubr.f32.mxu1 %v17765_v18  ;;  %v17769_v29 = vld [vmem:[%s31993_s21 + $0xa40] sm:$0xff]  ;;  %v17782_v18 = vld [vmem:[%s31993_s21 + $0xaa8] sm:$0xff] }
0x1d27   :  { %24864 = vmatprep.subr.bf16.mxu1 %v30302_v15 }
0x1d29   :  { %22858 = vmatmul.mubr.f32.gmra.mrb[146].mxu1 %v17766_v21  ;;  %v17783_v21 = vld [vmem:[%s31993_s21 + $0xab0] sm:$0xff] }
0x1d2a   :  { %24866 = vmatpush3.bf16.msra.mxu1 %v30302_v15  ;;  %22860 = vmatprep.mubr.f32.mxu1 %v17767_v1  ;;  %v17771_v15 = vld [vmem:[%s31993_s21 + $0xa50] sm:$0xff]  ;;  %v17784_v1 = vld [vmem:[%s31993_s21 + $0xab8] sm:$0xff] }
0x1d2b   :  { %24868 = vmatprep.subr.bf16.mxu1 %v30310_v22 }
0x1d2d   :  { %22861 = vmatmul.mubr.f32.gmra.mrb[148].mxu1 %v17768_v25  ;;  %v17785_v25 = vld [vmem:[%s31993_s21 + $0xac0] sm:$0xff] }
0x1d2e   :  { %24870 = vmatpush3.bf16.msra.mxu1 %v30310_v22  ;;  %22863 = vmatprep.mubr.f32.mxu1 %v17769_v29  ;;  %v17773_v22 = vld [vmem:[%s31993_s21 + $0xa60] sm:$0xff]  ;;  %v17786_v29 = vld [vmem:[%s31993_s21 + $0xac8] sm:$0xff] }
0x1d2f   :  { %24872 = vmatprep.subr.bf16.mxu1 %v30318_v17 }
0x1d31   :  { %22864 = vmatmul.mubr.f32.gmra.mrb[150].mxu1 %v17770_v49  ;;  %v17787_v49 = vld [vmem:[%s31993_s21 + $0xad0] sm:$0xff] }
0x1d32   :  { %24874 = vmatpush3.bf16.msra.mxu1 %v30318_v17  ;;  %22866 = vmatprep.mubr.f32.mxu1 %v17771_v15  ;;  %v17775_v17 = vld [vmem:[%s31993_s21 + $0xa70] sm:$0xff]  ;;  %v17788_v15 = vld [vmem:[%s31993_s21 + $0xad8] sm:$0xff] }
0x1d33   :  { %24876 = vmatprep.subr.bf16.mxu1 %v30326_v23 }
0x1d35   :  { %22867 = vmatmul.mubr.f32.gmra.mrb[152].mxu1 %v17772_v26  ;;  %v17789_v26 = vld [vmem:[%s31993_s21 + $0xae0] sm:$0xff] }
0x1d36   :  { %24878 = vmatpush3.bf16.msra.mxu1 %v30326_v23  ;;  %22869 = vmatprep.mubr.f32.mxu1 %v17773_v22  ;;  %v17777_v23 = vld [vmem:[%s31993_s21 + $0xa80] sm:$0xff]  ;;  %v17790_v22 = vld [vmem:[%s31993_s21 + $0xae8] sm:$0xff] }
0x1d37   :  { %24880 = vmatprep.subr.bf16.mxu1 %v30334_v8 }
0x1d39   :  { %22870 = vmatmul.mubr.f32.gmra.mrb[154].mxu1 %v17774_v20  ;;  %v17791_v20 = vld [vmem:[%s31993_s21 + $0xaf0] sm:$0xff] }
0x1d3a   :  { %24882 = vmatpush3.bf16.msra.mxu1 %v30334_v8  ;;  %22872 = vmatprep.mubr.f32.mxu1 %v17775_v17  ;;  %v17779_v8 = vld [vmem:[%s31993_s21 + $0xa90] sm:$0xff]  ;;  %v17792_v17 = vld [vmem:[%s31993_s21 + $0xaf8] sm:$0xff] }
0x1d3b   :  { %24884 = vmatprep.subr.bf16.mxu1 %v30342_v48 }
0x1d3d   :  { %22873 = vmatmul.mubr.f32.gmra.mrb[156].mxu1 %v17776_v35  ;;  %v17793_v35 = vld [vmem:[%s31993_s21 + $0xb00] sm:$0xff] }
0x1d3e   :  { %24886 = vmatpush3.bf16.msra.mxu1 %v30342_v48  ;;  %22875 = vmatprep.mubr.f32.mxu1 %v17777_v23  ;;  %v17781_v48 = vld [vmem:[%s31993_s21 + $0xaa0] sm:$0xff]  ;;  %v17794_v23 = vld [vmem:[%s31993_s21 + $0xb08] sm:$0xff] }
0x1d3f   :  { %24896 = vmatprep.subr.bf16.mxu1 %v30350_v16 }
0x1d41   :  { %22876 = vmatmul.mubr.f32.gmra.mrb[158].mxu1 %v17778_v28  ;;  %v17795_v28 = vld [vmem:[%s31993_s21 + $0xb10] sm:$0xff] }
0x1d42   :  { %22878 = vmatprep.mubr.f32.mxu1 %v17779_v8  ;;  %v17796_v8 = vld [vmem:[%s31993_s21 + $0xb18] sm:$0xff] }
0x1d45   :  { %22879 = vmatmul.mubr.f32.gmra.mrb[160].mxu1 %v17780_v6  ;;  %v17797_v6 = vld [vmem:[%s31993_s21 + $0xb20] sm:$0xff] }
0x1d46   :  { %22881 = vmatprep.mubr.f32.mxu1 %v17781_v48  ;;  %v17798_v48 = vld [vmem:[%s31993_s21 + $0xb28] sm:$0xff] }
0x1d49   :  { %22882 = vmatmul.mubr.f32.gmra.mrb[162].mxu1 %v17782_v18  ;;  %v17799_v18 = vld [vmem:[%s31993_s21 + $0xb30] sm:$0xff] }
0x1d4a   :  { %22884 = vmatprep.mubr.f32.mxu1 %v17783_v21  ;;  %v17800_v21 = vld [vmem:[%s31993_s21 + $0xb38] sm:$0xff] }
0x1d4d   :  { %22885 = vmatmul.mubr.f32.gmra.mrb[164].mxu1 %v17784_v1  ;;  %v17801_v1 = vld [vmem:[%s31993_s21 + $0xb40] sm:$0xff] }
0x1d4e   :  { %22887 = vmatprep.mubr.f32.mxu1 %v17785_v25  ;;  %v17802_v25 = vld [vmem:[%s31993_s21 + $0xb48] sm:$0xff] }
0x1d51   :  { %22888 = vmatmul.mubr.f32.gmra.mrb[166].mxu1 %v17786_v29  ;;  %v17803_v29 = vld [vmem:[%s31993_s21 + $0xb50] sm:$0xff] }
0x1d52   :  { %22890 = vmatprep.mubr.f32.mxu1 %v17787_v49  ;;  %v17804_v49 = vld [vmem:[%s31993_s21 + $0xb58] sm:$0xff] }
0x1d55   :  { %22891 = vmatmul.mubr.f32.gmra.mrb[168].mxu1 %v17788_v15  ;;  %v17805_v15 = vld [vmem:[%s31993_s21 + $0xb60] sm:$0xff] }
0x1d56   :  { %22893 = vmatprep.mubr.f32.mxu1 %v17789_v26  ;;  %v17806_v26 = vld [vmem:[%s31993_s21 + $0xb68] sm:$0xff] }
0x1d59   :  { %22894 = vmatmul.mubr.f32.gmra.mrb[170].mxu1 %v17790_v22  ;;  %v17807_v22 = vld [vmem:[%s31993_s21 + $0xb70] sm:$0xff] }
0x1d5a   :  { %22896 = vmatprep.mubr.f32.mxu1 %v17791_v20  ;;  %v17808_v20 = vld [vmem:[%s31993_s21 + $0xb78] sm:$0xff] }
0x1d5d   :  { %22897 = vmatmul.mubr.f32.gmra.mrb[172].mxu1 %v17792_v17  ;;  %v17809_v17 = vld [vmem:[%s31993_s21 + $0xb80] sm:$0xff] }
0x1d5e   :  { %22899 = vmatprep.mubr.f32.mxu1 %v17793_v35  ;;  %v17810_v35 = vld [vmem:[%s31993_s21 + $0xb88] sm:$0xff] }
0x1d61   :  { %22900 = vmatmul.mubr.f32.gmra.mrb[174].mxu1 %v17794_v23  ;;  %v17811_v23 = vld [vmem:[%s31993_s21 + $0xb90] sm:$0xff] }
0x1d62   :  { %22902 = vmatprep.mubr.f32.mxu1 %v17795_v28  ;;  %v17812_v28 = vld [vmem:[%s31993_s21 + $0xb98] sm:$0xff] }
0x1d65   :  { %22903 = vmatmul.mubr.f32.gmra.mrb[176].mxu1 %v17796_v8  ;;  %v17813_v8 = vld [vmem:[%s31993_s21 + $0xba0] sm:$0xff] }
0x1d66   :  { %22905 = vmatprep.mubr.f32.mxu1 %v17797_v6  ;;  %v17814_v6 = vld [vmem:[%s31993_s21 + $0xba8] sm:$0xff] }
0x1d69   :  { %22906 = vmatmul.mubr.f32.gmra.mrb[178].mxu1 %v17798_v48  ;;  %v17815_v48 = vld [vmem:[%s31993_s21 + $0xbb0] sm:$0xff] }
0x1d6a   :  { %22908 = vmatprep.mubr.f32.mxu1 %v17799_v18  ;;  %v17816_v18 = vld [vmem:[%s31993_s21 + $0xbb8] sm:$0xff] }
0x1d6d   :  { %22909 = vmatmul.mubr.f32.gmra.mrb[180].mxu1 %v17800_v21  ;;  %v17817_v21 = vld [vmem:[%s31993_s21 + $0xbc0] sm:$0xff] }
0x1d6e   :  { %22911 = vmatprep.mubr.f32.mxu1 %v17801_v1  ;;  %v17818_v1 = vld [vmem:[%s31993_s21 + $0xbc8] sm:$0xff] }
0x1d71   :  { %22912 = vmatmul.mubr.f32.gmra.mrb[182].mxu1 %v17802_v25  ;;  %v17819_v25 = vld [vmem:[%s31993_s21 + $0xbd0] sm:$0xff] }
0x1d72   :  { %22914 = vmatprep.mubr.f32.mxu1 %v17803_v29  ;;  %v17820_v29 = vld [vmem:[%s31993_s21 + $0xbd8] sm:$0xff] }
0x1d75   :  { %22915 = vmatmul.mubr.f32.gmra.mrb[184].mxu1 %v17804_v49  ;;  %v17821_v49 = vld [vmem:[%s31993_s21 + $0xbe0] sm:$0xff] }
0x1d76   :  { %22917 = vmatprep.mubr.f32.mxu1 %v17805_v15  ;;  %v17822_v15 = vld [vmem:[%s31993_s21 + $0xbe8] sm:$0xff] }
0x1d79   :  { %22918 = vmatmul.mubr.f32.gmra.mrb[186].mxu1 %v17806_v26  ;;  %v17823_v26 = vld [vmem:[%s31993_s21 + $0xbf0] sm:$0xff] }
0x1d7a   :  { %22920 = vmatprep.mubr.f32.mxu1 %v17807_v22  ;;  %v17824_v22 = vld [vmem:[%s31993_s21 + $0xbf8] sm:$0xff] }
0x1d7d   :  { %22921 = vmatmul.mubr.f32.gmra.mrb[188].mxu1 %v17808_v20  ;;  %v17845_v20 = vld [vmem:[%s31993_s21 + $0xc00] sm:$0xff] }
0x1d7e   :  { %22923 = vmatprep.mubr.f32.mxu1 %v17809_v17  ;;  %v17846_v17 = vld [vmem:[%s31993_s21 + $0xc08] sm:$0xff] }
0x1d81   :  { %22924 = vmatmul.mubr.f32.gmra.mrb[126].mxu1 %v17810_v35  ;;  %v17847_v35 = vld [vmem:[%s31993_s21 + $0xc10] sm:$0xff] }
0x1d82   :  { %22926 = vmatprep.mubr.f32.mxu1 %v17811_v23  ;;  %v17848_v23 = vld [vmem:[%s31993_s21 + $0xc18] sm:$0xff] }
0x1d85   :  { %22927 = vmatmul.mubr.f32.gmra.mrb[128].mxu1 %v17812_v28  ;;  %v17849_v28 = vld [vmem:[%s31993_s21 + $0xc20] sm:$0xff] }
0x1d86   :  { %22929 = vmatprep.mubr.f32.mxu1 %v17813_v8  ;;  %v17850_v8 = vld [vmem:[%s31993_s21 + $0xc28] sm:$0xff] }
0x1d89   :  { %22930 = vmatmul.mubr.f32.gmra.mrb[130].mxu1 %v17814_v6  ;;  %v17852_v6 = vld [vmem:[%s31993_s21 + $0xc38] sm:$0xff] }
0x1d8a   :  { %22932 = vmatprep.mubr.f32.mxu1 %v17815_v48  ;;  %v17854_v48 = vld [vmem:[%s31993_s21 + $0xc48] sm:$0xff] }
0x1d8d   :  { %22933 = vmatmul.mubr.f32.gmra.mrb[132].mxu1 %v17816_v18  ;;  %v17856_v18 = vld [vmem:[%s31993_s21 + $0xc58] sm:$0xff] }
0x1d8e   :  { %22935 = vmatprep.mubr.f32.mxu1 %v17817_v21  ;;  %v17858_v21 = vld [vmem:[%s31993_s21 + $0xc68] sm:$0xff] }
0x1d91   :  { %22936 = vmatmul.mubr.f32.gmra.mrb[134].mxu1 %v17818_v1  ;;  %v17860_v1 = vld [vmem:[%s31993_s21 + $0xc78] sm:$0xff] }
0x1d92   :  { %22938 = vmatprep.mubr.f32.mxu1 %v17819_v25  ;;  %v17862_v25 = vld [vmem:[%s31993_s21 + $0xc88] sm:$0xff] }
0x1d95   :  { %22939 = vmatmul.mubr.f32.gmra.mrb[136].mxu1 %v17820_v29  ;;  %v17864_v29 = vld [vmem:[%s31993_s21 + $0xc98] sm:$0xff] }
0x1d96   :  { %22941 = vmatprep.mubr.f32.mxu1 %v17821_v49  ;;  %v17866_v49 = vld [vmem:[%s31993_s21 + $0xca8] sm:$0xff] }
0x1d99   :  { %22942 = vmatmul.mubr.f32.gmra.mrb[138].mxu1 %v17822_v15  ;;  %v17867_v15 = vld [vmem:[%s31993_s21 + $0xcb0] sm:$0xff] }
0x1d9a   :  { %22944 = vmatprep.mubr.f32.mxu1 %v17823_v26  ;;  %v17868_v26 = vld [vmem:[%s31993_s21 + $0xcb8] sm:$0xff] }
0x1d9d   :  { %22945 = vmatmul.mubr.f32.gmra.mrb[140].mxu1 %v17824_v22  ;;  %v17869_v22 = vld [vmem:[%s31993_s21 + $0xcc0] sm:$0xff] }
0x1d9e   :  { %23011 = vmatprep.mubr.f32.mxu1 %v17845_v20  ;;  %v17870_v20 = vld [vmem:[%s31993_s21 + $0xcc8] sm:$0xff] }
0x1da1   :  { %23012 = vmatmul.mubr.f32.vlgmr.msra.gmra.mrb[142].mxu1 %v17846_v17  ;;  %v17871_v17 = vld [vmem:[%s31993_s21 + $0xcd0] sm:$0xff] }
0x1da2   :  { %24898 = vmatpush3.bf16.msra.mxu1 %v30350_v16  ;;  %23014 = vmatprep.mubr.f32.mxu1 %v17847_v35  ;;  %v17851_v16 = vld [vmem:[%s31993_s21 + $0xc30] sm:$0xff]  ;;  %v17872_v35 = vld [vmem:[%s31993_s21 + $0xcd8] sm:$0xff] }
0x1da3   :  { %24900 = vmatprep.subr.bf16.mxu1 %v30358_v56 }
0x1da5   :  { %23015 = vmatmul.mubr.f32.gmra.mrb[144].mxu1 %v17848_v23  ;;  %v17873_v23 = vld [vmem:[%s31993_s21 + $0xce0] sm:$0xff] }
0x1da6   :  { %24902 = vmatpush3.bf16.msra.mxu1 %v30358_v56  ;;  %23017 = vmatprep.mubr.f32.mxu1 %v17849_v28  ;;  %v17853_v56 = vld [vmem:[%s31993_s21 + $0xc40] sm:$0xff]  ;;  %v17874_v28 = vld [vmem:[%s31993_s21 + $0xce8] sm:$0xff] }
0x1da7   :  { %24904 = vmatprep.subr.bf16.mxu1 %v30366_v42 }
0x1da9   :  { %23018 = vmatmul.mubr.f32.gmra.mrb[146].mxu1 %v17850_v8  ;;  %v17875_v8 = vld [vmem:[%s31993_s21 + $0xcf0] sm:$0xff] }
0x1daa   :  { %24906 = vmatpush3.bf16.msra.mxu1 %v30366_v42  ;;  %23020 = vmatprep.mubr.f32.mxu1 %v17851_v16  ;;  %v17855_v42 = vld [vmem:[%s31993_s21 + $0xc50] sm:$0xff]  ;;  %v17876_v16 = vld [vmem:[%s31993_s21 + $0xcf8] sm:$0xff] }
0x1dab   :  { %24908 = vmatprep.subr.bf16.mxu1 %v30374_v7 }
0x1dad   :  { %23021 = vmatmul.mubr.f32.gmra.mrb[148].mxu1 %v17852_v6  ;;  %v17877_v6 = vld [vmem:[%s31993_s21 + $0xd00] sm:$0xff] }
0x1dae   :  { %24910 = vmatpush3.bf16.msra.mxu1 %v30374_v7  ;;  %23023 = vmatprep.mubr.f32.mxu1 %v17853_v56  ;;  %v17857_v7 = vld [vmem:[%s31993_s21 + $0xc60] sm:$0xff]  ;;  %v17878_v56 = vld [vmem:[%s31993_s21 + $0xd08] sm:$0xff] }
0x1daf   :  { %24912 = vmatprep.subr.bf16.mxu1 %v30382_v12 }
0x1db1   :  { %23024 = vmatmul.mubr.f32.gmra.mrb[150].mxu1 %v17854_v48  ;;  %v17879_v48 = vld [vmem:[%s31993_s21 + $0xd10] sm:$0xff] }
0x1db2   :  { %24914 = vmatpush3.bf16.msra.mxu1 %v30382_v12  ;;  %23026 = vmatprep.mubr.f32.mxu1 %v17855_v42  ;;  %v17859_v12 = vld [vmem:[%s31993_s21 + $0xc70] sm:$0xff]  ;;  %v17880_v42 = vld [vmem:[%s31993_s21 + $0xd18] sm:$0xff] }
0x1db3   :  { %24916 = vmatprep.subr.bf16.mxu1 %v30390_v5 }
0x1db5   :  { %23027 = vmatmul.mubr.f32.gmra.mrb[152].mxu1 %v17856_v18  ;;  %v17881_v18 = vld [vmem:[%s31993_s21 + $0xd20] sm:$0xff] }
0x1db6   :  { %24918 = vmatpush3.bf16.msra.mxu1 %v30390_v5  ;;  %23029 = vmatprep.mubr.f32.mxu1 %v17857_v7  ;;  %v17861_v5 = vld [vmem:[%s31993_s21 + $0xc80] sm:$0xff]  ;;  %v17882_v7 = vld [vmem:[%s31993_s21 + $0xd28] sm:$0xff] }
0x1db7   :  { %24920 = vmatprep.subr.bf16.mxu1 %v30398_v3 }
0x1db9   :  { %23030 = vmatmul.mubr.f32.gmra.mrb[154].mxu1 %v17858_v21  ;;  %v17883_v21 = vld [vmem:[%s31993_s21 + $0xd30] sm:$0xff] }
0x1dba   :  { %24922 = vmatpush3.bf16.msra.mxu1 %v30398_v3  ;;  %23032 = vmatprep.mubr.f32.mxu1 %v17859_v12  ;;  %v17863_v3 = vld [vmem:[%s31993_s21 + $0xc90] sm:$0xff]  ;;  %v17884_v12 = vld [vmem:[%s31993_s21 + $0xd38] sm:$0xff] }
0x1dbb   :  { %24924 = vmatprep.subr.bf16.mxu1 %v30406_v61 }
0x1dbd   :  { %23033 = vmatmul.mubr.f32.gmra.mrb[156].mxu1 %v17860_v1  ;;  %v17885_v1 = vld [vmem:[%s31993_s21 + $0xd40] sm:$0xff] }
0x1dbe   :  { %24926 = vmatpush3.bf16.msra.mxu1 %v30406_v61  ;;  %23035 = vmatprep.mubr.f32.mxu1 %v17861_v5  ;;  %v17865_v61 = vld [vmem:[%s31993_s21 + $0xca0] sm:$0xff]  ;;  %v17886_v5 = vld [vmem:[%s31993_s21 + $0xd48] sm:$0xff] }
0x1dbf   :  { %24936 = vmatprep.subr.bf16.mxu1 %v30414_v59 }
0x1dc1   :  { %23036 = vmatmul.mubr.f32.gmra.mrb[158].mxu1 %v17862_v25  ;;  %v17887_v25 = vld [vmem:[%s31993_s21 + $0xd50] sm:$0xff] }
0x1dc2   :  { %23038 = vmatprep.mubr.f32.mxu1 %v17863_v3  ;;  %v17888_v3 = vld [vmem:[%s31993_s21 + $0xd58] sm:$0xff] }
0x1dc5   :  { %23039 = vmatmul.mubr.f32.gmra.mrb[160].mxu1 %v17864_v29  ;;  %v17889_v29 = vld [vmem:[%s31993_s21 + $0xd60] sm:$0xff] }
0x1dc6   :  { %23041 = vmatprep.mubr.f32.mxu1 %v17865_v61  ;;  %v17890_v61 = vld [vmem:[%s31993_s21 + $0xd68] sm:$0xff] }
0x1dc9   :  { %23042 = vmatmul.mubr.f32.gmra.mrb[162].mxu1 %v17866_v49  ;;  %v17891_v49 = vld [vmem:[%s31993_s21 + $0xd70] sm:$0xff] }
0x1dca   :  { %23044 = vmatprep.mubr.f32.mxu1 %v17867_v15  ;;  %v17892_v15 = vld [vmem:[%s31993_s21 + $0xd78] sm:$0xff] }
0x1dcd   :  { %23045 = vmatmul.mubr.f32.gmra.mrb[164].mxu1 %v17868_v26  ;;  %v17893_v26 = vld [vmem:[%s31993_s21 + $0xd80] sm:$0xff] }
0x1dce   :  { %23047 = vmatprep.mubr.f32.mxu1 %v17869_v22  ;;  %v17894_v22 = vld [vmem:[%s31993_s21 + $0xd88] sm:$0xff] }
0x1dd1   :  { %23048 = vmatmul.mubr.f32.gmra.mrb[166].mxu1 %v17870_v20  ;;  %v17895_v20 = vld [vmem:[%s31993_s21 + $0xd90] sm:$0xff] }
0x1dd2   :  { %23050 = vmatprep.mubr.f32.mxu1 %v17871_v17  ;;  %v17896_v17 = vld [vmem:[%s31993_s21 + $0xd98] sm:$0xff] }
0x1dd5   :  { %23051 = vmatmul.mubr.f32.gmra.mrb[168].mxu1 %v17872_v35  ;;  %v17897_v35 = vld [vmem:[%s31993_s21 + $0xda0] sm:$0xff] }
0x1dd6   :  { %23053 = vmatprep.mubr.f32.mxu1 %v17873_v23  ;;  %v17898_v23 = vld [vmem:[%s31993_s21 + $0xda8] sm:$0xff] }
0x1dd9   :  { %23054 = vmatmul.mubr.f32.gmra.mrb[170].mxu1 %v17874_v28  ;;  %v17899_v28 = vld [vmem:[%s31993_s21 + $0xdb0] sm:$0xff] }
0x1dda   :  { %23056 = vmatprep.mubr.f32.mxu1 %v17875_v8  ;;  %v17900_v8 = vld [vmem:[%s31993_s21 + $0xdb8] sm:$0xff] }
0x1ddd   :  { %23057 = vmatmul.mubr.f32.gmra.mrb[172].mxu1 %v17876_v16  ;;  %v17901_v16 = vld [vmem:[%s31993_s21 + $0xdc0] sm:$0xff] }
0x1dde   :  { %23059 = vmatprep.mubr.f32.mxu1 %v17877_v6  ;;  %v17902_v6 = vld [vmem:[%s31993_s21 + $0xdc8] sm:$0xff] }
0x1de1   :  { %23060 = vmatmul.mubr.f32.gmra.mrb[174].mxu1 %v17878_v56  ;;  %v17903_v56 = vld [vmem:[%s31993_s21 + $0xdd0] sm:$0xff] }
0x1de2   :  { %23062 = vmatprep.mubr.f32.mxu1 %v17879_v48  ;;  %v17904_v48 = vld [vmem:[%s31993_s21 + $0xdd8] sm:$0xff] }
0x1de5   :  { %23063 = vmatmul.mubr.f32.gmra.mrb[176].mxu1 %v17880_v42  ;;  %v17905_v42 = vld [vmem:[%s31993_s21 + $0xde0] sm:$0xff] }
0x1de6   :  { %23065 = vmatprep.mubr.f32.mxu1 %v17881_v18  ;;  %v17906_v18 = vld [vmem:[%s31993_s21 + $0xde8] sm:$0xff] }
0x1de9   :  { %23066 = vmatmul.mubr.f32.gmra.mrb[178].mxu1 %v17882_v7  ;;  %v17907_v7 = vld [vmem:[%s31993_s21 + $0xdf0] sm:$0xff] }
0x1dea   :  { %23068 = vmatprep.mubr.f32.mxu1 %v17883_v21  ;;  %v17908_v21 = vld [vmem:[%s31993_s21 + $0xdf8] sm:$0xff] }
0x1ded   :  { %23069 = vmatmul.mubr.f32.gmra.mrb[180].mxu1 %v17884_v12  ;;  %v17929_v12 = vld [vmem:[%s31993_s21 + $0xe00] sm:$0xff] }
0x1dee   :  { %23071 = vmatprep.mubr.f32.mxu1 %v17885_v1  ;;  %v17930_v1 = vld [vmem:[%s31993_s21 + $0xe08] sm:$0xff] }
0x1df1   :  { %23072 = vmatmul.mubr.f32.gmra.mrb[182].mxu1 %v17886_v5  ;;  %v17931_v5 = vld [vmem:[%s31993_s21 + $0xe10] sm:$0xff] }
0x1df2   :  { %23074 = vmatprep.mubr.f32.mxu1 %v17887_v25  ;;  %v17932_v25 = vld [vmem:[%s31993_s21 + $0xe18] sm:$0xff] }
0x1df5   :  { %23075 = vmatmul.mubr.f32.gmra.mrb[184].mxu1 %v17888_v3  ;;  %v17933_v3 = vld [vmem:[%s31993_s21 + $0xe20] sm:$0xff] }
0x1df6   :  { %23077 = vmatprep.mubr.f32.mxu1 %v17889_v29  ;;  %v17934_v29 = vld [vmem:[%s31993_s21 + $0xe28] sm:$0xff] }
0x1df9   :  { %23078 = vmatmul.mubr.f32.gmra.mrb[186].mxu1 %v17890_v61  ;;  %v17936_v61 = vld [vmem:[%s31993_s21 + $0xe38] sm:$0xff] }
0x1dfa   :  { %23080 = vmatprep.mubr.f32.mxu1 %v17891_v49  ;;  %v17938_v49 = vld [vmem:[%s31993_s21 + $0xe48] sm:$0xff] }
0x1dfd   :  { %23081 = vmatmul.mubr.f32.gmra.mrb[188].mxu1 %v17892_v15  ;;  %v17940_v15 = vld [vmem:[%s31993_s21 + $0xe58] sm:$0xff] }
0x1dfe   :  { %23083 = vmatprep.mubr.f32.mxu1 %v17893_v26  ;;  %v17942_v26 = vld [vmem:[%s31993_s21 + $0xe68] sm:$0xff] }
0x1e01   :  { %23084 = vmatmul.mubr.f32.gmra.mrb[126].mxu1 %v17894_v22  ;;  %v17944_v22 = vld [vmem:[%s31993_s21 + $0xe78] sm:$0xff] }
0x1e02   :  { %23086 = vmatprep.mubr.f32.mxu1 %v17895_v20  ;;  %v17946_v20 = vld [vmem:[%s31993_s21 + $0xe88] sm:$0xff] }
0x1e05   :  { %23087 = vmatmul.mubr.f32.gmra.mrb[128].mxu1 %v17896_v17  ;;  %v17948_v17 = vld [vmem:[%s31993_s21 + $0xe98] sm:$0xff] }
0x1e06   :  { %23089 = vmatprep.mubr.f32.mxu1 %v17897_v35  ;;  %v17949_v35 = vld [vmem:[%s31993_s21 + $0xea0] sm:$0xff] }
0x1e09   :  { %23090 = vmatmul.mubr.f32.gmra.mrb[130].mxu1 %v17898_v23  ;;  %v17951_v23 = vld [vmem:[%s31993_s21 + $0xeb0] sm:$0xff] }
0x1e0a   :  { %23092 = vmatprep.mubr.f32.mxu1 %v17899_v28  ;;  %v17952_v28 = vld [vmem:[%s31993_s21 + $0xeb8] sm:$0xff] }
0x1e0d   :  { %23093 = vmatmul.mubr.f32.gmra.mrb[132].mxu1 %v17900_v8  ;;  %v17953_v8 = vld [vmem:[%s31993_s21 + $0xec0] sm:$0xff] }
0x1e0e   :  { %23095 = vmatprep.mubr.f32.mxu1 %v17901_v16  ;;  %v17954_v16 = vld [vmem:[%s31993_s21 + $0xec8] sm:$0xff] }
0x1e11   :  { %23096 = vmatmul.mubr.f32.gmra.mrb[134].mxu1 %v17902_v6  ;;  %v17955_v6 = vld [vmem:[%s31993_s21 + $0xed0] sm:$0xff] }
0x1e12   :  { %23098 = vmatprep.mubr.f32.mxu1 %v17903_v56  ;;  %v17956_v56 = vld [vmem:[%s31993_s21 + $0xed8] sm:$0xff] }
0x1e15   :  { %23099 = vmatmul.mubr.f32.gmra.mrb[136].mxu1 %v17904_v48  ;;  %v17957_v48 = vld [vmem:[%s31993_s21 + $0xee0] sm:$0xff] }
0x1e16   :  { %23101 = vmatprep.mubr.f32.mxu1 %v17905_v42  ;;  %v17958_v42 = vld [vmem:[%s31993_s21 + $0xee8] sm:$0xff] }
0x1e19   :  { %23102 = vmatmul.mubr.f32.gmra.mrb[138].mxu1 %v17906_v18  ;;  %v17959_v18 = vld [vmem:[%s31993_s21 + $0xef0] sm:$0xff] }
0x1e1a   :  { %23104 = vmatprep.mubr.f32.mxu1 %v17907_v7  ;;  %v17960_v7 = vld [vmem:[%s31993_s21 + $0xef8] sm:$0xff] }
0x1e1d   :  { %23105 = vmatmul.mubr.f32.gmra.mrb[140].mxu1 %v17908_v21  ;;  %v17961_v21 = vld [vmem:[%s31993_s21 + $0xf00] sm:$0xff] }
0x1e1e   :  { %23171 = vmatprep.mubr.f32.mxu1 %v17929_v12  ;;  %v17962_v12 = vld [vmem:[%s31993_s21 + $0xf08] sm:$0xff] }
0x1e21   :  { %23172 = vmatmul.mubr.f32.vlgmr.msra.gmra.mrb[142].mxu1 %v17930_v1  ;;  %v17963_v1 = vld [vmem:[%s31993_s21 + $0xf10] sm:$0xff] }
0x1e22   :  { %24938 = vmatpush3.bf16.msra.mxu1 %v30414_v59  ;;  %23174 = vmatprep.mubr.f32.mxu1 %v17931_v5  ;;  %v17935_v59 = vld [vmem:[%s31993_s21 + $0xe30] sm:$0xff]  ;;  %v17964_v5 = vld [vmem:[%s31993_s21 + $0xf18] sm:$0xff] }
0x1e23   :  { %24940 = vmatprep.subr.bf16.mxu1 %v30424_v24 }
0x1e25   :  { %23175 = vmatmul.mubr.f32.gmra.mrb[144].mxu1 %v17932_v25  ;;  %v17965_v25 = vld [vmem:[%s31993_s21 + $0xf20] sm:$0xff] }
0x1e26   :  { %24942 = vmatpush3.bf16.msra.mxu1 %v30424_v24  ;;  %23177 = vmatprep.mubr.f32.mxu1 %v17933_v3  ;;  %v17937_v24 = vld [vmem:[%s31993_s21 + $0xe40] sm:$0xff]  ;;  %v17966_v3 = vld [vmem:[%s31993_s21 + $0xf28] sm:$0xff] }
0x1e27   :  { %24944 = vmatprep.subr.bf16.mxu1 %v30434_v30 }
0x1e29   :  { %23178 = vmatmul.mubr.f32.gmra.mrb[146].mxu1 %v17934_v29  ;;  %v17967_v29 = vld [vmem:[%s31993_s21 + $0xf30] sm:$0xff] }
0x1e2a   :  { %24946 = vmatpush3.bf16.msra.mxu1 %v30434_v30  ;;  %23180 = vmatprep.mubr.f32.mxu1 %v17935_v59  ;;  %v17939_v30 = vld [vmem:[%s31993_s21 + $0xe50] sm:$0xff]  ;;  %v17968_v59 = vld [vmem:[%s31993_s21 + $0xf38] sm:$0xff] }
0x1e2b   :  { %24948 = vmatprep.subr.bf16.mxu1 %v30444_v19 }
0x1e2d   :  { %23181 = vmatmul.mubr.f32.gmra.mrb[148].mxu1 %v17936_v61  ;;  %v17969_v61 = vld [vmem:[%s31993_s21 + $0xf40] sm:$0xff] }
0x1e2e   :  { %24950 = vmatpush3.bf16.msra.mxu1 %v30444_v19  ;;  %23183 = vmatprep.mubr.f32.mxu1 %v17937_v24  ;;  %v17941_v19 = vld [vmem:[%s31993_s21 + $0xe60] sm:$0xff]  ;;  %v17970_v24 = vld [vmem:[%s31993_s21 + $0xf48] sm:$0xff] }
0x1e2f   :  { %24952 = vmatprep.subr.bf16.mxu1 %v30454_v57 }
0x1e31   :  { %23184 = vmatmul.mubr.f32.gmra.mrb[150].mxu1 %v17938_v49  ;;  %v17971_v49 = vld [vmem:[%s31993_s21 + $0xf50] sm:$0xff] }
0x1e32   :  { %24954 = vmatpush3.bf16.msra.mxu1 %v30454_v57  ;;  %23186 = vmatprep.mubr.f32.mxu1 %v17939_v30  ;;  %v17943_v57 = vld [vmem:[%s31993_s21 + $0xe70] sm:$0xff]  ;;  %v17972_v30 = vld [vmem:[%s31993_s21 + $0xf58] sm:$0xff] }
0x1e33   :  { %24956 = vmatprep.subr.bf16.mxu1 %v30464_v13 }
0x1e35   :  { %23187 = vmatmul.mubr.f32.gmra.mrb[152].mxu1 %v17940_v15  ;;  %v17973_v15 = vld [vmem:[%s31993_s21 + $0xf60] sm:$0xff] }
0x1e36   :  { %24958 = vmatpush3.bf16.msra.mxu1 %v30464_v13  ;;  %23189 = vmatprep.mubr.f32.mxu1 %v17941_v19  ;;  %v17945_v13 = vld [vmem:[%s31993_s21 + $0xe80] sm:$0xff]  ;;  %v17974_v19 = vld [vmem:[%s31993_s21 + $0xf68] sm:$0xff] }
0x1e37   :  { %24960 = vmatprep.subr.bf16.mxu1 %v30474_v27 }
0x1e39   :  { %23190 = vmatmul.mubr.f32.gmra.mrb[154].mxu1 %v17942_v26  ;;  %v17975_v26 = vld [vmem:[%s31993_s21 + $0xf70] sm:$0xff] }
0x1e3a   :  { %24962 = vmatpush3.bf16.msra.mxu1 %v30474_v27  ;;  %23192 = vmatprep.mubr.f32.mxu1 %v17943_v57  ;;  %v17947_v27 = vld [vmem:[%s31993_s21 + $0xe90] sm:$0xff]  ;;  %v17976_v57 = vld [vmem:[%s31993_s21 + $0xf78] sm:$0xff] }
0x1e3b   :  { %24964 = vmatprep.subr.bf16.mxu1 %v30484_v63 }
0x1e3d   :  { %23193 = vmatmul.mubr.f32.gmra.mrb[156].mxu1 %v17944_v22  ;;  %v17977_v22 = vld [vmem:[%s31993_s21 + $0xf80] sm:$0xff] }
0x1e3e   :  { %24966 = vmatpush3.bf16.msra.mxu1 %v30484_v63  ;;  %23195 = vmatprep.mubr.f32.mxu1 %v17945_v13  ;;  %v17950_v63 = vld [vmem:[%s31993_s21 + $0xea8] sm:$0xff] }
0x1e3f   :  { %v17978_v13 = vld [vmem:[%s31993_s21 + $0xf88] sm:$0xff] }
0x1e41   :  { %23196 = vmatmul.mubr.f32.gmra.mrb[158].mxu1 %v17946_v20  ;;  %v17979_v20 = vld [vmem:[%s31993_s21 + $0xf90] sm:$0xff] }
0x1e42   :  { %23198 = vmatprep.mubr.f32.mxu1 %v17947_v27  ;;  %v17980_v27 = vld [vmem:[%s31993_s21 + $0xf98] sm:$0xff] }
0x1e45   :  { %23199 = vmatmul.mubr.f32.gmra.mrb[160].mxu1 %v17948_v17  ;;  %v17981_v17 = vld [vmem:[%s31993_s21 + $0xfa0] sm:$0xff] }
0x1e46   :  { %23201 = vmatprep.mubr.f32.mxu1 %v17949_v35  ;;  %v17982_v35 = vld [vmem:[%s31993_s21 + $0xfa8] sm:$0xff] }
0x1e49   :  { %23202 = vmatmul.mubr.f32.gmra.mrb[162].mxu1 %v17950_v63  ;;  %v17983_v63 = vld [vmem:[%s31993_s21 + $0xfb0] sm:$0xff] }
0x1e4a   :  { %23204 = vmatprep.mubr.f32.mxu1 %v17951_v23  ;;  %v17984_v23 = vld [vmem:[%s31993_s21 + $0xfb8] sm:$0xff] }
0x1e4d   :  { %23205 = vmatmul.mubr.f32.gmra.mrb[164].mxu1 %v17952_v28  ;;  %v17985_v28 = vld [vmem:[%s31993_s21 + $0xfc0] sm:$0xff] }
0x1e4e   :  { %23207 = vmatprep.mubr.f32.mxu1 %v17953_v8  ;;  %v17986_v8 = vld [vmem:[%s31993_s21 + $0xfc8] sm:$0xff] }
0x1e51   :  { %23208 = vmatmul.mubr.f32.gmra.mrb[166].mxu1 %v17954_v16  ;;  %v17987_v16 = vld [vmem:[%s31993_s21 + $0xfd0] sm:$0xff] }
0x1e52   :  { %23210 = vmatprep.mubr.f32.mxu1 %v17955_v6  ;;  %v17988_v6 = vld [vmem:[%s31993_s21 + $0xfd8] sm:$0xff] }
0x1e55   :  { %23211 = vmatmul.mubr.f32.gmra.mrb[168].mxu1 %v17956_v56  ;;  %v17989_v56 = vld [vmem:[%s31993_s21 + $0xfe0] sm:$0xff] }
0x1e56   :  { %23213 = vmatprep.mubr.f32.mxu1 %v17957_v48  ;;  %v17990_v48 = vld [vmem:[%s31993_s21 + $0xfe8] sm:$0xff] }
0x1e59   :  { %23214 = vmatmul.mubr.f32.gmra.mrb[170].mxu1 %v17958_v42  ;;  %v17991_v42 = vld [vmem:[%s31993_s21 + $0xff0] sm:$0xff] }
0x1e5a   :  { %23216 = vmatprep.mubr.f32.mxu1 %v17959_v18  ;;  %v17992_v18 = vld [vmem:[%s31993_s21 + $0xff8] sm:$0xff] }
0x1e5d   :  { %23217 = vmatmul.mubr.f32.gmra.mrb[172].mxu1 %v17960_v7  ;;  %v18013_v7 = vld [vmem:[%s31993_s21 + $0x1000] sm:$0xff] }
0x1e5e   :  { %23219 = vmatprep.mubr.f32.mxu1 %v17961_v21  ;;  %v18014_v21 = vld [vmem:[%s31993_s21 + $0x1008] sm:$0xff] }
0x1e61   :  { %23220 = vmatmul.mubr.f32.gmra.mrb[174].mxu1 %v17962_v12  ;;  %v15498_v12 = vld [vmem:[%s31994_s24] sm:$0xf] }
0x1e62   :  { %23222 = vmatprep.mubr.f32.mxu1 %v17963_v1  ;;  %v18015_v1 = vld [vmem:[%s31993_s21 + $0x1010] sm:$0xff]  ;;  %23427 = vmatprep.subr.msk.mxu0 %vm160_vm1, %v15498_v12 }
0x1e63   :  { %23428 = vmatpush3.msk.msra.mxu0 %vm160_vm1, %v15498_v12  ;;  %v18047_v12 = vld [vmem:[%s31993_s21 + $0x1110] sm:$0xff] }
0x1e65   :  { %23223 = vmatmul.mubr.f32.gmra.mrb[176].mxu1 %v17964_v5  ;;  %v18016_v5 = vld [vmem:[%s31993_s21 + $0x1018] sm:$0xff] }
0x1e66   :  { %23225 = vmatprep.mubr.f32.mxu1 %v17965_v25  ;;  %v18017_v25 = vld [vmem:[%s31993_s21 + $0x1020] sm:$0xff] }
0x1e69   :  { %23226 = vmatmul.mubr.f32.gmra.mrb[178].mxu1 %v17966_v3  ;;  %v18018_v3 = vld [vmem:[%s31993_s21 + $0x1028] sm:$0xff] }
0x1e6a   :  { %23228 = vmatprep.mubr.f32.mxu1 %v17967_v29  ;;  %v18019_v29 = vld [vmem:[%s31993_s21 + $0x1030] sm:$0xff] }
0x1e6d   :  { %23229 = vmatmul.mubr.f32.gmra.mrb[180].mxu1 %v17968_v59  ;;  %v18020_v59 = vld [vmem:[%s31993_s21 + $0x1038] sm:$0xff] }
0x1e6e   :  { %23231 = vmatprep.mubr.f32.mxu1 %v17969_v61  ;;  %v18021_v61 = vld [vmem:[%s31993_s21 + $0x1040] sm:$0xff] }
0x1e71   :  { %23232 = vmatmul.mubr.f32.gmra.mrb[182].mxu1 %v17970_v24  ;;  %v18022_v24 = vld [vmem:[%s31993_s21 + $0x1048] sm:$0xff] }
0x1e72   :  { %23234 = vmatprep.mubr.f32.mxu1 %v17971_v49  ;;  %v18023_v49 = vld [vmem:[%s31993_s21 + $0x1050] sm:$0xff] }
0x1e75   :  { %23235 = vmatmul.mubr.f32.gmra.mrb[184].mxu1 %v17972_v30  ;;  %v18024_v30 = vld [vmem:[%s31993_s21 + $0x1058] sm:$0xff] }
0x1e76   :  { %23237 = vmatprep.mubr.f32.mxu1 %v17973_v15  ;;  %v18025_v15 = vld [vmem:[%s31993_s21 + $0x1060] sm:$0xff] }
0x1e79   :  { %23238 = vmatmul.mubr.f32.gmra.mrb[186].mxu1 %v17974_v19  ;;  %v18026_v19 = vld [vmem:[%s31993_s21 + $0x1068] sm:$0xff] }
0x1e7a   :  { %23240 = vmatprep.mubr.f32.mxu1 %v17975_v26  ;;  %v18027_v26 = vld [vmem:[%s31993_s21 + $0x1070] sm:$0xff] }
0x1e7d   :  { %23241 = vmatmul.mubr.f32.gmra.mrb[188].mxu1 %v17976_v57  ;;  %v18028_v57 = vld [vmem:[%s31993_s21 + $0x1078] sm:$0xff] }
0x1e7e   :  { %23243 = vmatprep.mubr.f32.mxu1 %v17977_v22  ;;  %v18029_v22 = vld [vmem:[%s31993_s21 + $0x1080] sm:$0xff] }
0x1e81   :  { %23244 = vmatmul.mubr.f32.gmra.mrb[126].mxu1 %v17978_v13  ;;  %v18030_v13 = vld [vmem:[%s31993_s21 + $0x1088] sm:$0xff] }
0x1e82   :  { %23246 = vmatprep.mubr.f32.mxu1 %v17979_v20  ;;  %v18031_v20 = vld [vmem:[%s31993_s21 + $0x1090] sm:$0xff] }
0x1e85   :  { %23247 = vmatmul.mubr.f32.gmra.mrb[128].mxu1 %v17980_v27  ;;  %v18032_v27 = vld [vmem:[%s31993_s21 + $0x1098] sm:$0xff] }
0x1e86   :  { %23249 = vmatprep.mubr.f32.mxu1 %v17981_v17  ;;  %v18033_v17 = vld [vmem:[%s31993_s21 + $0x10a0] sm:$0xff] }
0x1e89   :  { %23250 = vmatmul.mubr.f32.gmra.mrb[130].mxu1 %v17982_v35  ;;  %v18034_v35 = vld [vmem:[%s31993_s21 + $0x10a8] sm:$0xff] }
0x1e8a   :  { %23252 = vmatprep.mubr.f32.mxu1 %v17983_v63  ;;  %v18035_v63 = vld [vmem:[%s31993_s21 + $0x10b0] sm:$0xff] }
0x1e8d   :  { %23253 = vmatmul.mubr.f32.gmra.mrb[132].mxu1 %v17984_v23  ;;  %v18036_v23 = vld [vmem:[%s31993_s21 + $0x10b8] sm:$0xff] }
0x1e8e   :  { %23255 = vmatprep.mubr.f32.mxu1 %v17985_v28  ;;  %v18037_v28 = vld [vmem:[%s31993_s21 + $0x10c0] sm:$0xff] }
0x1e91   :  { %23256 = vmatmul.mubr.f32.gmra.mrb[134].mxu1 %v17986_v8  ;;  %v18038_v8 = vld [vmem:[%s31993_s21 + $0x10c8] sm:$0xff] }
0x1e92   :  { %23258 = vmatprep.mubr.f32.mxu1 %v17987_v16  ;;  %v18039_v16 = vld [vmem:[%s31993_s21 + $0x10d0] sm:$0xff] }
0x1e95   :  { %23259 = vmatmul.mubr.f32.gmra.mrb[136].mxu1 %v17988_v6  ;;  %v18040_v6 = vld [vmem:[%s31993_s21 + $0x10d8] sm:$0xff] }
0x1e96   :  { %23261 = vmatprep.mubr.f32.mxu1 %v17989_v56  ;;  %v18041_v56 = vld [vmem:[%s31993_s21 + $0x10e0] sm:$0xff] }
0x1e99   :  { %23262 = vmatmul.mubr.f32.gmra.mrb[138].mxu1 %v17990_v48  ;;  %v18042_v48 = vld [vmem:[%s31993_s21 + $0x10e8] sm:$0xff] }
0x1e9a   :  { %23264 = vmatprep.mubr.f32.mxu1 %v17991_v42  ;;  %v18043_v42 = vld [vmem:[%s31993_s21 + $0x10f0] sm:$0xff] }
0x1e9d   :  { %23265 = vmatmul.mubr.f32.gmra.mrb[140].mxu1 %v17992_v18  ;;  %v18044_v18 = vld [vmem:[%s31993_s21 + $0x10f8] sm:$0xff] }
0x1e9e   :  { %23331 = vmatprep.mubr.f32.mxu1 %v18013_v7  ;;  %v18045_v7 = vld [vmem:[%s31993_s21 + $0x1100] sm:$0xff] }
0x1ea1   :  { %23332 = vmatmul.mubr.f32.vlgmr.msra.gmra.mrb[142].mxu1 %v18014_v21  ;;  %v18046_v21 = vld [vmem:[%s31993_s21 + $0x1108] sm:$0xff] }
0x1ea2   :  { %23334 = vmatprep.mubr.f32.mxu1 %v18015_v1  ;;  %v18048_v1 = vld [vmem:[%s31993_s21 + $0x1118] sm:$0xff] }
0x1ea5   :  { %23335 = vmatmul.mubr.f32.gmra.mrb[144].mxu1 %v18016_v5  ;;  %v18049_v5 = vld [vmem:[%s31993_s21 + $0x1120] sm:$0xff] }
0x1ea6   :  { %23337 = vmatprep.mubr.f32.mxu1 %v18017_v25  ;;  %v18050_v25 = vld [vmem:[%s31993_s21 + $0x1128] sm:$0xff] }
0x1ea9   :  { %23338 = vmatmul.mubr.f32.gmra.mrb[146].mxu1 %v18018_v3  ;;  %v18051_v3 = vld [vmem:[%s31993_s21 + $0x1130] sm:$0xff] }
0x1eaa   :  { %23340 = vmatprep.mubr.f32.mxu1 %v18019_v29  ;;  %v18052_v29 = vld [vmem:[%s31993_s21 + $0x1138] sm:$0xff] }
0x1ead   :  { %23341 = vmatmul.mubr.f32.gmra.mrb[148].mxu1 %v18020_v59  ;;  %v18053_v59 = vld [vmem:[%s31993_s21 + $0x1140] sm:$0xff] }
0x1eae   :  { %23343 = vmatprep.mubr.f32.mxu1 %v18021_v61  ;;  %v18054_v61 = vld [vmem:[%s31993_s21 + $0x1148] sm:$0xff] }
0x1eb1   :  { %23344 = vmatmul.mubr.f32.gmra.mrb[150].mxu1 %v18022_v24  ;;  %v18055_v24 = vld [vmem:[%s31993_s21 + $0x1150] sm:$0xff] }
0x1eb2   :  { %23346 = vmatprep.mubr.f32.mxu1 %v18023_v49  ;;  %v18056_v49 = vld [vmem:[%s31993_s21 + $0x1158] sm:$0xff] }
0x1eb5   :  { %23347 = vmatmul.mubr.f32.gmra.mrb[152].mxu1 %v18024_v30  ;;  %v18057_v30 = vld [vmem:[%s31993_s21 + $0x1160] sm:$0xff] }
0x1eb6   :  { %23349 = vmatprep.mubr.f32.mxu1 %v18025_v15  ;;  %v18058_v15 = vld [vmem:[%s31993_s21 + $0x1168] sm:$0xff] }
0x1eb9   :  { %23350 = vmatmul.mubr.f32.gmra.mrb[154].mxu1 %v18026_v19  ;;  %v18059_v19 = vld [vmem:[%s31993_s21 + $0x1170] sm:$0xff] }
0x1eba   :  { %23352 = vmatprep.mubr.f32.mxu1 %v18027_v26  ;;  %v18060_v26 = vld [vmem:[%s31993_s21 + $0x1178] sm:$0xff] }
0x1ebd   :  { %23353 = vmatmul.mubr.f32.gmra.mrb[156].mxu1 %v18028_v57  ;;  %v18061_v57 = vld [vmem:[%s31993_s21 + $0x1180] sm:$0xff] }
0x1ebe   :  { %23355 = vmatprep.mubr.f32.mxu1 %v18029_v22  ;;  %v18062_v22 = vld [vmem:[%s31993_s21 + $0x1188] sm:$0xff] }
0x1ec1   :  { %23356 = vmatmul.mubr.f32.gmra.mrb[158].mxu1 %v18030_v13  ;;  %v18063_v13 = vld [vmem:[%s31993_s21 + $0x1190] sm:$0xff] }
0x1ec2   :  { %23358 = vmatprep.mubr.f32.mxu1 %v18031_v20  ;;  %v18064_v20 = vld [vmem:[%s31993_s21 + $0x1198] sm:$0xff] }
0x1ec5   :  { %23359 = vmatmul.mubr.f32.gmra.mrb[160].mxu1 %v18032_v27  ;;  %v18065_v27 = vld [vmem:[%s31993_s21 + $0x11a0] sm:$0xff] }
0x1ec6   :  { %23361 = vmatprep.mubr.f32.mxu1 %v18033_v17  ;;  %v18066_v17 = vld [vmem:[%s31993_s21 + $0x11a8] sm:$0xff] }
0x1ec9   :  { %23362 = vmatmul.mubr.f32.gmra.mrb[162].mxu1 %v18034_v35  ;;  %v18067_v35 = vld [vmem:[%s31993_s21 + $0x11b0] sm:$0xff] }
0x1eca   :  { %23364 = vmatprep.mubr.f32.mxu1 %v18035_v63  ;;  %v18068_v63 = vld [vmem:[%s31993_s21 + $0x11b8] sm:$0xff] }
0x1ecd   :  { %23365 = vmatmul.mubr.f32.gmra.mrb[164].mxu1 %v18036_v23  ;;  %v18069_v23 = vld [vmem:[%s31993_s21 + $0x11c0] sm:$0xff] }
0x1ece   :  { %23367 = vmatprep.mubr.f32.mxu1 %v18037_v28  ;;  %v18070_v28 = vld [vmem:[%s31993_s21 + $0x11c8] sm:$0xff] }
0x1ed1   :  { %23368 = vmatmul.mubr.f32.gmra.mrb[166].mxu1 %v18038_v8  ;;  %v18071_v8 = vld [vmem:[%s31993_s21 + $0x11d0] sm:$0xff] }
0x1ed2   :  { %23370 = vmatprep.mubr.f32.mxu1 %v18039_v16  ;;  %v18072_v16 = vld [vmem:[%s31993_s21 + $0x11d8] sm:$0xff] }
0x1ed5   :  { %23371 = vmatmul.mubr.f32.gmra.mrb[168].mxu1 %v18040_v6  ;;  %v18073_v6 = vld [vmem:[%s31993_s21 + $0x11e0] sm:$0xff] }
0x1ed6   :  { %23373 = vmatprep.mubr.f32.mxu1 %v18041_v56  ;;  %v18074_v56 = vld [vmem:[%s31993_s21 + $0x11e8] sm:$0xff] }
0x1ed9   :  { %23374 = vmatmul.mubr.f32.gmra.mrb[170].mxu1 %v18042_v48  ;;  %v18075_v48 = vld [vmem:[%s31993_s21 + $0x11f0] sm:$0xff] }
0x1eda   :  { %23376 = vmatprep.mubr.f32.mxu1 %v18043_v42  ;;  %v18076_v42 = vld [vmem:[%s31993_s21 + $0x11f8] sm:$0xff] }
0x1edd   :  { %23377 = vmatmul.mubr.f32.gmra.mrb[172].mxu1 %v18044_v18 }
0x1ede   :  { %23379 = vmatprep.mubr.f32.mxu1 %v18045_v7  ;;  %v31455_v7 = vld [vmem:[%s31995_s23] ss:$0 sm:$0xff] }
0x1ee1   :  { %23380 = vmatmul.mubr.f32.gmra.mrb[174].mxu1 %v18046_v21 }
0x1ee2   :  { %23382 = vmatprep.mubr.f32.mxu1 %v18047_v12 }
0x1ee5   :  { %23383 = vmatmul.mubr.f32.gmra.mrb[176].mxu1 %v18048_v1 }
0x1ee6   :  { %23385 = vmatprep.mubr.f32.mxu1 %v18049_v5 }
0x1ee9   :  { %23386 = vmatmul.mubr.f32.gmra.mrb[178].mxu1 %v18050_v25 }
0x1eea   :  { %23388 = vmatprep.mubr.f32.mxu1 %v18051_v3 }
0x1eed   :  { %23389 = vmatmul.mubr.f32.gmra.mrb[180].mxu1 %v18052_v29 }
0x1eee   :  { %23391 = vmatprep.mubr.f32.mxu1 %v18053_v59 }
0x1ef1   :  { %23392 = vmatmul.mubr.f32.gmra.mrb[182].mxu1 %v18054_v61 }
0x1ef2   :  { %23394 = vmatprep.mubr.f32.mxu1 %v18055_v24 }
0x1ef5   :  { %23395 = vmatmul.mubr.f32.gmra.mrb[184].mxu1 %v18056_v49 }
0x1ef6   :  { %23397 = vmatprep.mubr.f32.mxu1 %v18057_v30 }
0x1ef9   :  { %23398 = vmatmul.mubr.f32.gmra.mrb[186].mxu1 %v18058_v15 }
0x1efa   :  { %23400 = vmatprep.mubr.f32.mxu1 %v18059_v19 }
0x1efd   :  { %23401 = vmatmul.mubr.f32.gmra.mrb[188].mxu1 %v18060_v26 }
0x1efe   :  { %23403 = vmatprep.mubr.f32.mxu1 %v18061_v57 }
0x1f01   :  { %23404 = vmatmul.mubr.f32.gmra.mrb[126].mxu1 %v18062_v22 }
0x1f02   :  { %23406 = vmatprep.mubr.f32.mxu1 %v18063_v13 }
0x1f05   :  { %23407 = vmatmul.mubr.f32.gmra.mrb[128].mxu1 %v18064_v20 }
0x1f06   :  { %23409 = vmatprep.mubr.f32.mxu1 %v18065_v27 }
0x1f09   :  { %23410 = vmatmul.mubr.f32.gmra.mrb[130].mxu1 %v18066_v17 }
0x1f0a   :  { %23412 = vmatprep.mubr.f32.mxu1 %v18067_v35 }
0x1f0d   :  { %23413 = vmatmul.mubr.f32.gmra.mrb[132].mxu1 %v18068_v63 }
0x1f0e   :  { %23415 = vmatprep.mubr.f32.mxu1 %v18069_v23 }
0x1f11   :  { %23416 = vmatmul.mubr.f32.gmra.mrb[134].mxu1 %v18070_v28 }
0x1f12   :  { %23418 = vmatprep.mubr.f32.mxu1 %v18071_v8 }
0x1f15   :  { %23419 = vmatmul.mubr.f32.gmra.mrb[136].mxu1 %v18072_v16 }
0x1f16   :  { %23421 = vmatprep.mubr.f32.mxu1 %v18073_v6 }
0x1f19   :  { %23422 = vmatmul.mubr.f32.gmra.mrb[138].mxu1 %v18074_v56 }
0x1f1a   :  { %23424 = vmatprep.mubr.f32.mxu1 %v18075_v48 }
0x1f1d   :  { %23425 = vmatmul.mubr.f32.gmra.mrb[140].mxu1 %v18076_v42 }
0x1f74   :  { %v23333_v18 = vpop.f32.mrb[142].mxu1 }
0x1f75   :  { %v24983_v21 = vadd.f32 %v23333_v18, %v29991_v2  ;;  %v14980_v12 = vpop.f32.mrb[143].mxu1 }
0x1f76   :  { %v24984_v1 = vadd.f32 %v14980_v12, %v29993_v4 }
0x1f77   :  { %v15371_v5 = vadd.f32 %v24983_v21, %v31455_v7 }
0x1f78   :  { %v15370_v25 = vadd.f32 %v24984_v1, %v31455_v7  ;;  %v23336_v3 = vpop.f32.mrb[144].mxu1 }
0x1f79   :  { %v24985_v29 = vadd.f32 %v23336_v3, %v30002_v9  ;;  %v14990_v59 = vpop.f32.mrb[145].mxu1  ;;  %v15435_v49 = vmax.f32 %v15371_v5, 0.0 }
0x1f7a   :  { %v15434_v61 = vmax.f32 %v15370_v25, 0.0  ;;  %v24986_v24 = vadd.f32 %v14990_v59, %v30004_v0 }
0x1f7b   :  { %v15373_v30 = vadd.f32 %v24985_v29, %v31455_v7 }
0x1f7c   :  { %v15372_v2 = vadd.f32 %v24986_v24, %v31455_v7  ;;  %v23339_v15 = vpop.f32.mrb[146].mxu1  ;;  %23429 = vmatprep.mubr.msk.f32.mxu0 %vm15506_vm8, %v15434_v61 }
0x1f7d   :  { %v24987_v4 = vadd.f32 %v23339_v15, %v30010_v14  ;;  %v15000_v19 = vpop.f32.mrb[147].mxu1  ;;  %23430 = vmatmul.mubr.msk.f32.vlgmr.msra.gmra.mrb[18].mxu0 %vm15506_vm8, %v15435_v49  ;;  %v15437_v57 = vmax.f32 %v15373_v30, 0.0 }
0x1f7e   :  { %v15436_v26 = vmax.f32 %v15372_v2, 0.0  ;;  %v24988_v9 = vadd.f32 %v15000_v19, %v30018_v31 }
0x1f7f   :  { %v15375_v22 = vadd.f32 %v24987_v4, %v31455_v7 }
0x1f80   :  { %v15374_v0 = vadd.f32 %v24988_v9, %v31455_v7  ;;  %v23342_v13 = vpop.f32.mrb[148].mxu1  ;;  %23432 = vmatprep.mubr.msk.f32.mxu0 %vm15506_vm8, %v15436_v26 }
0x1f81   :  { %v24989_v20 = vadd.f32 %v23342_v13, %v30024_v11  ;;  %v15010_v27 = vpop.f32.mrb[149].mxu1  ;;  %23433 = vmatmul.mubr.msk.f32.gmra.mrb[20].mxu0 %vm15506_vm8, %v15437_v57  ;;  %v15439_v35 = vmax.f32 %v15375_v22, 0.0 }
0x1f82   :  { %v15438_v14 = vmax.f32 %v15374_v0, 0.0  ;;  %v24990_v17 = vadd.f32 %v15010_v27, %v30026_v10 }
0x1f83   :  { %v15377_v63 = vadd.f32 %v24989_v20, %v31455_v7 }
0x1f84   :  { %v15376_v31 = vadd.f32 %v24990_v17, %v31455_v7  ;;  %v23345_v23 = vpop.f32.mrb[150].mxu1  ;;  %23435 = vmatprep.mubr.msk.f32.mxu0 %vm15506_vm8, %v15438_v14 }
0x1f85   :  { %v24991_v28 = vadd.f32 %v23345_v23, %v30032_v32  ;;  %v15020_v8 = vpop.f32.mrb[151].mxu1  ;;  %23436 = vmatmul.mubr.msk.f32.gmra.mrb[22].mxu0 %vm15506_vm8, %v15439_v35  ;;  %v15441_v6 = vmax.f32 %v15377_v63, 0.0 }
0x1f86   :  { %v15440_v11 = vmax.f32 %v15376_v31, 0.0  ;;  %v24992_v16 = vadd.f32 %v15020_v8, %v30034_v33 }
0x1f87   :  { %v15379_v56 = vadd.f32 %v24991_v28, %v31455_v7 }
0x1f88   :  { %v15378_v10 = vadd.f32 %v24992_v16, %v31455_v7  ;;  %v23348_v48 = vpop.f32.mrb[152].mxu1  ;;  %23438 = vmatprep.mubr.msk.f32.mxu0 %vm15506_vm8, %v15440_v11 }
0x1f89   :  { %v24993_v42 = vadd.f32 %v23348_v48, %v30040_v34  ;;  %v15030_v18 = vpop.f32.mrb[153].mxu1  ;;  %23439 = vmatmul.mubr.msk.f32.gmra.mrb[24].mxu0 %vm15506_vm8, %v15441_v6  ;;  %v15443_v12 = vmax.f32 %v15379_v56, 0.0 }
0x1f8a   :  { %v15442_v32 = vmax.f32 %v15378_v10, 0.0  ;;  %v24994_v21 = vadd.f32 %v15030_v18, %v30042_v36 }
0x1f8b   :  { %v15381_v1 = vadd.f32 %v24993_v42, %v31455_v7 }
0x1f8c   :  { %v15380_v33 = vadd.f32 %v24994_v21, %v31455_v7  ;;  %v23351_v5 = vpop.f32.mrb[154].mxu1  ;;  %23441 = vmatprep.mubr.msk.f32.mxu0 %vm15506_vm8, %v15442_v32 }
0x1f8d   :  { %v24995_v25 = vadd.f32 %v23351_v5, %v30048_v37  ;;  %v15040_v3 = vpop.f32.mrb[155].mxu1  ;;  %23442 = vmatmul.mubr.msk.f32.gmra.mrb[26].mxu0 %vm15506_vm8, %v15443_v12  ;;  %v15445_v59 = vmax.f32 %v15381_v1, 0.0 }
0x1f8e   :  { %v15444_v34 = vmax.f32 %v15380_v33, 0.0  ;;  %v24996_v29 = vadd.f32 %v15040_v3, %v30050_v38 }
0x1f8f   :  { %v15383_v61 = vadd.f32 %v24995_v25, %v31455_v7 }
0x1f90   :  { %v15382_v36 = vadd.f32 %v24996_v29, %v31455_v7  ;;  %v23354_v24 = vpop.f32.mrb[156].mxu1  ;;  %23444 = vmatprep.mubr.msk.f32.mxu0 %vm15506_vm8, %v15444_v34 }
0x1f91   :  { %v24997_v49 = vadd.f32 %v23354_v24, %v30056_v39  ;;  %v15050_v30 = vpop.f32.mrb[157].mxu1  ;;  %23445 = vmatmul.mubr.msk.f32.gmra.mrb[28].mxu0 %vm15506_vm8, %v15445_v59  ;;  %v15447_v15 = vmax.f32 %v15383_v61, 0.0 }
0x1f92   :  { %v15446_v37 = vmax.f32 %v15382_v36, 0.0  ;;  %v24998_v2 = vadd.f32 %v15050_v30, %v30058_v44 }
0x1f93   :  { %v15385_v4 = vadd.f32 %v24997_v49, %v31455_v7 }
0x1f94   :  { %v15384_v38 = vadd.f32 %v24998_v2, %v31455_v7  ;;  %v23357_v19 = vpop.f32.mrb[158].mxu1  ;;  %23447 = vmatprep.mubr.msk.f32.mxu0 %vm15506_vm8, %v15446_v37 }
0x1f95   :  { %v24999_v26 = vadd.f32 %v23357_v19, %v30064_v46  ;;  %v15060_v9 = vpop.f32.mrb[159].mxu1  ;;  %23448 = vmatmul.mubr.msk.f32.gmra.mrb[30].mxu0 %vm15506_vm8, %v15447_v15  ;;  %v15449_v22 = vmax.f32 %v15385_v4, 0.0 }
0x1f96   :  { %v15448_v39 = vmax.f32 %v15384_v38, 0.0  ;;  %v25000_v57 = vadd.f32 %v15060_v9, %v30066_v47  ;;  %v32061_v38 = vld [vmem:[#allocation18_spill] sm:$0xff] }
0x1f97   :  { %v15387_v0 = vadd.f32 %v24999_v26, %v31455_v7 }
0x1f98   :  { %v15386_v44 = vadd.f32 %v25000_v57, %v31455_v7  ;;  %v23360_v13 = vpop.f32.mrb[160].mxu1  ;;  %23450 = vmatprep.mubr.msk.f32.mxu0 %vm15506_vm8, %v15448_v39  ;;  %v32062_v57 = vld [vmem:[#allocation19_spill] sm:$0xff] }
0x1f99   :  { %v25001_v20 = vadd.f32 %v23360_v13, %v30072_v50  ;;  %v15070_v27 = vpop.f32.mrb[161].mxu1  ;;  %23451 = vmatmul.mubr.msk.f32.gmra.mrb[32].mxu0 %vm15506_vm8, %v15449_v22  ;;  %v15451_v17 = vmax.f32 %v15387_v0, 0.0 }
0x1f9a   :  { %v15450_v46 = vmax.f32 %v15386_v44, 0.0  ;;  %v25002_v14 = vadd.f32 %v15070_v27, %v30074_v45  ;;  %v32063_v44 = vld [vmem:[#allocation20_spill] sm:$0xff] }
0x1f9b   :  { %v15389_v35 = vadd.f32 %v25001_v20, %v31455_v7 }
0x1f9c   :  { %v15388_v47 = vadd.f32 %v25002_v14, %v31455_v7  ;;  %v23363_v63 = vpop.f32.mrb[162].mxu1  ;;  %23453 = vmatprep.mubr.msk.f32.mxu0 %vm15506_vm8, %v15450_v46 }
0x1f9d   :  { %v25003_v31 = vadd.f32 %v23363_v63, %v30080_v52  ;;  %v15080_v23 = vpop.f32.mrb[163].mxu1  ;;  %23454 = vmatmul.mubr.msk.f32.gmra.mrb[34].mxu0 %vm15506_vm8, %v15451_v17  ;;  %v15453_v8 = vmax.f32 %v15389_v35, 0.0  ;;  %v32064_v17 = vld [vmem:[#allocation21_spill] sm:$0xff] }
0x1f9e   :  { %v15452_v50 = vmax.f32 %v15388_v47, 0.0  ;;  %v25004_v28 = vadd.f32 %v15080_v23, %v30082_v55 }
0x1f9f   :  { %v15391_v11 = vadd.f32 %v25003_v31, %v31455_v7  ;;  %v32065_v31 = vld [vmem:[#allocation22_spill] sm:$0xff] }
0x1fa0   :  { %v15390_v45 = vadd.f32 %v25004_v28, %v31455_v7  ;;  %v23366_v16 = vpop.f32.mrb[164].mxu1  ;;  %23456 = vmatprep.mubr.msk.f32.mxu0 %vm15506_vm8, %v15452_v50 }
0x1fa1   :  { %v25005_v6 = vadd.f32 %v23366_v16, %v30088_v58  ;;  %v15090_v56 = vpop.f32.mrb[165].mxu1  ;;  %23457 = vmatmul.mubr.msk.f32.gmra.mrb[36].mxu0 %vm15506_vm8, %v15453_v8  ;;  %v15455_v48 = vmax.f32 %v15391_v11, 0.0 }
0x1fa2   :  { %v15454_v52 = vmax.f32 %v15390_v45, 0.0  ;;  %v25006_v10 = vadd.f32 %v15090_v56, %v30090_v60  ;;  %v32066_v45 = vld [vmem:[#allocation23_spill] sm:$0xff] }
0x1fa3   :  { %v15393_v42 = vadd.f32 %v25005_v6, %v31455_v7 }
0x1fa4   :  { %v15392_v55 = vadd.f32 %v25006_v10, %v31455_v7  ;;  %v23369_v18 = vpop.f32.mrb[166].mxu1  ;;  %23459 = vmatprep.mubr.msk.f32.mxu0 %vm15506_vm8, %v15454_v52  ;;  %v32067_v52 = vld [vmem:[#allocation24_spill] sm:$0xff] }
0x1fa5   :  { %v25007_v32 = vadd.f32 %v23369_v18, %v30096_v62  ;;  %v15100_v21 = vpop.f32.mrb[167].mxu1  ;;  %23460 = vmatmul.mubr.msk.f32.gmra.mrb[38].mxu0 %vm15506_vm8, %v15455_v48  ;;  %v15457_v1 = vmax.f32 %v15393_v42, 0.0 }
0x1fa6   :  { %v15456_v58 = vmax.f32 %v15392_v55, 0.0  ;;  %v25008_v12 = vadd.f32 %v15100_v21, %v30098_v41 }
0x1fa7   :  { %v15395_v33 = vadd.f32 %v25007_v32, %v31455_v7  ;;  %v32068_v32 = vld [vmem:[#allocation25_spill] sm:$0xff] }
0x1fa8   :  { %v15394_v60 = vadd.f32 %v25008_v12, %v31455_v7  ;;  %v23372_v5 = vpop.f32.mrb[168].mxu1  ;;  %23462 = vmatprep.mubr.msk.f32.mxu0 %vm15506_vm8, %v15456_v58 }
0x1fa9   :  { %v25009_v25 = vadd.f32 %v23372_v5, %v30104_v40  ;;  %v15110_v3 = vpop.f32.mrb[169].mxu1  ;;  %23463 = vmatmul.mubr.msk.f32.gmra.mrb[40].mxu0 %vm15506_vm8, %v15457_v1  ;;  %v15459_v29 = vmax.f32 %v15395_v33, 0.0  ;;  %v32069_v1 = vld [vmem:[#allocation26_spill] sm:$0xff] }
0x1faa   :  { %v15458_v62 = vmax.f32 %v15394_v60, 0.0  ;;  %v25010_v34 = vadd.f32 %v15110_v3, %v30106_v53 }
0x1fab   :  { %v15397_v59 = vadd.f32 %v25009_v25, %v31455_v7 }
0x1fac   :  { %v15396_v41 = vadd.f32 %v25010_v34, %v31455_v7  ;;  %v23375_v61 = vpop.f32.mrb[170].mxu1  ;;  %23465 = vmatprep.mubr.msk.f32.mxu0 %vm15506_vm8, %v15458_v62  ;;  %v32070_v62 = vld [vmem:[#allocation27_spill] sm:$0xff] }
0x1fad   :  { %v25011_v36 = vadd.f32 %v23375_v61, %v30112_v43  ;;  %v15120_v24 = vpop.f32.mrb[171].mxu1  ;;  %23466 = vmatmul.mubr.msk.f32.gmra.mrb[42].mxu0 %vm15506_vm8, %v15459_v29  ;;  %v15461_v30 = vmax.f32 %v15397_v59, 0.0 }
0x1fae   :  { %v15460_v40 = vmax.f32 %v15396_v41, 0.0  ;;  %v25012_v49 = vadd.f32 %v15120_v24, %v30114_v51  ;;  %v32071_v41 = vld [vmem:[#allocation28_spill] sm:$0xff] }
0x1faf   :  { %v15399_v37 = vadd.f32 %v25011_v36, %v31455_v7 }
0x1fb0   :  { %v15398_v53 = vadd.f32 %v25012_v49, %v31455_v7  ;;  %v23378_v2 = vpop.f32.mrb[172].mxu1  ;;  %23468 = vmatprep.mubr.msk.f32.mxu0 %vm15506_vm8, %v15460_v40 }
0x1fb1   :  { %v25013_v15 = vadd.f32 %v23378_v2, %v30120_v54  ;;  %v15130_v4 = vpop.f32.mrb[173].mxu1  ;;  %23469 = vmatmul.mubr.msk.f32.gmra.mrb[44].mxu0 %vm15506_vm8, %v15461_v30  ;;  %v15463_v26 = vmax.f32 %v15399_v37, 0.0  ;;  %v32072_v30 = vld [vmem:[#allocation29_spill] sm:$0xff] }
0x1fb2   :  { %v15462_v43 = vmax.f32 %v15398_v53, 0.0  ;;  %v25014_v19 = vadd.f32 %v15130_v4, %v32061_v38 }
0x1fb3   :  { %v15401_v9 = vadd.f32 %v25013_v15, %v31455_v7  ;;  %v32073_v15 = vld [vmem:[#allocation30_spill] sm:$0xff] }
0x1fb4   :  { %v15400_v51 = vadd.f32 %v25014_v19, %v31455_v7  ;;  %v23381_v39 = vpop.f32.mrb[174].mxu1  ;;  %23471 = vmatprep.mubr.msk.f32.mxu0 %vm15506_vm8, %v15462_v43 }
0x1fb5   :  { %v25015_v22 = vadd.f32 %v23381_v39, %v32062_v57  ;;  %v15140_v0 = vpop.f32.mrb[175].mxu1  ;;  %23472 = vmatmul.mubr.msk.f32.gmra.mrb[46].mxu0 %vm15506_vm8, %v15463_v26  ;;  %v15465_v20 = vmax.f32 %v15401_v9, 0.0  ;;  %v32074_v9 = vld [vmem:[#allocation31_spill] sm:$0xff] }
0x1fb6   :  { %v15464_v54 = vmax.f32 %v15400_v51, 0.0  ;;  %v25016_v13 = vadd.f32 %v15140_v0, %v32063_v44 }
0x1fb7   :  { %v15403_v27 = vadd.f32 %v25015_v22, %v31455_v7  ;;  %v32075_v22 = vld [vmem:[#allocation32_spill] sm:$0xff] }
0x1fb8   :  { %v15402_v46 = vadd.f32 %v25016_v13, %v31455_v7  ;;  %v23384_v14 = vpop.f32.mrb[176].mxu1  ;;  %23474 = vmatprep.mubr.msk.f32.mxu0 %vm15506_vm8, %v15464_v54 }
0x1fb9   :  { %v25017_v35 = vadd.f32 %v23384_v14, %v32064_v17  ;;  %v15150_v47 = vpop.f32.mrb[177].mxu1  ;;  %23475 = vmatmul.mubr.msk.f32.gmra.mrb[48].mxu0 %vm15506_vm8, %v15465_v20  ;;  %v15467_v50 = vmax.f32 %v15403_v27, 0.0  ;;  %v32076_v27 = vld [vmem:[#allocation33_spill] sm:$0xff] }
0x1fba   :  { %v15466_v63 = vmax.f32 %v15402_v46, 0.0  ;;  %v25018_v23 = vadd.f32 %v15150_v47, %v32065_v31 }
0x1fbb   :  { %v15405_v28 = vadd.f32 %v25017_v35, %v31455_v7  ;;  %v32077_v35 = vld [vmem:[#allocation34_spill] sm:$0xff] }
0x1fbc   :  { %v15404_v8 = vadd.f32 %v25018_v23, %v31455_v7  ;;  %v23387_v11 = vpop.f32.mrb[178].mxu1  ;;  %23477 = vmatprep.mubr.msk.f32.mxu0 %vm15506_vm8, %v15466_v63 }
0x1fbd   :  { %v25019_v16 = vadd.f32 %v23387_v11, %v32066_v45  ;;  %v15160_v6 = vpop.f32.mrb[179].mxu1  ;;  %23478 = vmatmul.mubr.msk.f32.gmra.mrb[50].mxu0 %vm15506_vm8, %v15467_v50  ;;  %v15469_v48 = vmax.f32 %v15405_v28, 0.0  ;;  %v32078_v28 = vld [vmem:[#allocation2_spill] sm:$0xff] }
0x1fbe   :  { %v15468_v56 = vmax.f32 %v15404_v8, 0.0  ;;  %v25020_v10 = vadd.f32 %v15160_v6, %v32067_v52 }
0x1fbf   :  { %v15407_v42 = vadd.f32 %v25019_v16, %v31455_v7  ;;  %v32079_v16 = vld [vmem:[#allocation3_spill] sm:$0xff] }
0x1fc0   :  { %v15406_v55 = vadd.f32 %v25020_v10, %v31455_v7  ;;  %v23390_v18 = vpop.f32.mrb[180].mxu1  ;;  %23480 = vmatprep.mubr.msk.f32.mxu0 %vm15506_vm8, %v15468_v56 }
0x1fc1   :  { %v25021_v21 = vadd.f32 %v23390_v18, %v32068_v32  ;;  %v15170_v58 = vpop.f32.mrb[181].mxu1  ;;  %23481 = vmatmul.mubr.msk.f32.gmra.mrb[52].mxu0 %vm15506_vm8, %v15469_v48  ;;  %v15471_v60 = vmax.f32 %v15407_v42, 0.0  ;;  %v32080_v42 = vld [vmem:[#allocation4_spill] sm:$0xff] }
0x1fc2   :  { %v15470_v12 = vmax.f32 %v15406_v55, 0.0  ;;  %v25022_v33 = vadd.f32 %v15170_v58, %v32069_v1 }
0x1fc3   :  { %v15409_v5 = vadd.f32 %v25021_v21, %v31455_v7  ;;  %v32081_v21 = vld [vmem:[#allocation5_spill] sm:$0xff] }
0x1fc4   :  { %v15408_v25 = vadd.f32 %v25022_v33, %v31455_v7  ;;  %v23393_v3 = vpop.f32.mrb[182].mxu1  ;;  %23483 = vmatprep.mubr.msk.f32.mxu0 %vm15506_vm8, %v15470_v12 }
0x1fc5   :  { %v25023_v34 = vadd.f32 %v23393_v3, %v32070_v62  ;;  %v15180_v29 = vpop.f32.mrb[183].mxu1  ;;  %23484 = vmatmul.mubr.msk.f32.gmra.mrb[54].mxu0 %vm15506_vm8, %v15471_v60  ;;  %v15473_v36 = vmax.f32 %v15409_v5, 0.0  ;;  %v32082_v5 = vld [vmem:[#allocation6_spill] sm:$0xff] }
0x1fc6   :  { %v15472_v59 = vmax.f32 %v15408_v25, 0.0  ;;  %v25024_v61 = vadd.f32 %v15180_v29, %v32071_v41 }
0x1fc7   :  { %v15411_v24 = vadd.f32 %v25023_v34, %v31455_v7  ;;  %v32083_v34 = vld [vmem:[#allocation7_spill] sm:$0xff] }
0x1fc8   :  { %v15410_v40 = vadd.f32 %v25024_v61, %v31455_v7  ;;  %v23396_v49 = vpop.f32.mrb[184].mxu1  ;;  %23486 = vmatprep.mubr.msk.f32.mxu0 %vm15506_vm8, %v15472_v59 }
0x1fc9   :  { %v25025_v37 = vadd.f32 %v23396_v49, %v32072_v30  ;;  %v15190_v53 = vpop.f32.mrb[185].mxu1  ;;  %23487 = vmatmul.mubr.msk.f32.gmra.mrb[56].mxu0 %vm15506_vm8, %v15473_v36  ;;  %v15475_v43 = vmax.f32 %v15411_v24, 0.0  ;;  %v32084_v24 = vld [vmem:[#allocation8_spill] sm:$0xff] }
0x1fca   :  { %v15474_v2 = vmax.f32 %v15410_v40, 0.0  ;;  %v25026_v4 = vadd.f32 %v15190_v53, %v32073_v15 }
0x1fcb   :  { %v15413_v38 = vadd.f32 %v25025_v37, %v31455_v7  ;;  %v32085_v37 = vld [vmem:[#allocation9_spill] sm:$0xff] }
0x1fcc   :  { %v15412_v19 = vadd.f32 %v25026_v4, %v31455_v7  ;;  %v23399_v26 = vpop.f32.mrb[186].mxu1  ;;  %23489 = vmatprep.mubr.msk.f32.mxu0 %vm15506_vm8, %v15474_v2 }
0x1fcd   :  { %v25027_v51 = vadd.f32 %v23399_v26, %v32074_v9  ;;  %v15200_v39 = vpop.f32.mrb[187].mxu1  ;;  %23490 = vmatmul.mubr.msk.f32.gmra.mrb[58].mxu0 %vm15506_vm8, %v15475_v43  ;;  %v15477_v54 = vmax.f32 %v15413_v38, 0.0  ;;  %v32086_v38 = vld [vmem:[#allocation10_spill] sm:$0xff] }
0x1fce   :  { %v15476_v57 = vmax.f32 %v15412_v19, 0.0  ;;  %v25028_v0 = vadd.f32 %v15200_v39, %v32075_v22 }
0x1fcf   :  { %v15415_v44 = vadd.f32 %v25027_v51, %v31455_v7  ;;  %v32087_v51 = vld [vmem:[#allocation11_spill] sm:$0xff] }
0x1fd0   :  { %v15414_v13 = vadd.f32 %v25028_v0, %v31455_v7  ;;  %v23402_v20 = vpop.f32.mrb[188].mxu1  ;;  %23492 = vmatprep.mubr.msk.f32.mxu0 %vm15506_vm8, %v15476_v57 }
0x1fd1   :  { %v25029_v46 = vadd.f32 %v23402_v20, %v32076_v27  ;;  %v15210_v14 = vpop.f32.mrb[189].mxu1  ;;  %23493 = vmatmul.mubr.msk.f32.gmra.mrb[60].mxu0 %vm15506_vm8, %v15477_v54  ;;  %v15479_v63 = vmax.f32 %v15415_v44, 0.0  ;;  %v32088_v44 = vld [vmem:[#allocation12_spill] sm:$0xff] }
0x1fd2   :  { %v15478_v17 = vmax.f32 %v15414_v13, 0.0  ;;  %v25030_v47 = vadd.f32 %v15210_v14, %v32077_v35 }
0x1fd3   :  { %v15417_v31 = vadd.f32 %v25029_v46, %v31455_v7  ;;  %v32089_v46 = vld [vmem:[#allocation13_spill] sm:$0xff] }
0x1fd4   :  { %v15416_v23 = vadd.f32 %v25030_v47, %v31455_v7  ;;  %v23405_v50 = vpop.f32.mrb[126].mxu1  ;;  %23495 = vmatprep.mubr.msk.f32.mxu0 %vm15506_vm8, %v15478_v17 }
0x1fd5   :  { %v25031_v8 = vadd.f32 %v23405_v50, %v32078_v28  ;;  %v15220_v11 = vpop.f32.mrb[127].mxu1  ;;  %23496 = vmatmul.mubr.msk.f32.gmra.mrb[62].mxu0 %vm15506_vm8, %v15479_v63  ;;  %v15481_v56 = vmax.f32 %v15417_v31, 0.0  ;;  %v32090_v31 = vld [vmem:[#allocation14_spill] sm:$0xff] }
0x1fd6   :  { %v15480_v45 = vmax.f32 %v15416_v23, 0.0  ;;  %v25032_v6 = vadd.f32 %v15220_v11, %v32079_v16 }
0x1fd7   :  { %v15419_v52 = vadd.f32 %v25031_v8, %v31455_v7  ;;  %v32091_v8 = vld [vmem:[#allocation15_spill] sm:$0xff] }
0x1fd8   :  { %v15418_v10 = vadd.f32 %v25032_v6, %v31455_v7  ;;  %v23408_v48 = vpop.f32.mrb[128].mxu1  ;;  %23498 = vmatprep.mubr.msk.f32.mxu0 %vm15506_vm8, %v15480_v45 }
0x1fd9   :  { %v25033_v55 = vadd.f32 %v23408_v48, %v32080_v42  ;;  %v15230_v18 = vpop.f32.mrb[129].mxu1  ;;  %23499 = vmatmul.mubr.msk.f32.gmra.mrb[66].mxu0 %vm15506_vm8, %v15481_v56  ;;  %v15483_v12 = vmax.f32 %v15419_v52, 0.0  ;;  %v32092_v52 = vld [vmem:[#allocation16_spill] sm:$0xff] }
0x1fda   :  { %v15482_v32 = vmax.f32 %v15418_v10, 0.0  ;;  %v25034_v58 = vadd.f32 %v15230_v18, %v32081_v21 }
0x1fdb   :  { %v15421_v1 = vadd.f32 %v25033_v55, %v31455_v7  ;;  %v32093_v55 = vld [vmem:[#allocation17_spill] sm:$0xff] }
0x1fdc   :  { %v15420_v33 = vadd.f32 %v25034_v58, %v31455_v7  ;;  %v23411_v60 = vpop.f32.mrb[130].mxu1  ;;  %23501 = vmatprep.mubr.msk.f32.mxu0 %vm15506_vm8, %v15482_v32 }
0x1fdd   :  { %v25035_v25 = vadd.f32 %v23411_v60, %v32082_v5  ;;  %v15240_v3 = vpop.f32.mrb[131].mxu1  ;;  %23502 = vmatmul.mubr.msk.f32.gmra.mrb[64].mxu0 %vm15506_vm8, %v15483_v12  ;;  %v15485_v59 = vmax.f32 %v15421_v1, 0.0 }
0x1fde   :  { %v15484_v62 = vmax.f32 %v15420_v33, 0.0  ;;  %v25036_v29 = vadd.f32 %v15240_v3, %v32083_v34  ;;  %v31652_v33 = vld [vmem:[%s31996_s25] ss:$0 sm:$0xff] }
0x1fdf   :  { %v15423_v41 = vadd.f32 %v25035_v25, %v31455_v7 }
0x1fe0   :  { %v15422_v61 = vadd.f32 %v25036_v29, %v31455_v7  ;;  %v23414_v36 = vpop.f32.mrb[132].mxu1  ;;  %23504 = vmatprep.mubr.msk.f32.mxu0 %vm15506_vm8, %v15484_v62 }
0x1fe1   :  { %v25037_v40 = vadd.f32 %v23414_v36, %v32084_v24  ;;  %v15250_v49 = vpop.f32.mrb[133].mxu1  ;;  %23505 = vmatmul.mubr.msk.f32.gmra.mrb[68].mxu0 %vm15506_vm8, %v15485_v59  ;;  %v15487_v2 = vmax.f32 %v15423_v41, 0.0 }
0x1fe2   :  { %v15486_v30 = vmax.f32 %v15422_v61, 0.0  ;;  %v25038_v53 = vadd.f32 %v15250_v49, %v32085_v37 }
0x1fe3   :  { %v15425_v15 = vadd.f32 %v25037_v40, %v31455_v7 }
0x1fe4   :  { %v15424_v4 = vadd.f32 %v25038_v53, %v31455_v7  ;;  %v23417_v43 = vpop.f32.mrb[134].mxu1  ;;  %23507 = vmatprep.mubr.msk.f32.mxu0 %vm15506_vm8, %v15486_v30 }
0x1fe5   :  { %v25039_v19 = vadd.f32 %v23417_v43, %v32086_v38  ;;  %v15260_v26 = vpop.f32.mrb[135].mxu1  ;;  %23508 = vmatmul.mubr.msk.f32.gmra.mrb[70].mxu0 %vm15506_vm8, %v15487_v2  ;;  %v15489_v57 = vmax.f32 %v15425_v15, 0.0 }
0x1fe6   :  { %v15488_v9 = vmax.f32 %v15424_v4, 0.0  ;;  %v25040_v39 = vadd.f32 %v15260_v26, %v32087_v51 }
0x1fe7   :  { %v15427_v22 = vadd.f32 %v25039_v19, %v31455_v7 }
0x1fe8   :  { %v15426_v0 = vadd.f32 %v25040_v39, %v31455_v7  ;;  %v23420_v54 = vpop.f32.mrb[136].mxu1  ;;  %23510 = vmatprep.mubr.msk.f32.mxu0 %vm15506_vm8, %v15488_v9 }
0x1fe9   :  { %v25041_v13 = vadd.f32 %v23420_v54, %v32088_v44  ;;  %v15270_v20 = vpop.f32.mrb[137].mxu1  ;;  %23511 = vmatmul.mubr.msk.f32.gmra.mrb[72].mxu0 %vm15506_vm8, %v15489_v57  ;;  %v15491_v17 = vmax.f32 %v15427_v22, 0.0 }
0x1fea   :  { %v15490_v27 = vmax.f32 %v15426_v0, 0.0  ;;  %v25042_v14 = vadd.f32 %v15270_v20, %v32089_v46 }
0x1feb   :  { %v15429_v35 = vadd.f32 %v25041_v13, %v31455_v7 }
0x1fec   :  { %v15428_v47 = vadd.f32 %v25042_v14, %v31455_v7  ;;  %v23423_v63 = vpop.f32.mrb[138].mxu1  ;;  %23513 = vmatprep.mubr.msk.f32.mxu0 %vm15506_vm8, %v15490_v27 }
0x1fed   :  { %v25043_v23 = vadd.f32 %v23423_v63, %v32090_v31  ;;  %v15280_v50 = vpop.f32.mrb[139].mxu1  ;;  %23514 = vmatmul.mubr.msk.f32.gmra.mrb[74].mxu0 %vm15506_vm8, %v15491_v17  ;;  %v15493_v45 = vmax.f32 %v15429_v35, 0.0 }
0x1fee   :  { %v15492_v28 = vmax.f32 %v15428_v47, 0.0  ;;  %v25044_v11 = vadd.f32 %v15280_v50, %v32091_v8 }
0x1fef   :  { %v15431_v16 = vadd.f32 %v25043_v23, %v31455_v7 }
0x1ff0   :  { %v15430_v6 = vadd.f32 %v25044_v11, %v31455_v7  ;;  %v23426_v56 = vpop.f32.mrb[140].mxu1  ;;  %23516 = vmatprep.mubr.msk.f32.mxu0 %vm15506_vm8, %v15492_v28 }
0x1ff1   :  { %v25045_v10 = vadd.f32 %v23426_v56, %v32092_v52  ;;  %v15290_v48 = vpop.f32.mrb[141].mxu1  ;;  %23517 = vmatmul.mubr.msk.f32.gmra.mrb[76].mxu0 %vm15506_vm8, %v15493_v45  ;;  %v15495_v32 = vmax.f32 %v15431_v16, 0.0 }
0x1ff2   :  { %v15494_v42 = vmax.f32 %v15430_v6, 0.0  ;;  %v25046_v18 = vadd.f32 %v15290_v48, %v32093_v55 }
0x1ff3   :  { %v15433_v21 = vadd.f32 %v25045_v10, %v31455_v7 }
0x1ff4   :  { %v15432_v58 = vadd.f32 %v25046_v18, %v31455_v7  ;;  %23519 = vmatprep.mubr.msk.f32.mxu0 %vm15506_vm8, %v15494_v42 }
0x1ff5   :  { %23520 = vmatmul.mubr.msk.f32.gmra.mrb[78].mxu0 %vm15506_vm8, %v15495_v32  ;;  %v15497_v1 = vmax.f32 %v15433_v21, 0.0 }
0x1ff6   :  { %v15496_v12 = vmax.f32 %v15432_v58, 0.0 }
0x1ff8   :  { %23522 = vmatprep.mubr.msk.f32.mxu0 %vm15506_vm8, %v15496_v12 }
0x1ff9   :  { %23523 = vmatmul.mubr.msk.f32.gmra.mrb[80].mxu0 %vm15506_vm8, %v15497_v1 }
0x2050   :  { %v23431_v60 = vpop.f32.mrb[18].mxu0 }
0x2051   :  { %v15774_v5 = vadd.f32 %v23431_v60, %v31652_v33  ;;  %v15768_v25 = vpop.f32.mrb[19].mxu0 }
0x2052   :  { %v15769_v7 = vadd.f32 %v31652_v33, %v15768_v25 }
0x2053   :  { %v16088_v3 = vsub.f32 0.0, %v15774_v5 }
0x2054   :  { %v16087_v62 = vsub.f32 0.0, %v15769_v7  ;;  %v23434_v34 = vpop.f32.mrb[20].mxu0 }
0x2055   :  { %v16153_v29 = vmul.f32 1.442695, %v16088_v3  ;;  %v15784_v59 = vadd.f32 %v23434_v34, %v31652_v33  ;;  %v15778_v41 = vpop.f32.mrb[21].mxu0 }
0x2056   :  { %v16151_v61 = vmul.f32 1.442695, %v16087_v62  ;;  %v15779_v36 = vadd.f32 %v31652_v33, %v15778_v41 }
0x2057   :  { %25696 = vpow2.f32 %v16153_v29  ;;  %v16090_v24 = vsub.f32 0.0, %v15784_v59 }
0x2058   :  { %25698 = vpow2.f32 %v16151_v61  ;;  %v16089_v40 = vsub.f32 0.0, %v15779_v36  ;;  %v23437_v49 = vpop.f32.mrb[22].mxu0 }
0x2059   :  { %v16157_v30 = vmul.f32 1.442695, %v16090_v24  ;;  %v15794_v37 = vadd.f32 %v23437_v49, %v31652_v33  ;;  %v15788_v53 = vpop.f32.mrb[23].mxu0 }
0x205a   :  { %v16155_v2 = vmul.f32 1.442695, %v16089_v40  ;;  %v15789_v15 = vadd.f32 %v31652_v33, %v15788_v53 }
0x205b   :  { %25700 = vpow2.f32 %v16157_v30  ;;  %v16092_v4 = vsub.f32 0.0, %v15794_v37 }
0x205c   :  { %25702 = vpow2.f32 %v16155_v2  ;;  %v16091_v43 = vsub.f32 0.0, %v15789_v15  ;;  %v23440_v38 = vpop.f32.mrb[24].mxu0 }
0x205d   :  { %v16161_v19 = vmul.f32 1.442695, %v16092_v4  ;;  %v15804_v26 = vadd.f32 %v23440_v38, %v31652_v33  ;;  %v15798_v9 = vpop.f32.mrb[25].mxu0 }
0x205e   :  { %v16159_v51 = vmul.f32 1.442695, %v16091_v43  ;;  %v15799_v39 = vadd.f32 %v31652_v33, %v15798_v9 }
0x205f   :  { %25704 = vpow2.f32 %v16161_v19  ;;  %v16094_v57 = vsub.f32 0.0, %v15804_v26 }
0x2060   :  { %25706 = vpow2.f32 %v16159_v51  ;;  %v16093_v22 = vsub.f32 0.0, %v15799_v39  ;;  %v23443_v0 = vpop.f32.mrb[26].mxu0 }
0x2061   :  { %v25697_v54 = vpop.eup %25696  ;;  %v16165_v44 = vmul.f32 1.442695, %v16094_v57  ;;  %v15814_v13 = vadd.f32 %v23443_v0, %v31652_v33  ;;  %v15808_v20 = vpop.f32.mrb[27].mxu0 }
0x2062   :  { %v25699_v27 = vpop.eup %25698  ;;  %v16280_v46 = vadd.f32 1.0, %v25697_v54  ;;  %v16163_v14 = vmul.f32 1.442695, %v16093_v22  ;;  %v15809_v17 = vadd.f32 %v31652_v33, %v15808_v20 }
0x2063   :  { %v16279_v35 = vadd.f32 1.0, %v25699_v27  ;;  %25708 = vpow2.f32 %v16165_v44  ;;  %v16096_v47 = vsub.f32 0.0, %v15814_v13 }
0x2064   :  { %25710 = vrcp.f32 %v16280_v46  ;;  %v16095_v63 = vsub.f32 0.0, %v15809_v17  ;;  %v23446_v31 = vpop.f32.mrb[28].mxu0 }
0x2065   :  { %v25701_v23 = vpop.eup %25700  ;;  %25712 = vrcp.f32 %v16279_v35  ;;  %v16169_v50 = vmul.f32 1.442695, %v16096_v47  ;;  %v15824_v28 = vadd.f32 %v23446_v31, %v31652_v33  ;;  %v15818_v8 = vpop.f32.mrb[29].mxu0 }
0x2066   :  { %v25703_v11 = vpop.eup %25702  ;;  %v16282_v45 = vadd.f32 1.0, %v25701_v23  ;;  %25714 = vpow2.f32 %v16163_v14  ;;  %v16167_v16 = vmul.f32 1.442695, %v16095_v63  ;;  %v15819_v6 = vadd.f32 %v31652_v33, %v15818_v8 }
0x2067   :  { %v16281_v56 = vadd.f32 1.0, %v25703_v11  ;;  %25716 = vpow2.f32 %v16169_v50  ;;  %v16098_v52 = vsub.f32 0.0, %v15824_v28 }
0x2068   :  { %25718 = vrcp.f32 %v16282_v45  ;;  %v16097_v10 = vsub.f32 0.0, %v15819_v6  ;;  %v23449_v48 = vpop.f32.mrb[30].mxu0 }
0x2069   :  { %v25705_v42 = vpop.eup %25704  ;;  %25720 = vrcp.f32 %v16281_v56  ;;  %v16173_v55 = vmul.f32 1.442695, %v16098_v52  ;;  %v15834_v18 = vadd.f32 %v23449_v48, %v31652_v33  ;;  %v15828_v32 = vpop.f32.mrb[31].mxu0 }
0x206a   :  { %v25707_v21 = vpop.eup %25706  ;;  %v16284_v58 = vadd.f32 1.0, %v25705_v42  ;;  %25722 = vpow2.f32 %v16167_v16  ;;  %v16171_v12 = vmul.f32 1.442695, %v16097_v10  ;;  %v15829_v1 = vadd.f32 %v31652_v33, %v15828_v32 }
0x206b   :  { %v16283_v60 = vadd.f32 1.0, %v25707_v21  ;;  %25724 = vpow2.f32 %v16173_v55  ;;  %v16100_v5 = vsub.f32 0.0, %v15834_v18 }
0x206c   :  { %25726 = vrcp.f32 %v16284_v58  ;;  %v16099_v25 = vsub.f32 0.0, %v15829_v1  ;;  %v23452_v7 = vpop.f32.mrb[32].mxu0 }
0x206d   :  { %v25709_v3 = vpop.eup %25708  ;;  %25728 = vrcp.f32 %v16283_v60  ;;  %v16177_v62 = vmul.f32 1.442695, %v16100_v5  ;;  %v15844_v34 = vadd.f32 %v23452_v7, %v31652_v33  ;;  %v15838_v29 = vpop.f32.mrb[33].mxu0 }
0x206e   :  { %v25711_v59 = vpop.eup %25710  ;;  %v16286_v41 = vadd.f32 1.0, %v25709_v3  ;;  %25730 = vpow2.f32 %v16171_v12  ;;  %v16175_v61 = vmul.f32 1.442695, %v16099_v25  ;;  %v15839_v36 = vadd.f32 %v31652_v33, %v15838_v29 }
0x206f   :  { %v25713_v24 = vpop.eup %25712  ;;  %16472 = vst.msk [vmem:[%s31997_s26 + $0x8] sm:$0xff] %vm15506_vm8, %v25711_v59  ;;  %25732 = vpow2.f32 %v16177_v62  ;;  %v16102_v40 = vsub.f32 0.0, %v15844_v34 }
0x2070   :  { %v25715_v49 = vpop.eup %25714  ;;  %16471 = vst.msk [vmem:[%s31997_s26] sm:$0xff] %vm15506_vm8, %v25713_v24  ;;  %25734 = vrcp.f32 %v16286_v41  ;;  %v16101_v30 = vsub.f32 0.0, %v15839_v36  ;;  %v23455_v37 = vpop.f32.mrb[34].mxu0 }
0x2071   :  { %v25717_v53 = vpop.eup %25716  ;;  %v16285_v2 = vadd.f32 1.0, %v25715_v49  ;;  %25736 = vpow2.f32 %v16175_v61  ;;  %v16181_v15 = vmul.f32 1.442695, %v16102_v40  ;;  %v15854_v4 = vadd.f32 %v23455_v37, %v31652_v33  ;;  %v15848_v43 = vpop.f32.mrb[35].mxu0 }
0x2072   :  { %v25719_v38 = vpop.eup %25718  ;;  %v16288_v19 = vadd.f32 1.0, %v25717_v53  ;;  %v16179_v26 = vmul.f32 1.442695, %v16101_v30  ;;  %v15849_v9 = vadd.f32 %v31652_v33, %v15848_v43 }
0x2073   :  { %v25721_v51 = vpop.eup %25720  ;;  %16474 = vst.msk [vmem:[%s31997_s26 + $0x18] sm:$0xff] %vm15506_vm8, %v25719_v38  ;;  %25738 = vrcp.f32 %v16285_v2  ;;  %v16104_v39 = vsub.f32 0.0, %v15854_v4 }
0x2074   :  { %v25723_v57 = vpop.eup %25722  ;;  %16473 = vst.msk [vmem:[%s31997_s26 + $0x10] sm:$0xff] %vm15506_vm8, %v25721_v51  ;;  %25740 = vrcp.f32 %v16288_v19  ;;  %v16103_v22 = vsub.f32 0.0, %v15849_v9  ;;  %v23458_v0 = vpop.f32.mrb[36].mxu0 }
0x2075   :  { %v25725_v54 = vpop.eup %25724  ;;  %v16287_v44 = vadd.f32 1.0, %v25723_v57  ;;  %25742 = vpow2.f32 %v16181_v15  ;;  %v16185_v13 = vmul.f32 1.442695, %v16104_v39  ;;  %v15864_v20 = vadd.f32 %v23458_v0, %v31652_v33  ;;  %v15858_v27 = vpop.f32.mrb[37].mxu0 }
0x2076   :  { %v25727_v46 = vpop.eup %25726  ;;  %v16290_v14 = vadd.f32 1.0, %v25725_v54  ;;  %25744 = vpow2.f32 %v16179_v26  ;;  %v16183_v17 = vmul.f32 1.442695, %v16103_v22  ;;  %v15859_v35 = vadd.f32 %v31652_v33, %v15858_v27 }
0x2077   :  { %v25729_v47 = vpop.eup %25728  ;;  %16476 = vst.msk [vmem:[%s31997_s26 + $0x28] sm:$0xff] %vm15506_vm8, %v25727_v46  ;;  %25746 = vrcp.f32 %v16287_v44  ;;  %v16106_v63 = vsub.f32 0.0, %v15864_v20 }
0x2078   :  { %v25731_v31 = vpop.eup %25730  ;;  %16475 = vst.msk [vmem:[%s31997_s26 + $0x20] sm:$0xff] %vm15506_vm8, %v25729_v47  ;;  %25748 = vrcp.f32 %v16290_v14  ;;  %v16105_v23 = vsub.f32 0.0, %v15859_v35  ;;  %v23461_v50 = vpop.f32.mrb[38].mxu0 }
0x2079   :  { %v25733_v28 = vpop.eup %25732  ;;  %v16289_v8 = vadd.f32 1.0, %v25731_v31  ;;  %25750 = vpow2.f32 %v16185_v13  ;;  %v16189_v11 = vmul.f32 1.442695, %v16106_v63  ;;  %v15874_v45 = vadd.f32 %v23461_v50, %v31652_v33  ;;  %v15868_v16 = vpop.f32.mrb[39].mxu0 }
0x207a   :  { %v25735_v6 = vpop.eup %25734  ;;  %v16292_v56 = vadd.f32 1.0, %v25733_v28  ;;  %25752 = vpow2.f32 %v16183_v17  ;;  %v15869_v52 = vadd.f32 %v31652_v33, %v15868_v16  ;;  %v16187_v48 = vmul.f32 1.442695, %v16105_v23 }
0x207b   :  { %v25737_v10 = vpop.eup %25736  ;;  %16478 = vst.msk [vmem:[%s31997_s26 + $0x38] sm:$0xff] %vm15506_vm8, %v25735_v6  ;;  %25754 = vrcp.f32 %v16289_v8  ;;  %v16108_v42 = vsub.f32 0.0, %v15874_v45 }
0x207c   :  { %25756 = vrcp.f32 %v16292_v56  ;;  %v16291_v55 = vadd.f32 1.0, %v25737_v10  ;;  %v16107_v18 = vsub.f32 0.0, %v15869_v52  ;;  %v23464_v32 = vpop.f32.mrb[40].mxu0 }
0x207d   :  { %v25739_v21 = vpop.eup %25738  ;;  %25758 = vpow2.f32 %v16189_v11  ;;  %v16193_v58 = vmul.f32 1.442695, %v16108_v42  ;;  %v15884_v12 = vadd.f32 %v23464_v32, %v31652_v33  ;;  %v15878_v1 = vpop.f32.mrb[41].mxu0 }
0x207e   :  { %v25741_v60 = vpop.eup %25740  ;;  %16477 = vst.msk [vmem:[%s31997_s26 + $0x30] sm:$0xff] %vm15506_vm8, %v25739_v21  ;;  %25760 = vrcp.f32 %v16291_v55  ;;  %v16191_v5 = vmul.f32 1.442695, %v16107_v18  ;;  %v15879_v25 = vadd.f32 %v31652_v33, %v15878_v1 }
0x207f   :  { %v25743_v7 = vpop.eup %25742  ;;  %16480 = vst.msk [vmem:[%s31997_s26 + $0x48] sm:$0xff] %vm15506_vm8, %v25741_v60  ;;  %25762 = vpow2.f32 %v16187_v48  ;;  %v16110_v3 = vsub.f32 0.0, %v15884_v12 }
0x2080   :  { %v25745_v62 = vpop.eup %25744  ;;  %v16294_v34 = vadd.f32 1.0, %v25743_v7  ;;  %25764 = vpow2.f32 %v16193_v58  ;;  %v16109_v29 = vsub.f32 0.0, %v15879_v25  ;;  %v23467_v59 = vpop.f32.mrb[42].mxu0 }
0x2081   :  { %v25747_v41 = vpop.eup %25746  ;;  %v16293_v61 = vadd.f32 1.0, %v25745_v62  ;;  %25766 = vpow2.f32 %v16191_v5  ;;  %v16197_v36 = vmul.f32 1.442695, %v16110_v3  ;;  %v15894_v24 = vadd.f32 %v23467_v59, %v31652_v33  ;;  %v15888_v40 = vpop.f32.mrb[43].mxu0 }
0x2082   :  { %v25749_v49 = vpop.eup %25748  ;;  %16479 = vst.msk [vmem:[%s31997_s26 + $0x40] sm:$0xff] %vm15506_vm8, %v25747_v41  ;;  %25768 = vrcp.f32 %v16294_v34  ;;  %v16195_v30 = vmul.f32 1.442695, %v16109_v29  ;;  %v15889_v37 = vadd.f32 %v31652_v33, %v15888_v40 }
0x2083   :  { %v25751_v53 = vpop.eup %25750  ;;  %16482 = vst.msk [vmem:[%s31997_s26 + $0x58] sm:$0xff] %vm15506_vm8, %v25749_v49  ;;  %25770 = vrcp.f32 %v16293_v61  ;;  %v16112_v2 = vsub.f32 0.0, %v15894_v24 }
0x2084   :  { %v25753_v15 = vpop.eup %25752  ;;  %v16296_v4 = vadd.f32 1.0, %v25751_v53  ;;  %25772 = vpow2.f32 %v16197_v36  ;;  %v16111_v43 = vsub.f32 0.0, %v15889_v37  ;;  %v23470_v38 = vpop.f32.mrb[44].mxu0 }
0x2085   :  { %v25755_v19 = vpop.eup %25754  ;;  %v16295_v26 = vadd.f32 1.0, %v25753_v15  ;;  %25774 = vpow2.f32 %v16195_v30  ;;  %v16201_v9 = vmul.f32 1.442695, %v16112_v2  ;;  %v15904_v51 = vadd.f32 %v23470_v38, %v31652_v33  ;;  %v15898_v39 = vpop.f32.mrb[45].mxu0 }
0x2086   :  { %v25757_v57 = vpop.eup %25756  ;;  %16481 = vst.msk [vmem:[%s31997_s26 + $0x50] sm:$0xff] %vm15506_vm8, %v25755_v19  ;;  %25776 = vrcp.f32 %v16296_v4  ;;  %v16199_v22 = vmul.f32 1.442695, %v16111_v43  ;;  %v15899_v0 = vadd.f32 %v31652_v33, %v15898_v39 }
0x2087   :  { %v25759_v54 = vpop.eup %25758  ;;  %16484 = vst.msk [vmem:[%s31997_s26 + $0x68] sm:$0xff] %vm15506_vm8, %v25757_v57  ;;  %25778 = vrcp.f32 %v16295_v26  ;;  %v16114_v44 = vsub.f32 0.0, %v15904_v51 }
0x2088   :  { %v25761_v13 = vpop.eup %25760  ;;  %v16298_v20 = vadd.f32 1.0, %v25759_v54  ;;  %25780 = vpow2.f32 %v16201_v9  ;;  %v16113_v27 = vsub.f32 0.0, %v15899_v0  ;;  %v23473_v46 = vpop.f32.mrb[46].mxu0 }
0x2089   :  { %v25763_v14 = vpop.eup %25762  ;;  %16483 = vst.msk [vmem:[%s31997_s26 + $0x60] sm:$0xff] %vm15506_vm8, %v25761_v13  ;;  %25782 = vpow2.f32 %v16199_v22  ;;  %v16205_v17 = vmul.f32 1.442695, %v16114_v44  ;;  %v15914_v35 = vadd.f32 %v23473_v46, %v31652_v33  ;;  %v15908_v47 = vpop.f32.mrb[47].mxu0 }
0x208a   :  { %v25765_v63 = vpop.eup %25764  ;;  %25784 = vrcp.f32 %v16298_v20  ;;  %v16297_v31 = vadd.f32 1.0, %v25763_v14  ;;  %v15909_v23 = vadd.f32 %v31652_v33, %v15908_v47  ;;  %v16203_v8 = vmul.f32 1.442695, %v16113_v27 }
0x208b   :  { %v25767_v50 = vpop.eup %25766  ;;  %v16300_v28 = vadd.f32 1.0, %v25765_v63  ;;  %25786 = vpow2.f32 %v16205_v17  ;;  %v16116_v11 = vsub.f32 0.0, %v15914_v35 }
0x208c   :  { %v25769_v45 = vpop.eup %25768  ;;  %25788 = vrcp.f32 %v16297_v31  ;;  %v16299_v16 = vadd.f32 1.0, %v25767_v50  ;;  %v16115_v6 = vsub.f32 0.0, %v15909_v23  ;;  %v23476_v56 = vpop.f32.mrb[48].mxu0 }
0x208d   :  { %v25771_v52 = vpop.eup %25770  ;;  %16486 = vst.msk [vmem:[%s31997_s26 + $0x78] sm:$0xff] %vm15506_vm8, %v25769_v45  ;;  %25790 = vrcp.f32 %v16300_v28  ;;  %v16209_v10 = vmul.f32 1.442695, %v16116_v11  ;;  %v15924_v48 = vadd.f32 %v23476_v56, %v31652_v33  ;;  %v15918_v42 = vpop.f32.mrb[49].mxu0 }
0x208e   :  { %v25773_v55 = vpop.eup %25772  ;;  %16485 = vst.msk [vmem:[%s31997_s26 + $0x70] sm:$0xff] %vm15506_vm8, %v25771_v52  ;;  %25792 = vrcp.f32 %v16299_v16  ;;  %v15919_v18 = vadd.f32 %v31652_v33, %v15918_v42  ;;  %v16207_v58 = vmul.f32 1.442695, %v16115_v6 }
0x208f   :  { %v25775_v32 = vpop.eup %25774  ;;  %v16302_v21 = vadd.f32 1.0, %v25773_v55  ;;  %25794 = vpow2.f32 %v16203_v8  ;;  %v16118_v12 = vsub.f32 0.0, %v15924_v48 }
0x2090   :  { %v25777_v1 = vpop.eup %25776  ;;  %v16301_v60 = vadd.f32 1.0, %v25775_v32  ;;  %25796 = vpow2.f32 %v16209_v10  ;;  %v16117_v5 = vsub.f32 0.0, %v15919_v18  ;;  %v23479_v25 = vpop.f32.mrb[50].mxu0 }
0x2091   :  { %v25779_v7 = vpop.eup %25778  ;;  %16488 = vst.msk [vmem:[%s31997_s26 + $0x88] sm:$0xff] %vm15506_vm8, %v25777_v1  ;;  %25798 = vrcp.f32 %v16302_v21  ;;  %v16213_v3 = vmul.f32 1.442695, %v16118_v12  ;;  %v15934_v62 = vadd.f32 %v23479_v25, %v31652_v33  ;;  %v15928_v34 = vpop.f32.mrb[51].mxu0 }
0x2092   :  { %v25781_v29 = vpop.eup %25780  ;;  %16487 = vst.msk [vmem:[%s31997_s26 + $0x80] sm:$0xff] %vm15506_vm8, %v25779_v7  ;;  %25800 = vrcp.f32 %v16301_v60  ;;  %v15929_v59 = vadd.f32 %v31652_v33, %v15928_v34  ;;  %v16211_v36 = vmul.f32 1.442695, %v16117_v5 }
0x2093   :  { %v25783_v41 = vpop.eup %25782  ;;  %v16304_v61 = vadd.f32 1.0, %v25781_v29  ;;  %25802 = vpow2.f32 %v16207_v58  ;;  %v16120_v24 = vsub.f32 0.0, %v15934_v62 }
0x2094   :  { %v25785_v40 = vpop.eup %25784  ;;  %v16303_v49 = vadd.f32 1.0, %v25783_v41  ;;  %25804 = vpow2.f32 %v16213_v3  ;;  %v16119_v30 = vsub.f32 0.0, %v15929_v59  ;;  %v23482_v37 = vpop.f32.mrb[52].mxu0 }
0x2095   :  { %v25787_v53 = vpop.eup %25786  ;;  %16490 = vst.msk [vmem:[%s31997_s26 + $0x98] sm:$0xff] %vm15506_vm8, %v25785_v40  ;;  %25806 = vrcp.f32 %v16304_v61  ;;  %v16217_v2 = vmul.f32 1.442695, %v16120_v24  ;;  %v15944_v15 = vadd.f32 %v23482_v37, %v31652_v33  ;;  %v15938_v4 = vpop.f32.mrb[53].mxu0 }
0x2096   :  { %v25789_v43 = vpop.eup %25788  ;;  %25808 = vrcp.f32 %v16303_v49  ;;  %v16306_v38 = vadd.f32 1.0, %v25787_v53  ;;  %v16215_v19 = vmul.f32 1.442695, %v16119_v30  ;;  %v15939_v26 = vadd.f32 %v31652_v33, %v15938_v4 }
0x2097   :  { %v25791_v9 = vpop.eup %25790  ;;  %16489 = vst.msk [vmem:[%s31997_s26 + $0x90] sm:$0xff] %vm15506_vm8, %v25789_v43  ;;  %25810 = vpow2.f32 %v16211_v36  ;;  %v16122_v51 = vsub.f32 0.0, %v15944_v15 }
0x2098   :  { %v25793_v39 = vpop.eup %25792  ;;  %16492 = vst.msk [vmem:[%s31997_s26 + $0xa8] sm:$0xff] %vm15506_vm8, %v25791_v9  ;;  %25812 = vrcp.f32 %v16306_v38  ;;  %v16121_v57 = vsub.f32 0.0, %v15939_v26  ;;  %v23485_v22 = vpop.f32.mrb[54].mxu0 }
0x2099   :  { %v25795_v0 = vpop.eup %25794  ;;  %16491 = vst.msk [vmem:[%s31997_s26 + $0xa0] sm:$0xff] %vm15506_vm8, %v25793_v39  ;;  %25814 = vpow2.f32 %v16217_v2  ;;  %v16221_v54 = vmul.f32 1.442695, %v16122_v51  ;;  %v15954_v44 = vadd.f32 %v23485_v22, %v31652_v33  ;;  %v15948_v13 = vpop.f32.mrb[55].mxu0 }
0x209a   :  { %v25797_v20 = vpop.eup %25796  ;;  %v16305_v27 = vadd.f32 1.0, %v25795_v0  ;;  %25816 = vpow2.f32 %v16215_v19  ;;  %v16219_v46 = vmul.f32 1.442695, %v16121_v57  ;;  %v15949_v14 = vadd.f32 %v31652_v33, %v15948_v13 }
0x209b   :  { %v25799_v17 = vpop.eup %25798  ;;  %v16308_v35 = vadd.f32 1.0, %v25797_v20  ;;  %25818 = vpow2.f32 %v16221_v54  ;;  %v16124_v47 = vsub.f32 0.0, %v15954_v44 }
0x209c   :  { %v25801_v63 = vpop.eup %25800  ;;  %16494 = vst.msk [vmem:[%s31997_s26 + $0xb8] sm:$0xff] %vm15506_vm8, %v25799_v17  ;;  %25820 = vrcp.f32 %v16305_v27  ;;  %v16123_v31 = vsub.f32 0.0, %v15949_v14  ;;  %v23488_v23 = vpop.f32.mrb[56].mxu0 }
0x209d   :  { %v25803_v50 = vpop.eup %25802  ;;  %16493 = vst.msk [vmem:[%s31997_s26 + $0xb0] sm:$0xff] %vm15506_vm8, %v25801_v63  ;;  %25822 = vrcp.f32 %v16308_v35  ;;  %v16225_v28 = vmul.f32 1.442695, %v16124_v47  ;;  %v15964_v8 = vadd.f32 %v23488_v23, %v31652_v33  ;;  %v15958_v11 = vpop.f32.mrb[57].mxu0 }
0x209e   :  { %v25805_v45 = vpop.eup %25804  ;;  %v16307_v16 = vadd.f32 1.0, %v25803_v50  ;;  %25824 = vpow2.f32 %v16219_v46  ;;  %v16223_v6 = vmul.f32 1.442695, %v16123_v31  ;;  %v15959_v56 = vadd.f32 %v31652_v33, %v15958_v11 }
0x209f   :  { %v25807_v52 = vpop.eup %25806  ;;  %v16310_v10 = vadd.f32 1.0, %v25805_v45  ;;  %25826 = vpow2.f32 %v16225_v28  ;;  %v16126_v48 = vsub.f32 0.0, %v15964_v8 }
0x20a0   :  { %v25809_v42 = vpop.eup %25808  ;;  %16496 = vst.msk [vmem:[%s31997_s26 + $0xc8] sm:$0xff] %vm15506_vm8, %v25807_v52  ;;  %25828 = vrcp.f32 %v16307_v16  ;;  %v16125_v55 = vsub.f32 0.0, %v15959_v56  ;;  %v23491_v18 = vpop.f32.mrb[58].mxu0 }
0x20a1   :  { %v25811_v32 = vpop.eup %25810  ;;  %16495 = vst.msk [vmem:[%s31997_s26 + $0xc0] sm:$0xff] %vm15506_vm8, %v25809_v42  ;;  %25830 = vrcp.f32 %v16310_v10  ;;  %v16229_v21 = vmul.f32 1.442695, %v16126_v48  ;;  %v15974_v58 = vadd.f32 %v23491_v18, %v31652_v33  ;;  %v15968_v12 = vpop.f32.mrb[59].mxu0 }
0x20a2   :  { %v25813_v1 = vpop.eup %25812  ;;  %v16309_v60 = vadd.f32 1.0, %v25811_v32  ;;  %25832 = vpow2.f32 %v16223_v6  ;;  %v16227_v5 = vmul.f32 1.442695, %v16125_v55  ;;  %v15969_v25 = vadd.f32 %v31652_v33, %v15968_v12 }
0x20a3   :  { %v25815_v7 = vpop.eup %25814  ;;  %16498 = vst.msk [vmem:[%s31997_s26 + $0xd8] sm:$0xff] %vm15506_vm8, %v25813_v1  ;;  %25834 = vpow2.f32 %v16229_v21  ;;  %v16128_v3 = vsub.f32 0.0, %v15974_v58 }
0x20a4   :  { %v25817_v62 = vpop.eup %25816  ;;  %25836 = vrcp.f32 %v16309_v60  ;;  %v16312_v34 = vadd.f32 1.0, %v25815_v7  ;;  %v16127_v29 = vsub.f32 0.0, %v15969_v25  ;;  %v23494_v59 = vpop.f32.mrb[60].mxu0 }
0x20a5   :  { %v25819_v41 = vpop.eup %25818  ;;  %v16311_v61 = vadd.f32 1.0, %v25817_v62  ;;  %25838 = vpow2.f32 %v16227_v5  ;;  %v16233_v36 = vmul.f32 1.442695, %v16128_v3  ;;  %v15984_v24 = vadd.f32 %v23494_v59, %v31652_v33  ;;  %v15978_v40 = vpop.f32.mrb[61].mxu0 }
0x20a6   :  { %v25821_v49 = vpop.eup %25820  ;;  %25840 = vrcp.f32 %v16312_v34  ;;  %v16314_v30 = vadd.f32 1.0, %v25819_v41  ;;  %v16231_v37 = vmul.f32 1.442695, %v16127_v29  ;;  %v15979_v53 = vadd.f32 %v31652_v33, %v15978_v40 }
0x20a7   :  { %v25823_v2 = vpop.eup %25822  ;;  %16497 = vst.msk [vmem:[%s31997_s26 + $0xd0] sm:$0xff] %vm15506_vm8, %v25821_v49  ;;  %25842 = vrcp.f32 %v16311_v61  ;;  %v16130_v15 = vsub.f32 0.0, %v15984_v24 }
0x20a8   :  { %v25825_v4 = vpop.eup %25824  ;;  %16500 = vst.msk [vmem:[%s31997_s26 + $0xe8] sm:$0xff] %vm15506_vm8, %v25823_v2  ;;  %25844 = vrcp.f32 %v16314_v30  ;;  %v16129_v43 = vsub.f32 0.0, %v15979_v53  ;;  %v23497_v38 = vpop.f32.mrb[62].mxu0 }
0x20a9   :  { %v25827_v19 = vpop.eup %25826  ;;  %v16313_v26 = vadd.f32 1.0, %v25825_v4  ;;  %25846 = vpow2.f32 %v16233_v36  ;;  %v16237_v9 = vmul.f32 1.442695, %v16130_v15  ;;  %v15994_v51 = vadd.f32 %v23497_v38, %v31652_v33  ;;  %v15988_v39 = vpop.f32.mrb[63].mxu0 }
0x20aa   :  { %v25829_v57 = vpop.eup %25828  ;;  %v16316_v22 = vadd.f32 1.0, %v25827_v19  ;;  %25848 = vpow2.f32 %v16231_v37  ;;  %v16235_v0 = vmul.f32 1.442695, %v16129_v43  ;;  %v15989_v54 = vadd.f32 %v31652_v33, %v15988_v39 }
0x20ab   :  { %v25831_v44 = vpop.eup %25830  ;;  %16499 = vst.msk [vmem:[%s31997_s26 + $0xe0] sm:$0xff] %vm15506_vm8, %v25829_v57  ;;  %25850 = vrcp.f32 %v16313_v26  ;;  %v16132_v13 = vsub.f32 0.0, %v15994_v51 }
0x20ac   :  { %v25833_v20 = vpop.eup %25832  ;;  %16502 = vst.msk [vmem:[%s31997_s26 + $0xf8] sm:$0xff] %vm15506_vm8, %v25831_v44  ;;  %25852 = vrcp.f32 %v16316_v22  ;;  %v16131_v27 = vsub.f32 0.0, %v15989_v54  ;;  %v23500_v46 = vpop.f32.mrb[66].mxu0 }
0x20ad   :  { %v25835_v14 = vpop.eup %25834  ;;  %v16315_v17 = vadd.f32 1.0, %v25833_v20  ;;  %25854 = vpow2.f32 %v16237_v9  ;;  %v16241_v35 = vmul.f32 1.442695, %v16132_v13  ;;  %v16004_v47 = vadd.f32 %v23500_v46, %v31652_v33  ;;  %v15998_v63 = vpop.f32.mrb[67].mxu0 }
0x20ae   :  { %v25837_v31 = vpop.eup %25836  ;;  %v16318_v23 = vadd.f32 1.0, %v25835_v14  ;;  %25856 = vpow2.f32 %v16235_v0  ;;  %v15999_v50 = vadd.f32 %v31652_v33, %v15998_v63  ;;  %v16239_v8 = vmul.f32 1.442695, %v16131_v27 }
0x20af   :  { %v25839_v28 = vpop.eup %25838  ;;  %16501 = vst.msk [vmem:[%s31997_s26 + $0xf0] sm:$0xff] %vm15506_vm8, %v25837_v31  ;;  %25858 = vrcp.f32 %v16315_v17  ;;  %v16134_v11 = vsub.f32 0.0, %v16004_v47 }
0x20b0   :  { %v25841_v45 = vpop.eup %25840  ;;  %25860 = vrcp.f32 %v16318_v23  ;;  %v16317_v16 = vadd.f32 1.0, %v25839_v28  ;;  %v16133_v6 = vsub.f32 0.0, %v15999_v50  ;;  %v23503_v56 = vpop.f32.mrb[64].mxu0 }
0x20b1   :  { %v25843_v52 = vpop.eup %25842  ;;  %16504 = vst.msk [vmem:[%s31997_s26 + $0x108] sm:$0xff] %vm15506_vm8, %v25841_v45  ;;  %25862 = vpow2.f32 %v16241_v35  ;;  %v16245_v10 = vmul.f32 1.442695, %v16134_v11  ;;  %v16014_v48 = vadd.f32 %v23503_v56, %v31652_v33  ;;  %v16008_v42 = vpop.f32.mrb[65].mxu0 }
0x20b2   :  { %v25845_v55 = vpop.eup %25844  ;;  %16503 = vst.msk [vmem:[%s31997_s26 + $0x100] sm:$0xff] %vm15506_vm8, %v25843_v52  ;;  %25864 = vrcp.f32 %v16317_v16  ;;  %v16243_v18 = vmul.f32 1.442695, %v16133_v6  ;;  %v16009_v32 = vadd.f32 %v31652_v33, %v16008_v42 }
0x20b3   :  { %v25847_v21 = vpop.eup %25846  ;;  %16506 = vst.msk [vmem:[%s31997_s26 + $0x118] sm:$0xff] %vm15506_vm8, %v25845_v55  ;;  %25866 = vpow2.f32 %v16239_v8  ;;  %v16136_v58 = vsub.f32 0.0, %v16014_v48 }
0x20b4   :  { %v25849_v12 = vpop.eup %25848  ;;  %v16320_v1 = vadd.f32 1.0, %v25847_v21  ;;  %25868 = vpow2.f32 %v16245_v10  ;;  %v16135_v60 = vsub.f32 0.0, %v16009_v32  ;;  %v23506_v5 = vpop.f32.mrb[68].mxu0 }
0x20b5   :  { %v25851_v25 = vpop.eup %25850  ;;  %v16319_v7 = vadd.f32 1.0, %v25849_v12  ;;  %25870 = vpow2.f32 %v16243_v18  ;;  %v16249_v3 = vmul.f32 1.442695, %v16136_v58  ;;  %v16024_v62 = vadd.f32 %v23506_v5, %v31652_v33  ;;  %v16018_v34 = vpop.f32.mrb[69].mxu0 }
0x20b6   :  { %v25853_v29 = vpop.eup %25852  ;;  %16505 = vst.msk [vmem:[%s31997_s26 + $0x110] sm:$0xff] %vm15506_vm8, %v25851_v25  ;;  %25872 = vrcp.f32 %v16320_v1  ;;  %v16247_v59 = vmul.f32 1.442695, %v16135_v60  ;;  %v16019_v41 = vadd.f32 %v31652_v33, %v16018_v34 }
0x20b7   :  { %v25855_v61 = vpop.eup %25854  ;;  %16508 = vst.msk [vmem:[%s31997_s26 + $0x128] sm:$0xff] %vm15506_vm8, %v25853_v29  ;;  %25874 = vrcp.f32 %v16319_v7  ;;  %v16138_v36 = vsub.f32 0.0, %v16024_v62 }
0x20b8   :  { %v25857_v24 = vpop.eup %25856  ;;  %v16322_v40 = vadd.f32 1.0, %v25855_v61  ;;  %25876 = vpow2.f32 %v16249_v3  ;;  %v16137_v49 = vsub.f32 0.0, %v16019_v41  ;;  %v23509_v30 = vpop.f32.mrb[70].mxu0 }
0x20b9   :  { %v25859_v37 = vpop.eup %25858  ;;  %v16321_v53 = vadd.f32 1.0, %v25857_v24  ;;  %25878 = vpow2.f32 %v16247_v59  ;;  %v16253_v2 = vmul.f32 1.442695, %v16138_v36  ;;  %v16034_v15 = vadd.f32 %v23509_v30, %v31652_v33  ;;  %v16028_v4 = vpop.f32.mrb[71].mxu0 }
0x20ba   :  { %v25861_v43 = vpop.eup %25860  ;;  %16507 = vst.msk [vmem:[%s31997_s26 + $0x120] sm:$0xff] %vm15506_vm8, %v25859_v37  ;;  %25880 = vrcp.f32 %v16322_v40  ;;  %v16251_v38 = vmul.f32 1.442695, %v16137_v49  ;;  %v16029_v19 = vadd.f32 %v31652_v33, %v16028_v4 }
0x20bb   :  { %v25863_v26 = vpop.eup %25862  ;;  %16510 = vst.msk [vmem:[%s31997_s26 + $0x138] sm:$0xff] %vm15506_vm8, %v25861_v43  ;;  %25882 = vrcp.f32 %v16321_v53  ;;  %v16140_v9 = vsub.f32 0.0, %v16034_v15 }
0x20bc   :  { %v25865_v51 = vpop.eup %25864  ;;  %v16324_v39 = vadd.f32 1.0, %v25863_v26  ;;  %25884 = vpow2.f32 %v16253_v2  ;;  %v16139_v57 = vsub.f32 0.0, %v16029_v19  ;;  %v23512_v22 = vpop.f32.mrb[72].mxu0 }
0x20bd   :  { %v25867_v0 = vpop.eup %25866  ;;  %16509 = vst.msk [vmem:[%s31997_s26 + $0x130] sm:$0xff] %vm15506_vm8, %v25865_v51  ;;  %25886 = vpow2.f32 %v16251_v38  ;;  %v16257_v54 = vmul.f32 1.442695, %v16140_v9  ;;  %v16044_v44 = vadd.f32 %v23512_v22, %v31652_v33  ;;  %v16038_v13 = vpop.f32.mrb[73].mxu0 }
0x20be   :  { %v25869_v20 = vpop.eup %25868  ;;  %25888 = vrcp.f32 %v16324_v39  ;;  %v16323_v27 = vadd.f32 1.0, %v25867_v0  ;;  %v16039_v46 = vadd.f32 %v31652_v33, %v16038_v13  ;;  %v16255_v35 = vmul.f32 1.442695, %v16139_v57 }
0x20bf   :  { %v25871_v14 = vpop.eup %25870  ;;  %v16326_v17 = vadd.f32 1.0, %v25869_v20  ;;  %25890 = vpow2.f32 %v16257_v54  ;;  %v16142_v47 = vsub.f32 0.0, %v16044_v44 }
0x20c0   :  { %v25873_v63 = vpop.eup %25872  ;;  %25892 = vrcp.f32 %v16323_v27  ;;  %v16325_v31 = vadd.f32 1.0, %v25871_v14  ;;  %v16141_v23 = vsub.f32 0.0, %v16039_v46  ;;  %v23515_v50 = vpop.f32.mrb[74].mxu0 }
0x20c1   :  { %v25875_v28 = vpop.eup %25874  ;;  %16512 = vst.msk [vmem:[%s31997_s26 + $0x148] sm:$0xff] %vm15506_vm8, %v25873_v63  ;;  %25894 = vrcp.f32 %v16326_v17  ;;  %v16261_v8 = vmul.f32 1.442695, %v16142_v47  ;;  %v16054_v11 = vadd.f32 %v23515_v50, %v31652_v33  ;;  %v16048_v45 = vpop.f32.mrb[75].mxu0 }
0x20c2   :  { %v25877_v16 = vpop.eup %25876  ;;  %16511 = vst.msk [vmem:[%s31997_s26 + $0x140] sm:$0xff] %vm15506_vm8, %v25875_v28  ;;  %25896 = vrcp.f32 %v16325_v31  ;;  %v16049_v6 = vadd.f32 %v31652_v33, %v16048_v45  ;;  %v16259_v10 = vmul.f32 1.442695, %v16141_v23  ;;  %v25952_v33 = vld [vmem:[%s31996_s25] ss:$0 sm:$0xff] }
0x20c3   :  { %v25879_v56 = vpop.eup %25878  ;;  %v16328_v52 = vadd.f32 1.0, %v25877_v16  ;;  %25898 = vpow2.f32 %v16255_v35  ;;  %v16144_v48 = vsub.f32 0.0, %v16054_v11 }
0x20c4   :  { %v25881_v42 = vpop.eup %25880  ;;  %v16327_v55 = vadd.f32 1.0, %v25879_v56  ;;  %25900 = vpow2.f32 %v16261_v8  ;;  %v16143_v18 = vsub.f32 0.0, %v16049_v6  ;;  %v23518_v32 = vpop.f32.mrb[76].mxu0 }
0x20c5   :  { %v25883_v21 = vpop.eup %25882  ;;  %16514 = vst.msk [vmem:[%s31997_s26 + $0x158] sm:$0xff] %vm15506_vm8, %v25881_v42  ;;  %25902 = vrcp.f32 %v16328_v52  ;;  %v16265_v58 = vmul.f32 1.442695, %v16144_v48  ;;  %v16064_v12 = vadd.f32 %v25952_v33, %v23518_v32  ;;  %v16058_v1 = vpop.f32.mrb[77].mxu0 }
0x20c6   :  { %v25885_v60 = vpop.eup %25884  ;;  %16513 = vst.msk [vmem:[%s31997_s26 + $0x150] sm:$0xff] %vm15506_vm8, %v25883_v21  ;;  %25904 = vrcp.f32 %v16327_v55  ;;  %v16059_v5 = vadd.f32 %v25952_v33, %v16058_v1  ;;  %v16263_v3 = vmul.f32 1.442695, %v16143_v18 }
0x20c7   :  { %v25887_v25 = vpop.eup %25886  ;;  %v16330_v7 = vadd.f32 1.0, %v25885_v60  ;;  %25906 = vpow2.f32 %v16259_v10  ;;  %v16146_v62 = vsub.f32 0.0, %v16064_v12 }
0x20c8   :  { %v25889_v34 = vpop.eup %25888  ;;  %v16329_v29 = vadd.f32 1.0, %v25887_v25  ;;  %25908 = vpow2.f32 %v16265_v58  ;;  %v16145_v59 = vsub.f32 0.0, %v16059_v5  ;;  %v23521_v41 = vpop.f32.mrb[78].mxu0 }
0x20c9   :  { %v25891_v61 = vpop.eup %25890  ;;  %16516 = vst.msk [vmem:[%s31997_s26 + $0x168] sm:$0xff] %vm15506_vm8, %v25889_v34  ;;  %25910 = vrcp.f32 %v16330_v7  ;;  %v16269_v36 = vmul.f32 1.442695, %v16146_v62  ;;  %v16074_v24 = vadd.f32 %v25952_v33, %v23521_v41  ;;  %v16068_v40 = vpop.f32.mrb[79].mxu0 }
0x20ca   :  { %v25893_v49 = vpop.eup %25892  ;;  %25912 = vrcp.f32 %v16329_v29  ;;  %v16332_v30 = vadd.f32 1.0, %v25891_v61  ;;  %v16267_v37 = vmul.f32 1.442695, %v16145_v59  ;;  %v16069_v53 = vadd.f32 %v25952_v33, %v16068_v40 }
0x20cb   :  { %v25895_v2 = vpop.eup %25894  ;;  %16515 = vst.msk [vmem:[%s31997_s26 + $0x160] sm:$0xff] %vm15506_vm8, %v25893_v49  ;;  %25914 = vpow2.f32 %v16263_v3  ;;  %v16148_v15 = vsub.f32 0.0, %v16074_v24 }
0x20cc   :  { %v25897_v4 = vpop.eup %25896  ;;  %16518 = vst.msk [vmem:[%s31997_s26 + $0x178] sm:$0xff] %vm15506_vm8, %v25895_v2  ;;  %25916 = vrcp.f32 %v16332_v30  ;;  %v16147_v43 = vsub.f32 0.0, %v16069_v53  ;;  %v23524_v38 = vpop.f32.mrb[80].mxu0 }
0x20cd   :  { %v25899_v19 = vpop.eup %25898  ;;  %16517 = vst.msk [vmem:[%s31997_s26 + $0x170] sm:$0xff] %vm15506_vm8, %v25897_v4  ;;  %25918 = vpow2.f32 %v16269_v36  ;;  %v16273_v26 = vmul.f32 1.442695, %v16148_v15  ;;  %v16084_v9 = vadd.f32 %v25952_v33, %v23524_v38  ;;  %v16078_v51 = vpop.f32.mrb[81].mxu0 }
0x20ce   :  { %v25901_v39 = vpop.eup %25900  ;;  %v16331_v57 = vadd.f32 1.0, %v25899_v19  ;;  %25920 = vpow2.f32 %v16267_v37  ;;  %v16271_v22 = vmul.f32 1.442695, %v16147_v43  ;;  %v16079_v0 = vadd.f32 %v25952_v33, %v16078_v51 }
0x20cf   :  { %v25903_v54 = vpop.eup %25902  ;;  %v16334_v44 = vadd.f32 1.0, %v25901_v39  ;;  %25922 = vpow2.f32 %v16273_v26  ;;  %v16150_v13 = vsub.f32 0.0, %v16084_v9 }
0x20d0   :  { %v25905_v20 = vpop.eup %25904  ;;  %16520 = vst.msk [vmem:[%s31997_s26 + $0x188] sm:$0xff] %vm15506_vm8, %v25903_v54  ;;  %25924 = vrcp.f32 %v16331_v57  ;;  %v16149_v27 = vsub.f32 0.0, %v16079_v0 }
0x20d1   :  { %v25907_v46 = vpop.eup %25906  ;;  %16519 = vst.msk [vmem:[%s31997_s26 + $0x180] sm:$0xff] %vm15506_vm8, %v25905_v20  ;;  %25926 = vrcp.f32 %v16334_v44  ;;  %v16277_v14 = vmul.f32 1.442695, %v16150_v13 }
0x20d2   :  { %v25909_v17 = vpop.eup %25908  ;;  %v16333_v35 = vadd.f32 1.0, %v25907_v46  ;;  %25928 = vpow2.f32 %v16271_v22  ;;  %v16275_v47 = vmul.f32 1.442695, %v16149_v27 }
0x20d3   :  { %v25911_v63 = vpop.eup %25910  ;;  %v16336_v31 = vadd.f32 1.0, %v25909_v17  ;;  %25930 = vpow2.f32 %v16277_v14 }
0x20d4   :  { %v25913_v23 = vpop.eup %25912  ;;  %16522 = vst.msk [vmem:[%s31997_s26 + $0x198] sm:$0xff] %vm15506_vm8, %v25911_v63  ;;  %25932 = vrcp.f32 %v16333_v35 }
0x20d5   :  { %v25915_v50 = vpop.eup %25914  ;;  %16521 = vst.msk [vmem:[%s31997_s26 + $0x190] sm:$0xff] %vm15506_vm8, %v25913_v23  ;;  %25934 = vrcp.f32 %v16336_v31 }
0x20d6   :  { %v25917_v28 = vpop.eup %25916  ;;  %v16335_v8 = vadd.f32 1.0, %v25915_v50  ;;  %25936 = vpow2.f32 %v16275_v47 }
0x20d7   :  { %v25919_v11 = vpop.eup %25918  ;;  %16524 = vst.msk [vmem:[%s31997_s26 + $0x1a8] sm:$0xff] %vm15506_vm8, %v25917_v28 }
0x20d8   :  { %v25921_v45 = vpop.eup %25920  ;;  %25938 = vrcp.f32 %v16335_v8  ;;  %v16338_v16 = vadd.f32 1.0, %v25919_v11 }
0x20d9   :  { %v25923_v6 = vpop.eup %25922  ;;  %v16337_v56 = vadd.f32 1.0, %v25921_v45 }
0x20da   :  { %v25925_v52 = vpop.eup %25924  ;;  %25940 = vrcp.f32 %v16338_v16  ;;  %v16340_v10 = vadd.f32 1.0, %v25923_v6 }
0x20db   :  { %v25927_v48 = vpop.eup %25926  ;;  %16523 = vst.msk [vmem:[%s31997_s26 + $0x1a0] sm:$0xff] %vm15506_vm8, %v25925_v52  ;;  %25942 = vrcp.f32 %v16337_v56 }
0x20dc   :  { %v25929_v42 = vpop.eup %25928  ;;  %16526 = vst.msk [vmem:[%s31997_s26 + $0x1b8] sm:$0xff] %vm15506_vm8, %v25927_v48  ;;  %25944 = vrcp.f32 %v16340_v10 }
0x20dd   :  { %v25931_v55 = vpop.eup %25930  ;;  %v16339_v18 = vadd.f32 1.0, %v25929_v42 }
0x20de   :  { %v25933_v32 = vpop.eup %25932  ;;  %v16342_v21 = vadd.f32 1.0, %v25931_v55 }
0x20df   :  { %v25935_v58 = vpop.eup %25934  ;;  %16525 = vst.msk [vmem:[%s31997_s26 + $0x1b0] sm:$0xff] %vm15506_vm8, %v25933_v32  ;;  %25946 = vrcp.f32 %v16339_v18 }
0x20e0   :  { %v25937_v33 = vpop.eup %25936  ;;  %16528 = vst.msk [vmem:[%s31997_s26 + $0x1c8] sm:$0xff] %vm15506_vm8, %v25935_v58  ;;  %25948 = vrcp.f32 %v16342_v21 }
0x20e1   :  { %v16341_v12 = vadd.f32 1.0, %v25937_v33 }
0x20e2   :  { %v25939_v1 = vpop.eup %25938 }
0x20e3   :  { %16527 = vst.msk [vmem:[%s31997_s26 + $0x1c0] sm:$0xff] %vm15506_vm8, %v25939_v1  ;;  %25950 = vrcp.f32 %v16341_v12 }
0x20e4   :  { %v25941_v60 = vpop.eup %25940 }
0x20e5   :  { %v25943_v5 = vpop.eup %25942  ;;  %16530 = vst.msk [vmem:[%s31997_s26 + $0x1d8] sm:$0xff] %vm15506_vm8, %v25941_v60 }
0x20e6   :  { %v25945_v25 = vpop.eup %25944  ;;  %16529 = vst.msk [vmem:[%s31997_s26 + $0x1d0] sm:$0xff] %vm15506_vm8, %v25943_v5 }
0x20e7   :  { %16532 = vst.msk [vmem:[%s31997_s26 + $0x1e8] sm:$0xff] %vm15506_vm8, %v25945_v25 }
0x20e9   :  { %v25947_v7 = vpop.eup %25946 }
0x20ea   :  { %v25949_v3 = vpop.eup %25948  ;;  %16531 = vst.msk [vmem:[%s31997_s26 + $0x1e0] sm:$0xff] %vm15506_vm8, %v25947_v7 }
0x20eb   :  { %16534 = vst.msk [vmem:[%s31997_s26 + $0x1f8] sm:$0xff] %vm15506_vm8, %v25949_v3 }
0x20ed   :  { %v25951_v62 = vpop.eup %25950 }
0x20ee   :  { %16533 = vst.msk [vmem:[%s31997_s26 + $0x1f0] sm:$0xff] %vm15506_vm8, %v25951_v62 }

</bundles_post_ra>
